<compile_context>
chip_gen: v5e
topology: v5e:2x2
jax: 0.10.0
libtpu: 0.0.40
codegen_flags: <defaults>
</compile_context>

<pallas_src>
import jax
import jax.numpy as jnp
from jax.experimental import pallas as pl
from jax.experimental.pallas import tpu as pltpu


# ---------------------------------------------------------------------------
# Kernel 1: single-shot matmul + bias + ReLU (one call per conv, after im2col)
# ---------------------------------------------------------------------------
def _matmul_bias_relu_kernel(x_ref, w_ref, b_ref, o_ref):
    # Grid-less fast path: compute, activate, store — no scratch, no zero-init.
    y = jnp.dot(x_ref[...], w_ref[...], preferred_element_type=jnp.float32)
    y = jnp.maximum(y + b_ref[...], 0.0)              # f32 epilogue
    o_ref[...] = y.astype(o_ref.dtype)


def matmul_bias_relu(x, w, b2, *, out_dtype):
    """relu(x @ w + b). x:[M,K] bf16, w:[K,N] bf16, b2:[1,N] f32.

    Whole arrays live in VMEM (full-array blocks satisfy the (8,128) rule by
    matching the array extents); for this model every conv working set is
    well under 1 MiB, so a single launch per conv is optimal.
    """
    M, K = x.shape
    K2, N = w.shape
    assert K == K2 and b2.shape == (1, N)
    return pl.pallas_call(
        _matmul_bias_relu_kernel,
        out_shape=jax.ShapeDtypeStruct((M, N), out_dtype),
    )(x, w, b2)


# ---------------------------------------------------------------------------
# Kernel 2: fused FC head — fc1 (K-tiled) + ReLU + fc2 + log_softmax
# ---------------------------------------------------------------------------
def _fc_head_kernel(x_ref, w1_ref, b1_ref, w2_ref, b2_ref, o_ref, acc_ref):
    k = pl.program_id(0)

    @pl.when(k == 0)
    def _():
        acc_ref[...] = jnp.zeros_like(acc_ref)

    acc_ref[...] += jnp.dot(x_ref[...], w1_ref[...],
                            preferred_element_type=jnp.float32)

    @pl.when(k == pl.num_programs(0) - 1)
    def _():
        h = jnp.maximum(acc_ref[...] + b1_ref[...], 0.0)          # [B,128] f32
        logits = jnp.dot(h, w2_ref[...],
                         preferred_element_type=jnp.float32) + b2_ref[...]
        m = jnp.max(logits, axis=-1, keepdims=True)
        lse = m + jnp.log(jnp.sum(jnp.exp(logits - m), axis=-1, keepdims=True))
        o_ref[...] = (logits - lse).astype(o_ref.dtype)


def fc_head(x, w1, b1, w2, b2, *, k_tile=4608):
    """log_softmax(relu(x @ w1 + b1) @ w2 + b2), one Pallas call.

    x:[B,K] bf16, w1:[K,H] bf16, b1:[1,H] f32, w2:[H,N] f32, b2:[1,N] f32.
    The K axis is the only large axis; it is streamed (double-buffered by the
    BlockSpec pipeline) so the head overlaps fc1-weight DMA with MXU work.
    """
    B, K = x.shape
    K2, H = w1.shape
    H2, N = w2.shape
    assert K == K2 and H == H2
    if K % k_tile != 0:
        k_tile = K
    nk = K // k_tile
    return pl.pallas_call(
        _fc_head_kernel,
        out_shape=jax.ShapeDtypeStruct((B, N), jnp.float32),
        grid_spec=pltpu.PrefetchScalarGridSpec(
            num_scalar_prefetch=0,
            grid=(nk,),
            in_specs=[
                pl.BlockSpec((B, k_tile), lambda k: (0, k)),   # activation slab
                pl.BlockSpec((k_tile, H), lambda k: (k, 0)),   # fc1 weight stream
                pl.BlockSpec((1, H), lambda k: (0, 0)),        # fc1 bias (resident)
                pl.BlockSpec((H, N), lambda k: (0, 0)),        # fc2 weight (resident)
                pl.BlockSpec((1, N), lambda k: (0, 0)),        # fc2 bias (resident)
            ],
            out_specs=pl.BlockSpec((B, N), lambda k: (0, 0)),
            scratch_shapes=[pltpu.VMEM((B, H), jnp.float32)],
        ),
        compiler_params=pltpu.CompilerParams(
            dimension_semantics=("arbitrary",)),
    )(x, w1, b1, w2, b2)


# ---------------------------------------------------------------------------
# Conv layer = XLA im2col glue (fuses to one op) + Pallas matmul kernel
# ---------------------------------------------------------------------------
def im2col(x, kh, kw, stride):
    """x: [B,H,W,C] (NHWC) -> patches [B*Ho*Wo, kh*kw*C], feature order (ki,kj,c)."""
    B, H, W, C = x.shape
    ho = (H - kh) // stride + 1
    wo = (W - kw) // stride + 1
    cols = []
    for ki in range(kh):
        for kj in range(kw):
            cols.append(x[:, ki:ki + stride * ho:stride,
                          kj:kj + stride * wo:stride, :])
    patches = jnp.concatenate(cols, axis=-1)          # [B, ho, wo, kh*kw*C]
    return patches.reshape(B * ho * wo, kh * kw * C), ho, wo


def conv2d_relu(x, w_hwio, b2, *, stride):
    """VALID conv + ReLU. x:[B,H,W,Cin] bf16, w_hwio:[KH,KW,Cin,Cout] bf16, b2:[1,Cout] f32."""
    B = x.shape[0]
    kh, kw, cin, cout = w_hwio.shape
    patches, ho, wo = im2col(x, kh, kw, stride)
    w_mat = w_hwio.reshape(kh * kw * cin, cout)       # matches (ki,kj,c) patch order
    y = matmul_bias_relu(patches, w_mat, b2, out_dtype=x.dtype)
    return y.reshape(B, ho, wo, cout)


# ---------------------------------------------------------------------------
# Parameters
# ---------------------------------------------------------------------------
def init_params(key):
    """Deterministic synthetic parameters in PyTorch-compatible layout
    ([KH,KW,Cin,Cout] HWIO convs; fc weights as [in, out] with fc1's `in`
    index flattened in (C,H,W) order, exactly as torch.flatten(x, 1) on an
    NCHW tensor would produce)."""
    ks = jax.random.split(key, 10)
    s = 0.05
    return {
        "conv1_w": s * jax.random.normal(ks[0], (3, 3, 3, 32), jnp.float32),
        "conv1_b": s * jax.random.normal(ks[1], (32,), jnp.float32),
        "conv2_w": s * jax.random.normal(ks[2], (3, 3, 32, 64), jnp.float32),
        "conv2_b": s * jax.random.normal(ks[3], (64,), jnp.float32),
        "conv3_w": s * jax.random.normal(ks[4], (3, 3, 64, 128), jnp.float32),
        "conv3_b": s * jax.random.normal(ks[5], (128,), jnp.float32),
        "fc1_w": s * jax.random.normal(ks[6], (18432, 128), jnp.float32),
        "fc1_b": s * jax.random.normal(ks[7], (128,), jnp.float32),
        "fc2_w": s * jax.random.normal(ks[8], (128, 10), jnp.float32),
        "fc2_b": s * jax.random.normal(ks[9], (10,), jnp.float32),
    }


def prepare_params(p):
    """One-time repack for the kernels: cast MXU operands to bf16, reshape
    biases to [1,N] f32, and permute fc1 rows from torch's (C,H,W) flatten
    order to NHWC (H,W,C) flatten order (kills the runtime transpose)."""
    fc1_w = p["fc1_w"].reshape(128, 12, 12, 128)                    # (C, H, W, out)
    fc1_w = jnp.transpose(fc1_w, (1, 2, 0, 3)).reshape(18432, 128)  # (H,W,C) rows
    return {
        "conv1_w": p["conv1_w"].astype(jnp.bfloat16),
        "conv1_b": p["conv1_b"].reshape(1, -1).astype(jnp.float32),
        "conv2_w": p["conv2_w"].astype(jnp.bfloat16),
        "conv2_b": p["conv2_b"].reshape(1, -1).astype(jnp.float32),
        "conv3_w": p["conv3_w"].astype(jnp.bfloat16),
        "conv3_b": p["conv3_b"].reshape(1, -1).astype(jnp.float32),
        "fc1_w": fc1_w.astype(jnp.bfloat16),
        "fc1_b": p["fc1_b"].reshape(1, -1).astype(jnp.float32),
        "fc2_w": p["fc2_w"].astype(jnp.float32),
        "fc2_b": p["fc2_b"].reshape(1, -1).astype(jnp.float32),
    }


# ---------------------------------------------------------------------------
# Forward pass (matches CNN.forward)
# ---------------------------------------------------------------------------
@jax.jit
def cnn_forward(x_nchw, params):
    # x_nchw: [B, 3, 32, 32] (PyTorch NCHW) -> NHWC bf16 for the conv stack.
    x = jnp.transpose(x_nchw, (0, 2, 3, 1)).astype(jnp.bfloat16)
    x = conv2d_relu(x, params["conv1_w"], params["conv1_b"], stride=1)  # [B,30,30,32]
    x = conv2d_relu(x, params["conv2_w"], params["conv2_b"], stride=2)  # [B,14,14,64]
    x = conv2d_relu(x, params["conv3_w"], params["conv3_b"], stride=1)  # [B,12,12,128]
    B = x.shape[0]
    # NHWC flatten — fc1_w rows were permuted to (H,W,C) order, so this is
    # equivalent to torch.flatten(NCHW, 1) @ fc1_w (no runtime transpose).
    x = x.reshape(B, -1)                                                # [B, 18432]
    return fc_head(x, params["fc1_w"], params["fc1_b"],
                   params["fc2_w"], params["fc2_b"], k_tile=4608)       # [B, 10]


if __name__ == "__main__":
    key = jax.random.PRNGKey(0)
    k_x, k_p = jax.random.split(key)
    # fc1 in_features=18432 = 128*12*12 forces a 3x32x32 input.
    x = jax.random.normal(k_x, (2, 3, 32, 32), jnp.float32)
    params = prepare_params(init_params(k_p))
    out = cnn_forward(x, params)
    out = jax.block_until_ready(out)
    assert out.shape == (2, 10)
    # log_softmax rows should sum (in prob space) to ~1
    assert bool(jnp.all(jnp.abs(jnp.sum(jnp.exp(out), axis=1) - 1.0) < 1e-3))
    print("KERNEL_OK")
</pallas_src>

<mosaic_0001>
module attributes {stable_mosaic.version = 11 : i64} {
  func.func @_matmul_bias_relu_kernel(%arg0: memref<1800x27xbf16, #tpu.memory_space<vmem>>, %arg1: memref<27x32xbf16, #tpu.memory_space<vmem>>, %arg2: memref<1x32xf32, #tpu.memory_space<vmem>>, %arg3: memref<1800x32xbf16, #tpu.memory_space<vmem>>) attributes {dimension_semantics = [], scalar_prefetch = 0 : i64, scratch_operands = 0 : i64, tpu.core_type = #tpu.core_type<tc>} {
    %c0 = arith.constant 0 : index
    %c0_0 = arith.constant 0 : index
    %0 = vector.load %arg0[%c0, %c0_0] : memref<1800x27xbf16, #tpu.memory_space<vmem>>, vector<1800x27xbf16>
    %c0_1 = arith.constant 0 : index
    %c0_2 = arith.constant 0 : index
    %1 = vector.load %arg1[%c0_1, %c0_2] : memref<27x32xbf16, #tpu.memory_space<vmem>>, vector<27x32xbf16>
    %cst = arith.constant dense<0.000000e+00> : vector<1800x32xf32>
    %2 = tpu.matmul %0, %1, %cst {dimension_numbers = #tpu.dot_dimension_numbers<[1], [0], [0], [1], [0, 0, 1, 1], [], []>} : vector<1800x27xbf16>, vector<27x32xbf16>, vector<1800x32xf32> -> vector<1800x32xf32>
    %c0_3 = arith.constant 0 : index
    %c0_4 = arith.constant 0 : index
    %3 = vector.load %arg2[%c0_3, %c0_4] : memref<1x32xf32, #tpu.memory_space<vmem>>, vector<1x32xf32>
    %4 = vector.broadcast %3 : vector<1x32xf32> to vector<1800x32xf32>
    %5 = arith.addf %2, %4 : vector<1800x32xf32>
    %cst_5 = arith.constant 0.000000e+00 : f32
    %6 = vector.broadcast %cst_5 : f32 to vector<1800x32xf32>
    %7 = arith.maximumf %5, %6 : vector<1800x32xf32>
    %8 = arith.truncf %7 : vector<1800x32xf32> to vector<1800x32xbf16>
    %c0_6 = arith.constant 0 : index
    %c0_7 = arith.constant 0 : index
    %9 = vector.load %arg3[%c0_6, %c0_7] : memref<1800x32xbf16, #tpu.memory_space<vmem>>, vector<1800x32xbf16>
    tpu.vector_store %arg3[%c0_6, %c0_7], %8 {strides = array<i32>} : memref<1800x32xbf16, #tpu.memory_space<vmem>>, vector<1800x32xbf16>,
    return
  }
}

module attributes {stable_mosaic.version = 11 : i64} {
  func.func @_matmul_bias_relu_kernel(%arg0: memref<392x288xbf16, #tpu.memory_space<vmem>>, %arg1: memref<288x64xbf16, #tpu.memory_space<vmem>>, %arg2: memref<1x64xf32, #tpu.memory_space<vmem>>, %arg3: memref<392x64xbf16, #tpu.memory_space<vmem>>) attributes {dimension_semantics = [], scalar_prefetch = 0 : i64, scratch_operands = 0 : i64, tpu.core_type = #tpu.core_type<tc>} {
    %c0 = arith.constant 0 : index
    %c0_0 = arith.constant 0 : index
    %0 = vector.load %arg0[%c0, %c0_0] : memref<392x288xbf16, #tpu.memory_space<vmem>>, vector<392x288xbf16>
    %c0_1 = arith.constant 0 : index
    %c0_2 = arith.constant 0 : index
    %1 = vector.load %arg1[%c0_1, %c0_2] : memref<288x64xbf16, #tpu.memory_space<vmem>>, vector<288x64xbf16>
    %cst = arith.constant dense<0.000000e+00> : vector<392x64xf32>
    %2 = tpu.matmul %0, %1, %cst {dimension_numbers = #tpu.dot_dimension_numbers<[1], [0], [0], [1], [0, 0, 1, 1], [], []>} : vector<392x288xbf16>, vector<288x64xbf16>, vector<392x64xf32> -> vector<392x64xf32>
    %c0_3 = arith.constant 0 : index
    %c0_4 = arith.constant 0 : index
    %3 = vector.load %arg2[%c0_3, %c0_4] : memref<1x64xf32, #tpu.memory_space<vmem>>, vector<1x64xf32>
    %4 = vector.broadcast %3 : vector<1x64xf32> to vector<392x64xf32>
    %5 = arith.addf %2, %4 : vector<392x64xf32>
    %cst_5 = arith.constant 0.000000e+00 : f32
    %6 = vector.broadcast %cst_5 : f32 to vector<392x64xf32>
    %7 = arith.maximumf %5, %6 : vector<392x64xf32>
    %8 = arith.truncf %7 : vector<392x64xf32> to vector<392x64xbf16>
    %c0_6 = arith.constant 0 : index
    %c0_7 = arith.constant 0 : index
    %9 = vector.load %arg3[%c0_6, %c0_7] : memref<392x64xbf16, #tpu.memory_space<vmem>>, vector<392x64xbf16>
    tpu.vector_store %arg3[%c0_6, %c0_7], %8 {strides = array<i32>} : memref<392x64xbf16, #tpu.memory_space<vmem>>, vector<392x64xbf16>,
    return
  }
}

module attributes {stable_mosaic.version = 11 : i64} {
  func.func @_matmul_bias_relu_kernel(%arg0: memref<288x576xbf16, #tpu.memory_space<vmem>>, %arg1: memref<576x128xbf16, #tpu.memory_space<vmem>>, %arg2: memref<1x128xf32, #tpu.memory_space<vmem>>, %arg3: memref<288x128xbf16, #tpu.memory_space<vmem>>) attributes {dimension_semantics = [], scalar_prefetch = 0 : i64, scratch_operands = 0 : i64, tpu.core_type = #tpu.core_type<tc>} {
    %c0 = arith.constant 0 : index
    %c0_0 = arith.constant 0 : index
    %0 = vector.load %arg0[%c0, %c0_0] : memref<288x576xbf16, #tpu.memory_space<vmem>>, vector<288x576xbf16>
    %c0_1 = arith.constant 0 : index
    %c0_2 = arith.constant 0 : index
    %1 = vector.load %arg1[%c0_1, %c0_2] : memref<576x128xbf16, #tpu.memory_space<vmem>>, vector<576x128xbf16>
    %cst = arith.constant dense<0.000000e+00> : vector<288x128xf32>
    %2 = tpu.matmul %0, %1, %cst {dimension_numbers = #tpu.dot_dimension_numbers<[1], [0], [0], [1], [0, 0, 1, 1], [], []>} : vector<288x576xbf16>, vector<576x128xbf16>, vector<288x128xf32> -> vector<288x128xf32>
    %c0_3 = arith.constant 0 : index
    %c0_4 = arith.constant 0 : index
    %3 = vector.load %arg2[%c0_3, %c0_4] : memref<1x128xf32, #tpu.memory_space<vmem>>, vector<1x128xf32>
    %4 = vector.broadcast %3 : vector<1x128xf32> to vector<288x128xf32>
    %5 = arith.addf %2, %4 : vector<288x128xf32>
    %cst_5 = arith.constant 0.000000e+00 : f32
    %6 = vector.broadcast %cst_5 : f32 to vector<288x128xf32>
    %7 = arith.maximumf %5, %6 : vector<288x128xf32>
    %8 = arith.truncf %7 : vector<288x128xf32> to vector<288x128xbf16>
    %c0_6 = arith.constant 0 : index
    %c0_7 = arith.constant 0 : index
    %9 = vector.load %arg3[%c0_6, %c0_7] : memref<288x128xbf16, #tpu.memory_space<vmem>>, vector<288x128xbf16>
    tpu.vector_store %arg3[%c0_6, %c0_7], %8 {strides = array<i32>} : memref<288x128xbf16, #tpu.memory_space<vmem>>, vector<288x128xbf16>,
    return
  }
}

module attributes {stable_mosaic.version = 11 : i64} {
  func.func @_fc_head_kernel(%arg0: i32, %arg1: memref<2x4608xbf16, #tpu.memory_space<vmem>>, %arg2: memref<4608x128xbf16, #tpu.memory_space<vmem>>, %arg3: memref<1x128xf32, #tpu.memory_space<vmem>>, %arg4: memref<128x10xf32, #tpu.memory_space<vmem>>, %arg5: memref<1x10xf32, #tpu.memory_space<vmem>>, %arg6: memref<2x10xf32, #tpu.memory_space<vmem>>, %arg7: memref<2x128xf32, #tpu.memory_space<vmem>>) attributes {dimension_semantics = [#tpu.dimension_semantics<arbitrary>], iteration_bounds = array<i64: 4>, scalar_prefetch = 0 : i64, scratch_operands = 1 : i64, tpu.core_type = #tpu.core_type<tc>, window_params = [{transform_indices = @transform_0, window_bounds = array<i64: 2, 4608>}, {transform_indices = @transform_1, window_bounds = array<i64: 4608, 128>}, {pipeline_mode = #tpu.pipeline_mode<synchronous>, transform_indices = @transform_2, window_bounds = array<i64: 1, 128>}, {pipeline_mode = #tpu.pipeline_mode<synchronous>, transform_indices = @transform_3, window_bounds = array<i64: 128, 10>}, {pipeline_mode = #tpu.pipeline_mode<synchronous>, transform_indices = @transform_4, window_bounds = array<i64: 1, 10>}, {pipeline_mode = #tpu.pipeline_mode<synchronous>, transform_indices = @transform_5, window_bounds = array<i64: 2, 10>}]} {
    %c0_i32 = arith.constant 0 : i32
    %0 = arith.cmpi eq, %arg0, %c0_i32 : i32
    %1 = arith.extui %0 : i1 to i32
    %c0_i32_0 = arith.constant 0 : i32
    %2 = arith.cmpi ne, %1, %c0_i32_0 : i32
    scf.if %2 {
      %cst_9 = arith.constant 0.000000e+00 : f32
      %12 = vector.broadcast %cst_9 : f32 to vector<2x128xf32>
      %c0_10 = arith.constant 0 : index
      %c0_11 = arith.constant 0 : index
      %13 = vector.load %arg7[%c0_10, %c0_11] : memref<2x128xf32, #tpu.memory_space<vmem>>, vector<2x128xf32>
      tpu.vector_store %arg7[%c0_10, %c0_11], %12 {strides = array<i32>} : memref<2x128xf32, #tpu.memory_space<vmem>>, vector<2x128xf32>,
    } else {
    }
    %c0 = arith.constant 0 : index
    %c0_1 = arith.constant 0 : index
    %3 = vector.load %arg7[%c0, %c0_1] : memref<2x128xf32, #tpu.memory_space<vmem>>, vector<2x128xf32>
    %c0_2 = arith.constant 0 : index
    %c0_3 = arith.constant 0 : index
    %4 = vector.load %arg1[%c0_2, %c0_3] : memref<2x4608xbf16, #tpu.memory_space<vmem>>, vector<2x4608xbf16>
    %c0_4 = arith.constant 0 : index
    %c0_5 = arith.constant 0 : index
    %5 = vector.load %arg2[%c0_4, %c0_5] : memref<4608x128xbf16, #tpu.memory_space<vmem>>, vector<4608x128xbf16>
    %cst = arith.constant dense<0.000000e+00> : vector<2x128xf32>
    %6 = tpu.matmul %4, %5, %cst {dimension_numbers = #tpu.dot_dimension_numbers<[1], [0], [0], [1], [0, 0, 1, 1], [], []>} : vector<2x4608xbf16>, vector<4608x128xbf16>, vector<2x128xf32> -> vector<2x128xf32>
    %7 = arith.addf %3, %6 : vector<2x128xf32>
    %c0_6 = arith.constant 0 : index
    %c0_7 = arith.constant 0 : index
    %8 = vector.load %arg7[%c0_6, %c0_7] : memref<2x128xf32, #tpu.memory_space<vmem>>, vector<2x128xf32>
    tpu.vector_store %arg7[%c0_6, %c0_7], %7 {strides = array<i32>} : memref<2x128xf32, #tpu.memory_space<vmem>>, vector<2x128xf32>,
    %c3_i32 = arith.constant 3 : i32
    %9 = arith.cmpi eq, %arg0, %c3_i32 : i32
    %10 = arith.extui %9 : i1 to i32
    %c0_i32_8 = arith.constant 0 : i32
    %11 = arith.cmpi ne, %10, %c0_i32_8 : i32
    scf.if %11 {
      %c0_9 = arith.constant 0 : index
      %c0_10 = arith.constant 0 : index
      %12 = vector.load %arg7[%c0_9, %c0_10] : memref<2x128xf32, #tpu.memory_space<vmem>>, vector<2x128xf32>
      %c0_11 = arith.constant 0 : index
      %c0_12 = arith.constant 0 : index
      %13 = vector.load %arg3[%c0_11, %c0_12] : memref<1x128xf32, #tpu.memory_space<vmem>>, vector<1x128xf32>
      %14 = vector.broadcast %13 : vector<1x128xf32> to vector<2x128xf32>
      %15 = arith.addf %12, %14 : vector<2x128xf32>
      %cst_13 = arith.constant 0.000000e+00 : f32
      %16 = vector.broadcast %cst_13 : f32 to vector<2x128xf32>
      %17 = arith.maximumf %15, %16 : vector<2x128xf32>
      %c0_14 = arith.constant 0 : index
      %c0_15 = arith.constant 0 : index
      %18 = vector.load %arg4[%c0_14, %c0_15] : memref<128x10xf32, #tpu.memory_space<vmem>>, vector<128x10xf32>
      %cst_16 = arith.constant dense<0.000000e+00> : vector<2x10xf32>
      %19 = tpu.matmul %17, %18, %cst_16 {dimension_numbers = #tpu.dot_dimension_numbers<[1], [0], [0], [1], [0, 0, 1, 1], [], []>} : vector<2x128xf32>, vector<128x10xf32>, vector<2x10xf32> -> vector<2x10xf32>
      %c0_17 = arith.constant 0 : index
      %c0_18 = arith.constant 0 : index
      %20 = vector.load %arg5[%c0_17, %c0_18] : memref<1x10xf32, #tpu.memory_space<vmem>>, vector<1x10xf32>
      %21 = vector.broadcast %20 : vector<1x10xf32> to vector<2x10xf32>
      %22 = arith.addf %19, %21 : vector<2x10xf32>
      %cst_19 = arith.constant dense<0xFF800000> : vector<2xf32>
      %23 = vector.multi_reduction <maximumf>, %22, %cst_19 [1] : vector<2x10xf32> to vector<2xf32>
      %24 = vector.shape_cast %23 : vector<2xf32> to vector<2x1xf32>
      %25 = vector.broadcast %24 : vector<2x1xf32> to vector<2x10xf32>
      %26 = arith.subf %22, %25 : vector<2x10xf32>
      %27 = math.exp %26 : vector<2x10xf32>
      %cst_20 = arith.constant dense<0.000000e+00> : vector<2xf32>
      %28 = vector.multi_reduction <add>, %27, %cst_20 [1] : vector<2x10xf32> to vector<2xf32>
      %29 = vector.shape_cast %28 : vector<2xf32> to vector<2x1xf32>
      %30 = math.log %29 : vector<2x1xf32>
      %31 = arith.addf %24, %30 : vector<2x1xf32>
      %32 = vector.broadcast %31 : vector<2x1xf32> to vector<2x10xf32>
      %33 = arith.subf %22, %32 : vector<2x10xf32>
      %c0_21 = arith.constant 0 : index
      %c0_22 = arith.constant 0 : index
      %34 = vector.load %arg6[%c0_21, %c0_22] : memref<2x10xf32, #tpu.memory_space<vmem>>, vector<2x10xf32>
      tpu.vector_store %arg6[%c0_21, %c0_22], %33 {strides = array<i32>} : memref<2x10xf32, #tpu.memory_space<vmem>>, vector<2x10xf32>,
    } else {
    }
    return
  }
  func.func @transform_0(%arg0: i32) -> (i32, i32) {
    %c0_i32 = arith.constant 0 : i32
    %c0_i32_0 = arith.constant 0 : i32
    return %c0_i32, %arg0 : i32, i32
  }
  func.func @transform_1(%arg0: i32) -> (i32, i32) {
    %c0_i32 = arith.constant 0 : i32
    %c0_i32_0 = arith.constant 0 : i32
    return %arg0, %c0_i32 : i32, i32
  }
  func.func @transform_2(%arg0: i32) -> (i32, i32) {
    %c0_i32 = arith.constant 0 : i32
    %c0_i32_0 = arith.constant 0 : i32
    %c0_i32_1 = arith.constant 0 : i32
    return %c0_i32, %c0_i32_0 : i32, i32
  }
  func.func @transform_3(%arg0: i32) -> (i32, i32) {
    %c0_i32 = arith.constant 0 : i32
    %c0_i32_0 = arith.constant 0 : i32
    %c0_i32_1 = arith.constant 0 : i32
    return %c0_i32, %c0_i32_0 : i32, i32
  }
  func.func @transform_4(%arg0: i32) -> (i32, i32) {
    %c0_i32 = arith.constant 0 : i32
    %c0_i32_0 = arith.constant 0 : i32
    %c0_i32_1 = arith.constant 0 : i32
    return %c0_i32, %c0_i32_0 : i32, i32
  }
  func.func @transform_5(%arg0: i32) -> (i32, i32) {
    %c0_i32 = arith.constant 0 : i32
    %c0_i32_0 = arith.constant 0 : i32
    %c0_i32_1 = arith.constant 0 : i32
    return %c0_i32, %c0_i32_0 : i32, i32
  }
}

</mosaic_0001>

<bundles_post_ra>
// kernel: cnn_forward.4
= control target key start
LH: loop header
LB: loop body
LE: loop exit
PB: predicated region body
PF: predicated region fallthrough
CT: control target
= control target key end

     0   :  { %vm1162_vm0 = vcmask 1044480   ;;  %vm1163_vm1 = vcmask 1045504   ;;  %v3115_v2 = vmov 65535   ;;  %vm822_vm2 = vcmask 220160   ;;  %s4737_s1 = inlined_call_operand.vmem [shape: bf16[27,32], index: 1, kind: input, shape index: {}]   ;;  %s4738_s2 = inlined_call_operand.vmem [shape: f32[1,32], index: 2, kind: input, shape index: {}]   ;;  %s4739_s0 = inlined_call_operand.vmem [shape: bf16[1800,27], index: 0, kind: input, shape index: {}]   ;;  %s4740_s3 = inlined_call_operand.vmem [shape: bf16[1800,32], index: 3, kind: output, shape index: {}]  }
   0x1   :  { %v2876_v0 = vld [vmem:[%s4737_s1 + $0x8] sm:$0xf]  ;;  %v3104_v1 = vld [vmem:[%s4737_s1 + $0x8] sm:$0x30]  ;;  %v1164_v3 = vsel %vm1162_vm0, 4294967295, %v3115_v2  ;;  %v3103_v7 = vld [vmem:[%s4737_s1] sm:$0xff] }
   0x2   :  { %v2877_v4 = vor.u32 %v3104_v1, %v2876_v0  ;;  %v1165_v5 = vsel %vm1163_vm1, %v1164_v3, 0  ;;  %v3019_v8 = vld [vmem:[%s4739_s0 + $0xe0] sm:$0xff]  ;;  %v3048_v9 = vld [vmem:[%s4739_s0 + $0x1c8] sm:$0xff]  ;;  %v3077_v11 = vld [vmem:[%s4739_s0 + $0x2b0] sm:$0xff]  ;;  %vm2192_vm3 = vcmask 257024  }
   0x3   :  { %v2991_v10 = vld [vmem:[%s4739_s0] sm:$0xff]  ;;  %v3020_v12 = vld [vmem:[%s4739_s0 + $0xe8] sm:$0xff]  ;;  %v3049_v13 = vld [vmem:[%s4739_s0 + $0x1d0] sm:$0xff] }
   0x4   :  { %v1167_v6 = vand.u32 %v2877_v4, %v1165_v5  ;;  %v2992_v14 = vld [vmem:[%s4739_s0 + $0x8] sm:$0xff]  ;;  %v3078_v15 = vld [vmem:[%s4739_s0 + $0x2b8] sm:$0xff]  ;;  %v3021_v16 = vld [vmem:[%s4739_s0 + $0xf0] sm:$0xff] }
   0x5   :  { %v3050_v17 = vld [vmem:[%s4739_s0 + $0x1d8] sm:$0xff]  ;;  %v2993_v18 = vld [vmem:[%s4739_s0 + $0x10] sm:$0xff]  ;;  %v3079_v19 = vld [vmem:[%s4739_s0 + $0x2c0] sm:$0xff] }
   0x6   :  { %3105 = vmatpush.bf16.msra.mxu1 %v1167_v6  ;;  %3106 = vmatpush.bf16.msra.mxu2 %v1167_v6  ;;  %v3022_v20 = vld [vmem:[%s4739_s0 + $0xf8] sm:$0xff]  ;;  %v3051_v21 = vld [vmem:[%s4739_s0 + $0x1e0] sm:$0xff]  ;;  %v3080_v23 = vld [vmem:[%s4739_s0 + $0x2c8] sm:$0xff] }
   0x7   :  { %1175 = vmatpush.bf16.msra.mxu0 %v1167_v6  ;;  %3107 = vmatpush.bf16.msra.mxu3 %v1167_v6  ;;  %v2994_v22 = vld [vmem:[%s4739_s0 + $0x18] sm:$0xff]  ;;  %v3023_v24 = vld [vmem:[%s4739_s0 + $0x100] sm:$0xff]  ;;  %v3052_v25 = vld [vmem:[%s4739_s0 + $0x1e8] sm:$0xff] }
   0x8   :  { %v2995_v26 = vld [vmem:[%s4739_s0 + $0x20] sm:$0xff]  ;;  %v3081_v27 = vld [vmem:[%s4739_s0 + $0x2d0] sm:$0xff]  ;;  %v3024_v28 = vld [vmem:[%s4739_s0 + $0x108] sm:$0xff] }
   0x9   :  { %v3053_v29 = vld [vmem:[%s4739_s0 + $0x1f0] sm:$0xff]  ;;  %v2996_v30 = vld [vmem:[%s4739_s0 + $0x28] sm:$0xff]  ;;  %v3082_v31 = vld [vmem:[%s4739_s0 + $0x2d8] sm:$0xff] }
   0xa   :  { %3108 = vmatpush.bf16.msra.mxu1 %v3103_v7  ;;  %3109 = vmatpush.bf16.msra.mxu2 %v3103_v7  ;;  %v3025_v32 = vld [vmem:[%s4739_s0 + $0x110] sm:$0xff]  ;;  %v3054_v33 = vld [vmem:[%s4739_s0 + $0x1f8] sm:$0xff]  ;;  %v3083_v35 = vld [vmem:[%s4739_s0 + $0x2e0] sm:$0xff] }
   0xb   :  { %1176 = vmatpush.bf16.msra.mxu0 %v3103_v7  ;;  %3110 = vmatpush.bf16.msra.mxu3 %v3103_v7  ;;  %v2997_v34 = vld [vmem:[%s4739_s0 + $0x30] sm:$0xff]  ;;  %v3026_v36 = vld [vmem:[%s4739_s0 + $0x118] sm:$0xff]  ;;  %v3055_v37 = vld [vmem:[%s4739_s0 + $0x200] sm:$0xff] }
   0xc   :  { %v2998_v38 = vld [vmem:[%s4739_s0 + $0x38] sm:$0xff]  ;;  %v3084_v39 = vld [vmem:[%s4739_s0 + $0x2e8] sm:$0xff]  ;;  %v3276_v40 = vld [vmem:[%s4738_s2] ss:$0 sm:$0xff] }
   0xd   :  { %2906 = vmatmul.msk.bf16.vlgmr.msra.gmra.mxu1 %vm822_vm2, %v3019_v8  ;;  %2935 = vmatmul.msk.bf16.vlgmr.msra.gmra.mxu2 %vm822_vm2, %v3048_v9  ;;  %v3027_v41 = vld [vmem:[%s4739_s0 + $0x120] sm:$0xff]  ;;  %v3056_v42 = vld [vmem:[%s4739_s0 + $0x208] sm:$0xff]  ;;  %v3085_v45 = vld [vmem:[%s4739_s0 + $0x2f0] sm:$0xff] }
   0xe   :  { %2878 = vmatmul.msk.bf16.vlgmr.msra.gmra.mxu0 %vm822_vm2, %v2991_v10  ;;  %2964 = vmatmul.msk.bf16.vlgmr.msra.gmra.mxu3 %vm822_vm2, %v3077_v11  ;;  %v2999_v44 = vld [vmem:[%s4739_s0 + $0x40] sm:$0xff]  ;;  %v3028_v7 = vld [vmem:[%s4739_s0 + $0x128] sm:$0xff]  ;;  %v3057_v8 = vld [vmem:[%s4739_s0 + $0x210] sm:$0xff] }
   0xf   :  { %v3000_v11 = vld [vmem:[%s4739_s0 + $0x48] sm:$0xff] }
  0x1d   :  { %2907 = vmatmul.msk.bf16.gmra.mxu1 %vm822_vm2, %v3020_v12  ;;  %2936 = vmatmul.msk.bf16.gmra.mxu2 %vm822_vm2, %v3049_v13  ;;  %v3086_v13 = vld [vmem:[%s4739_s0 + $0x2f8] sm:$0xff] }
  0x1e   :  { %2879 = vmatmul.msk.bf16.gmra.mxu0 %vm822_vm2, %v2992_v14  ;;  %2965 = vmatmul.msk.bf16.gmra.mxu3 %vm822_vm2, %v3078_v15 }
  0x2d   :  { %2908 = vmatmul.msk.bf16.gmra.mxu1 %vm822_vm2, %v3021_v16  ;;  %2937 = vmatmul.msk.bf16.gmra.mxu2 %vm822_vm2, %v3050_v17 }
  0x2e   :  { %2880 = vmatmul.msk.bf16.gmra.mxu0 %vm822_vm2, %v2993_v18  ;;  %2966 = vmatmul.msk.bf16.gmra.mxu3 %vm822_vm2, %v3079_v19 }
  0x3d   :  { %2909 = vmatmul.msk.bf16.gmra.mxu1 %vm822_vm2, %v3022_v20  ;;  %2938 = vmatmul.msk.bf16.gmra.mxu2 %vm822_vm2, %v3051_v21 }
  0x3e   :  { %2881 = vmatmul.msk.bf16.gmra.mxu0 %vm822_vm2, %v2994_v22  ;;  %2967 = vmatmul.msk.bf16.gmra.mxu3 %vm822_vm2, %v3080_v23 }
  0x4d   :  { %2910 = vmatmul.msk.bf16.gmra.mxu1 %vm822_vm2, %v3023_v24  ;;  %2939 = vmatmul.msk.bf16.gmra.mxu2 %vm822_vm2, %v3052_v25 }
  0x4e   :  { %2882 = vmatmul.msk.bf16.gmra.mxu0 %vm822_vm2, %v2995_v26  ;;  %2968 = vmatmul.msk.bf16.gmra.mxu3 %vm822_vm2, %v3081_v27 }
  0x5d   :  { %2911 = vmatmul.msk.bf16.gmra.mxu1 %vm822_vm2, %v3024_v28  ;;  %2940 = vmatmul.msk.bf16.gmra.mxu2 %vm822_vm2, %v3053_v29 }
  0x5e   :  { %2883 = vmatmul.msk.bf16.gmra.mxu0 %vm822_vm2, %v2996_v30  ;;  %2969 = vmatmul.msk.bf16.gmra.mxu3 %vm822_vm2, %v3082_v31 }
  0x6d   :  { %2912 = vmatmul.msk.bf16.gmra.mxu1 %vm822_vm2, %v3025_v32  ;;  %2941 = vmatmul.msk.bf16.gmra.mxu2 %vm822_vm2, %v3054_v33 }
  0x6e   :  { %2884 = vmatmul.msk.bf16.gmra.mxu0 %vm822_vm2, %v2997_v34  ;;  %2970 = vmatmul.msk.bf16.gmra.mxu3 %vm822_vm2, %v3083_v35 }
  0x7d   :  { %2913 = vmatmul.msk.bf16.gmra.mxu1 %vm822_vm2, %v3026_v36  ;;  %2942 = vmatmul.msk.bf16.gmra.mxu2 %vm822_vm2, %v3055_v37 }
  0x7e   :  { %2885 = vmatmul.msk.bf16.gmra.mxu0 %vm822_vm2, %v2998_v38  ;;  %2971 = vmatmul.msk.bf16.gmra.mxu3 %vm822_vm2, %v3084_v39 }
  0x8a   :  { %v1318_v43 = vpop.f32.mrf.mxu1 }
  0x8b   :  { %v1319_v46 = vadd.f32 %v3276_v40, %v1318_v43  ;;  %v1178_v47 = vpop.f32.mrf.mxu0 }
  0x8c   :  { %v1179_v48 = vadd.f32 %v3276_v40, %v1178_v47 }
  0x8d   :  { %v1798_v49 = vmax.f32 %v1319_v46, 0.0  ;;  %2914 = vmatmul.msk.bf16.gmra.mxu1 %vm822_vm2, %v3027_v41  ;;  %2943 = vmatmul.msk.bf16.gmra.mxu2 %vm822_vm2, %v3056_v42 }
  0x8e   :  { %v1742_v50 = vmax.f32 %v1179_v48, 0.0  ;;  %2886 = vmatmul.msk.bf16.gmra.mxu0 %vm822_vm2, %v2999_v44  ;;  %2972 = vmatmul.msk.bf16.gmra.mxu3 %vm822_vm2, %v3085_v45  ;;  %v3029_v44 = vld [vmem:[%s4739_s0 + $0x130] sm:$0xff]  ;;  %v3058_v45 = vld [vmem:[%s4739_s0 + $0x218] sm:$0xff] }
  0x8f   :  { %v2023_v51 = vpack.c.bf16 %v1798_v49, %v1798_v49  ;;  %v3001_v48 = vld [vmem:[%s4739_s0 + $0x50] sm:$0xff] }
  0x90   :  { %v1463_v52 = vpop.f32.mrf.mxu2  ;;  %v1967_v53 = vpack.c.bf16 %v1742_v50, %v1742_v50  ;;  %v3087_v50 = vld [vmem:[%s4739_s0 + $0x300] sm:$0xff] }
  0x91   :  { %2249 = vst.msk [vmem:[%s4740_s3 + $0xe0] sm:$0xf] %vm2192_vm3, %v2023_v51  ;;  %v1464_v54 = vadd.f32 %v3276_v40, %v1463_v52  ;;  %v1608_v55 = vpop.f32.mrf.mxu3 }
  0x92   :  { %v1320_v56 = vpop.f32.mrf.mxu1  ;;  %2193 = vst.msk [vmem:[%s4740_s3] sm:$0xf] %vm2192_vm3, %v1967_v53  ;;  %v1609_v57 = vadd.f32 %v3276_v40, %v1608_v55 }
  0x93   :  { %v1856_v58 = vmax.f32 %v1464_v54, 0.0  ;;  %v1321_v59 = vadd.f32 %v3276_v40, %v1320_v56  ;;  %v1180_v60 = vpop.f32.mrf.mxu0 }
  0x94   :  { %v1181_v61 = vadd.f32 %v3276_v40, %v1180_v60  ;;  %v1914_v62 = vmax.f32 %v1609_v57, 0.0 }
  0x95   :  { %v2081_v63 = vpack.c.bf16 %v1856_v58, %v1856_v58  ;;  %v1799_v0 = vmax.f32 %v1321_v59, 0.0 }
  0x96   :  { %v1743_v1 = vmax.f32 %v1181_v61, 0.0  ;;  %v2139_v2 = vpack.c.bf16 %v1914_v62, %v1914_v62 }
  0x97   :  { %2307 = vst.msk [vmem:[%s4740_s3 + $0x1c8] sm:$0xf] %vm2192_vm3, %v2081_v63  ;;  %v2024_v3 = vpack.c.bf16 %v1799_v0, %v1799_v0 }
  0x98   :  { %v1465_v4 = vpop.f32.mrf.mxu2  ;;  %v1968_v5 = vpack.c.bf16 %v1743_v1, %v1743_v1  ;;  %2365 = vst.msk [vmem:[%s4740_s3 + $0x2b0] sm:$0xf] %vm2192_vm3, %v2139_v2 }
  0x99   :  { %2250 = vst.msk [vmem:[%s4740_s3 + $0xe4] sm:$0xf] %vm2192_vm3, %v2024_v3  ;;  %v1466_v6 = vadd.f32 %v3276_v40, %v1465_v4  ;;  %v1610_v9 = vpop.f32.mrf.mxu3 }
  0x9a   :  { %v1323_v10 = vpop.f32.mrf.mxu1  ;;  %2194 = vst.msk [vmem:[%s4740_s3 + $0x4] sm:$0xf] %vm2192_vm3, %v1968_v5  ;;  %v1611_v12 = vadd.f32 %v3276_v40, %v1610_v9 }
  0x9b   :  { %v1857_v14 = vmax.f32 %v1466_v6, 0.0  ;;  %v1324_v15 = vadd.f32 %v3276_v40, %v1323_v10  ;;  %v1183_v16 = vpop.f32.mrf.mxu0 }
  0x9c   :  { %v1184_v17 = vadd.f32 %v3276_v40, %v1183_v16  ;;  %v1915_v18 = vmax.f32 %v1611_v12, 0.0  ;;  %v3030_v16 = vld [vmem:[%s4739_s0 + $0x138] sm:$0xff] }
  0x9d   :  { %v2082_v19 = vpack.c.bf16 %v1857_v14, %v1857_v14  ;;  %v1800_v20 = vmax.f32 %v1324_v15, 0.0  ;;  %2915 = vmatmul.msk.bf16.gmra.mxu1 %vm822_vm2, %v3028_v7  ;;  %2944 = vmatmul.msk.bf16.gmra.mxu2 %vm822_vm2, %v3057_v8 }
  0x9e   :  { %v1744_v21 = vmax.f32 %v1184_v17, 0.0  ;;  %2887 = vmatmul.msk.bf16.gmra.mxu0 %vm822_vm2, %v3000_v11  ;;  %v2140_v22 = vpack.c.bf16 %v1915_v18, %v1915_v18  ;;  %2973 = vmatmul.msk.bf16.gmra.mxu3 %vm822_vm2, %v3086_v13  ;;  %v3059_v17 = vld [vmem:[%s4739_s0 + $0x220] sm:$0xff] }
  0x9f   :  { %2308 = vst.msk [vmem:[%s4740_s3 + $0x1cc] sm:$0xf] %vm2192_vm3, %v2082_v19  ;;  %v2025_v23 = vpack.c.bf16 %v1800_v20, %v1800_v20  ;;  %v3002_v20 = vld [vmem:[%s4739_s0 + $0x58] sm:$0xff] }
  0xa0   :  { %v1468_v24 = vpop.f32.mrf.mxu2  ;;  %v1969_v25 = vpack.c.bf16 %v1744_v21, %v1744_v21  ;;  %2366 = vst.msk [vmem:[%s4740_s3 + $0x2b4] sm:$0xf] %vm2192_vm3, %v2140_v22  ;;  %v3088_v22 = vld [vmem:[%s4739_s0 + $0x308] sm:$0xff] }
  0xa1   :  { %2251 = vst.msk [vmem:[%s4740_s3 + $0xe8] sm:$0xf] %vm2192_vm3, %v2025_v23  ;;  %v1469_v26 = vadd.f32 %v3276_v40, %v1468_v24  ;;  %v1613_v27 = vpop.f32.mrf.mxu3 }
  0xa2   :  { %v1325_v28 = vpop.f32.mrf.mxu1  ;;  %2195 = vst.msk [vmem:[%s4740_s3 + $0x8] sm:$0xf] %vm2192_vm3, %v1969_v25  ;;  %v1614_v29 = vadd.f32 %v3276_v40, %v1613_v27 }
  0xa3   :  { %v1858_v30 = vmax.f32 %v1469_v26, 0.0  ;;  %v1326_v31 = vadd.f32 %v3276_v40, %v1325_v28  ;;  %v1185_v32 = vpop.f32.mrf.mxu0 }
  0xa4   :  { %v1186_v33 = vadd.f32 %v3276_v40, %v1185_v32  ;;  %v1916_v34 = vmax.f32 %v1614_v29, 0.0 }
  0xa5   :  { %v2083_v35 = vpack.c.bf16 %v1858_v30, %v1858_v30  ;;  %v1801_v36 = vmax.f32 %v1326_v31, 0.0 }
  0xa6   :  { %v1745_v37 = vmax.f32 %v1186_v33, 0.0  ;;  %v2141_v38 = vpack.c.bf16 %v1916_v34, %v1916_v34 }
  0xa7   :  { %2309 = vst.msk [vmem:[%s4740_s3 + $0x1d0] sm:$0xf] %vm2192_vm3, %v2083_v35  ;;  %v2026_v39 = vpack.c.bf16 %v1801_v36, %v1801_v36 }
  0xa8   :  { %v1470_v41 = vpop.f32.mrf.mxu2  ;;  %v1970_v42 = vpack.c.bf16 %v1745_v37, %v1745_v37  ;;  %2367 = vst.msk [vmem:[%s4740_s3 + $0x2b8] sm:$0xf] %vm2192_vm3, %v2141_v38 }
  0xa9   :  { %2252 = vst.msk [vmem:[%s4740_s3 + $0xec] sm:$0xf] %vm2192_vm3, %v2026_v39  ;;  %v1471_v43 = vadd.f32 %v3276_v40, %v1470_v41  ;;  %v1615_v46 = vpop.f32.mrf.mxu3 }
  0xaa   :  { %v1328_v47 = vpop.f32.mrf.mxu1  ;;  %2196 = vst.msk [vmem:[%s4740_s3 + $0xc] sm:$0xf] %vm2192_vm3, %v1970_v42  ;;  %v1616_v49 = vadd.f32 %v3276_v40, %v1615_v46 }
  0xab   :  { %v1859_v51 = vmax.f32 %v1471_v43, 0.0  ;;  %v1329_v52 = vadd.f32 %v3276_v40, %v1328_v47  ;;  %v1188_v53 = vpop.f32.mrf.mxu0 }
  0xac   :  { %v1189_v54 = vadd.f32 %v3276_v40, %v1188_v53  ;;  %v1917_v55 = vmax.f32 %v1616_v49, 0.0  ;;  %v3031_v53 = vld [vmem:[%s4739_s0 + $0x140] sm:$0xff] }
  0xad   :  { %v2084_v56 = vpack.c.bf16 %v1859_v51, %v1859_v51  ;;  %v1802_v57 = vmax.f32 %v1329_v52, 0.0  ;;  %2916 = vmatmul.msk.bf16.gmra.mxu1 %vm822_vm2, %v3029_v44  ;;  %2945 = vmatmul.msk.bf16.gmra.mxu2 %vm822_vm2, %v3058_v45 }
  0xae   :  { %v1746_v58 = vmax.f32 %v1189_v54, 0.0  ;;  %2888 = vmatmul.msk.bf16.gmra.mxu0 %vm822_vm2, %v3001_v48  ;;  %v2142_v59 = vpack.c.bf16 %v1917_v55, %v1917_v55  ;;  %2974 = vmatmul.msk.bf16.gmra.mxu3 %vm822_vm2, %v3087_v50  ;;  %v3060_v54 = vld [vmem:[%s4739_s0 + $0x228] sm:$0xff] }
  0xaf   :  { %2310 = vst.msk [vmem:[%s4740_s3 + $0x1d4] sm:$0xf] %vm2192_vm3, %v2084_v56  ;;  %v2027_v60 = vpack.c.bf16 %v1802_v57, %v1802_v57  ;;  %v3003_v57 = vld [vmem:[%s4739_s0 + $0x60] sm:$0xff] }
  0xb0   :  { %v1473_v61 = vpop.f32.mrf.mxu2  ;;  %v1971_v62 = vpack.c.bf16 %v1746_v58, %v1746_v58  ;;  %2368 = vst.msk [vmem:[%s4740_s3 + $0x2bc] sm:$0xf] %vm2192_vm3, %v2142_v59  ;;  %v3089_v59 = vld [vmem:[%s4739_s0 + $0x310] sm:$0xff] }
  0xb1   :  { %2253 = vst.msk [vmem:[%s4740_s3 + $0xf0] sm:$0xf] %vm2192_vm3, %v2027_v60  ;;  %v1474_v63 = vadd.f32 %v3276_v40, %v1473_v61  ;;  %v1618_v0 = vpop.f32.mrf.mxu3 }
  0xb2   :  { %v1330_v1 = vpop.f32.mrf.mxu1  ;;  %2197 = vst.msk [vmem:[%s4740_s3 + $0x10] sm:$0xf] %vm2192_vm3, %v1971_v62  ;;  %v1619_v2 = vadd.f32 %v3276_v40, %v1618_v0 }
  0xb3   :  { %v1860_v3 = vmax.f32 %v1474_v63, 0.0  ;;  %v1331_v4 = vadd.f32 %v3276_v40, %v1330_v1  ;;  %v1190_v5 = vpop.f32.mrf.mxu0 }
  0xb4   :  { %v1191_v6 = vadd.f32 %v3276_v40, %v1190_v5  ;;  %v1918_v7 = vmax.f32 %v1619_v2, 0.0 }
  0xb5   :  { %v2085_v8 = vpack.c.bf16 %v1860_v3, %v1860_v3  ;;  %v1803_v9 = vmax.f32 %v1331_v4, 0.0 }
  0xb6   :  { %v1747_v10 = vmax.f32 %v1191_v6, 0.0  ;;  %v2143_v11 = vpack.c.bf16 %v1918_v7, %v1918_v7 }
  0xb7   :  { %2311 = vst.msk [vmem:[%s4740_s3 + $0x1d8] sm:$0xf] %vm2192_vm3, %v2085_v8  ;;  %v2028_v12 = vpack.c.bf16 %v1803_v9, %v1803_v9 }
  0xb8   :  { %v1475_v13 = vpop.f32.mrf.mxu2  ;;  %v1972_v14 = vpack.c.bf16 %v1747_v10, %v1747_v10  ;;  %2369 = vst.msk [vmem:[%s4740_s3 + $0x2c0] sm:$0xf] %vm2192_vm3, %v2143_v11 }
  0xb9   :  { %2254 = vst.msk [vmem:[%s4740_s3 + $0xf4] sm:$0xf] %vm2192_vm3, %v2028_v12  ;;  %v1476_v15 = vadd.f32 %v3276_v40, %v1475_v13  ;;  %v1620_v18 = vpop.f32.mrf.mxu3 }
  0xba   :  { %v1333_v19 = vpop.f32.mrf.mxu1  ;;  %2198 = vst.msk [vmem:[%s4740_s3 + $0x14] sm:$0xf] %vm2192_vm3, %v1972_v14  ;;  %v1621_v21 = vadd.f32 %v3276_v40, %v1620_v18 }
  0xbb   :  { %v1861_v23 = vmax.f32 %v1476_v15, 0.0  ;;  %v1334_v24 = vadd.f32 %v3276_v40, %v1333_v19  ;;  %v1193_v25 = vpop.f32.mrf.mxu0 }
  0xbc   :  { %v1194_v26 = vadd.f32 %v3276_v40, %v1193_v25  ;;  %v1919_v27 = vmax.f32 %v1621_v21, 0.0  ;;  %v3032_v25 = vld [vmem:[%s4739_s0 + $0x148] sm:$0xff] }
  0xbd   :  { %v2086_v28 = vpack.c.bf16 %v1861_v23, %v1861_v23  ;;  %v1804_v29 = vmax.f32 %v1334_v24, 0.0  ;;  %2917 = vmatmul.msk.bf16.gmra.mxu1 %vm822_vm2, %v3030_v16  ;;  %2946 = vmatmul.msk.bf16.gmra.mxu2 %vm822_vm2, %v3059_v17 }
  0xbe   :  { %v1748_v30 = vmax.f32 %v1194_v26, 0.0  ;;  %2889 = vmatmul.msk.bf16.gmra.mxu0 %vm822_vm2, %v3002_v20  ;;  %v2144_v31 = vpack.c.bf16 %v1919_v27, %v1919_v27  ;;  %2975 = vmatmul.msk.bf16.gmra.mxu3 %vm822_vm2, %v3088_v22  ;;  %v3061_v26 = vld [vmem:[%s4739_s0 + $0x230] sm:$0xff] }
  0xbf   :  { %2312 = vst.msk [vmem:[%s4740_s3 + $0x1dc] sm:$0xf] %vm2192_vm3, %v2086_v28  ;;  %v2029_v32 = vpack.c.bf16 %v1804_v29, %v1804_v29  ;;  %v3004_v29 = vld [vmem:[%s4739_s0 + $0x68] sm:$0xff] }
  0xc0   :  { %v1478_v33 = vpop.f32.mrf.mxu2  ;;  %v1973_v34 = vpack.c.bf16 %v1748_v30, %v1748_v30  ;;  %2370 = vst.msk [vmem:[%s4740_s3 + $0x2c4] sm:$0xf] %vm2192_vm3, %v2144_v31  ;;  %v3090_v31 = vld [vmem:[%s4739_s0 + $0x318] sm:$0xff] }
  0xc1   :  { %2255 = vst.msk [vmem:[%s4740_s3 + $0xf8] sm:$0xf] %vm2192_vm3, %v2029_v32  ;;  %v1479_v35 = vadd.f32 %v3276_v40, %v1478_v33  ;;  %v1623_v36 = vpop.f32.mrf.mxu3 }
  0xc2   :  { %v1335_v37 = vpop.f32.mrf.mxu1  ;;  %2199 = vst.msk [vmem:[%s4740_s3 + $0x18] sm:$0xf] %vm2192_vm3, %v1973_v34  ;;  %v1624_v38 = vadd.f32 %v3276_v40, %v1623_v36 }
  0xc3   :  { %v1862_v39 = vmax.f32 %v1479_v35, 0.0  ;;  %v1336_v41 = vadd.f32 %v3276_v40, %v1335_v37  ;;  %v1195_v42 = vpop.f32.mrf.mxu0 }
  0xc4   :  { %v1196_v43 = vadd.f32 %v3276_v40, %v1195_v42  ;;  %v1920_v44 = vmax.f32 %v1624_v38, 0.0 }
  0xc5   :  { %v2087_v45 = vpack.c.bf16 %v1862_v39, %v1862_v39  ;;  %v1805_v46 = vmax.f32 %v1336_v41, 0.0 }
  0xc6   :  { %v1749_v47 = vmax.f32 %v1196_v43, 0.0  ;;  %v2145_v48 = vpack.c.bf16 %v1920_v44, %v1920_v44 }
  0xc7   :  { %2313 = vst.msk [vmem:[%s4740_s3 + $0x1e0] sm:$0xf] %vm2192_vm3, %v2087_v45  ;;  %v2030_v49 = vpack.c.bf16 %v1805_v46, %v1805_v46 }
  0xc8   :  { %v1480_v50 = vpop.f32.mrf.mxu2  ;;  %v1974_v51 = vpack.c.bf16 %v1749_v47, %v1749_v47  ;;  %2371 = vst.msk [vmem:[%s4740_s3 + $0x2c8] sm:$0xf] %vm2192_vm3, %v2145_v48 }
  0xc9   :  { %2256 = vst.msk [vmem:[%s4740_s3 + $0xfc] sm:$0xf] %vm2192_vm3, %v2030_v49  ;;  %v1481_v52 = vadd.f32 %v3276_v40, %v1480_v50  ;;  %v1625_v55 = vpop.f32.mrf.mxu3 }
  0xca   :  { %v1338_v56 = vpop.f32.mrf.mxu1  ;;  %2200 = vst.msk [vmem:[%s4740_s3 + $0x1c] sm:$0xf] %vm2192_vm3, %v1974_v51  ;;  %v1626_v58 = vadd.f32 %v3276_v40, %v1625_v55 }
  0xcb   :  { %v1863_v60 = vmax.f32 %v1481_v52, 0.0  ;;  %v1339_v61 = vadd.f32 %v3276_v40, %v1338_v56  ;;  %v1198_v62 = vpop.f32.mrf.mxu0 }
  0xcc   :  { %v1199_v63 = vadd.f32 %v3276_v40, %v1198_v62  ;;  %v1921_v0 = vmax.f32 %v1626_v58, 0.0  ;;  %v3033_v62 = vld [vmem:[%s4739_s0 + $0x150] sm:$0xff] }
  0xcd   :  { %v2088_v1 = vpack.c.bf16 %v1863_v60, %v1863_v60  ;;  %v1806_v2 = vmax.f32 %v1339_v61, 0.0  ;;  %2918 = vmatmul.msk.bf16.gmra.mxu1 %vm822_vm2, %v3031_v53  ;;  %2947 = vmatmul.msk.bf16.gmra.mxu2 %vm822_vm2, %v3060_v54 }
  0xce   :  { %v1750_v3 = vmax.f32 %v1199_v63, 0.0  ;;  %2890 = vmatmul.msk.bf16.gmra.mxu0 %vm822_vm2, %v3003_v57  ;;  %v2146_v4 = vpack.c.bf16 %v1921_v0, %v1921_v0  ;;  %2976 = vmatmul.msk.bf16.gmra.mxu3 %vm822_vm2, %v3089_v59  ;;  %v3062_v63 = vld [vmem:[%s4739_s0 + $0x238] sm:$0xff] }
  0xcf   :  { %2314 = vst.msk [vmem:[%s4740_s3 + $0x1e4] sm:$0xf] %vm2192_vm3, %v2088_v1  ;;  %v2031_v5 = vpack.c.bf16 %v1806_v2, %v1806_v2  ;;  %v3005_v2 = vld [vmem:[%s4739_s0 + $0x70] sm:$0xff] }
  0xd0   :  { %v1483_v6 = vpop.f32.mrf.mxu2  ;;  %v1975_v7 = vpack.c.bf16 %v1750_v3, %v1750_v3  ;;  %2372 = vst.msk [vmem:[%s4740_s3 + $0x2cc] sm:$0xf] %vm2192_vm3, %v2146_v4  ;;  %v3091_v4 = vld [vmem:[%s4739_s0 + $0x320] sm:$0xff] }
  0xd1   :  { %2257 = vst.msk [vmem:[%s4740_s3 + $0x100] sm:$0xf] %vm2192_vm3, %v2031_v5  ;;  %v1484_v8 = vadd.f32 %v3276_v40, %v1483_v6  ;;  %v1628_v9 = vpop.f32.mrf.mxu3 }
  0xd2   :  { %v1340_v10 = vpop.f32.mrf.mxu1  ;;  %2201 = vst.msk [vmem:[%s4740_s3 + $0x20] sm:$0xf] %vm2192_vm3, %v1975_v7  ;;  %v1629_v11 = vadd.f32 %v3276_v40, %v1628_v9 }
  0xd3   :  { %v1864_v12 = vmax.f32 %v1484_v8, 0.0  ;;  %v1341_v13 = vadd.f32 %v3276_v40, %v1340_v10  ;;  %v1200_v14 = vpop.f32.mrf.mxu0 }
  0xd4   :  { %v1201_v15 = vadd.f32 %v3276_v40, %v1200_v14  ;;  %v1922_v16 = vmax.f32 %v1629_v11, 0.0 }
  0xd5   :  { %v2089_v17 = vpack.c.bf16 %v1864_v12, %v1864_v12  ;;  %v1807_v18 = vmax.f32 %v1341_v13, 0.0 }
  0xd6   :  { %v1751_v19 = vmax.f32 %v1201_v15, 0.0  ;;  %v2147_v20 = vpack.c.bf16 %v1922_v16, %v1922_v16 }
  0xd7   :  { %2315 = vst.msk [vmem:[%s4740_s3 + $0x1e8] sm:$0xf] %vm2192_vm3, %v2089_v17  ;;  %v2032_v21 = vpack.c.bf16 %v1807_v18, %v1807_v18 }
  0xd8   :  { %v1485_v22 = vpop.f32.mrf.mxu2  ;;  %v1976_v23 = vpack.c.bf16 %v1751_v19, %v1751_v19  ;;  %2373 = vst.msk [vmem:[%s4740_s3 + $0x2d0] sm:$0xf] %vm2192_vm3, %v2147_v20 }
  0xd9   :  { %2258 = vst.msk [vmem:[%s4740_s3 + $0x104] sm:$0xf] %vm2192_vm3, %v2032_v21  ;;  %v1486_v24 = vadd.f32 %v3276_v40, %v1485_v22  ;;  %v1630_v27 = vpop.f32.mrf.mxu3 }
  0xda   :  { %v1343_v28 = vpop.f32.mrf.mxu1  ;;  %2202 = vst.msk [vmem:[%s4740_s3 + $0x24] sm:$0xf] %vm2192_vm3, %v1976_v23  ;;  %v1631_v30 = vadd.f32 %v3276_v40, %v1630_v27 }
  0xdb   :  { %v1865_v32 = vmax.f32 %v1486_v24, 0.0  ;;  %v1344_v33 = vadd.f32 %v3276_v40, %v1343_v28  ;;  %v1203_v34 = vpop.f32.mrf.mxu0 }
  0xdc   :  { %v1204_v35 = vadd.f32 %v3276_v40, %v1203_v34  ;;  %v1923_v36 = vmax.f32 %v1631_v30, 0.0  ;;  %v3034_v34 = vld [vmem:[%s4739_s0 + $0x158] sm:$0xff] }
  0xdd   :  { %v2090_v37 = vpack.c.bf16 %v1865_v32, %v1865_v32  ;;  %v1808_v38 = vmax.f32 %v1344_v33, 0.0  ;;  %2919 = vmatmul.msk.bf16.gmra.mxu1 %vm822_vm2, %v3032_v25  ;;  %2948 = vmatmul.msk.bf16.gmra.mxu2 %vm822_vm2, %v3061_v26 }
  0xde   :  { %v1752_v39 = vmax.f32 %v1204_v35, 0.0  ;;  %2891 = vmatmul.msk.bf16.gmra.mxu0 %vm822_vm2, %v3004_v29  ;;  %v2148_v41 = vpack.c.bf16 %v1923_v36, %v1923_v36  ;;  %2977 = vmatmul.msk.bf16.gmra.mxu3 %vm822_vm2, %v3090_v31  ;;  %v3063_v35 = vld [vmem:[%s4739_s0 + $0x240] sm:$0xff] }
  0xdf   :  { %2316 = vst.msk [vmem:[%s4740_s3 + $0x1ec] sm:$0xf] %vm2192_vm3, %v2090_v37  ;;  %v2033_v42 = vpack.c.bf16 %v1808_v38, %v1808_v38  ;;  %v3006_v38 = vld [vmem:[%s4739_s0 + $0x78] sm:$0xff] }
  0xe0   :  { %v1488_v43 = vpop.f32.mrf.mxu2  ;;  %v1977_v44 = vpack.c.bf16 %v1752_v39, %v1752_v39  ;;  %2374 = vst.msk [vmem:[%s4740_s3 + $0x2d4] sm:$0xf] %vm2192_vm3, %v2148_v41  ;;  %v3092_v41 = vld [vmem:[%s4739_s0 + $0x328] sm:$0xff] }
  0xe1   :  { %2259 = vst.msk [vmem:[%s4740_s3 + $0x108] sm:$0xf] %vm2192_vm3, %v2033_v42  ;;  %v1489_v45 = vadd.f32 %v3276_v40, %v1488_v43  ;;  %v1633_v46 = vpop.f32.mrf.mxu3 }
  0xe2   :  { %v1345_v47 = vpop.f32.mrf.mxu1  ;;  %2203 = vst.msk [vmem:[%s4740_s3 + $0x28] sm:$0xf] %vm2192_vm3, %v1977_v44  ;;  %v1634_v48 = vadd.f32 %v3276_v40, %v1633_v46 }
  0xe3   :  { %v1866_v49 = vmax.f32 %v1489_v45, 0.0  ;;  %v1346_v50 = vadd.f32 %v3276_v40, %v1345_v47  ;;  %v1205_v51 = vpop.f32.mrf.mxu0 }
  0xe4   :  { %v1206_v52 = vadd.f32 %v3276_v40, %v1205_v51  ;;  %v1924_v53 = vmax.f32 %v1634_v48, 0.0 }
  0xe5   :  { %v2091_v54 = vpack.c.bf16 %v1866_v49, %v1866_v49  ;;  %v1809_v55 = vmax.f32 %v1346_v50, 0.0 }
  0xe6   :  { %v1753_v56 = vmax.f32 %v1206_v52, 0.0  ;;  %v2149_v57 = vpack.c.bf16 %v1924_v53, %v1924_v53 }
  0xe7   :  { %2317 = vst.msk [vmem:[%s4740_s3 + $0x1f0] sm:$0xf] %vm2192_vm3, %v2091_v54  ;;  %v2034_v58 = vpack.c.bf16 %v1809_v55, %v1809_v55 }
  0xe8   :  { %v1490_v59 = vpop.f32.mrf.mxu2  ;;  %v1978_v60 = vpack.c.bf16 %v1753_v56, %v1753_v56  ;;  %2375 = vst.msk [vmem:[%s4740_s3 + $0x2d8] sm:$0xf] %vm2192_vm3, %v2149_v57 }
  0xe9   :  { %2260 = vst.msk [vmem:[%s4740_s3 + $0x10c] sm:$0xf] %vm2192_vm3, %v2034_v58  ;;  %v1491_v61 = vadd.f32 %v3276_v40, %v1490_v59  ;;  %v1635_v0 = vpop.f32.mrf.mxu3 }
  0xea   :  { %v1348_v1 = vpop.f32.mrf.mxu1  ;;  %2204 = vst.msk [vmem:[%s4740_s3 + $0x2c] sm:$0xf] %vm2192_vm3, %v1978_v60  ;;  %v1636_v3 = vadd.f32 %v3276_v40, %v1635_v0 }
  0xeb   :  { %v1867_v5 = vmax.f32 %v1491_v61, 0.0  ;;  %v1349_v6 = vadd.f32 %v3276_v40, %v1348_v1  ;;  %v1208_v7 = vpop.f32.mrf.mxu0 }
  0xec   :  { %v1209_v8 = vadd.f32 %v3276_v40, %v1208_v7  ;;  %v1925_v9 = vmax.f32 %v1636_v3, 0.0  ;;  %v3035_v7 = vld [vmem:[%s4739_s0 + $0x160] sm:$0xff] }
  0xed   :  { %v2092_v10 = vpack.c.bf16 %v1867_v5, %v1867_v5  ;;  %v1810_v11 = vmax.f32 %v1349_v6, 0.0  ;;  %2920 = vmatmul.msk.bf16.gmra.mxu1 %vm822_vm2, %v3033_v62  ;;  %2949 = vmatmul.msk.bf16.gmra.mxu2 %vm822_vm2, %v3062_v63 }
  0xee   :  { %v1754_v12 = vmax.f32 %v1209_v8, 0.0  ;;  %2892 = vmatmul.msk.bf16.gmra.mxu0 %vm822_vm2, %v3005_v2  ;;  %v2150_v13 = vpack.c.bf16 %v1925_v9, %v1925_v9  ;;  %2978 = vmatmul.msk.bf16.gmra.mxu3 %vm822_vm2, %v3091_v4  ;;  %v3064_v8 = vld [vmem:[%s4739_s0 + $0x248] sm:$0xff] }
  0xef   :  { %2318 = vst.msk [vmem:[%s4740_s3 + $0x1f4] sm:$0xf] %vm2192_vm3, %v2092_v10  ;;  %v2035_v14 = vpack.c.bf16 %v1810_v11, %v1810_v11  ;;  %v3007_v11 = vld [vmem:[%s4739_s0 + $0x80] sm:$0xff] }
  0xf0   :  { %v1493_v15 = vpop.f32.mrf.mxu2  ;;  %v1979_v16 = vpack.c.bf16 %v1754_v12, %v1754_v12  ;;  %2376 = vst.msk [vmem:[%s4740_s3 + $0x2dc] sm:$0xf] %vm2192_vm3, %v2150_v13  ;;  %v3093_v13 = vld [vmem:[%s4739_s0 + $0x330] sm:$0xff] }
  0xf1   :  { %2261 = vst.msk [vmem:[%s4740_s3 + $0x110] sm:$0xf] %vm2192_vm3, %v2035_v14  ;;  %v1494_v17 = vadd.f32 %v3276_v40, %v1493_v15  ;;  %v1638_v18 = vpop.f32.mrf.mxu3 }
  0xf2   :  { %v1350_v19 = vpop.f32.mrf.mxu1  ;;  %2205 = vst.msk [vmem:[%s4740_s3 + $0x30] sm:$0xf] %vm2192_vm3, %v1979_v16  ;;  %v1639_v20 = vadd.f32 %v3276_v40, %v1638_v18 }
  0xf3   :  { %v1868_v21 = vmax.f32 %v1494_v17, 0.0  ;;  %v1351_v22 = vadd.f32 %v3276_v40, %v1350_v19  ;;  %v1210_v23 = vpop.f32.mrf.mxu0 }
  0xf4   :  { %v1211_v24 = vadd.f32 %v3276_v40, %v1210_v23  ;;  %v1926_v25 = vmax.f32 %v1639_v20, 0.0 }
  0xf5   :  { %v2093_v26 = vpack.c.bf16 %v1868_v21, %v1868_v21  ;;  %v1811_v27 = vmax.f32 %v1351_v22, 0.0 }
  0xf6   :  { %v1755_v28 = vmax.f32 %v1211_v24, 0.0  ;;  %v2151_v29 = vpack.c.bf16 %v1926_v25, %v1926_v25 }
  0xf7   :  { %2319 = vst.msk [vmem:[%s4740_s3 + $0x1f8] sm:$0xf] %vm2192_vm3, %v2093_v26  ;;  %v2036_v30 = vpack.c.bf16 %v1811_v27, %v1811_v27 }
  0xf8   :  { %v1495_v31 = vpop.f32.mrf.mxu2  ;;  %v1980_v32 = vpack.c.bf16 %v1755_v28, %v1755_v28  ;;  %2377 = vst.msk [vmem:[%s4740_s3 + $0x2e0] sm:$0xf] %vm2192_vm3, %v2151_v29 }
  0xf9   :  { %2262 = vst.msk [vmem:[%s4740_s3 + $0x114] sm:$0xf] %vm2192_vm3, %v2036_v30  ;;  %v1496_v33 = vadd.f32 %v3276_v40, %v1495_v31  ;;  %v1640_v36 = vpop.f32.mrf.mxu3 }
  0xfa   :  { %v1353_v37 = vpop.f32.mrf.mxu1  ;;  %2206 = vst.msk [vmem:[%s4740_s3 + $0x34] sm:$0xf] %vm2192_vm3, %v1980_v32  ;;  %v1641_v39 = vadd.f32 %v3276_v40, %v1640_v36 }
  0xfb   :  { %v1869_v42 = vmax.f32 %v1496_v33, 0.0  ;;  %v1354_v43 = vadd.f32 %v3276_v40, %v1353_v37  ;;  %v1213_v44 = vpop.f32.mrf.mxu0 }
  0xfc   :  { %v1214_v45 = vadd.f32 %v3276_v40, %v1213_v44  ;;  %v1927_v46 = vmax.f32 %v1641_v39, 0.0  ;;  %v3036_v44 = vld [vmem:[%s4739_s0 + $0x168] sm:$0xff] }
  0xfd   :  { %v2094_v47 = vpack.c.bf16 %v1869_v42, %v1869_v42  ;;  %v1812_v48 = vmax.f32 %v1354_v43, 0.0  ;;  %2921 = vmatmul.msk.bf16.gmra.mxu1 %vm822_vm2, %v3034_v34  ;;  %2950 = vmatmul.msk.bf16.gmra.mxu2 %vm822_vm2, %v3063_v35 }
  0xfe   :  { %v1756_v49 = vmax.f32 %v1214_v45, 0.0  ;;  %2893 = vmatmul.msk.bf16.gmra.mxu0 %vm822_vm2, %v3006_v38  ;;  %v2152_v50 = vpack.c.bf16 %v1927_v46, %v1927_v46  ;;  %2979 = vmatmul.msk.bf16.gmra.mxu3 %vm822_vm2, %v3092_v41  ;;  %v3065_v45 = vld [vmem:[%s4739_s0 + $0x250] sm:$0xff] }
  0xff   :  { %2320 = vst.msk [vmem:[%s4740_s3 + $0x1fc] sm:$0xf] %vm2192_vm3, %v2094_v47  ;;  %v2037_v51 = vpack.c.bf16 %v1812_v48, %v1812_v48  ;;  %v3008_v48 = vld [vmem:[%s4739_s0 + $0x88] sm:$0xff] }
 0x100   :  { %v1498_v52 = vpop.f32.mrf.mxu2  ;;  %v1981_v53 = vpack.c.bf16 %v1756_v49, %v1756_v49  ;;  %2378 = vst.msk [vmem:[%s4740_s3 + $0x2e4] sm:$0xf] %vm2192_vm3, %v2152_v50  ;;  %v3094_v50 = vld [vmem:[%s4739_s0 + $0x338] sm:$0xff] }
 0x101   :  { %2263 = vst.msk [vmem:[%s4740_s3 + $0x118] sm:$0xf] %vm2192_vm3, %v2037_v51  ;;  %v1499_v54 = vadd.f32 %v3276_v40, %v1498_v52  ;;  %v1643_v55 = vpop.f32.mrf.mxu3 }
 0x102   :  { %v1355_v56 = vpop.f32.mrf.mxu1  ;;  %2207 = vst.msk [vmem:[%s4740_s3 + $0x38] sm:$0xf] %vm2192_vm3, %v1981_v53  ;;  %v1644_v57 = vadd.f32 %v3276_v40, %v1643_v55 }
 0x103   :  { %v1870_v58 = vmax.f32 %v1499_v54, 0.0  ;;  %v1356_v59 = vadd.f32 %v3276_v40, %v1355_v56  ;;  %v1215_v60 = vpop.f32.mrf.mxu0 }
 0x104   :  { %v1216_v61 = vadd.f32 %v3276_v40, %v1215_v60  ;;  %v1928_v62 = vmax.f32 %v1644_v57, 0.0 }
 0x105   :  { %v2095_v63 = vpack.c.bf16 %v1870_v58, %v1870_v58  ;;  %v1813_v0 = vmax.f32 %v1356_v59, 0.0 }
 0x106   :  { %v1757_v1 = vmax.f32 %v1216_v61, 0.0  ;;  %v2153_v2 = vpack.c.bf16 %v1928_v62, %v1928_v62 }
 0x107   :  { %2321 = vst.msk [vmem:[%s4740_s3 + $0x200] sm:$0xf] %vm2192_vm3, %v2095_v63  ;;  %v2038_v3 = vpack.c.bf16 %v1813_v0, %v1813_v0 }
 0x108   :  { %v1500_v4 = vpop.f32.mrf.mxu2  ;;  %v1982_v5 = vpack.c.bf16 %v1757_v1, %v1757_v1  ;;  %2379 = vst.msk [vmem:[%s4740_s3 + $0x2e8] sm:$0xf] %vm2192_vm3, %v2153_v2 }
 0x109   :  { %2264 = vst.msk [vmem:[%s4740_s3 + $0x11c] sm:$0xf] %vm2192_vm3, %v2038_v3  ;;  %v1501_v6 = vadd.f32 %v3276_v40, %v1500_v4  ;;  %v1645_v9 = vpop.f32.mrf.mxu3 }
 0x10a   :  { %v1358_v10 = vpop.f32.mrf.mxu1  ;;  %2208 = vst.msk [vmem:[%s4740_s3 + $0x3c] sm:$0xf] %vm2192_vm3, %v1982_v5  ;;  %v1646_v12 = vadd.f32 %v3276_v40, %v1645_v9 }
 0x10b   :  { %v1871_v14 = vmax.f32 %v1501_v6, 0.0  ;;  %v1359_v15 = vadd.f32 %v3276_v40, %v1358_v10  ;;  %v1218_v16 = vpop.f32.mrf.mxu0 }
 0x10c   :  { %v1219_v17 = vadd.f32 %v3276_v40, %v1218_v16  ;;  %v1929_v18 = vmax.f32 %v1646_v12, 0.0  ;;  %v3037_v16 = vld [vmem:[%s4739_s0 + $0x170] sm:$0xff] }
 0x10d   :  { %v2096_v19 = vpack.c.bf16 %v1871_v14, %v1871_v14  ;;  %v1814_v20 = vmax.f32 %v1359_v15, 0.0  ;;  %2922 = vmatmul.msk.bf16.gmra.mxu1 %vm822_vm2, %v3035_v7  ;;  %2951 = vmatmul.msk.bf16.gmra.mxu2 %vm822_vm2, %v3064_v8 }
 0x10e   :  { %v1758_v21 = vmax.f32 %v1219_v17, 0.0  ;;  %2894 = vmatmul.msk.bf16.gmra.mxu0 %vm822_vm2, %v3007_v11  ;;  %v2154_v22 = vpack.c.bf16 %v1929_v18, %v1929_v18  ;;  %2980 = vmatmul.msk.bf16.gmra.mxu3 %vm822_vm2, %v3093_v13  ;;  %v3066_v17 = vld [vmem:[%s4739_s0 + $0x258] sm:$0xff] }
 0x10f   :  { %2322 = vst.msk [vmem:[%s4740_s3 + $0x204] sm:$0xf] %vm2192_vm3, %v2096_v19  ;;  %v2039_v23 = vpack.c.bf16 %v1814_v20, %v1814_v20  ;;  %v3009_v20 = vld [vmem:[%s4739_s0 + $0x90] sm:$0xff] }
 0x110   :  { %v1503_v24 = vpop.f32.mrf.mxu2  ;;  %v1983_v25 = vpack.c.bf16 %v1758_v21, %v1758_v21  ;;  %2380 = vst.msk [vmem:[%s4740_s3 + $0x2ec] sm:$0xf] %vm2192_vm3, %v2154_v22  ;;  %v3095_v22 = vld [vmem:[%s4739_s0 + $0x340] sm:$0xff] }
 0x111   :  { %2265 = vst.msk [vmem:[%s4740_s3 + $0x120] sm:$0xf] %vm2192_vm3, %v2039_v23  ;;  %v1504_v26 = vadd.f32 %v3276_v40, %v1503_v24  ;;  %v1648_v27 = vpop.f32.mrf.mxu3 }
 0x112   :  { %v1360_v28 = vpop.f32.mrf.mxu1  ;;  %2209 = vst.msk [vmem:[%s4740_s3 + $0x40] sm:$0xf] %vm2192_vm3, %v1983_v25  ;;  %v1649_v29 = vadd.f32 %v3276_v40, %v1648_v27 }
 0x113   :  { %v1872_v30 = vmax.f32 %v1504_v26, 0.0  ;;  %v1361_v31 = vadd.f32 %v3276_v40, %v1360_v28  ;;  %v1220_v32 = vpop.f32.mrf.mxu0 }
 0x114   :  { %v1221_v33 = vadd.f32 %v3276_v40, %v1220_v32  ;;  %v1930_v34 = vmax.f32 %v1649_v29, 0.0 }
 0x115   :  { %v2097_v35 = vpack.c.bf16 %v1872_v30, %v1872_v30  ;;  %v1815_v36 = vmax.f32 %v1361_v31, 0.0 }
 0x116   :  { %v1759_v37 = vmax.f32 %v1221_v33, 0.0  ;;  %v2155_v38 = vpack.c.bf16 %v1930_v34, %v1930_v34 }
 0x117   :  { %2323 = vst.msk [vmem:[%s4740_s3 + $0x208] sm:$0xf] %vm2192_vm3, %v2097_v35  ;;  %v2040_v39 = vpack.c.bf16 %v1815_v36, %v1815_v36 }
 0x118   :  { %v1505_v41 = vpop.f32.mrf.mxu2  ;;  %v1984_v42 = vpack.c.bf16 %v1759_v37, %v1759_v37  ;;  %2381 = vst.msk [vmem:[%s4740_s3 + $0x2f0] sm:$0xf] %vm2192_vm3, %v2155_v38 }
 0x119   :  { %2266 = vst.msk [vmem:[%s4740_s3 + $0x124] sm:$0xf] %vm2192_vm3, %v2040_v39  ;;  %v1506_v43 = vadd.f32 %v3276_v40, %v1505_v41  ;;  %v1650_v46 = vpop.f32.mrf.mxu3 }
 0x11a   :  { %v1363_v47 = vpop.f32.mrf.mxu1  ;;  %2210 = vst.msk [vmem:[%s4740_s3 + $0x44] sm:$0xf] %vm2192_vm3, %v1984_v42  ;;  %v1651_v49 = vadd.f32 %v3276_v40, %v1650_v46 }
 0x11b   :  { %v1873_v51 = vmax.f32 %v1506_v43, 0.0  ;;  %v1364_v52 = vadd.f32 %v3276_v40, %v1363_v47  ;;  %v1223_v53 = vpop.f32.mrf.mxu0 }
 0x11c   :  { %v1224_v54 = vadd.f32 %v3276_v40, %v1223_v53  ;;  %v1931_v55 = vmax.f32 %v1651_v49, 0.0  ;;  %v3038_v53 = vld [vmem:[%s4739_s0 + $0x178] sm:$0xff] }
 0x11d   :  { %v2098_v56 = vpack.c.bf16 %v1873_v51, %v1873_v51  ;;  %v1816_v57 = vmax.f32 %v1364_v52, 0.0  ;;  %2923 = vmatmul.msk.bf16.gmra.mxu1 %vm822_vm2, %v3036_v44  ;;  %2952 = vmatmul.msk.bf16.gmra.mxu2 %vm822_vm2, %v3065_v45 }
 0x11e   :  { %v1760_v58 = vmax.f32 %v1224_v54, 0.0  ;;  %2895 = vmatmul.msk.bf16.gmra.mxu0 %vm822_vm2, %v3008_v48  ;;  %v2156_v59 = vpack.c.bf16 %v1931_v55, %v1931_v55  ;;  %2981 = vmatmul.msk.bf16.gmra.mxu3 %vm822_vm2, %v3094_v50  ;;  %v3067_v54 = vld [vmem:[%s4739_s0 + $0x260] sm:$0xff] }
 0x11f   :  { %2324 = vst.msk [vmem:[%s4740_s3 + $0x20c] sm:$0xf] %vm2192_vm3, %v2098_v56  ;;  %v2041_v60 = vpack.c.bf16 %v1816_v57, %v1816_v57  ;;  %v3010_v57 = vld [vmem:[%s4739_s0 + $0x98] sm:$0xff] }
 0x120   :  { %v1508_v61 = vpop.f32.mrf.mxu2  ;;  %v1985_v62 = vpack.c.bf16 %v1760_v58, %v1760_v58  ;;  %2382 = vst.msk [vmem:[%s4740_s3 + $0x2f4] sm:$0xf] %vm2192_vm3, %v2156_v59  ;;  %v3096_v59 = vld [vmem:[%s4739_s0 + $0x348] sm:$0xff] }
 0x121   :  { %2267 = vst.msk [vmem:[%s4740_s3 + $0x128] sm:$0xf] %vm2192_vm3, %v2041_v60  ;;  %v1509_v63 = vadd.f32 %v3276_v40, %v1508_v61  ;;  %v1653_v0 = vpop.f32.mrf.mxu3 }
 0x122   :  { %v1365_v1 = vpop.f32.mrf.mxu1  ;;  %2211 = vst.msk [vmem:[%s4740_s3 + $0x48] sm:$0xf] %vm2192_vm3, %v1985_v62  ;;  %v1654_v2 = vadd.f32 %v3276_v40, %v1653_v0 }
 0x123   :  { %v1874_v3 = vmax.f32 %v1509_v63, 0.0  ;;  %v1366_v4 = vadd.f32 %v3276_v40, %v1365_v1  ;;  %v1225_v5 = vpop.f32.mrf.mxu0 }
 0x124   :  { %v1226_v6 = vadd.f32 %v3276_v40, %v1225_v5  ;;  %v1932_v7 = vmax.f32 %v1654_v2, 0.0 }
 0x125   :  { %v2099_v8 = vpack.c.bf16 %v1874_v3, %v1874_v3  ;;  %v1817_v9 = vmax.f32 %v1366_v4, 0.0 }
 0x126   :  { %v1761_v10 = vmax.f32 %v1226_v6, 0.0  ;;  %v2157_v11 = vpack.c.bf16 %v1932_v7, %v1932_v7 }
 0x127   :  { %2325 = vst.msk [vmem:[%s4740_s3 + $0x210] sm:$0xf] %vm2192_vm3, %v2099_v8  ;;  %v2042_v12 = vpack.c.bf16 %v1817_v9, %v1817_v9 }
 0x128   :  { %v1510_v13 = vpop.f32.mrf.mxu2  ;;  %v1986_v14 = vpack.c.bf16 %v1761_v10, %v1761_v10  ;;  %2383 = vst.msk [vmem:[%s4740_s3 + $0x2f8] sm:$0xf] %vm2192_vm3, %v2157_v11 }
 0x129   :  { %2268 = vst.msk [vmem:[%s4740_s3 + $0x12c] sm:$0xf] %vm2192_vm3, %v2042_v12  ;;  %v1511_v15 = vadd.f32 %v3276_v40, %v1510_v13  ;;  %v1655_v18 = vpop.f32.mrf.mxu3 }
 0x12a   :  { %v1368_v19 = vpop.f32.mrf.mxu1  ;;  %2212 = vst.msk [vmem:[%s4740_s3 + $0x4c] sm:$0xf] %vm2192_vm3, %v1986_v14  ;;  %v1656_v21 = vadd.f32 %v3276_v40, %v1655_v18 }
 0x12b   :  { %v1875_v23 = vmax.f32 %v1511_v15, 0.0  ;;  %v1369_v24 = vadd.f32 %v3276_v40, %v1368_v19  ;;  %v1228_v25 = vpop.f32.mrf.mxu0 }
 0x12c   :  { %v1229_v26 = vadd.f32 %v3276_v40, %v1228_v25  ;;  %v1933_v27 = vmax.f32 %v1656_v21, 0.0  ;;  %v3039_v25 = vld [vmem:[%s4739_s0 + $0x180] sm:$0xff] }
 0x12d   :  { %v2100_v28 = vpack.c.bf16 %v1875_v23, %v1875_v23  ;;  %v1818_v29 = vmax.f32 %v1369_v24, 0.0  ;;  %2924 = vmatmul.msk.bf16.gmra.mxu1 %vm822_vm2, %v3037_v16  ;;  %2953 = vmatmul.msk.bf16.gmra.mxu2 %vm822_vm2, %v3066_v17 }
 0x12e   :  { %v1762_v30 = vmax.f32 %v1229_v26, 0.0  ;;  %2896 = vmatmul.msk.bf16.gmra.mxu0 %vm822_vm2, %v3009_v20  ;;  %v2158_v31 = vpack.c.bf16 %v1933_v27, %v1933_v27  ;;  %2982 = vmatmul.msk.bf16.gmra.mxu3 %vm822_vm2, %v3095_v22  ;;  %v3068_v26 = vld [vmem:[%s4739_s0 + $0x268] sm:$0xff] }
 0x12f   :  { %2326 = vst.msk [vmem:[%s4740_s3 + $0x214] sm:$0xf] %vm2192_vm3, %v2100_v28  ;;  %v2043_v32 = vpack.c.bf16 %v1818_v29, %v1818_v29  ;;  %v3011_v29 = vld [vmem:[%s4739_s0 + $0xa0] sm:$0xff] }
 0x130   :  { %v1513_v33 = vpop.f32.mrf.mxu2  ;;  %v1987_v34 = vpack.c.bf16 %v1762_v30, %v1762_v30  ;;  %2384 = vst.msk [vmem:[%s4740_s3 + $0x2fc] sm:$0xf] %vm2192_vm3, %v2158_v31  ;;  %v3097_v31 = vld [vmem:[%s4739_s0 + $0x350] sm:$0xff] }
 0x131   :  { %2269 = vst.msk [vmem:[%s4740_s3 + $0x130] sm:$0xf] %vm2192_vm3, %v2043_v32  ;;  %v1514_v35 = vadd.f32 %v3276_v40, %v1513_v33  ;;  %v1658_v36 = vpop.f32.mrf.mxu3 }
 0x132   :  { %v1370_v37 = vpop.f32.mrf.mxu1  ;;  %2213 = vst.msk [vmem:[%s4740_s3 + $0x50] sm:$0xf] %vm2192_vm3, %v1987_v34  ;;  %v1659_v38 = vadd.f32 %v3276_v40, %v1658_v36 }
 0x133   :  { %v1876_v39 = vmax.f32 %v1514_v35, 0.0  ;;  %v1371_v41 = vadd.f32 %v3276_v40, %v1370_v37  ;;  %v1230_v42 = vpop.f32.mrf.mxu0 }
 0x134   :  { %v1231_v43 = vadd.f32 %v3276_v40, %v1230_v42  ;;  %v1934_v44 = vmax.f32 %v1659_v38, 0.0  ;;  %v3883_v40 = vld [vmem:[%s4738_s2] ss:$0 sm:$0xff] }
 0x135   :  { %v2101_v45 = vpack.c.bf16 %v1876_v39, %v1876_v39  ;;  %v1819_v46 = vmax.f32 %v1371_v41, 0.0 }
 0x136   :  { %v1763_v47 = vmax.f32 %v1231_v43, 0.0  ;;  %v2159_v48 = vpack.c.bf16 %v1934_v44, %v1934_v44 }
 0x137   :  { %2327 = vst.msk [vmem:[%s4740_s3 + $0x218] sm:$0xf] %vm2192_vm3, %v2101_v45  ;;  %v2044_v49 = vpack.c.bf16 %v1819_v46, %v1819_v46 }
 0x138   :  { %v1515_v50 = vpop.f32.mrf.mxu2  ;;  %v1988_v51 = vpack.c.bf16 %v1763_v47, %v1763_v47  ;;  %2385 = vst.msk [vmem:[%s4740_s3 + $0x300] sm:$0xf] %vm2192_vm3, %v2159_v48 }
 0x139   :  { %2270 = vst.msk [vmem:[%s4740_s3 + $0x134] sm:$0xf] %vm2192_vm3, %v2044_v49  ;;  %v1516_v52 = vadd.f32 %v3883_v40, %v1515_v50  ;;  %v1660_v55 = vpop.f32.mrf.mxu3 }
 0x13a   :  { %v1373_v56 = vpop.f32.mrf.mxu1  ;;  %2214 = vst.msk [vmem:[%s4740_s3 + $0x54] sm:$0xf] %vm2192_vm3, %v1988_v51  ;;  %v1661_v58 = vadd.f32 %v3883_v40, %v1660_v55 }
 0x13b   :  { %v1877_v60 = vmax.f32 %v1516_v52, 0.0  ;;  %v1374_v61 = vadd.f32 %v3883_v40, %v1373_v56  ;;  %v1233_v62 = vpop.f32.mrf.mxu0 }
 0x13c   :  { %v1234_v63 = vadd.f32 %v3883_v40, %v1233_v62  ;;  %v1935_v0 = vmax.f32 %v1661_v58, 0.0  ;;  %v3040_v62 = vld [vmem:[%s4739_s0 + $0x188] sm:$0xff] }
 0x13d   :  { %v2102_v1 = vpack.c.bf16 %v1877_v60, %v1877_v60  ;;  %v1820_v2 = vmax.f32 %v1374_v61, 0.0  ;;  %2925 = vmatmul.msk.bf16.gmra.mxu1 %vm822_vm2, %v3038_v53  ;;  %2954 = vmatmul.msk.bf16.gmra.mxu2 %vm822_vm2, %v3067_v54 }
 0x13e   :  { %v1764_v3 = vmax.f32 %v1234_v63, 0.0  ;;  %2897 = vmatmul.msk.bf16.gmra.mxu0 %vm822_vm2, %v3010_v57  ;;  %v2160_v4 = vpack.c.bf16 %v1935_v0, %v1935_v0  ;;  %2983 = vmatmul.msk.bf16.gmra.mxu3 %vm822_vm2, %v3096_v59  ;;  %v3069_v63 = vld [vmem:[%s4739_s0 + $0x270] sm:$0xff] }
 0x13f   :  { %2328 = vst.msk [vmem:[%s4740_s3 + $0x21c] sm:$0xf] %vm2192_vm3, %v2102_v1  ;;  %v2045_v5 = vpack.c.bf16 %v1820_v2, %v1820_v2  ;;  %v3012_v2 = vld [vmem:[%s4739_s0 + $0xa8] sm:$0xff] }
 0x140   :  { %v1518_v6 = vpop.f32.mrf.mxu2  ;;  %v1989_v7 = vpack.c.bf16 %v1764_v3, %v1764_v3  ;;  %2386 = vst.msk [vmem:[%s4740_s3 + $0x304] sm:$0xf] %vm2192_vm3, %v2160_v4  ;;  %v3098_v4 = vld [vmem:[%s4739_s0 + $0x358] sm:$0xff] }
 0x141   :  { %2271 = vst.msk [vmem:[%s4740_s3 + $0x138] sm:$0xf] %vm2192_vm3, %v2045_v5  ;;  %v1519_v8 = vadd.f32 %v3883_v40, %v1518_v6  ;;  %v1663_v9 = vpop.f32.mrf.mxu3 }
 0x142   :  { %v1375_v10 = vpop.f32.mrf.mxu1  ;;  %2215 = vst.msk [vmem:[%s4740_s3 + $0x58] sm:$0xf] %vm2192_vm3, %v1989_v7  ;;  %v1664_v11 = vadd.f32 %v3883_v40, %v1663_v9 }
 0x143   :  { %v1878_v12 = vmax.f32 %v1519_v8, 0.0  ;;  %v1376_v13 = vadd.f32 %v3883_v40, %v1375_v10  ;;  %v1235_v14 = vpop.f32.mrf.mxu0 }
 0x144   :  { %v1236_v15 = vadd.f32 %v3883_v40, %v1235_v14  ;;  %v1936_v16 = vmax.f32 %v1664_v11, 0.0 }
 0x145   :  { %v2103_v17 = vpack.c.bf16 %v1878_v12, %v1878_v12  ;;  %v1821_v18 = vmax.f32 %v1376_v13, 0.0 }
 0x146   :  { %v1765_v19 = vmax.f32 %v1236_v15, 0.0  ;;  %v2161_v20 = vpack.c.bf16 %v1936_v16, %v1936_v16 }
 0x147   :  { %2329 = vst.msk [vmem:[%s4740_s3 + $0x220] sm:$0xf] %vm2192_vm3, %v2103_v17  ;;  %v2046_v21 = vpack.c.bf16 %v1821_v18, %v1821_v18 }
 0x148   :  { %v1520_v22 = vpop.f32.mrf.mxu2  ;;  %v1990_v23 = vpack.c.bf16 %v1765_v19, %v1765_v19  ;;  %2387 = vst.msk [vmem:[%s4740_s3 + $0x308] sm:$0xf] %vm2192_vm3, %v2161_v20 }
 0x149   :  { %2272 = vst.msk [vmem:[%s4740_s3 + $0x13c] sm:$0xf] %vm2192_vm3, %v2046_v21  ;;  %v1521_v24 = vadd.f32 %v3883_v40, %v1520_v22  ;;  %v1665_v27 = vpop.f32.mrf.mxu3 }
 0x14a   :  { %v1378_v28 = vpop.f32.mrf.mxu1  ;;  %2216 = vst.msk [vmem:[%s4740_s3 + $0x5c] sm:$0xf] %vm2192_vm3, %v1990_v23  ;;  %v1666_v30 = vadd.f32 %v3883_v40, %v1665_v27 }
 0x14b   :  { %v1879_v32 = vmax.f32 %v1521_v24, 0.0  ;;  %v1379_v33 = vadd.f32 %v3883_v40, %v1378_v28  ;;  %v1238_v34 = vpop.f32.mrf.mxu0 }
 0x14c   :  { %v1239_v35 = vadd.f32 %v3883_v40, %v1238_v34  ;;  %v1937_v36 = vmax.f32 %v1666_v30, 0.0  ;;  %v3041_v34 = vld [vmem:[%s4739_s0 + $0x190] sm:$0xff] }
 0x14d   :  { %v2104_v37 = vpack.c.bf16 %v1879_v32, %v1879_v32  ;;  %v1822_v38 = vmax.f32 %v1379_v33, 0.0  ;;  %2926 = vmatmul.msk.bf16.gmra.mxu1 %vm822_vm2, %v3039_v25  ;;  %2955 = vmatmul.msk.bf16.gmra.mxu2 %vm822_vm2, %v3068_v26 }
 0x14e   :  { %v1766_v39 = vmax.f32 %v1239_v35, 0.0  ;;  %2898 = vmatmul.msk.bf16.gmra.mxu0 %vm822_vm2, %v3011_v29  ;;  %v2162_v41 = vpack.c.bf16 %v1937_v36, %v1937_v36  ;;  %2984 = vmatmul.msk.bf16.gmra.mxu3 %vm822_vm2, %v3097_v31  ;;  %v3070_v35 = vld [vmem:[%s4739_s0 + $0x278] sm:$0xff] }
 0x14f   :  { %2330 = vst.msk [vmem:[%s4740_s3 + $0x224] sm:$0xf] %vm2192_vm3, %v2104_v37  ;;  %v2047_v42 = vpack.c.bf16 %v1822_v38, %v1822_v38  ;;  %v3013_v38 = vld [vmem:[%s4739_s0 + $0xb0] sm:$0xff] }
 0x150   :  { %v1523_v43 = vpop.f32.mrf.mxu2  ;;  %v1991_v44 = vpack.c.bf16 %v1766_v39, %v1766_v39  ;;  %2388 = vst.msk [vmem:[%s4740_s3 + $0x30c] sm:$0xf] %vm2192_vm3, %v2162_v41  ;;  %v3099_v41 = vld [vmem:[%s4739_s0 + $0x360] sm:$0xff] }
 0x151   :  { %2273 = vst.msk [vmem:[%s4740_s3 + $0x140] sm:$0xf] %vm2192_vm3, %v2047_v42  ;;  %v1524_v45 = vadd.f32 %v3883_v40, %v1523_v43  ;;  %v1668_v46 = vpop.f32.mrf.mxu3 }
 0x152   :  { %v1380_v47 = vpop.f32.mrf.mxu1  ;;  %2217 = vst.msk [vmem:[%s4740_s3 + $0x60] sm:$0xf] %vm2192_vm3, %v1991_v44  ;;  %v1669_v48 = vadd.f32 %v3883_v40, %v1668_v46 }
 0x153   :  { %v1880_v49 = vmax.f32 %v1524_v45, 0.0  ;;  %v1381_v50 = vadd.f32 %v3883_v40, %v1380_v47  ;;  %v1240_v51 = vpop.f32.mrf.mxu0 }
 0x154   :  { %v1241_v52 = vadd.f32 %v3883_v40, %v1240_v51  ;;  %v1938_v53 = vmax.f32 %v1669_v48, 0.0 }
 0x155   :  { %v2105_v54 = vpack.c.bf16 %v1880_v49, %v1880_v49  ;;  %v1823_v55 = vmax.f32 %v1381_v50, 0.0 }
 0x156   :  { %v1767_v56 = vmax.f32 %v1241_v52, 0.0  ;;  %v2163_v57 = vpack.c.bf16 %v1938_v53, %v1938_v53 }
 0x157   :  { %2331 = vst.msk [vmem:[%s4740_s3 + $0x228] sm:$0xf] %vm2192_vm3, %v2105_v54  ;;  %v2048_v58 = vpack.c.bf16 %v1823_v55, %v1823_v55 }
 0x158   :  { %v1525_v59 = vpop.f32.mrf.mxu2  ;;  %v1992_v60 = vpack.c.bf16 %v1767_v56, %v1767_v56  ;;  %2389 = vst.msk [vmem:[%s4740_s3 + $0x310] sm:$0xf] %vm2192_vm3, %v2163_v57 }
 0x159   :  { %2274 = vst.msk [vmem:[%s4740_s3 + $0x144] sm:$0xf] %vm2192_vm3, %v2048_v58  ;;  %v1526_v61 = vadd.f32 %v3883_v40, %v1525_v59  ;;  %v1670_v0 = vpop.f32.mrf.mxu3 }
 0x15a   :  { %v1383_v1 = vpop.f32.mrf.mxu1  ;;  %2218 = vst.msk [vmem:[%s4740_s3 + $0x64] sm:$0xf] %vm2192_vm3, %v1992_v60  ;;  %v1671_v3 = vadd.f32 %v3883_v40, %v1670_v0 }
 0x15b   :  { %v1881_v5 = vmax.f32 %v1526_v61, 0.0  ;;  %v1384_v6 = vadd.f32 %v3883_v40, %v1383_v1  ;;  %v1243_v7 = vpop.f32.mrf.mxu0 }
 0x15c   :  { %v1244_v8 = vadd.f32 %v3883_v40, %v1243_v7  ;;  %v1939_v9 = vmax.f32 %v1671_v3, 0.0  ;;  %v3042_v7 = vld [vmem:[%s4739_s0 + $0x198] sm:$0xff] }
 0x15d   :  { %v2106_v10 = vpack.c.bf16 %v1881_v5, %v1881_v5  ;;  %v1824_v11 = vmax.f32 %v1384_v6, 0.0  ;;  %2927 = vmatmul.msk.bf16.gmra.mxu1 %vm822_vm2, %v3040_v62  ;;  %2956 = vmatmul.msk.bf16.gmra.mxu2 %vm822_vm2, %v3069_v63 }
 0x15e   :  { %v1768_v12 = vmax.f32 %v1244_v8, 0.0  ;;  %2899 = vmatmul.msk.bf16.gmra.mxu0 %vm822_vm2, %v3012_v2  ;;  %v2164_v13 = vpack.c.bf16 %v1939_v9, %v1939_v9  ;;  %2985 = vmatmul.msk.bf16.gmra.mxu3 %vm822_vm2, %v3098_v4  ;;  %v3071_v8 = vld [vmem:[%s4739_s0 + $0x280] sm:$0xff] }
 0x15f   :  { %2332 = vst.msk [vmem:[%s4740_s3 + $0x22c] sm:$0xf] %vm2192_vm3, %v2106_v10  ;;  %v2049_v14 = vpack.c.bf16 %v1824_v11, %v1824_v11  ;;  %v3014_v11 = vld [vmem:[%s4739_s0 + $0xb8] sm:$0xff] }
 0x160   :  { %v1528_v15 = vpop.f32.mrf.mxu2  ;;  %v1993_v16 = vpack.c.bf16 %v1768_v12, %v1768_v12  ;;  %2390 = vst.msk [vmem:[%s4740_s3 + $0x314] sm:$0xf] %vm2192_vm3, %v2164_v13  ;;  %v3100_v13 = vld [vmem:[%s4739_s0 + $0x368] sm:$0xff] }
 0x161   :  { %2275 = vst.msk [vmem:[%s4740_s3 + $0x148] sm:$0xf] %vm2192_vm3, %v2049_v14  ;;  %v1529_v17 = vadd.f32 %v3883_v40, %v1528_v15  ;;  %v1673_v18 = vpop.f32.mrf.mxu3 }
 0x162   :  { %v1385_v19 = vpop.f32.mrf.mxu1  ;;  %2219 = vst.msk [vmem:[%s4740_s3 + $0x68] sm:$0xf] %vm2192_vm3, %v1993_v16  ;;  %v1674_v20 = vadd.f32 %v3883_v40, %v1673_v18 }
 0x163   :  { %v1882_v21 = vmax.f32 %v1529_v17, 0.0  ;;  %v1386_v22 = vadd.f32 %v3883_v40, %v1385_v19  ;;  %v1245_v23 = vpop.f32.mrf.mxu0 }
 0x164   :  { %v1246_v24 = vadd.f32 %v3883_v40, %v1245_v23  ;;  %v1940_v25 = vmax.f32 %v1674_v20, 0.0 }
 0x165   :  { %v2107_v26 = vpack.c.bf16 %v1882_v21, %v1882_v21  ;;  %v1825_v27 = vmax.f32 %v1386_v22, 0.0 }
 0x166   :  { %v1769_v28 = vmax.f32 %v1246_v24, 0.0  ;;  %v2165_v29 = vpack.c.bf16 %v1940_v25, %v1940_v25 }
 0x167   :  { %2333 = vst.msk [vmem:[%s4740_s3 + $0x230] sm:$0xf] %vm2192_vm3, %v2107_v26  ;;  %v2050_v30 = vpack.c.bf16 %v1825_v27, %v1825_v27 }
 0x168   :  { %v1530_v31 = vpop.f32.mrf.mxu2  ;;  %v1994_v32 = vpack.c.bf16 %v1769_v28, %v1769_v28  ;;  %2391 = vst.msk [vmem:[%s4740_s3 + $0x318] sm:$0xf] %vm2192_vm3, %v2165_v29 }
 0x169   :  { %2276 = vst.msk [vmem:[%s4740_s3 + $0x14c] sm:$0xf] %vm2192_vm3, %v2050_v30  ;;  %v1531_v33 = vadd.f32 %v3883_v40, %v1530_v31  ;;  %v1675_v36 = vpop.f32.mrf.mxu3 }
 0x16a   :  { %v1388_v37 = vpop.f32.mrf.mxu1  ;;  %2220 = vst.msk [vmem:[%s4740_s3 + $0x6c] sm:$0xf] %vm2192_vm3, %v1994_v32  ;;  %v1676_v39 = vadd.f32 %v3883_v40, %v1675_v36 }
 0x16b   :  { %v1883_v42 = vmax.f32 %v1531_v33, 0.0  ;;  %v1389_v43 = vadd.f32 %v3883_v40, %v1388_v37  ;;  %v1248_v44 = vpop.f32.mrf.mxu0 }
 0x16c   :  { %v1249_v45 = vadd.f32 %v3883_v40, %v1248_v44  ;;  %v1941_v46 = vmax.f32 %v1676_v39, 0.0  ;;  %v3043_v44 = vld [vmem:[%s4739_s0 + $0x1a0] sm:$0xff] }
 0x16d   :  { %v2108_v47 = vpack.c.bf16 %v1883_v42, %v1883_v42  ;;  %v1826_v48 = vmax.f32 %v1389_v43, 0.0  ;;  %2928 = vmatmul.msk.bf16.gmra.mxu1 %vm822_vm2, %v3041_v34  ;;  %2957 = vmatmul.msk.bf16.gmra.mxu2 %vm822_vm2, %v3070_v35 }
 0x16e   :  { %v1770_v49 = vmax.f32 %v1249_v45, 0.0  ;;  %2900 = vmatmul.msk.bf16.gmra.mxu0 %vm822_vm2, %v3013_v38  ;;  %v2166_v50 = vpack.c.bf16 %v1941_v46, %v1941_v46  ;;  %2986 = vmatmul.msk.bf16.gmra.mxu3 %vm822_vm2, %v3099_v41  ;;  %v3072_v45 = vld [vmem:[%s4739_s0 + $0x288] sm:$0xff] }
 0x16f   :  { %2334 = vst.msk [vmem:[%s4740_s3 + $0x234] sm:$0xf] %vm2192_vm3, %v2108_v47  ;;  %v2051_v51 = vpack.c.bf16 %v1826_v48, %v1826_v48  ;;  %v3015_v48 = vld [vmem:[%s4739_s0 + $0xc0] sm:$0xff] }
 0x170   :  { %v1533_v52 = vpop.f32.mrf.mxu2  ;;  %v1995_v53 = vpack.c.bf16 %v1770_v49, %v1770_v49  ;;  %2392 = vst.msk [vmem:[%s4740_s3 + $0x31c] sm:$0xf] %vm2192_vm3, %v2166_v50  ;;  %v3101_v50 = vld [vmem:[%s4739_s0 + $0x370] sm:$0xff] }
 0x171   :  { %2277 = vst.msk [vmem:[%s4740_s3 + $0x150] sm:$0xf] %vm2192_vm3, %v2051_v51  ;;  %v1534_v54 = vadd.f32 %v3883_v40, %v1533_v52  ;;  %v1678_v55 = vpop.f32.mrf.mxu3 }
 0x172   :  { %v1390_v56 = vpop.f32.mrf.mxu1  ;;  %2221 = vst.msk [vmem:[%s4740_s3 + $0x70] sm:$0xf] %vm2192_vm3, %v1995_v53  ;;  %v1679_v57 = vadd.f32 %v3883_v40, %v1678_v55 }
 0x173   :  { %v1884_v58 = vmax.f32 %v1534_v54, 0.0  ;;  %v1391_v59 = vadd.f32 %v3883_v40, %v1390_v56  ;;  %v1250_v60 = vpop.f32.mrf.mxu0 }
 0x174   :  { %v1251_v61 = vadd.f32 %v3883_v40, %v1250_v60  ;;  %v1942_v62 = vmax.f32 %v1679_v57, 0.0 }
 0x175   :  { %v2109_v63 = vpack.c.bf16 %v1884_v58, %v1884_v58  ;;  %v1827_v0 = vmax.f32 %v1391_v59, 0.0 }
 0x176   :  { %v1771_v1 = vmax.f32 %v1251_v61, 0.0  ;;  %v2167_v2 = vpack.c.bf16 %v1942_v62, %v1942_v62 }
 0x177   :  { %2335 = vst.msk [vmem:[%s4740_s3 + $0x238] sm:$0xf] %vm2192_vm3, %v2109_v63  ;;  %v2052_v3 = vpack.c.bf16 %v1827_v0, %v1827_v0 }
 0x178   :  { %v1535_v4 = vpop.f32.mrf.mxu2  ;;  %v1996_v5 = vpack.c.bf16 %v1771_v1, %v1771_v1  ;;  %2393 = vst.msk [vmem:[%s4740_s3 + $0x320] sm:$0xf] %vm2192_vm3, %v2167_v2 }
 0x179   :  { %2278 = vst.msk [vmem:[%s4740_s3 + $0x154] sm:$0xf] %vm2192_vm3, %v2052_v3  ;;  %v1536_v6 = vadd.f32 %v3883_v40, %v1535_v4  ;;  %v1680_v9 = vpop.f32.mrf.mxu3 }
 0x17a   :  { %v1393_v10 = vpop.f32.mrf.mxu1  ;;  %2222 = vst.msk [vmem:[%s4740_s3 + $0x74] sm:$0xf] %vm2192_vm3, %v1996_v5  ;;  %v1681_v12 = vadd.f32 %v3883_v40, %v1680_v9 }
 0x17b   :  { %v1885_v14 = vmax.f32 %v1536_v6, 0.0  ;;  %v1394_v15 = vadd.f32 %v3883_v40, %v1393_v10  ;;  %v1253_v16 = vpop.f32.mrf.mxu0 }
 0x17c   :  { %v1254_v17 = vadd.f32 %v3883_v40, %v1253_v16  ;;  %v1943_v18 = vmax.f32 %v1681_v12, 0.0  ;;  %v3044_v16 = vld [vmem:[%s4739_s0 + $0x1a8] sm:$0xff] }
 0x17d   :  { %v2110_v19 = vpack.c.bf16 %v1885_v14, %v1885_v14  ;;  %v1828_v20 = vmax.f32 %v1394_v15, 0.0  ;;  %2929 = vmatmul.msk.bf16.gmra.mxu1 %vm822_vm2, %v3042_v7  ;;  %2958 = vmatmul.msk.bf16.gmra.mxu2 %vm822_vm2, %v3071_v8 }
 0x17e   :  { %v1772_v21 = vmax.f32 %v1254_v17, 0.0  ;;  %2901 = vmatmul.msk.bf16.gmra.mxu0 %vm822_vm2, %v3014_v11  ;;  %v2168_v22 = vpack.c.bf16 %v1943_v18, %v1943_v18  ;;  %2987 = vmatmul.msk.bf16.gmra.mxu3 %vm822_vm2, %v3100_v13  ;;  %v3073_v17 = vld [vmem:[%s4739_s0 + $0x290] sm:$0xff] }
 0x17f   :  { %2336 = vst.msk [vmem:[%s4740_s3 + $0x23c] sm:$0xf] %vm2192_vm3, %v2110_v19  ;;  %v2053_v23 = vpack.c.bf16 %v1828_v20, %v1828_v20  ;;  %v3016_v20 = vld [vmem:[%s4739_s0 + $0xc8] sm:$0xff] }
 0x180   :  { %v1538_v24 = vpop.f32.mrf.mxu2  ;;  %v1997_v25 = vpack.c.bf16 %v1772_v21, %v1772_v21  ;;  %2394 = vst.msk [vmem:[%s4740_s3 + $0x324] sm:$0xf] %vm2192_vm3, %v2168_v22  ;;  %v3102_v22 = vld [vmem:[%s4739_s0 + $0x378] sm:$0xff] }
 0x181   :  { %2279 = vst.msk [vmem:[%s4740_s3 + $0x158] sm:$0xf] %vm2192_vm3, %v2053_v23  ;;  %v1539_v26 = vadd.f32 %v3883_v40, %v1538_v24  ;;  %v1683_v27 = vpop.f32.mrf.mxu3 }
 0x182   :  { %v1395_v28 = vpop.f32.mrf.mxu1  ;;  %2223 = vst.msk [vmem:[%s4740_s3 + $0x78] sm:$0xf] %vm2192_vm3, %v1997_v25  ;;  %v1684_v29 = vadd.f32 %v3883_v40, %v1683_v27 }
 0x183   :  { %v1886_v30 = vmax.f32 %v1539_v26, 0.0  ;;  %v1396_v31 = vadd.f32 %v3883_v40, %v1395_v28  ;;  %v1255_v32 = vpop.f32.mrf.mxu0 }
 0x184   :  { %v1256_v33 = vadd.f32 %v3883_v40, %v1255_v32  ;;  %v1944_v34 = vmax.f32 %v1684_v29, 0.0 }
 0x185   :  { %v2111_v35 = vpack.c.bf16 %v1886_v30, %v1886_v30  ;;  %v1829_v36 = vmax.f32 %v1396_v31, 0.0 }
 0x186   :  { %v1773_v37 = vmax.f32 %v1256_v33, 0.0  ;;  %v2169_v38 = vpack.c.bf16 %v1944_v34, %v1944_v34 }
 0x187   :  { %2337 = vst.msk [vmem:[%s4740_s3 + $0x240] sm:$0xf] %vm2192_vm3, %v2111_v35  ;;  %v2054_v39 = vpack.c.bf16 %v1829_v36, %v1829_v36 }
 0x188   :  { %v1540_v41 = vpop.f32.mrf.mxu2  ;;  %v1998_v42 = vpack.c.bf16 %v1773_v37, %v1773_v37  ;;  %2395 = vst.msk [vmem:[%s4740_s3 + $0x328] sm:$0xf] %vm2192_vm3, %v2169_v38 }
 0x189   :  { %2280 = vst.msk [vmem:[%s4740_s3 + $0x15c] sm:$0xf] %vm2192_vm3, %v2054_v39  ;;  %v1541_v43 = vadd.f32 %v3883_v40, %v1540_v41  ;;  %v1685_v46 = vpop.f32.mrf.mxu3 }
 0x18a   :  { %v1398_v47 = vpop.f32.mrf.mxu1  ;;  %2224 = vst.msk [vmem:[%s4740_s3 + $0x7c] sm:$0xf] %vm2192_vm3, %v1998_v42  ;;  %v1686_v49 = vadd.f32 %v3883_v40, %v1685_v46 }
 0x18b   :  { %v1887_v51 = vmax.f32 %v1541_v43, 0.0  ;;  %v1399_v52 = vadd.f32 %v3883_v40, %v1398_v47  ;;  %v1258_v53 = vpop.f32.mrf.mxu0 }
 0x18c   :  { %v1259_v54 = vadd.f32 %v3883_v40, %v1258_v53  ;;  %v1945_v55 = vmax.f32 %v1686_v49, 0.0 }
 0x18d   :  { %v2112_v56 = vpack.c.bf16 %v1887_v51, %v1887_v51  ;;  %v1830_v57 = vmax.f32 %v1399_v52, 0.0  ;;  %2930 = vmatmul.msk.bf16.gmra.mxu1 %vm822_vm2, %v3043_v44  ;;  %2959 = vmatmul.msk.bf16.gmra.mxu2 %vm822_vm2, %v3072_v45 }
 0x18e   :  { %v1774_v58 = vmax.f32 %v1259_v54, 0.0  ;;  %2902 = vmatmul.msk.bf16.gmra.mxu0 %vm822_vm2, %v3015_v48  ;;  %v2170_v59 = vpack.c.bf16 %v1945_v55, %v1945_v55  ;;  %2988 = vmatmul.msk.bf16.gmra.mxu3 %vm822_vm2, %v3101_v50  ;;  %v239_v50 = vld [vmem:[%s4739_s0 + $0x380] sm:$0xf]  ;;  %v3045_v55 = vld [vmem:[%s4739_s0 + $0x1b0] sm:$0xff] }
 0x18f   :  { %2338 = vst.msk [vmem:[%s4740_s3 + $0x244] sm:$0xf] %vm2192_vm3, %v2112_v56  ;;  %v2055_v60 = vpack.c.bf16 %v1830_v57, %v1830_v57  ;;  %v697_v53 = vunpack.c.l.b16 %v239_v50  ;;  %v3074_v56 = vld [vmem:[%s4739_s0 + $0x298] sm:$0xff] }
 0x190   :  { %v1543_v61 = vpop.f32.mrf.mxu2  ;;  %v1999_v62 = vpack.c.bf16 %v1774_v58, %v1774_v58  ;;  %2396 = vst.msk [vmem:[%s4740_s3 + $0x32c] sm:$0xf] %vm2192_vm3, %v2170_v59  ;;  %v3017_v59 = vld [vmem:[%s4739_s0 + $0xd0] sm:$0xff] }
 0x191   :  { %2281 = vst.msk [vmem:[%s4740_s3 + $0x160] sm:$0xf] %vm2192_vm3, %v2055_v60  ;;  %v1544_v63 = vadd.f32 %v3883_v40, %v1543_v61  ;;  %v1688_v0 = vpop.f32.mrf.mxu3  ;;  %v810_v61 = vpack.c.b16 %v697_v53, %v697_v53 }
 0x192   :  { %v1400_v1 = vpop.f32.mrf.mxu1  ;;  %2225 = vst.msk [vmem:[%s4740_s3 + $0x80] sm:$0xf] %vm2192_vm3, %v1999_v62  ;;  %v1689_v2 = vadd.f32 %v3883_v40, %v1688_v0 }
 0x193   :  { %v1888_v3 = vmax.f32 %v1544_v63, 0.0  ;;  %v1401_v4 = vadd.f32 %v3883_v40, %v1400_v1  ;;  %v1260_v5 = vpop.f32.mrf.mxu0 }
 0x194   :  { %v1261_v6 = vadd.f32 %v3883_v40, %v1260_v5  ;;  %v1946_v7 = vmax.f32 %v1689_v2, 0.0 }
 0x195   :  { %v2113_v8 = vpack.c.bf16 %v1888_v3, %v1888_v3  ;;  %v1831_v9 = vmax.f32 %v1401_v4, 0.0 }
 0x196   :  { %v1775_v10 = vmax.f32 %v1261_v6, 0.0  ;;  %v2171_v11 = vpack.c.bf16 %v1946_v7, %v1946_v7 }
 0x197   :  { %2339 = vst.msk [vmem:[%s4740_s3 + $0x248] sm:$0xf] %vm2192_vm3, %v2113_v8  ;;  %v2056_v12 = vpack.c.bf16 %v1831_v9, %v1831_v9 }
 0x198   :  { %v1545_v13 = vpop.f32.mrf.mxu2  ;;  %v2000_v14 = vpack.c.bf16 %v1775_v10, %v1775_v10  ;;  %2397 = vst.msk [vmem:[%s4740_s3 + $0x330] sm:$0xf] %vm2192_vm3, %v2171_v11 }
 0x199   :  { %2282 = vst.msk [vmem:[%s4740_s3 + $0x164] sm:$0xf] %vm2192_vm3, %v2056_v12  ;;  %v1546_v15 = vadd.f32 %v3883_v40, %v1545_v13  ;;  %v1690_v18 = vpop.f32.mrf.mxu3 }
 0x19a   :  { %v1403_v19 = vpop.f32.mrf.mxu1  ;;  %2226 = vst.msk [vmem:[%s4740_s3 + $0x84] sm:$0xf] %vm2192_vm3, %v2000_v14  ;;  %v1691_v21 = vadd.f32 %v3883_v40, %v1690_v18 }
 0x19b   :  { %v1889_v23 = vmax.f32 %v1546_v15, 0.0  ;;  %v1404_v24 = vadd.f32 %v3883_v40, %v1403_v19  ;;  %v1263_v25 = vpop.f32.mrf.mxu0 }
 0x19c   :  { %v1264_v26 = vadd.f32 %v3883_v40, %v1263_v25  ;;  %v1947_v27 = vmax.f32 %v1691_v21, 0.0 }
 0x19d   :  { %v2114_v28 = vpack.c.bf16 %v1889_v23, %v1889_v23  ;;  %v1832_v29 = vmax.f32 %v1404_v24, 0.0  ;;  %2931 = vmatmul.msk.bf16.gmra.mxu1 %vm822_vm2, %v3044_v16  ;;  %2960 = vmatmul.msk.bf16.gmra.mxu2 %vm822_vm2, %v3073_v17 }
 0x19e   :  { %v1776_v30 = vmax.f32 %v1264_v26, 0.0  ;;  %2903 = vmatmul.msk.bf16.gmra.mxu0 %vm822_vm2, %v3016_v20  ;;  %v2172_v31 = vpack.c.bf16 %v1947_v27, %v1947_v27  ;;  %2989 = vmatmul.msk.bf16.gmra.mxu3 %vm822_vm2, %v3102_v22  ;;  %v3046_v27 = vld [vmem:[%s4739_s0 + $0x1b8] sm:$0xff] }
 0x19f   :  { %2340 = vst.msk [vmem:[%s4740_s3 + $0x24c] sm:$0xf] %vm2192_vm3, %v2114_v28  ;;  %v2057_v32 = vpack.c.bf16 %v1832_v29, %v1832_v29  ;;  %v3075_v28 = vld [vmem:[%s4739_s0 + $0x2a0] sm:$0xff] }
 0x1a0   :  { %v1548_v33 = vpop.f32.mrf.mxu2  ;;  %v2001_v34 = vpack.c.bf16 %v1776_v30, %v1776_v30  ;;  %2398 = vst.msk [vmem:[%s4740_s3 + $0x334] sm:$0xf] %vm2192_vm3, %v2172_v31  ;;  %v3018_v31 = vld [vmem:[%s4739_s0 + $0xd8] sm:$0xff] }
 0x1a1   :  { %2283 = vst.msk [vmem:[%s4740_s3 + $0x168] sm:$0xf] %vm2192_vm3, %v2057_v32  ;;  %v1549_v35 = vadd.f32 %v3883_v40, %v1548_v33  ;;  %v1693_v36 = vpop.f32.mrf.mxu3 }
 0x1a2   :  { %v1405_v37 = vpop.f32.mrf.mxu1  ;;  %2227 = vst.msk [vmem:[%s4740_s3 + $0x88] sm:$0xf] %vm2192_vm3, %v2001_v34  ;;  %v1694_v38 = vadd.f32 %v3883_v40, %v1693_v36 }
 0x1a3   :  { %v1890_v39 = vmax.f32 %v1549_v35, 0.0  ;;  %v1406_v41 = vadd.f32 %v3883_v40, %v1405_v37  ;;  %v1265_v42 = vpop.f32.mrf.mxu0 }
 0x1a4   :  { %v1266_v43 = vadd.f32 %v3883_v40, %v1265_v42  ;;  %v1948_v44 = vmax.f32 %v1694_v38, 0.0 }
 0x1a5   :  { %v2115_v45 = vpack.c.bf16 %v1890_v39, %v1890_v39  ;;  %v1833_v46 = vmax.f32 %v1406_v41, 0.0 }
 0x1a6   :  { %v1777_v47 = vmax.f32 %v1266_v43, 0.0  ;;  %v2173_v48 = vpack.c.bf16 %v1948_v44, %v1948_v44 }
 0x1a7   :  { %2341 = vst.msk [vmem:[%s4740_s3 + $0x250] sm:$0xf] %vm2192_vm3, %v2115_v45  ;;  %v2058_v49 = vpack.c.bf16 %v1833_v46, %v1833_v46 }
 0x1a8   :  { %v1550_v51 = vpop.f32.mrf.mxu2  ;;  %v2002_v52 = vpack.c.bf16 %v1777_v47, %v1777_v47  ;;  %2399 = vst.msk [vmem:[%s4740_s3 + $0x338] sm:$0xf] %vm2192_vm3, %v2173_v48 }
 0x1a9   :  { %2284 = vst.msk [vmem:[%s4740_s3 + $0x16c] sm:$0xf] %vm2192_vm3, %v2058_v49  ;;  %v1551_v54 = vadd.f32 %v3883_v40, %v1550_v51  ;;  %v1695_v57 = vpop.f32.mrf.mxu3 }
 0x1aa   :  { %v1408_v58 = vpop.f32.mrf.mxu1  ;;  %2228 = vst.msk [vmem:[%s4740_s3 + $0x8c] sm:$0xf] %vm2192_vm3, %v2002_v52  ;;  %v1696_v60 = vadd.f32 %v3883_v40, %v1695_v57 }
 0x1ab   :  { %v1891_v62 = vmax.f32 %v1551_v54, 0.0  ;;  %v1409_v63 = vadd.f32 %v3883_v40, %v1408_v58  ;;  %v1268_v0 = vpop.f32.mrf.mxu0 }
 0x1ac   :  { %v1269_v1 = vadd.f32 %v3883_v40, %v1268_v0  ;;  %v1949_v2 = vmax.f32 %v1696_v60, 0.0  ;;  %v3076_v0 = vld [vmem:[%s4739_s0 + $0x2a8] sm:$0xff] }
 0x1ad   :  { %v2116_v3 = vpack.c.bf16 %v1891_v62, %v1891_v62  ;;  %v1834_v4 = vmax.f32 %v1409_v63, 0.0  ;;  %2932 = vmatmul.msk.bf16.gmra.mxu1 %vm822_vm2, %v3045_v55  ;;  %2961 = vmatmul.msk.bf16.gmra.mxu2 %vm822_vm2, %v3074_v56  ;;  %v3047_v63 = vld [vmem:[%s4739_s0 + $0x1c0] sm:$0xff] }
 0x1ae   :  { %v1778_v5 = vmax.f32 %v1269_v1, 0.0  ;;  %2904 = vmatmul.msk.bf16.gmra.mxu0 %vm822_vm2, %v3017_v59  ;;  %v2174_v6 = vpack.c.bf16 %v1949_v2, %v1949_v2  ;;  %2990 = vmatmul.msk.bf16.gmra.mxu3 %vm822_vm2, %v810_v61 }
 0x1af   :  { %2342 = vst.msk [vmem:[%s4740_s3 + $0x254] sm:$0xf] %vm2192_vm3, %v2116_v3  ;;  %v2059_v7 = vpack.c.bf16 %v1834_v4, %v1834_v4 }
 0x1b0   :  { %v1553_v8 = vpop.f32.mrf.mxu2  ;;  %v2003_v9 = vpack.c.bf16 %v1778_v5, %v1778_v5  ;;  %2400 = vst.msk [vmem:[%s4740_s3 + $0x33c] sm:$0xf] %vm2192_vm3, %v2174_v6 }
 0x1b1   :  { %2285 = vst.msk [vmem:[%s4740_s3 + $0x170] sm:$0xf] %vm2192_vm3, %v2059_v7  ;;  %v1554_v10 = vadd.f32 %v3883_v40, %v1553_v8  ;;  %v1698_v11 = vpop.f32.mrf.mxu3 }
 0x1b2   :  { %v1410_v12 = vpop.f32.mrf.mxu1  ;;  %2229 = vst.msk [vmem:[%s4740_s3 + $0x90] sm:$0xf] %vm2192_vm3, %v2003_v9  ;;  %v1699_v13 = vadd.f32 %v3883_v40, %v1698_v11 }
 0x1b3   :  { %v1892_v14 = vmax.f32 %v1554_v10, 0.0  ;;  %v1411_v15 = vadd.f32 %v3883_v40, %v1410_v12  ;;  %v1270_v16 = vpop.f32.mrf.mxu0 }
 0x1b4   :  { %v1271_v17 = vadd.f32 %v3883_v40, %v1270_v16  ;;  %v1950_v18 = vmax.f32 %v1699_v13, 0.0 }
 0x1b5   :  { %v2117_v19 = vpack.c.bf16 %v1892_v14, %v1892_v14  ;;  %v1835_v20 = vmax.f32 %v1411_v15, 0.0 }
 0x1b6   :  { %v1779_v21 = vmax.f32 %v1271_v17, 0.0  ;;  %v2175_v22 = vpack.c.bf16 %v1950_v18, %v1950_v18 }
 0x1b7   :  { %2343 = vst.msk [vmem:[%s4740_s3 + $0x258] sm:$0xf] %vm2192_vm3, %v2117_v19  ;;  %v2060_v23 = vpack.c.bf16 %v1835_v20, %v1835_v20 }
 0x1b8   :  { %v1555_v24 = vpop.f32.mrf.mxu2  ;;  %v2004_v25 = vpack.c.bf16 %v1779_v21, %v1779_v21  ;;  %2401 = vst.msk [vmem:[%s4740_s3 + $0x340] sm:$0xf] %vm2192_vm3, %v2175_v22 }
 0x1b9   :  { %2286 = vst.msk [vmem:[%s4740_s3 + $0x174] sm:$0xf] %vm2192_vm3, %v2060_v23  ;;  %v1556_v26 = vadd.f32 %v3883_v40, %v1555_v24  ;;  %v1700_v29 = vpop.f32.mrf.mxu3 }
 0x1ba   :  { %v1413_v30 = vpop.f32.mrf.mxu1  ;;  %2230 = vst.msk [vmem:[%s4740_s3 + $0x94] sm:$0xf] %vm2192_vm3, %v2004_v25  ;;  %v1701_v32 = vadd.f32 %v3883_v40, %v1700_v29 }
 0x1bb   :  { %v1893_v33 = vmax.f32 %v1556_v26, 0.0  ;;  %v1414_v34 = vadd.f32 %v3883_v40, %v1413_v30  ;;  %v1273_v35 = vpop.f32.mrf.mxu0 }
 0x1bc   :  { %v1274_v36 = vadd.f32 %v3883_v40, %v1273_v35  ;;  %v1951_v37 = vmax.f32 %v1701_v32, 0.0 }
 0x1bd   :  { %v2118_v38 = vpack.c.bf16 %v1893_v33, %v1893_v33  ;;  %v1836_v39 = vmax.f32 %v1414_v34, 0.0  ;;  %2933 = vmatmul.msk.bf16.gmra.mxu1 %vm822_vm2, %v3046_v27  ;;  %2962 = vmatmul.msk.bf16.gmra.mxu2 %vm822_vm2, %v3075_v28 }
 0x1be   :  { %v1780_v41 = vmax.f32 %v1274_v36, 0.0  ;;  %2905 = vmatmul.msk.bf16.gmra.mxu0 %vm822_vm2, %v3018_v31  ;;  %v2176_v42 = vpack.c.bf16 %v1951_v37, %v1951_v37 }
 0x1bf   :  { %2344 = vst.msk [vmem:[%s4740_s3 + $0x25c] sm:$0xf] %vm2192_vm3, %v2118_v38  ;;  %v2061_v43 = vpack.c.bf16 %v1836_v39, %v1836_v39 }
 0x1c0   :  { %v1558_v44 = vpop.f32.mrf.mxu2  ;;  %v2005_v45 = vpack.c.bf16 %v1780_v41, %v1780_v41  ;;  %2402 = vst.msk [vmem:[%s4740_s3 + $0x344] sm:$0xf] %vm2192_vm3, %v2176_v42 }
 0x1c1   :  { %2287 = vst.msk [vmem:[%s4740_s3 + $0x178] sm:$0xf] %vm2192_vm3, %v2061_v43  ;;  %v1559_v46 = vadd.f32 %v3883_v40, %v1558_v44  ;;  %v1703_v47 = vpop.f32.mrf.mxu3 }
 0x1c2   :  { %v1415_v48 = vpop.f32.mrf.mxu1  ;;  %2231 = vst.msk [vmem:[%s4740_s3 + $0x98] sm:$0xf] %vm2192_vm3, %v2005_v45  ;;  %v1704_v49 = vadd.f32 %v3883_v40, %v1703_v47 }
 0x1c3   :  { %v1894_v50 = vmax.f32 %v1559_v46, 0.0  ;;  %v1416_v51 = vadd.f32 %v3883_v40, %v1415_v48  ;;  %v1275_v52 = vpop.f32.mrf.mxu0 }
 0x1c4   :  { %v1276_v53 = vadd.f32 %v3883_v40, %v1275_v52  ;;  %v1952_v54 = vmax.f32 %v1704_v49, 0.0 }
 0x1c5   :  { %v2119_v55 = vpack.c.bf16 %v1894_v50, %v1894_v50  ;;  %v1837_v56 = vmax.f32 %v1416_v51, 0.0 }
 0x1c6   :  { %v1781_v57 = vmax.f32 %v1276_v53, 0.0  ;;  %v2177_v58 = vpack.c.bf16 %v1952_v54, %v1952_v54 }
 0x1c7   :  { %2345 = vst.msk [vmem:[%s4740_s3 + $0x260] sm:$0xf] %vm2192_vm3, %v2119_v55  ;;  %v2062_v59 = vpack.c.bf16 %v1837_v56, %v1837_v56 }
 0x1c8   :  { %v1560_v60 = vpop.f32.mrf.mxu2  ;;  %v2006_v61 = vpack.c.bf16 %v1781_v57, %v1781_v57  ;;  %2403 = vst.msk [vmem:[%s4740_s3 + $0x348] sm:$0xf] %vm2192_vm3, %v2177_v58 }
 0x1c9   :  { %2288 = vst.msk [vmem:[%s4740_s3 + $0x17c] sm:$0xf] %vm2192_vm3, %v2062_v59  ;;  %v1561_v62 = vadd.f32 %v3883_v40, %v1560_v60  ;;  %v1705_v1 = vpop.f32.mrf.mxu3 }
 0x1ca   :  { %v1418_v2 = vpop.f32.mrf.mxu1  ;;  %2232 = vst.msk [vmem:[%s4740_s3 + $0x9c] sm:$0xf] %vm2192_vm3, %v2006_v61  ;;  %v1706_v3 = vadd.f32 %v3883_v40, %v1705_v1 }
 0x1cb   :  { %v1895_v4 = vmax.f32 %v1561_v62, 0.0  ;;  %v1419_v5 = vadd.f32 %v3883_v40, %v1418_v2  ;;  %v1278_v6 = vpop.f32.mrf.mxu0 }
 0x1cc   :  { %v1279_v7 = vadd.f32 %v3883_v40, %v1278_v6  ;;  %v1953_v8 = vmax.f32 %v1706_v3, 0.0 }
 0x1cd   :  { %v2120_v9 = vpack.c.bf16 %v1895_v4, %v1895_v4  ;;  %v1838_v10 = vmax.f32 %v1419_v5, 0.0  ;;  %2934 = vmatmul.msk.bf16.gmra.mxu1 %vm822_vm2, %v3047_v63  ;;  %2963 = vmatmul.msk.bf16.gmra.mxu2 %vm822_vm2, %v3076_v0 }
 0x1ce   :  { %v1782_v11 = vmax.f32 %v1279_v7, 0.0  ;;  %v2178_v12 = vpack.c.bf16 %v1953_v8, %v1953_v8 }
 0x1cf   :  { %2346 = vst.msk [vmem:[%s4740_s3 + $0x264] sm:$0xf] %vm2192_vm3, %v2120_v9  ;;  %v2063_v13 = vpack.c.bf16 %v1838_v10, %v1838_v10 }
 0x1d0   :  { %v1563_v14 = vpop.f32.mrf.mxu2  ;;  %v2007_v15 = vpack.c.bf16 %v1782_v11, %v1782_v11  ;;  %2404 = vst.msk [vmem:[%s4740_s3 + $0x34c] sm:$0xf] %vm2192_vm3, %v2178_v12 }
 0x1d1   :  { %2289 = vst.msk [vmem:[%s4740_s3 + $0x180] sm:$0xf] %vm2192_vm3, %v2063_v13  ;;  %v1564_v16 = vadd.f32 %v3883_v40, %v1563_v14  ;;  %v1708_v17 = vpop.f32.mrf.mxu3 }
 0x1d2   :  { %v1420_v18 = vpop.f32.mrf.mxu1  ;;  %2233 = vst.msk [vmem:[%s4740_s3 + $0xa0] sm:$0xf] %vm2192_vm3, %v2007_v15  ;;  %v1709_v19 = vadd.f32 %v3883_v40, %v1708_v17 }
 0x1d3   :  { %v1896_v20 = vmax.f32 %v1564_v16, 0.0  ;;  %v1421_v21 = vadd.f32 %v3883_v40, %v1420_v18  ;;  %v1280_v22 = vpop.f32.mrf.mxu0 }
 0x1d4   :  { %v1281_v23 = vadd.f32 %v3883_v40, %v1280_v22  ;;  %v1954_v24 = vmax.f32 %v1709_v19, 0.0 }
 0x1d5   :  { %v2121_v25 = vpack.c.bf16 %v1896_v20, %v1896_v20  ;;  %v1839_v26 = vmax.f32 %v1421_v21, 0.0 }
 0x1d6   :  { %v1783_v27 = vmax.f32 %v1281_v23, 0.0  ;;  %v2179_v28 = vpack.c.bf16 %v1954_v24, %v1954_v24 }
 0x1d7   :  { %2347 = vst.msk [vmem:[%s4740_s3 + $0x268] sm:$0xf] %vm2192_vm3, %v2121_v25  ;;  %v2064_v29 = vpack.c.bf16 %v1839_v26, %v1839_v26 }
 0x1d8   :  { %v1565_v30 = vpop.f32.mrf.mxu2  ;;  %v2008_v31 = vpack.c.bf16 %v1783_v27, %v1783_v27  ;;  %2405 = vst.msk [vmem:[%s4740_s3 + $0x350] sm:$0xf] %vm2192_vm3, %v2179_v28 }
 0x1d9   :  { %2290 = vst.msk [vmem:[%s4740_s3 + $0x184] sm:$0xf] %vm2192_vm3, %v2064_v29  ;;  %v1566_v32 = vadd.f32 %v3883_v40, %v1565_v30  ;;  %v1710_v33 = vpop.f32.mrf.mxu3 }
 0x1da   :  { %v1423_v34 = vpop.f32.mrf.mxu1  ;;  %2234 = vst.msk [vmem:[%s4740_s3 + $0xa4] sm:$0xf] %vm2192_vm3, %v2008_v31  ;;  %v1711_v35 = vadd.f32 %v3883_v40, %v1710_v33 }
 0x1db   :  { %v1897_v36 = vmax.f32 %v1566_v32, 0.0  ;;  %v1424_v37 = vadd.f32 %v3883_v40, %v1423_v34  ;;  %v1283_v38 = vpop.f32.mrf.mxu0 }
 0x1dc   :  { %v1284_v39 = vadd.f32 %v3883_v40, %v1283_v38  ;;  %v1955_v41 = vmax.f32 %v1711_v35, 0.0 }
 0x1dd   :  { %v2122_v42 = vpack.c.bf16 %v1897_v36, %v1897_v36  ;;  %v1840_v43 = vmax.f32 %v1424_v37, 0.0 }
 0x1de   :  { %v1784_v44 = vmax.f32 %v1284_v39, 0.0  ;;  %v2180_v45 = vpack.c.bf16 %v1955_v41, %v1955_v41 }
 0x1df   :  { %2348 = vst.msk [vmem:[%s4740_s3 + $0x26c] sm:$0xf] %vm2192_vm3, %v2122_v42  ;;  %v2065_v46 = vpack.c.bf16 %v1840_v43, %v1840_v43 }
 0x1e0   :  { %v1568_v47 = vpop.f32.mrf.mxu2  ;;  %v2009_v48 = vpack.c.bf16 %v1784_v44, %v1784_v44  ;;  %2406 = vst.msk [vmem:[%s4740_s3 + $0x354] sm:$0xf] %vm2192_vm3, %v2180_v45 }
 0x1e1   :  { %2291 = vst.msk [vmem:[%s4740_s3 + $0x188] sm:$0xf] %vm2192_vm3, %v2065_v46  ;;  %v1569_v49 = vadd.f32 %v3883_v40, %v1568_v47  ;;  %v1713_v50 = vpop.f32.mrf.mxu3 }
 0x1e2   :  { %v1425_v51 = vpop.f32.mrf.mxu1  ;;  %2235 = vst.msk [vmem:[%s4740_s3 + $0xa8] sm:$0xf] %vm2192_vm3, %v2009_v48  ;;  %v1714_v52 = vadd.f32 %v3883_v40, %v1713_v50 }
 0x1e3   :  { %v1898_v53 = vmax.f32 %v1569_v49, 0.0  ;;  %v1426_v54 = vadd.f32 %v3883_v40, %v1425_v51  ;;  %v1285_v55 = vpop.f32.mrf.mxu0 }
 0x1e4   :  { %v1286_v56 = vadd.f32 %v3883_v40, %v1285_v55  ;;  %v1956_v57 = vmax.f32 %v1714_v52, 0.0  ;;  %v4476_v40 = vld [vmem:[%s4738_s2] ss:$0 sm:$0xff] }
 0x1e5   :  { %v2123_v58 = vpack.c.bf16 %v1898_v53, %v1898_v53  ;;  %v1841_v59 = vmax.f32 %v1426_v54, 0.0 }
 0x1e6   :  { %v1785_v60 = vmax.f32 %v1286_v56, 0.0  ;;  %v2181_v61 = vpack.c.bf16 %v1956_v57, %v1956_v57 }
 0x1e7   :  { %2349 = vst.msk [vmem:[%s4740_s3 + $0x270] sm:$0xf] %vm2192_vm3, %v2123_v58  ;;  %v2066_v62 = vpack.c.bf16 %v1841_v59, %v1841_v59 }
 0x1e8   :  { %v1570_v63 = vpop.f32.mrf.mxu2  ;;  %v2010_v0 = vpack.c.bf16 %v1785_v60, %v1785_v60  ;;  %2407 = vst.msk [vmem:[%s4740_s3 + $0x358] sm:$0xf] %vm2192_vm3, %v2181_v61 }
 0x1e9   :  { %2292 = vst.msk [vmem:[%s4740_s3 + $0x18c] sm:$0xf] %vm2192_vm3, %v2066_v62  ;;  %v1571_v1 = vadd.f32 %v4476_v40, %v1570_v63  ;;  %v1715_v2 = vpop.f32.mrf.mxu3 }
 0x1ea   :  { %v1428_v3 = vpop.f32.mrf.mxu1  ;;  %2236 = vst.msk [vmem:[%s4740_s3 + $0xac] sm:$0xf] %vm2192_vm3, %v2010_v0  ;;  %v1716_v4 = vadd.f32 %v4476_v40, %v1715_v2 }
 0x1eb   :  { %v1899_v5 = vmax.f32 %v1571_v1, 0.0  ;;  %v1429_v6 = vadd.f32 %v4476_v40, %v1428_v3  ;;  %v1288_v7 = vpop.f32.mrf.mxu0 }
 0x1ec   :  { %v1289_v8 = vadd.f32 %v4476_v40, %v1288_v7  ;;  %v1957_v9 = vmax.f32 %v1716_v4, 0.0 }
 0x1ed   :  { %v2124_v10 = vpack.c.bf16 %v1899_v5, %v1899_v5  ;;  %v1842_v11 = vmax.f32 %v1429_v6, 0.0 }
 0x1ee   :  { %v1786_v12 = vmax.f32 %v1289_v8, 0.0  ;;  %v2182_v13 = vpack.c.bf16 %v1957_v9, %v1957_v9 }
 0x1ef   :  { %2350 = vst.msk [vmem:[%s4740_s3 + $0x274] sm:$0xf] %vm2192_vm3, %v2124_v10  ;;  %v2067_v14 = vpack.c.bf16 %v1842_v11, %v1842_v11 }
 0x1f0   :  { %v1573_v15 = vpop.f32.mrf.mxu2  ;;  %v2011_v16 = vpack.c.bf16 %v1786_v12, %v1786_v12  ;;  %2408 = vst.msk [vmem:[%s4740_s3 + $0x35c] sm:$0xf] %vm2192_vm3, %v2182_v13 }
 0x1f1   :  { %2293 = vst.msk [vmem:[%s4740_s3 + $0x190] sm:$0xf] %vm2192_vm3, %v2067_v14  ;;  %v1574_v17 = vadd.f32 %v4476_v40, %v1573_v15  ;;  %v1718_v18 = vpop.f32.mrf.mxu3 }
 0x1f2   :  { %v1430_v19 = vpop.f32.mrf.mxu1  ;;  %2237 = vst.msk [vmem:[%s4740_s3 + $0xb0] sm:$0xf] %vm2192_vm3, %v2011_v16  ;;  %v1719_v20 = vadd.f32 %v4476_v40, %v1718_v18 }
 0x1f3   :  { %v1900_v21 = vmax.f32 %v1574_v17, 0.0  ;;  %v1431_v22 = vadd.f32 %v4476_v40, %v1430_v19  ;;  %v1290_v23 = vpop.f32.mrf.mxu0 }
 0x1f4   :  { %v1291_v24 = vadd.f32 %v4476_v40, %v1290_v23  ;;  %v1958_v25 = vmax.f32 %v1719_v20, 0.0 }
 0x1f5   :  { %v2125_v26 = vpack.c.bf16 %v1900_v21, %v1900_v21  ;;  %v1843_v27 = vmax.f32 %v1431_v22, 0.0 }
 0x1f6   :  { %v1787_v28 = vmax.f32 %v1291_v24, 0.0  ;;  %v2183_v29 = vpack.c.bf16 %v1958_v25, %v1958_v25 }
 0x1f7   :  { %2351 = vst.msk [vmem:[%s4740_s3 + $0x278] sm:$0xf] %vm2192_vm3, %v2125_v26  ;;  %v2068_v30 = vpack.c.bf16 %v1843_v27, %v1843_v27 }
 0x1f8   :  { %v1575_v31 = vpop.f32.mrf.mxu2  ;;  %v2012_v32 = vpack.c.bf16 %v1787_v28, %v1787_v28  ;;  %2409 = vst.msk [vmem:[%s4740_s3 + $0x360] sm:$0xf] %vm2192_vm3, %v2183_v29 }
 0x1f9   :  { %2294 = vst.msk [vmem:[%s4740_s3 + $0x194] sm:$0xf] %vm2192_vm3, %v2068_v30  ;;  %v1576_v33 = vadd.f32 %v4476_v40, %v1575_v31  ;;  %v1720_v34 = vpop.f32.mrf.mxu3 }
 0x1fa   :  { %v1433_v35 = vpop.f32.mrf.mxu1  ;;  %2238 = vst.msk [vmem:[%s4740_s3 + $0xb4] sm:$0xf] %vm2192_vm3, %v2012_v32  ;;  %v1721_v36 = vadd.f32 %v4476_v40, %v1720_v34 }
 0x1fb   :  { %v1901_v37 = vmax.f32 %v1576_v33, 0.0  ;;  %v1434_v38 = vadd.f32 %v4476_v40, %v1433_v35  ;;  %v1293_v39 = vpop.f32.mrf.mxu0 }
 0x1fc   :  { %v1294_v41 = vadd.f32 %v4476_v40, %v1293_v39  ;;  %v1959_v42 = vmax.f32 %v1721_v36, 0.0 }
 0x1fd   :  { %v2126_v43 = vpack.c.bf16 %v1901_v37, %v1901_v37  ;;  %v1844_v44 = vmax.f32 %v1434_v38, 0.0 }
 0x1fe   :  { %v1788_v45 = vmax.f32 %v1294_v41, 0.0  ;;  %v2184_v46 = vpack.c.bf16 %v1959_v42, %v1959_v42 }
 0x1ff   :  { %2352 = vst.msk [vmem:[%s4740_s3 + $0x27c] sm:$0xf] %vm2192_vm3, %v2126_v43  ;;  %v2069_v47 = vpack.c.bf16 %v1844_v44, %v1844_v44 }
 0x200   :  { %v1578_v48 = vpop.f32.mrf.mxu2  ;;  %v2013_v49 = vpack.c.bf16 %v1788_v45, %v1788_v45  ;;  %2410 = vst.msk [vmem:[%s4740_s3 + $0x364] sm:$0xf] %vm2192_vm3, %v2184_v46 }
 0x201   :  { %2295 = vst.msk [vmem:[%s4740_s3 + $0x198] sm:$0xf] %vm2192_vm3, %v2069_v47  ;;  %v1579_v50 = vadd.f32 %v4476_v40, %v1578_v48  ;;  %v1723_v51 = vpop.f32.mrf.mxu3 }
 0x202   :  { %v1435_v52 = vpop.f32.mrf.mxu1  ;;  %2239 = vst.msk [vmem:[%s4740_s3 + $0xb8] sm:$0xf] %vm2192_vm3, %v2013_v49  ;;  %v1724_v53 = vadd.f32 %v4476_v40, %v1723_v51 }
 0x203   :  { %v1902_v54 = vmax.f32 %v1579_v50, 0.0  ;;  %v1436_v55 = vadd.f32 %v4476_v40, %v1435_v52  ;;  %v1295_v56 = vpop.f32.mrf.mxu0 }
 0x204   :  { %v1296_v57 = vadd.f32 %v4476_v40, %v1295_v56  ;;  %v1960_v58 = vmax.f32 %v1724_v53, 0.0 }
 0x205   :  { %v2127_v59 = vpack.c.bf16 %v1902_v54, %v1902_v54  ;;  %v1845_v60 = vmax.f32 %v1436_v55, 0.0 }
 0x206   :  { %v1789_v61 = vmax.f32 %v1296_v57, 0.0  ;;  %v2185_v62 = vpack.c.bf16 %v1960_v58, %v1960_v58 }
 0x207   :  { %2353 = vst.msk [vmem:[%s4740_s3 + $0x280] sm:$0xf] %vm2192_vm3, %v2127_v59  ;;  %v2070_v63 = vpack.c.bf16 %v1845_v60, %v1845_v60 }
 0x208   :  { %v1580_v0 = vpop.f32.mrf.mxu2  ;;  %v2014_v1 = vpack.c.bf16 %v1789_v61, %v1789_v61  ;;  %2411 = vst.msk [vmem:[%s4740_s3 + $0x368] sm:$0xf] %vm2192_vm3, %v2185_v62 }
 0x209   :  { %2296 = vst.msk [vmem:[%s4740_s3 + $0x19c] sm:$0xf] %vm2192_vm3, %v2070_v63  ;;  %v1581_v2 = vadd.f32 %v4476_v40, %v1580_v0  ;;  %v1725_v3 = vpop.f32.mrf.mxu3 }
 0x20a   :  { %v1438_v4 = vpop.f32.mrf.mxu1  ;;  %2240 = vst.msk [vmem:[%s4740_s3 + $0xbc] sm:$0xf] %vm2192_vm3, %v2014_v1  ;;  %v1726_v5 = vadd.f32 %v4476_v40, %v1725_v3 }
 0x20b   :  { %v1903_v6 = vmax.f32 %v1581_v2, 0.0  ;;  %v1439_v7 = vadd.f32 %v4476_v40, %v1438_v4  ;;  %v1298_v8 = vpop.f32.mrf.mxu0 }
 0x20c   :  { %v1299_v9 = vadd.f32 %v4476_v40, %v1298_v8  ;;  %v1961_v10 = vmax.f32 %v1726_v5, 0.0 }
 0x20d   :  { %v2128_v11 = vpack.c.bf16 %v1903_v6, %v1903_v6  ;;  %v1846_v12 = vmax.f32 %v1439_v7, 0.0 }
 0x20e   :  { %v1790_v13 = vmax.f32 %v1299_v9, 0.0  ;;  %v2186_v14 = vpack.c.bf16 %v1961_v10, %v1961_v10 }
 0x20f   :  { %2354 = vst.msk [vmem:[%s4740_s3 + $0x284] sm:$0xf] %vm2192_vm3, %v2128_v11  ;;  %v2071_v15 = vpack.c.bf16 %v1846_v12, %v1846_v12 }
 0x210   :  { %v1583_v16 = vpop.f32.mrf.mxu2  ;;  %v2015_v17 = vpack.c.bf16 %v1790_v13, %v1790_v13  ;;  %2412 = vst.msk [vmem:[%s4740_s3 + $0x36c] sm:$0xf] %vm2192_vm3, %v2186_v14 }
 0x211   :  { %2297 = vst.msk [vmem:[%s4740_s3 + $0x1a0] sm:$0xf] %vm2192_vm3, %v2071_v15  ;;  %v1584_v18 = vadd.f32 %v4476_v40, %v1583_v16  ;;  %v1728_v19 = vpop.f32.mrf.mxu3 }
 0x212   :  { %v1440_v20 = vpop.f32.mrf.mxu1  ;;  %2241 = vst.msk [vmem:[%s4740_s3 + $0xc0] sm:$0xf] %vm2192_vm3, %v2015_v17  ;;  %v1729_v21 = vadd.f32 %v4476_v40, %v1728_v19 }
 0x213   :  { %v1904_v22 = vmax.f32 %v1584_v18, 0.0  ;;  %v1441_v23 = vadd.f32 %v4476_v40, %v1440_v20  ;;  %v1300_v24 = vpop.f32.mrf.mxu0 }
 0x214   :  { %v1301_v25 = vadd.f32 %v4476_v40, %v1300_v24  ;;  %v1962_v26 = vmax.f32 %v1729_v21, 0.0 }
 0x215   :  { %v2129_v27 = vpack.c.bf16 %v1904_v22, %v1904_v22  ;;  %v1847_v28 = vmax.f32 %v1441_v23, 0.0 }
 0x216   :  { %v1791_v29 = vmax.f32 %v1301_v25, 0.0  ;;  %v2187_v30 = vpack.c.bf16 %v1962_v26, %v1962_v26 }
 0x217   :  { %2355 = vst.msk [vmem:[%s4740_s3 + $0x288] sm:$0xf] %vm2192_vm3, %v2129_v27  ;;  %v2072_v31 = vpack.c.bf16 %v1847_v28, %v1847_v28 }
 0x218   :  { %v1585_v32 = vpop.f32.mrf.mxu2  ;;  %v2016_v33 = vpack.c.bf16 %v1791_v29, %v1791_v29  ;;  %2413 = vst.msk [vmem:[%s4740_s3 + $0x370] sm:$0xf] %vm2192_vm3, %v2187_v30 }
 0x219   :  { %2298 = vst.msk [vmem:[%s4740_s3 + $0x1a4] sm:$0xf] %vm2192_vm3, %v2072_v31  ;;  %v1586_v34 = vadd.f32 %v4476_v40, %v1585_v32  ;;  %v1730_v35 = vpop.f32.mrf.mxu3 }
 0x21a   :  { %v1443_v36 = vpop.f32.mrf.mxu1  ;;  %2242 = vst.msk [vmem:[%s4740_s3 + $0xc4] sm:$0xf] %vm2192_vm3, %v2016_v33  ;;  %v1731_v37 = vadd.f32 %v4476_v40, %v1730_v35 }
 0x21b   :  { %v1905_v38 = vmax.f32 %v1586_v34, 0.0  ;;  %v1444_v39 = vadd.f32 %v4476_v40, %v1443_v36  ;;  %v1303_v41 = vpop.f32.mrf.mxu0 }
 0x21c   :  { %v1304_v42 = vadd.f32 %v4476_v40, %v1303_v41  ;;  %v1963_v43 = vmax.f32 %v1731_v37, 0.0 }
 0x21d   :  { %v2130_v44 = vpack.c.bf16 %v1905_v38, %v1905_v38  ;;  %v1848_v45 = vmax.f32 %v1444_v39, 0.0 }
 0x21e   :  { %v1792_v46 = vmax.f32 %v1304_v42, 0.0  ;;  %v2188_v47 = vpack.c.bf16 %v1963_v43, %v1963_v43 }
 0x21f   :  { %2356 = vst.msk [vmem:[%s4740_s3 + $0x28c] sm:$0xf] %vm2192_vm3, %v2130_v44  ;;  %v2073_v48 = vpack.c.bf16 %v1848_v45, %v1848_v45 }
 0x220   :  { %v1588_v49 = vpop.f32.mrf.mxu2  ;;  %v2017_v50 = vpack.c.bf16 %v1792_v46, %v1792_v46  ;;  %2414 = vst.msk [vmem:[%s4740_s3 + $0x374] sm:$0xf] %vm2192_vm3, %v2188_v47 }
 0x221   :  { %2299 = vst.msk [vmem:[%s4740_s3 + $0x1a8] sm:$0xf] %vm2192_vm3, %v2073_v48  ;;  %v1589_v51 = vadd.f32 %v4476_v40, %v1588_v49  ;;  %v1733_v52 = vpop.f32.mrf.mxu3 }
 0x222   :  { %v1445_v53 = vpop.f32.mrf.mxu1  ;;  %2243 = vst.msk [vmem:[%s4740_s3 + $0xc8] sm:$0xf] %vm2192_vm3, %v2017_v50  ;;  %v1734_v54 = vadd.f32 %v4476_v40, %v1733_v52 }
 0x223   :  { %v1906_v55 = vmax.f32 %v1589_v51, 0.0  ;;  %v1446_v56 = vadd.f32 %v4476_v40, %v1445_v53  ;;  %v1305_v57 = vpop.f32.mrf.mxu0 }
 0x224   :  { %v1306_v58 = vadd.f32 %v4476_v40, %v1305_v57  ;;  %v1964_v59 = vmax.f32 %v1734_v54, 0.0 }
 0x225   :  { %v2131_v60 = vpack.c.bf16 %v1906_v55, %v1906_v55  ;;  %v1849_v61 = vmax.f32 %v1446_v56, 0.0 }
 0x226   :  { %v1793_v62 = vmax.f32 %v1306_v58, 0.0  ;;  %v2189_v63 = vpack.c.bf16 %v1964_v59, %v1964_v59 }
 0x227   :  { %2357 = vst.msk [vmem:[%s4740_s3 + $0x290] sm:$0xf] %vm2192_vm3, %v2131_v60  ;;  %v2074_v0 = vpack.c.bf16 %v1849_v61, %v1849_v61 }
 0x228   :  { %v1590_v1 = vpop.f32.mrf.mxu2  ;;  %v2018_v2 = vpack.c.bf16 %v1793_v62, %v1793_v62  ;;  %2415 = vst.msk [vmem:[%s4740_s3 + $0x378] sm:$0xf] %vm2192_vm3, %v2189_v63 }
 0x229   :  { %2300 = vst.msk [vmem:[%s4740_s3 + $0x1ac] sm:$0xf] %vm2192_vm3, %v2074_v0  ;;  %v1591_v3 = vadd.f32 %v4476_v40, %v1590_v1  ;;  %v1735_v4 = vpop.f32.mrf.mxu3 }
 0x22a   :  { %v1448_v5 = vpop.f32.mrf.mxu1  ;;  %2244 = vst.msk [vmem:[%s4740_s3 + $0xcc] sm:$0xf] %vm2192_vm3, %v2018_v2  ;;  %v1736_v6 = vadd.f32 %v4476_v40, %v1735_v4 }
 0x22b   :  { %v1907_v7 = vmax.f32 %v1591_v3, 0.0  ;;  %v1449_v8 = vadd.f32 %v4476_v40, %v1448_v5  ;;  %v1308_v9 = vpop.f32.mrf.mxu0 }
 0x22c   :  { %v1309_v10 = vadd.f32 %v4476_v40, %v1308_v9  ;;  %v1965_v11 = vmax.f32 %v1736_v6, 0.0 }
 0x22d   :  { %v2132_v12 = vpack.c.bf16 %v1907_v7, %v1907_v7  ;;  %v1850_v13 = vmax.f32 %v1449_v8, 0.0 }
 0x22e   :  { %v1794_v14 = vmax.f32 %v1309_v10, 0.0  ;;  %v2190_v15 = vpack.c.bf16 %v1965_v11, %v1965_v11 }
 0x22f   :  { %2358 = vst.msk [vmem:[%s4740_s3 + $0x294] sm:$0xf] %vm2192_vm3, %v2132_v12  ;;  %v2075_v16 = vpack.c.bf16 %v1850_v13, %v1850_v13 }
 0x230   :  { %v1593_v17 = vpop.f32.mrf.mxu2  ;;  %v2019_v18 = vpack.c.bf16 %v1794_v14, %v1794_v14  ;;  %2416 = vst.msk [vmem:[%s4740_s3 + $0x37c] sm:$0xf] %vm2192_vm3, %v2190_v15 }
 0x231   :  { %2301 = vst.msk [vmem:[%s4740_s3 + $0x1b0] sm:$0xf] %vm2192_vm3, %v2075_v16  ;;  %v1594_v19 = vadd.f32 %v4476_v40, %v1593_v17  ;;  %v1738_v20 = vpop.f32.mrf.mxu3 }
 0x232   :  { %v1450_v21 = vpop.f32.mrf.mxu1  ;;  %2245 = vst.msk [vmem:[%s4740_s3 + $0xd0] sm:$0xf] %vm2192_vm3, %v2019_v18  ;;  %v1739_v22 = vadd.f32 %v4476_v40, %v1738_v20 }
 0x233   :  { %v1908_v23 = vmax.f32 %v1594_v19, 0.0  ;;  %v1451_v24 = vadd.f32 %v4476_v40, %v1450_v21  ;;  %v1310_v25 = vpop.f32.mrf.mxu0 }
 0x234   :  { %v1311_v26 = vadd.f32 %v4476_v40, %v1310_v25  ;;  %v1966_v27 = vmax.f32 %v1739_v22, 0.0 }
 0x235   :  { %v2133_v28 = vpack.c.bf16 %v1908_v23, %v1908_v23  ;;  %v1851_v29 = vmax.f32 %v1451_v24, 0.0 }
 0x236   :  { %v1795_v30 = vmax.f32 %v1311_v26, 0.0  ;;  %v2191_v31 = vpack.c.bf16 %v1966_v27, %v1966_v27 }
 0x237   :  { %2359 = vst.msk [vmem:[%s4740_s3 + $0x298] sm:$0xf] %vm2192_vm3, %v2133_v28  ;;  %v2076_v32 = vpack.c.bf16 %v1851_v29, %v1851_v29 }
 0x238   :  { %v1595_v33 = vpop.f32.mrf.mxu2  ;;  %v2020_v34 = vpack.c.bf16 %v1795_v30, %v1795_v30  ;;  %2417 = vst.msk [vmem:[%s4740_s3 + $0x380] sm:$0xf] %vm2192_vm3, %v2191_v31 }
 0x239   :  { %2302 = vst.msk [vmem:[%s4740_s3 + $0x1b4] sm:$0xf] %vm2192_vm3, %v2076_v32  ;;  %v1596_v35 = vadd.f32 %v4476_v40, %v1595_v33  ;;  %v1740_v36 = vpop.f32.mrf.mxu3 }
 0x23a   :  { %v1453_v37 = vpop.f32.mrf.mxu1  ;;  %2246 = vst.msk [vmem:[%s4740_s3 + $0xd4] sm:$0xf] %vm2192_vm3, %v2020_v34 }
 0x23b   :  { %v1909_v38 = vmax.f32 %v1596_v35, 0.0  ;;  %v1454_v39 = vadd.f32 %v4476_v40, %v1453_v37  ;;  %v1313_v41 = vpop.f32.mrf.mxu0 }
 0x23c   :  { %v1314_v42 = vadd.f32 %v4476_v40, %v1313_v41 }
 0x23d   :  { %v2134_v43 = vpack.c.bf16 %v1909_v38, %v1909_v38  ;;  %v1852_v44 = vmax.f32 %v1454_v39, 0.0 }
 0x23e   :  { %v1796_v45 = vmax.f32 %v1314_v42, 0.0 }
 0x23f   :  { %2360 = vst.msk [vmem:[%s4740_s3 + $0x29c] sm:$0xf] %vm2192_vm3, %v2134_v43  ;;  %v2077_v46 = vpack.c.bf16 %v1852_v44, %v1852_v44 }
 0x240   :  { %v1598_v47 = vpop.f32.mrf.mxu2  ;;  %v2021_v48 = vpack.c.bf16 %v1796_v45, %v1796_v45 }
 0x241   :  { %2303 = vst.msk [vmem:[%s4740_s3 + $0x1b8] sm:$0xf] %vm2192_vm3, %v2077_v46  ;;  %v1599_v49 = vadd.f32 %v4476_v40, %v1598_v47 }
 0x242   :  { %v1455_v50 = vpop.f32.mrf.mxu1  ;;  %2247 = vst.msk [vmem:[%s4740_s3 + $0xd8] sm:$0xf] %vm2192_vm3, %v2021_v48 }
 0x243   :  { %v1910_v51 = vmax.f32 %v1599_v49, 0.0  ;;  %v1456_v52 = vadd.f32 %v4476_v40, %v1455_v50  ;;  %v1315_v53 = vpop.f32.mrf.mxu0 }
 0x244   :  { %v1316_v54 = vadd.f32 %v4476_v40, %v1315_v53 }
 0x245   :  { %v2135_v55 = vpack.c.bf16 %v1910_v51, %v1910_v51  ;;  %v1853_v56 = vmax.f32 %v1456_v52, 0.0 }
 0x246   :  { %v1797_v57 = vmax.f32 %v1316_v54, 0.0 }
 0x247   :  { %2361 = vst.msk [vmem:[%s4740_s3 + $0x2a0] sm:$0xf] %vm2192_vm3, %v2135_v55  ;;  %v2078_v58 = vpack.c.bf16 %v1853_v56, %v1853_v56 }
 0x248   :  { %v1600_v59 = vpop.f32.mrf.mxu2  ;;  %v2022_v60 = vpack.c.bf16 %v1797_v57, %v1797_v57 }
 0x249   :  { %2304 = vst.msk [vmem:[%s4740_s3 + $0x1bc] sm:$0xf] %vm2192_vm3, %v2078_v58  ;;  %v1601_v61 = vadd.f32 %v4476_v40, %v1600_v59 }
 0x24a   :  { %v1458_v62 = vpop.f32.mrf.mxu1  ;;  %2248 = vst.msk [vmem:[%s4740_s3 + $0xdc] sm:$0xf] %vm2192_vm3, %v2022_v60 }
 0x24b   :  { %v1911_v63 = vmax.f32 %v1601_v61, 0.0  ;;  %v1459_v0 = vadd.f32 %v4476_v40, %v1458_v62 }
 0x24d   :  { %v2136_v1 = vpack.c.bf16 %v1911_v63, %v1911_v63  ;;  %v1854_v2 = vmax.f32 %v1459_v0, 0.0 }
 0x24f   :  { %2362 = vst.msk [vmem:[%s4740_s3 + $0x2a4] sm:$0xf] %vm2192_vm3, %v2136_v1  ;;  %v2079_v3 = vpack.c.bf16 %v1854_v2, %v1854_v2 }
 0x250   :  { %v1603_v4 = vpop.f32.mrf.mxu2 }
 0x251   :  { %2305 = vst.msk [vmem:[%s4740_s3 + $0x1c0] sm:$0xf] %vm2192_vm3, %v2079_v3  ;;  %v1604_v5 = vadd.f32 %v4476_v40, %v1603_v4 }
 0x252   :  { %v1460_v6 = vpop.f32.mrf.mxu1 }
 0x253   :  { %v1912_v7 = vmax.f32 %v1604_v5, 0.0  ;;  %v1461_v8 = vadd.f32 %v4476_v40, %v1460_v6 }
 0x255   :  { %v2137_v9 = vpack.c.bf16 %v1912_v7, %v1912_v7  ;;  %v1855_v10 = vmax.f32 %v1461_v8, 0.0 }
 0x257   :  { %2363 = vst.msk [vmem:[%s4740_s3 + $0x2a8] sm:$0xf] %vm2192_vm3, %v2137_v9  ;;  %v2080_v11 = vpack.c.bf16 %v1855_v10, %v1855_v10 }
 0x258   :  { %v1605_v12 = vpop.f32.mrf.mxu2 }
 0x259   :  { %2306 = vst.msk [vmem:[%s4740_s3 + $0x1c4] sm:$0xf] %vm2192_vm3, %v2080_v11  ;;  %v1606_v13 = vadd.f32 %v4476_v40, %v1605_v12 }
 0x25b   :  { %v1913_v14 = vmax.f32 %v1606_v13, 0.0 }
 0x25d   :  { %v2138_v15 = vpack.c.bf16 %v1913_v14, %v1913_v14 }
 0x25f   :  { %2364 = vst.msk [vmem:[%s4740_s3 + $0x2ac] sm:$0xf] %vm2192_vm3, %v2138_v15 }

// kernel: cnn_forward.5
= control target key start
LH: loop header
LB: loop body
LE: loop exit
PB: predicated region body
PF: predicated region fallthrough
CT: control target
= control target key end

     0   :  { %vm631_vm0 = vcmask 261120   ;;  %vm1204_vm1 = vcmask 519168   ;;  %s2623_s1 = inlined_call_operand.vmem [shape: bf16[288,64], index: 1, kind: input, shape index: {}]   ;;  %s2624_s0 = inlined_call_operand.vmem [shape: bf16[392,288], index: 0, kind: input, shape index: {}]   ;;  %s2625_s2 = inlined_call_operand.vmem [shape: f32[1,64], index: 2, kind: input, shape index: {}]   ;;  %s2626_s3 = inlined_call_operand.vmem [shape: bf16[392,64], index: 3, kind: output, shape index: {}]  }
   0x1   :  { %v1722_v0 = vld [vmem:[%s2623_s1 + $0x38] sm:$0xff]  ;;  %v1782_v2 = vld [vmem:[%s2623_s1 + $0x88] sm:$0xff]  ;;  %v1721_v3 = vld [vmem:[%s2623_s1 + $0x30] sm:$0xff] }
   0x2   :  { %v1730_v1 = vld [vmem:[%s2623_s1 + $0x78] sm:$0xff]  ;;  %707 = vmatpush.bf16.msra.mxu0 %v1722_v0  ;;  %1733 = vmatpush.bf16.msra.mxu3 %v1722_v0  ;;  %v1729_v4 = vld [vmem:[%s2623_s1 + $0x70] sm:$0xff]  ;;  %v1794_v5 = vld [vmem:[%s2623_s1 + $0x80] sm:$0xff] }
   0x3   :  { %840 = vmatpush.bf16.msra.mxu1 %v1730_v1  ;;  %979 = vmatpush.bf16.msra.mxu2 %v1782_v2  ;;  %v1268_v6 = vld [vmem:[%s2624_s0 + $0x8] sm:$0xf]  ;;  %v1645_v7 = vld [vmem:[%s2624_s0 + $0x10] sm:$0xf0]  ;;  %v1719_v11 = vld [vmem:[%s2623_s1 + $0x20] sm:$0xff] }
   0x4   :  { %v1269_v8 = vor.u32 %v1645_v7, %v1268_v6  ;;  %v1720_v9 = vld [vmem:[%s2623_s1 + $0x28] sm:$0xff]  ;;  %v1727_v12 = vld [vmem:[%s2623_s1 + $0x60] sm:$0xff]  ;;  %v1718_v13 = vld [vmem:[%s2623_s1 + $0x18] sm:$0xff] }
   0x5   :  { %v1728_v10 = vld [vmem:[%s2623_s1 + $0x68] sm:$0xff]  ;;  %v1726_v14 = vld [vmem:[%s2623_s1 + $0x58] sm:$0xff]  ;;  %v1717_v15 = vld [vmem:[%s2623_s1 + $0x10] sm:$0xff] }
   0x6   :  { %708 = vmatpush.bf16.msra.mxu0 %v1721_v3  ;;  %1734 = vmatpush.bf16.msra.mxu3 %v1721_v3  ;;  %v1725_v16 = vld [vmem:[%s2623_s1 + $0x50] sm:$0xff]  ;;  %v1280_v17 = vld [vmem:[%s2624_s0 + $0x20] sm:$0xf]  ;;  %v1648_v18 = vld [vmem:[%s2624_s0 + $0x28] sm:$0xf0] }
   0x7   :  { %841 = vmatpush.bf16.msra.mxu1 %v1729_v4  ;;  %980 = vmatpush.bf16.msra.mxu2 %v1794_v5  ;;  %v1281_v19 = vor.u32 %v1648_v18, %v1280_v17  ;;  %v1716_v20 = vld [vmem:[%s2623_s1 + $0x8] sm:$0xff]  ;;  %v1715_v22 = vld [vmem:[%s2623_s1] sm:$0xff]  ;;  %v1701_v27 = vld [vmem:[%s2624_s0 + $0x1d0] sm:$0xf0] }
   0x8   :  { %v1724_v21 = vld [vmem:[%s2623_s1 + $0x48] sm:$0xff]  ;;  %v1723_v23 = vld [vmem:[%s2623_s1 + $0x40] sm:$0xff]  ;;  %v1262_v29 = vld [vmem:[%s2624_s0 + $0xc] sm:$0xf0] }
   0x9   :  { %v1260_v24 = vld [vmem:[%s2624_s0] sm:$0xf]  ;;  %v1644_v25 = vld [vmem:[%s2624_s0 + $0x8] sm:$0xf0]  ;;  %v1488_v26 = vld [vmem:[%s2624_s0 + $0x1c8] sm:$0xf] }
   0xa   :  { %1618 = vmatmul.msk.bf16.vlgmr.msra.gmra.mxu2 %vm631_vm0, %v1269_v8  ;;  %709 = vmatpush.bf16.msra.mxu0 %v1720_v9  ;;  %v1643_v28 = vld [vmem:[%s2624_s0 + $0x4] sm:$0xf]  ;;  %v1261_v30 = vor.u32 %v1644_v25, %v1260_v24  ;;  %v1489_v31 = vor.u32 %v1701_v27, %v1488_v26  ;;  %v1292_v33 = vld [vmem:[%s2624_s0 + $0x38] sm:$0xf]  ;;  %v1500_v38 = vld [vmem:[%s2624_s0 + $0x1e0] sm:$0xf] }
   0xb   :  { %1735 = vmatpush.bf16.msra.mxu3 %v1720_v9  ;;  %842 = vmatpush.bf16.msra.mxu1 %v1728_v10  ;;  %v1265_v32 = vor.u32 %v1643_v28, %v1262_v29  ;;  %v1651_v34 = vld [vmem:[%s2624_s0 + $0x40] sm:$0xf0]  ;;  %v1272_v36 = vld [vmem:[%s2624_s0 + $0x18] sm:$0xf]  ;;  %v1704_v39 = vld [vmem:[%s2624_s0 + $0x1e8] sm:$0xf0] }
   0xc   :  { %v1293_v35 = vor.u32 %v1651_v34, %v1292_v33  ;;  %v1647_v37 = vld [vmem:[%s2624_s0 + $0x20] sm:$0xf0]  ;;  %v1646_v40 = vld [vmem:[%s2624_s0 + $0x1c] sm:$0xf]  ;;  %v1274_v41 = vld [vmem:[%s2624_s0 + $0x24] sm:$0xf0]  ;;  %v1501_v43 = vor.u32 %v1704_v39, %v1500_v38 }
   0xd   :  { %v1273_v42 = vor.u32 %v1647_v37, %v1272_v36  ;;  %v1277_v44 = vor.u32 %v1646_v40, %v1274_v41  ;;  %v1304_v45 = vld [vmem:[%s2624_s0 + $0x50] sm:$0xf]  ;;  %v1654_v46 = vld [vmem:[%s2624_s0 + $0x58] sm:$0xf0]  ;;  %v1512_v50 = vld [vmem:[%s2624_s0 + $0x1f8] sm:$0xf] }
   0xe   :  { %710 = vmatpush.bf16.msra.mxu0 %v1719_v11  ;;  %v1305_v47 = vor.u32 %v1654_v46, %v1304_v45  ;;  %v1284_v48 = vld [vmem:[%s2624_s0 + $0x30] sm:$0xf]  ;;  %v1650_v49 = vld [vmem:[%s2624_s0 + $0x38] sm:$0xf0]  ;;  %v1707_v51 = vld [vmem:[%s2624_s0 + $0x200] sm:$0xf0] }
   0xf   :  { %1736 = vmatpush.bf16.msra.mxu3 %v1719_v11  ;;  %843 = vmatpush.bf16.msra.mxu1 %v1727_v12  ;;  %v1649_v52 = vld [vmem:[%s2624_s0 + $0x34] sm:$0xf]  ;;  %v1286_v53 = vld [vmem:[%s2624_s0 + $0x3c] sm:$0xf0]  ;;  %v1285_v54 = vor.u32 %v1650_v49, %v1284_v48  ;;  %v1513_v55 = vor.u32 %v1707_v51, %v1512_v50  ;;  %v1316_v57 = vld [vmem:[%s2624_s0 + $0x68] sm:$0xf] }
  0x10   :  { %v1289_v56 = vor.u32 %v1649_v52, %v1286_v53  ;;  %v1657_v58 = vld [vmem:[%s2624_s0 + $0x70] sm:$0xf0]  ;;  %v1296_v60 = vld [vmem:[%s2624_s0 + $0x48] sm:$0xf]  ;;  %v1524_v62 = vld [vmem:[%s2624_s0 + $0x210] sm:$0xf] }
  0x11   :  { %v1317_v59 = vor.u32 %v1657_v58, %v1316_v57  ;;  %v1653_v61 = vld [vmem:[%s2624_s0 + $0x50] sm:$0xf0]  ;;  %v1710_v63 = vld [vmem:[%s2624_s0 + $0x218] sm:$0xf0]  ;;  %v1652_v0 = vld [vmem:[%s2624_s0 + $0x4c] sm:$0xf] }
  0x12   :  { %711 = vmatpush.bf16.msra.mxu0 %v1718_v13  ;;  %v1525_v3 = vor.u32 %v1710_v63, %v1524_v62  ;;  %v1660_v6 = vld [vmem:[%s2624_s0 + $0x88] sm:$0xf0]  ;;  %v1308_v8 = vld [vmem:[%s2624_s0 + $0x60] sm:$0xf]  ;;  %v1713_v11 = vld [vmem:[%s2624_s0 + $0x230] sm:$0xf0] }
  0x13   :  { %1737 = vmatpush.bf16.msra.mxu3 %v1718_v13  ;;  %844 = vmatpush.bf16.msra.mxu1 %v1726_v14  ;;  %v1656_v9 = vld [vmem:[%s2624_s0 + $0x68] sm:$0xf0]  ;;  %v1310_v13 = vld [vmem:[%s2624_s0 + $0x6c] sm:$0xf0]  ;;  %v1340_v17 = vld [vmem:[%s2624_s0 + $0x98] sm:$0xf] }
  0x14   :  { %v1663_v18 = vld [vmem:[%s2624_s0 + $0xa0] sm:$0xf0]  ;;  %v1658_v24 = vld [vmem:[%s2624_s0 + $0x7c] sm:$0xf]  ;;  %v1322_v25 = vld [vmem:[%s2624_s0 + $0x84] sm:$0xf0] }
  0x15   :  { %v1325_v28 = vor.u32 %v1658_v24, %v1322_v25  ;;  %v1352_v29 = vld [vmem:[%s2624_s0 + $0xb0] sm:$0xf]  ;;  %v1662_v33 = vld [vmem:[%s2624_s0 + $0x98] sm:$0xf0]  ;;  %v1661_v34 = vld [vmem:[%s2624_s0 + $0x94] sm:$0xf] }
  0x16   :  { %712 = vmatpush.bf16.msra.mxu0 %v1717_v15  ;;  %v1700_v36 = vld [vmem:[%s2624_s0 + $0x1cc] sm:$0xf]  ;;  %v1490_v37 = vld [vmem:[%s2624_s0 + $0x1d4] sm:$0xf0]  ;;  %v1364_v41 = vld [vmem:[%s2624_s0 + $0xc8] sm:$0xf] }
  0x17   :  { %1738 = vmatpush.bf16.msra.mxu3 %v1717_v15  ;;  %845 = vmatpush.bf16.msra.mxu1 %v1725_v16  ;;  %v1493_v40 = vor.u32 %v1700_v36, %v1490_v37  ;;  %v1665_v45 = vld [vmem:[%s2624_s0 + $0xb0] sm:$0xf0]  ;;  %v1664_v46 = vld [vmem:[%s2624_s0 + $0xac] sm:$0xf]  ;;  %v1703_v48 = vld [vmem:[%s2624_s0 + $0x1e4] sm:$0xf] }
  0x18   :  { %v1502_v49 = vld [vmem:[%s2624_s0 + $0x1ec] sm:$0xf0]  ;;  %v2051_v58 = vld [vmem:[%s2625_s2] ss:$0 sm:$0xff]  ;;  %v1706_v63 = vld [vmem:[%s2624_s0 + $0x1fc] sm:$0xf] }
  0x19   :  { %v1505_v53 = vor.u32 %v1703_v48, %v1502_v49  ;;  %v1358_v62 = vld [vmem:[%s2624_s0 + $0xcc] sm:$0xf0]  ;;  %v1670_v24 = vld [vmem:[%s2624_s0 + $0xdc] sm:$0xf] }
  0x1a   :  { %1619 = vmatmul.msk.bf16.gmra.mxu2 %vm631_vm0, %v1281_v19  ;;  %713 = vmatpush.bf16.msra.mxu0 %v1716_v20  ;;  %v1341_v19 = vor.u32 %v1663_v18, %v1340_v17 }
  0x1b   :  { %1739 = vmatpush.bf16.msra.mxu3 %v1716_v20  ;;  %846 = vmatpush.bf16.msra.mxu1 %v1724_v21  ;;  %v1976_v20 = vld [vmem:[%s2624_s0 + $0x240] sm:$0xff] }
  0x1e   :  { %714 = vmatpush.bf16.msra.mxu0 %v1715_v22 }
  0x1f   :  { %1740 = vmatpush.bf16.msra.mxu3 %v1715_v22  ;;  %847 = vmatpush.bf16.msra.mxu1 %v1723_v23  ;;  %v1659_v22 = vld [vmem:[%s2624_s0 + $0x80] sm:$0xf0] }
  0x21   :  { %715 = vmatmul.bf16.vlgmr.msra.gmra.mxu0 %v1261_v30  ;;  %v1666_v30 = vld [vmem:[%s2624_s0 + $0xb8] sm:$0xf0] }
  0x22   :  { %810 = vmatmul.bf16.vlgmr.msra.gmra.mxu3 %v1489_v31  ;;  %848 = vmatmul.bf16.vlgmr.msra.gmra.mxu1 %v1265_v32  ;;  %v1353_v31 = vor.u32 %v1666_v30, %v1352_v29  ;;  %v1332_v32 = vld [vmem:[%s2624_s0 + $0x90] sm:$0xf] }
  0x23   :  { %1741 = vmatpush.bf16.msrb.mxu3 %v1730_v1  ;;  %v1298_v1 = vld [vmem:[%s2624_s0 + $0x54] sm:$0xf0]  ;;  %v1333_v38 = vor.u32 %v1662_v33, %v1332_v32 }
  0x27   :  { %1742 = vmatpush.bf16.msrb.mxu3 %v1729_v4  ;;  %v1301_v4 = vor.u32 %v1652_v0, %v1298_v1  ;;  %v1514_v0 = vld [vmem:[%s2624_s0 + $0x204] sm:$0xf0] }
  0x2a   :  { %1620 = vmatmul.msk.bf16.gmra.mxu2 %vm631_vm0, %v1293_v35  ;;  %v1334_v35 = vld [vmem:[%s2624_s0 + $0x9c] sm:$0xf0] }
  0x2b   :  { %1743 = vmatpush.bf16.msrb.mxu3 %v1728_v10  ;;  %v1536_v10 = vld [vmem:[%s2624_s0 + $0x228] sm:$0xf]  ;;  %v1337_v39 = vor.u32 %v1661_v34, %v1334_v35 }
  0x2c   :  { %v1537_v15 = vor.u32 %v1713_v11, %v1536_v10  ;;  %v1388_v10 = vld [vmem:[%s2624_s0 + $0xf8] sm:$0xf]  ;;  %v1675_v11 = vld [vmem:[%s2624_s0 + $0x100] sm:$0xf0] }
  0x2f   :  { %1744 = vmatpush.bf16.msrb.mxu3 %v1727_v12  ;;  %v1655_v12 = vld [vmem:[%s2624_s0 + $0x64] sm:$0xf] }
  0x31   :  { %720 = vmatmul.bf16.gmra.mxu0 %v1273_v42  ;;  %v1669_v42 = vld [vmem:[%s2624_s0 + $0xd0] sm:$0xf0] }
  0x32   :  { %815 = vmatmul.bf16.gmra.mxu3 %v1501_v43  ;;  %853 = vmatmul.bf16.gmra.mxu1 %v1277_v44  ;;  %v1365_v43 = vor.u32 %v1669_v42, %v1364_v41  ;;  %v1344_v44 = vld [vmem:[%s2624_s0 + $0xa8] sm:$0xf]  ;;  %v1400_v41 = vld [vmem:[%s2624_s0 + $0x110] sm:$0xf]  ;;  %v1678_v42 = vld [vmem:[%s2624_s0 + $0x118] sm:$0xf0] }
  0x33   :  { %1745 = vmatpush.bf16.msrb.mxu3 %v1726_v14  ;;  %v1309_v14 = vor.u32 %v1656_v9, %v1308_v8  ;;  %v1345_v51 = vor.u32 %v1665_v45, %v1344_v44 }
  0x37   :  { %1746 = vmatpush.bf16.msrb.mxu3 %v1725_v16  ;;  %v1313_v16 = vor.u32 %v1655_v12, %v1310_v13 }
  0x3a   :  { %1621 = vmatmul.msk.bf16.gmra.mxu2 %vm631_vm0, %v1305_v47  ;;  %v1346_v47 = vld [vmem:[%s2624_s0 + $0xb4] sm:$0xf0] }
  0x3b   :  { %1747 = vmatpush.bf16.msrb.mxu3 %v1724_v21  ;;  %v1320_v21 = vld [vmem:[%s2624_s0 + $0x78] sm:$0xf]  ;;  %v1349_v52 = vor.u32 %v1664_v46, %v1346_v47  ;;  %v1401_v47 = vor.u32 %v1678_v42, %v1400_v41 }
  0x3c   :  { %v1321_v26 = vor.u32 %v1659_v22, %v1320_v21  ;;  %v1368_v22 = vld [vmem:[%s2624_s0 + $0xd8] sm:$0xf] }
  0x3f   :  { %1748 = vmatpush.bf16.msrb.mxu3 %v1723_v23  ;;  %v395_v23 = vunpack.c.l.b16 %v1976_v20 }
  0x41   :  { %725 = vmatmul.bf16.gmra.mxu0 %v1285_v54  ;;  %v470_v27 = vpack.c.b16 %v395_v23, %v395_v23  ;;  %v1376_v54 = vld [vmem:[%s2624_s0 + $0xe0] sm:$0xf]  ;;  %v1671_v23 = vld [vmem:[%s2624_s0 + $0xe0] sm:$0xf0] }
  0x42   :  { %820 = vmatmul.bf16.gmra.mxu3 %v1513_v55  ;;  %858 = vmatmul.bf16.gmra.mxu1 %v1289_v56  ;;  %v1672_v55 = vld [vmem:[%s2624_s0 + $0xe8] sm:$0xf0]  ;;  %v1369_v32 = vor.u32 %v1671_v23, %v1368_v22  ;;  %v1677_v22 = vld [vmem:[%s2624_s0 + $0x110] sm:$0xf0]  ;;  %v396_v23 = vunpack.c.h.b16 %v1976_v20 }
  0x43   :  { %1749 = vmatpush.bf16.msra.mxu3 %v1782_v2  ;;  %v1297_v2 = vor.u32 %v1653_v61, %v1296_v60  ;;  %v1377_v57 = vor.u32 %v1672_v55, %v1376_v54  ;;  %v1668_v60 = vld [vmem:[%s2624_s0 + $0xc8] sm:$0xf0]  ;;  %v1667_v61 = vld [vmem:[%s2624_s0 + $0xc4] sm:$0xf]  ;;  %v1673_v54 = vld [vmem:[%s2624_s0 + $0xf4] sm:$0xf] }
  0x47   :  { %1750 = vmatpush.bf16.msra.mxu3 %v1794_v5  ;;  %v1328_v5 = vld [vmem:[%s2624_s0 + $0x80] sm:$0xf] }
  0x48   :  { %v1329_v7 = vor.u32 %v1660_v6, %v1328_v5  ;;  %v1517_v5 = vor.u32 %v1706_v63, %v1514_v0 }
  0x4a   :  { %1622 = vmatmul.msk.bf16.gmra.mxu2 %vm631_vm0, %v1317_v59  ;;  %v1356_v59 = vld [vmem:[%s2624_s0 + $0xc0] sm:$0xf] }
  0x51   :  { %730 = vmatmul.bf16.gmra.mxu0 %v1297_v2  ;;  %v1357_v2 = vor.u32 %v1668_v60, %v1356_v59  ;;  %v1538_v59 = vld [vmem:[%s2624_s0 + $0x234] sm:$0xf0] }
  0x52   :  { %825 = vmatmul.bf16.gmra.mxu3 %v1525_v3  ;;  %863 = vmatmul.bf16.gmra.mxu1 %v1301_v4  ;;  %v1361_v4 = vor.u32 %v1667_v61, %v1358_v62 }
  0x5a   :  { %1623 = vmatmul.msk.bf16.gmra.mxu2 %vm631_vm0, %v1329_v7 }
  0x61   :  { %735 = vmatmul.bf16.gmra.mxu0 %v1309_v14 }
  0x62   :  { %830 = vmatmul.bf16.gmra.mxu3 %v1537_v15  ;;  %868 = vmatmul.bf16.gmra.mxu1 %v1313_v16  ;;  %v1389_v16 = vor.u32 %v1675_v11, %v1388_v10 }
  0x6a   :  { %1624 = vmatmul.msk.bf16.gmra.mxu2 %vm631_vm0, %v1341_v19 }
  0x71   :  { %740 = vmatmul.bf16.gmra.mxu0 %v1321_v26  ;;  %v1370_v26 = vld [vmem:[%s2624_s0 + $0xe4] sm:$0xf0] }
  0x72   :  { %835 = vmatmul.bf16.gmra.mxu3 %v470_v27  ;;  %873 = vmatmul.bf16.gmra.mxu1 %v1325_v28  ;;  %v1709_v27 = vld [vmem:[%s2624_s0 + $0x214] sm:$0xf]  ;;  %v1526_v28 = vld [vmem:[%s2624_s0 + $0x21c] sm:$0xf0]  ;;  %v1373_v34 = vor.u32 %v1670_v24, %v1370_v26  ;;  %v1394_v26 = vld [vmem:[%s2624_s0 + $0x114] sm:$0xf0] }
  0x73   :  { %v1529_v35 = vor.u32 %v1709_v27, %v1526_v28 }
  0x7a   :  { %1625 = vmatmul.msk.bf16.gmra.mxu2 %vm631_vm0, %v1353_v31 }
  0x81   :  { %745 = vmatmul.bf16.gmra.mxu0 %v1333_v38 }
  0x82   :  { %878 = vmatmul.bf16.gmra.mxu1 %v1337_v39  ;;  %943 = vmatmul.bf16.vlgmr.msrb.gmra.mxu3 %v1493_v40 }
  0x8a   :  { %1626 = vmatmul.msk.bf16.gmra.mxu2 %vm631_vm0, %v1365_v43 }
  0x8d   :  { %v982_v50 = vpop.f32.mrf.mxu2 }
  0x91   :  { %750 = vmatmul.bf16.gmra.mxu0 %v1345_v51 }
  0x92   :  { %883 = vmatmul.bf16.gmra.mxu1 %v1349_v52  ;;  %948 = vmatmul.bf16.gmra.mxu3 %v1505_v53  ;;  %v1380_v52 = vld [vmem:[%s2624_s0 + $0xf0] sm:$0xf]  ;;  %v1674_v53 = vld [vmem:[%s2624_s0 + $0xf8] sm:$0xf0] }
  0x93   :  { %v1381_v63 = vor.u32 %v1674_v53, %v1380_v52  ;;  %v1680_v52 = vld [vmem:[%s2624_s0 + $0x128] sm:$0xf0]  ;;  %v1679_v53 = vld [vmem:[%s2624_s0 + $0x124] sm:$0xf] }
  0x95   :  { %v984_v56 = vpop.f32.mrf.mxu2 }
  0x9a   :  { %1627 = vmatmul.msk.bf16.gmra.mxu2 %vm631_vm0, %v1377_v57  ;;  %v1712_v57 = vld [vmem:[%s2624_s0 + $0x22c] sm:$0xf] }
  0x9d   :  { %v987_v1 = vpop.f32.mrf.mxu2 }
  0x9e   :  { %v716_v3 = vpop.f32.mrf.mxu0 }
  0x9f   :  { %v717_v6 = vadd.f32 %v2051_v58, %v716_v3  ;;  %v849_v7 = vpop.f32.mrf.mxu1 }
  0xa1   :  { %v850_v8 = vadd.f32 %v849_v7, %v717_v6  ;;  %755 = vmatmul.bf16.gmra.mxu0 %v1357_v2  ;;  %v1541_v2 = vor.u32 %v1712_v57, %v1538_v59  ;;  %v1705_v57 = vld [vmem:[%s2624_s0 + $0x1f0] sm:$0xf0] }
  0xa2   :  { %888 = vmatmul.bf16.gmra.mxu1 %v1361_v4  ;;  %953 = vmatmul.bf16.gmra.mxu3 %v1517_v5 }
  0xa3   :  { %v983_v9 = vadd.f32 %v982_v50, %v850_v8  ;;  %v1412_v8 = vld [vmem:[%s2624_s0 + $0x128] sm:$0xf] }
  0xa5   :  { %v1106_v12 = vmax.f32 %v983_v9, 0.0  ;;  %v2079_v13 = vpop.f32.mrf.mxu3  ;;  %v989_v14 = vpop.f32.mrf.mxu2  ;;  %v1681_v9 = vld [vmem:[%s2624_s0 + $0x130] sm:$0xf0] }
  0xa6   :  { %v718_v15 = vpop.f32.mrf.mxu0 }
  0xa7   :  { %v1155_v17 = vpack.c.bf16 %v1106_v12, %v1106_v12  ;;  %v719_v18 = vadd.f32 %v2051_v58, %v718_v15  ;;  %v851_v19 = vpop.f32.mrf.mxu1  ;;  %v1413_v15 = vor.u32 %v1681_v9, %v1412_v8  ;;  %v1436_v8 = vld [vmem:[%s2624_s0 + $0x158] sm:$0xf]  ;;  %v1687_v9 = vld [vmem:[%s2624_s0 + $0x160] sm:$0xf0] }
  0xa9   :  { %1205 = vst.msk [vmem:[%s2626_s3] sm:$0xf] %vm1204_vm1, %v1155_v17  ;;  %v852_v21 = vadd.f32 %v851_v19, %v719_v18 }
  0xaa   :  { %1628 = vmatmul.msk.bf16.gmra.mxu2 %vm631_vm0, %v1389_v16 }
  0xab   :  { %v985_v25 = vadd.f32 %v984_v56, %v852_v21  ;;  %v1382_v56 = vld [vmem:[%s2624_s0 + $0xfc] sm:$0xf0]  ;;  %v1392_v21 = vld [vmem:[%s2624_s0 + $0x108] sm:$0xf] }
  0xad   :  { %v1107_v29 = vmax.f32 %v985_v25, 0.0  ;;  %v2105_v30 = vpop.f32.mrf.mxu3  ;;  %v992_v31 = vpop.f32.mrf.mxu2  ;;  %v1676_v25 = vld [vmem:[%s2624_s0 + $0x10c] sm:$0xf] }
  0xae   :  { %v721_v33 = vpop.f32.mrf.mxu0 }
  0xaf   :  { %v1156_v36 = vpack.c.bf16 %v1107_v29, %v1107_v29  ;;  %v722_v37 = vadd.f32 %v2051_v58, %v721_v33  ;;  %v854_v38 = vpop.f32.mrf.mxu1  ;;  %v1397_v33 = vor.u32 %v1676_v25, %v1394_v26  ;;  %v1418_v26 = vld [vmem:[%s2624_s0 + $0x144] sm:$0xf0] }
  0xb1   :  { %1206 = vst.msk [vmem:[%s2626_s3 + $0x4] sm:$0xf] %vm1204_vm1, %v1156_v36  ;;  %v855_v39 = vadd.f32 %v854_v38, %v722_v37  ;;  %760 = vmatmul.bf16.gmra.mxu0 %v1369_v32 }
  0xb2   :  { %893 = vmatmul.bf16.gmra.mxu1 %v1373_v34  ;;  %958 = vmatmul.bf16.gmra.mxu3 %v1529_v35  ;;  %v471_v34 = vpack.c.b16 %v396_v23, %v396_v23  ;;  %v1683_v23 = vld [vmem:[%s2624_s0 + $0x140] sm:$0xf0] }
  0xb3   :  { %v988_v40 = vadd.f32 %v987_v1, %v855_v39  ;;  %v1385_v1 = vor.u32 %v1673_v54, %v1382_v56  ;;  %v1424_v39 = vld [vmem:[%s2624_s0 + $0x140] sm:$0xf]  ;;  %v1508_v56 = vld [vmem:[%s2624_s0 + $0x1e8] sm:$0xf] }
  0xb5   :  { %v1108_v43 = vmax.f32 %v988_v40, 0.0  ;;  %v2118_v44 = vpop.f32.mrf.mxu3  ;;  %v994_v45 = vpop.f32.mrf.mxu2  ;;  %v1684_v40 = vld [vmem:[%s2624_s0 + $0x148] sm:$0xf0] }
  0xb6   :  { %v723_v46 = vpop.f32.mrf.mxu0 }
  0xb7   :  { %v1157_v48 = vpack.c.bf16 %v1108_v43, %v1108_v43  ;;  %v724_v49 = vadd.f32 %v2051_v58, %v723_v46  ;;  %v856_v50 = vpop.f32.mrf.mxu1  ;;  %v1425_v46 = vor.u32 %v1684_v40, %v1424_v39 }
  0xb9   :  { %1207 = vst.msk [vmem:[%s2626_s3 + $0x8] sm:$0xf] %vm1204_vm1, %v1157_v48  ;;  %v857_v51 = vadd.f32 %v856_v50, %v724_v49 }
  0xba   :  { %1629 = vmatmul.msk.bf16.gmra.mxu2 %vm631_vm0, %v1401_v47 }
  0xbb   :  { %v990_v55 = vadd.f32 %v989_v14, %v857_v51  ;;  %v1404_v51 = vld [vmem:[%s2624_s0 + $0x120] sm:$0xf] }
  0xbd   :  { %v1109_v60 = vmax.f32 %v990_v55, 0.0  ;;  %v2144_v61 = vpop.f32.mrf.mxu3  ;;  %v997_v62 = vpop.f32.mrf.mxu2  ;;  %v1406_v55 = vld [vmem:[%s2624_s0 + $0x12c] sm:$0xf0] }
  0xbe   :  { %v726_v0 = vpop.f32.mrf.mxu0 }
  0xbf   :  { %v1158_v3 = vpack.c.bf16 %v1109_v60, %v1109_v60  ;;  %v727_v4 = vadd.f32 %v2051_v58, %v726_v0  ;;  %v859_v5 = vpop.f32.mrf.mxu1 }
  0xc1   :  { %1208 = vst.msk [vmem:[%s2626_s3 + $0xc] sm:$0xf] %vm1204_vm1, %v1158_v3  ;;  %v860_v6 = vadd.f32 %v859_v5, %v727_v4  ;;  %765 = vmatmul.bf16.gmra.mxu0 %v1381_v63  ;;  %v1405_v63 = vor.u32 %v1680_v52, %v1404_v51 }
  0xc2   :  { %898 = vmatmul.bf16.gmra.mxu1 %v1385_v1  ;;  %963 = vmatmul.bf16.gmra.mxu3 %v1541_v2  ;;  %v1409_v1 = vor.u32 %v1679_v53, %v1406_v55  ;;  %v1509_v2 = vor.u32 %v1705_v57, %v1508_v56  ;;  %v1428_v55 = vld [vmem:[%s2624_s0 + $0x150] sm:$0xf]  ;;  %v1686_v56 = vld [vmem:[%s2624_s0 + $0x158] sm:$0xf0]  ;;  %v1685_v57 = vld [vmem:[%s2624_s0 + $0x154] sm:$0xf] }
  0xc3   :  { %v993_v7 = vadd.f32 %v992_v31, %v860_v6  ;;  %v1393_v31 = vor.u32 %v1677_v22, %v1392_v21  ;;  %v1416_v22 = vld [vmem:[%s2624_s0 + $0x138] sm:$0xf] }
  0xc5   :  { %v1110_v10 = vmax.f32 %v993_v7, 0.0  ;;  %v2157_v11 = vpop.f32.mrf.mxu3  ;;  %v999_v12 = vpop.f32.mrf.mxu2 }
  0xc6   :  { %v728_v14 = vpop.f32.mrf.mxu0 }
  0xc7   :  { %v1159_v16 = vpack.c.bf16 %v1110_v10, %v1110_v10  ;;  %v729_v17 = vadd.f32 %v2051_v58, %v728_v14  ;;  %v861_v18 = vpop.f32.mrf.mxu1 }
  0xc9   :  { %1209 = vst.msk [vmem:[%s2626_s3 + $0x10] sm:$0xf] %vm1204_vm1, %v1159_v16  ;;  %v862_v19 = vadd.f32 %v861_v18, %v729_v17  ;;  %v1437_v16 = vor.u32 %v1687_v9, %v1436_v8 }
  0xca   :  { %1630 = vmatmul.msk.bf16.gmra.mxu2 %vm631_vm0, %v1413_v15 }
  0xcb   :  { %v995_v24 = vadd.f32 %v994_v45, %v862_v19 }
  0xcd   :  { %v1111_v27 = vmax.f32 %v995_v24, 0.0  ;;  %v2178_v28 = vpop.f32.mrf.mxu3  ;;  %v1002_v29 = vpop.f32.mrf.mxu2  ;;  %v1682_v24 = vld [vmem:[%s2624_s0 + $0x13c] sm:$0xf] }
  0xce   :  { %v731_v32 = vpop.f32.mrf.mxu0 }
  0xcf   :  { %v1160_v35 = vpack.c.bf16 %v1111_v27, %v1111_v27  ;;  %v732_v20 = vadd.f32 %v2051_v58, %v731_v32  ;;  %v864_v36 = vpop.f32.mrf.mxu1  ;;  %v1520_v27 = vld [vmem:[%s2624_s0 + $0x200] sm:$0xf] }
  0xd1   :  { %1210 = vst.msk [vmem:[%s2626_s3 + $0x14] sm:$0xf] %vm1204_vm1, %v1160_v35  ;;  %v865_v37 = vadd.f32 %v864_v36, %v732_v20  ;;  %770 = vmatmul.bf16.gmra.mxu0 %v1393_v31  ;;  %v1421_v20 = vor.u32 %v1682_v24, %v1418_v26 }
  0xd2   :  { %903 = vmatmul.bf16.gmra.mxu1 %v1397_v33  ;;  %968 = vmatmul.bf16.gmra.mxu3 %v471_v34  ;;  %v1417_v34 = vor.u32 %v1683_v23, %v1416_v22 }
  0xd3   :  { %v998_v38 = vadd.f32 %v997_v62, %v865_v37 }
  0xd5   :  { %v1112_v41 = vmax.f32 %v998_v38, 0.0  ;;  %v2191_v42 = vpop.f32.mrf.mxu3  ;;  %v1004_v43 = vpop.f32.mrf.mxu2 }
  0xd6   :  { %v733_v45 = vpop.f32.mrf.mxu0 }
  0xd7   :  { %v1161_v47 = vpack.c.bf16 %v1112_v41, %v1112_v41  ;;  %v734_v48 = vadd.f32 %v2051_v58, %v733_v45  ;;  %v866_v49 = vpop.f32.mrf.mxu1  ;;  %v1690_v45 = vld [vmem:[%s2624_s0 + $0x178] sm:$0xf0] }
  0xd9   :  { %1211 = vst.msk [vmem:[%s2626_s3 + $0x18] sm:$0xf] %vm1204_vm1, %v1161_v47  ;;  %v867_v50 = vadd.f32 %v866_v49, %v734_v48 }
  0xda   :  { %1631 = vmatmul.msk.bf16.gmra.mxu2 %vm631_vm0, %v1425_v46 }
  0xdb   :  { %v1000_v54 = vadd.f32 %v999_v12, %v867_v50 }
  0xdd   :  { %v1113_v59 = vmax.f32 %v1000_v54, 0.0  ;;  %v2217_v60 = vpop.f32.mrf.mxu3  ;;  %v1007_v62 = vpop.f32.mrf.mxu2 }
  0xde   :  { %v736_v0 = vpop.f32.mrf.mxu0 }
  0xdf   :  { %v1162_v3 = vpack.c.bf16 %v1113_v59, %v1113_v59  ;;  %v737_v4 = vadd.f32 %v2051_v58, %v736_v0  ;;  %v869_v5 = vpop.f32.mrf.mxu1  ;;  %v1711_v0 = vld [vmem:[%s2624_s0 + $0x220] sm:$0xf0] }
  0xe1   :  { %1212 = vst.msk [vmem:[%s2626_s3 + $0x1c] sm:$0xf] %vm1204_vm1, %v1162_v3  ;;  %v870_v6 = vadd.f32 %v869_v5, %v737_v4  ;;  %775 = vmatmul.bf16.gmra.mxu0 %v1405_v63  ;;  %v1532_v63 = vld [vmem:[%s2624_s0 + $0x218] sm:$0xf]  ;;  %v1429_v4 = vor.u32 %v1686_v56, %v1428_v55  ;;  %v1696_v55 = vld [vmem:[%s2624_s0 + $0x1a8] sm:$0xf0]  ;;  %v817_v56 = vadd.f32 %v2051_v58, %v2118_v44 }
  0xe2   :  { %908 = vmatmul.bf16.gmra.mxu1 %v1409_v1  ;;  %1638 = vmatmul.msk.bf16.vlgmr.msra.gmra.mxu3 %vm631_vm0, %v1509_v2 }
  0xe3   :  { %v1003_v7 = vadd.f32 %v1002_v29, %v870_v6  ;;  %v1708_v29 = vld [vmem:[%s2624_s0 + $0x208] sm:$0xf0] }
  0xe4   :  { %v1521_v36 = vor.u32 %v1708_v29, %v1520_v27 }
  0xe5   :  { %v1114_v10 = vmax.f32 %v1003_v7, 0.0  ;;  %v2231_v12 = vpop.f32.mrf.mxu3  ;;  %v1009_v14 = vpop.f32.mrf.mxu2  ;;  %v1533_v7 = vor.u32 %v1711_v0, %v1532_v63 }
  0xe6   :  { %v738_v15 = vpop.f32.mrf.mxu0 }
  0xe7   :  { %v1163_v17 = vpack.c.bf16 %v1114_v10, %v1114_v10  ;;  %v739_v18 = vadd.f32 %v2051_v58, %v738_v15  ;;  %v871_v19 = vpop.f32.mrf.mxu1 }
  0xe9   :  { %1213 = vst.msk [vmem:[%s2626_s3 + $0x20] sm:$0xf] %vm1204_vm1, %v1163_v17  ;;  %v872_v21 = vadd.f32 %v871_v19, %v739_v18  ;;  %v1693_v17 = vld [vmem:[%s2624_s0 + $0x190] sm:$0xf0]  ;;  %v812_v18 = vadd.f32 %v2051_v58, %v2079_v13  ;;  %v1440_v13 = vld [vmem:[%s2624_s0 + $0x168] sm:$0xf] }
  0xea   :  { %1632 = vmatmul.msk.bf16.gmra.mxu2 %vm631_vm0, %v1437_v16  ;;  %v1460_v16 = vld [vmem:[%s2624_s0 + $0x188] sm:$0xf] }
  0xeb   :  { %v1005_v25 = vadd.f32 %v1004_v43, %v872_v21  ;;  %v1448_v43 = vld [vmem:[%s2624_s0 + $0x170] sm:$0xf] }
  0xec   :  { %v1449_v50 = vor.u32 %v1690_v45, %v1448_v43 }
  0xed   :  { %v1115_v31 = vmax.f32 %v1005_v25, 0.0  ;;  %v2257_v32 = vpop.f32.mrf.mxu3  ;;  %v1012_v33 = vpop.f32.mrf.mxu2  ;;  %v1461_v25 = vor.u32 %v1693_v17, %v1460_v16 }
  0xee   :  { %v741_v35 = vpop.f32.mrf.mxu0 }
  0xef   :  { %v1164_v37 = vpack.c.bf16 %v1115_v31, %v1115_v31  ;;  %v742_v38 = vadd.f32 %v2051_v58, %v741_v35  ;;  %v874_v39 = vpop.f32.mrf.mxu1 }
  0xf1   :  { %1214 = vst.msk [vmem:[%s2626_s3 + $0x24] sm:$0xf] %vm1204_vm1, %v1164_v37  ;;  %v875_v40 = vadd.f32 %v874_v39, %v742_v38  ;;  %780 = vmatmul.bf16.gmra.mxu0 %v1417_v34  ;;  %v1688_v34 = vld [vmem:[%s2624_s0 + $0x16c] sm:$0xf]  ;;  %v1714_v37 = vld [vmem:[%s2624_s0 + $0x238] sm:$0xf0]  ;;  %v814_v38 = vadd.f32 %v2051_v58, %v2105_v30 }
  0xf2   :  { %913 = vmatmul.bf16.gmra.mxu1 %v1421_v20  ;;  %1639 = vmatmul.msk.bf16.gmra.mxu3 %vm631_vm0, %v1521_v36  ;;  %v1442_v20 = vld [vmem:[%s2624_s0 + $0x174] sm:$0xf0]  ;;  %v1544_v36 = vld [vmem:[%s2624_s0 + $0x230] sm:$0xf] }
  0xf3   :  { %v1008_v41 = vadd.f32 %v1007_v62, %v875_v40  ;;  %v1430_v62 = vld [vmem:[%s2624_s0 + $0x15c] sm:$0xf0] }
  0xf4   :  { %v1433_v6 = vor.u32 %v1685_v57, %v1430_v62 }
  0xf5   :  { %v1116_v46 = vmax.f32 %v1008_v41, 0.0  ;;  %v2271_v47 = vpop.f32.mrf.mxu3  ;;  %v1014_v48 = vpop.f32.mrf.mxu2 }
  0xf6   :  { %v743_v49 = vpop.f32.mrf.mxu0 }
  0xf7   :  { %v1165_v51 = vpack.c.bf16 %v1116_v46, %v1116_v46  ;;  %v744_v52 = vadd.f32 %v2051_v58, %v743_v49  ;;  %v876_v53 = vpop.f32.mrf.mxu1  ;;  %v1545_v49 = vor.u32 %v1714_v37, %v1544_v36 }
  0xf9   :  { %1215 = vst.msk [vmem:[%s2626_s3 + $0x28] sm:$0xf] %vm1204_vm1, %v1165_v51  ;;  %v877_v54 = vadd.f32 %v876_v53, %v744_v52 }
  0xfa   :  { %1633 = vmatmul.msk.bf16.gmra.mxu2 %vm631_vm0, %v1449_v50 }
  0xfb   :  { %v1010_v59 = vadd.f32 %v1009_v14, %v877_v54  ;;  %v1472_v54 = vld [vmem:[%s2624_s0 + $0x1a0] sm:$0xf] }
  0xfd   :  { %v1117_v1 = vmax.f32 %v1010_v59, 0.0  ;;  %v838_v2 = vpop.f32.mrf.mxu3  ;;  %v1017_v3 = vpop.f32.mrf.mxu2 }
  0xfe   :  { %v746_v5 = vpop.f32.mrf.mxu0 }
  0xff   :  { %v1166_v8 = vpack.c.bf16 %v1117_v1, %v1117_v1  ;;  %v747_v9 = vadd.f32 %v2051_v58, %v746_v5  ;;  %v879_v10 = vpop.f32.mrf.mxu1  ;;  %v1473_v1 = vor.u32 %v1696_v55, %v1472_v54  ;;  %v112_v5 = vld [vmem:[%s2624_s0 + $0x248] sm:$0xf] }
 0x101   :  { %1216 = vst.msk [vmem:[%s2626_s3 + $0x2c] sm:$0xf] %vm1204_vm1, %v1166_v8  ;;  %v880_v14 = vadd.f32 %v879_v10, %v747_v9  ;;  %785 = vmatmul.bf16.gmra.mxu0 %v1429_v4  ;;  %v397_v8 = vunpack.c.l.b16 %v112_v5  ;;  %v1691_v10 = vld [vmem:[%s2624_s0 + $0x184] sm:$0xf]  ;;  %v827_v5 = vadd.f32 %v2051_v58, %v2191_v42  ;;  %v1476_v42 = vld [vmem:[%s2624_s0 + $0x1b0] sm:$0xf] }
 0x102   :  { %918 = vmatmul.bf16.gmra.mxu1 %v1433_v6  ;;  %1640 = vmatmul.msk.bf16.gmra.mxu3 %vm631_vm0, %v1533_v7  ;;  %v1452_v6 = vld [vmem:[%s2624_s0 + $0x180] sm:$0xf]  ;;  %v1692_v7 = vld [vmem:[%s2624_s0 + $0x188] sm:$0xf0] }
 0x103   :  { %v1013_v15 = vadd.f32 %v1012_v33, %v880_v14  ;;  %v1689_v33 = vld [vmem:[%s2624_s0 + $0x170] sm:$0xf0]  ;;  %v1454_v14 = vld [vmem:[%s2624_s0 + $0x18c] sm:$0xf0] }
 0x104   :  { %v1441_v43 = vor.u32 %v1689_v33, %v1440_v13  ;;  %v1484_v13 = vld [vmem:[%s2624_s0 + $0x1b8] sm:$0xf]  ;;  %v1699_v33 = vld [vmem:[%s2624_s0 + $0x1c0] sm:$0xf0] }
 0x105   :  { %v1118_v19 = vmax.f32 %v1013_v15, 0.0  ;;  %v944_v21 = vpop.f32.mrf.mxu3  ;;  %v1019_v22 = vpop.f32.mrf.mxu2  ;;  %v819_v15 = vadd.f32 %v2051_v58, %v2144_v61 }
 0x106   :  { %v2311_v23 = vadd.f32 %v944_v21, %v812_v18  ;;  %v748_v24 = vpop.f32.mrf.mxu0 }
 0x107   :  { %v1167_v26 = vpack.c.bf16 %v1118_v19, %v1118_v19  ;;  %v749_v27 = vadd.f32 %v2051_v58, %v748_v24  ;;  %v881_v29 = vpop.f32.mrf.mxu1  ;;  %v1453_v19 = vor.u32 %v1692_v7, %v1452_v6 }
 0x109   :  { %1217 = vst.msk [vmem:[%s2626_s3 + $0x30] sm:$0xf] %vm1204_vm1, %v1167_v26  ;;  %v882_v31 = vadd.f32 %v881_v29, %v749_v27 }
 0x10a   :  { %1634 = vmatmul.msk.bf16.gmra.mxu2 %vm631_vm0, %v1461_v25  ;;  %v1457_v25 = vor.u32 %v1691_v10, %v1454_v14 }
 0x10b   :  { %v1015_v35 = vadd.f32 %v1014_v48, %v882_v31  ;;  %v1445_v48 = vor.u32 %v1688_v34, %v1442_v20  ;;  %v822_v34 = vadd.f32 %v2051_v58, %v2157_v11  ;;  %v1464_v11 = vld [vmem:[%s2624_s0 + $0x198] sm:$0xf] }
 0x10d   :  { %v1119_v39 = vmax.f32 %v1015_v35, 0.0  ;;  %v946_v40 = vpop.f32.mrf.mxu3  ;;  %v1022_v41 = vpop.f32.mrf.mxu2 }
 0x10e   :  { %v2339_v45 = vadd.f32 %v946_v40, %v814_v38  ;;  %v751_v46 = vpop.f32.mrf.mxu0 }
 0x10f   :  { %v1168_v50 = vpack.c.bf16 %v1119_v39, %v1119_v39  ;;  %v752_v51 = vadd.f32 %v2051_v58, %v751_v46  ;;  %v884_v52 = vpop.f32.mrf.mxu1  ;;  %v1485_v39 = vor.u32 %v1699_v33, %v1484_v13 }
 0x111   :  { %1218 = vst.msk [vmem:[%s2626_s3 + $0x34] sm:$0xf] %vm1204_vm1, %v1168_v50  ;;  %v885_v53 = vadd.f32 %v884_v52, %v752_v51  ;;  %790 = vmatmul.bf16.gmra.mxu0 %v1441_v43  ;;  %v1694_v50 = vld [vmem:[%s2624_s0 + $0x19c] sm:$0xf]  ;;  %v1466_v51 = vld [vmem:[%s2624_s0 + $0x1a4] sm:$0xf0]  ;;  %v824_v52 = vadd.f32 %v2051_v58, %v2178_v28 }
 0x112   :  { %923 = vmatmul.bf16.gmra.mxu1 %v1445_v48  ;;  %1641 = vmatmul.msk.bf16.gmra.mxu3 %vm631_vm0, %v1545_v49  ;;  %v1695_v48 = vld [vmem:[%s2624_s0 + $0x1a0] sm:$0xf0] }
 0x113   :  { %v1018_v30 = vadd.f32 %v1017_v3, %v885_v53  ;;  %v1465_v55 = vor.u32 %v1695_v48, %v1464_v11 }
 0x115   :  { %v1120_v57 = vmax.f32 %v1018_v30, 0.0  ;;  %v949_v59 = vpop.f32.mrf.mxu3  ;;  %v1024_v62 = vpop.f32.mrf.mxu2 }
 0x116   :  { %v2355_v63 = vadd.f32 %v949_v59, %v817_v56  ;;  %v753_v0 = vpop.f32.mrf.mxu0  ;;  %v1469_v59 = vor.u32 %v1694_v50, %v1466_v51 }
 0x117   :  { %v1169_v2 = vpack.c.bf16 %v1120_v57, %v1120_v57  ;;  %v754_v3 = vadd.f32 %v2051_v58, %v753_v0  ;;  %v886_v4 = vpop.f32.mrf.mxu1 }
 0x119   :  { %1219 = vst.msk [vmem:[%s2626_s3 + $0x38] sm:$0xf] %vm1204_vm1, %v1169_v2  ;;  %v887_v44 = vadd.f32 %v886_v4, %v754_v3  ;;  %v1496_v3 = vld [vmem:[%s2624_s0 + $0x1d0] sm:$0xf]  ;;  %v1702_v4 = vld [vmem:[%s2624_s0 + $0x1d8] sm:$0xf0] }
 0x11a   :  { %1635 = vmatmul.msk.bf16.gmra.mxu2 %vm631_vm0, %v1473_v1  ;;  %v1497_v10 = vor.u32 %v1702_v4, %v1496_v3 }
 0x11b   :  { %v1020_v9 = vadd.f32 %v1019_v22, %v887_v44  ;;  %v472_v22 = vpack.c.b16 %v397_v8, %v397_v8 }
 0x11d   :  { %v1121_v16 = vmax.f32 %v1020_v9, 0.0  ;;  %v951_v17 = vpop.f32.mrf.mxu3  ;;  %v1027_v18 = vpop.f32.mrf.mxu2 }
 0x11e   :  { %v2380_v21 = vadd.f32 %v951_v17, %v819_v15  ;;  %v756_v24 = vpop.f32.mrf.mxu0 }
 0x11f   :  { %v1170_v26 = vpack.c.bf16 %v1121_v16, %v1121_v16  ;;  %v757_v27 = vadd.f32 %v2051_v58, %v756_v24  ;;  %v889_v29 = vpop.f32.mrf.mxu1  ;;  %v1697_v24 = vld [vmem:[%s2624_s0 + $0x1b4] sm:$0xf] }
 0x121   :  { %1220 = vst.msk [vmem:[%s2626_s3 + $0x3c] sm:$0xf] %vm1204_vm1, %v1170_v26  ;;  %v890_v31 = vadd.f32 %v889_v29, %v757_v27  ;;  %795 = vmatmul.bf16.gmra.mxu0 %v1453_v19 }
 0x122   :  { %928 = vmatmul.bf16.gmra.mxu1 %v1457_v25  ;;  %1642 = vmatmul.msk.bf16.gmra.mxu3 %vm631_vm0, %v472_v22  ;;  %v1478_v25 = vld [vmem:[%s2624_s0 + $0x1bc] sm:$0xf0]  ;;  %v829_v22 = vadd.f32 %v2051_v58, %v2217_v60 }
 0x123   :  { %v1023_v61 = vadd.f32 %v1022_v41, %v890_v31  ;;  %v1481_v33 = vor.u32 %v1697_v24, %v1478_v25 }
 0x125   :  { %v1122_v35 = vmax.f32 %v1023_v61, 0.0  ;;  %v954_v20 = vpop.f32.mrf.mxu3  ;;  %v1029_v36 = vpop.f32.mrf.mxu2 }
 0x126   :  { %v2396_v37 = vadd.f32 %v954_v20, %v822_v34  ;;  %v758_v38 = vpop.f32.mrf.mxu0 }
 0x127   :  { %v1171_v40 = vpack.c.bf16 %v1122_v35, %v1122_v35  ;;  %v759_v41 = vadd.f32 %v2051_v58, %v758_v38  ;;  %v891_v43 = vpop.f32.mrf.mxu1  ;;  %v832_v38 = vadd.f32 %v2051_v58, %v2231_v12  ;;  %v834_v12 = vadd.f32 %v2051_v58, %v2257_v32 }
 0x128   :  { %v837_v32 = vadd.f32 %v2051_v58, %v2271_v47 }
 0x129   :  { %1221 = vst.msk [vmem:[%s2626_s3 + $0x40] sm:$0xf] %vm1204_vm1, %v1171_v40  ;;  %v892_v46 = vadd.f32 %v891_v43, %v759_v41 }
 0x12a   :  { %1636 = vmatmul.msk.bf16.gmra.mxu2 %vm631_vm0, %v1485_v39 }
 0x12b   :  { %v1025_v49 = vadd.f32 %v1024_v62, %v892_v46 }
 0x12d   :  { %v1123_v53 = vmax.f32 %v1025_v49, 0.0  ;;  %v956_v30 = vpop.f32.mrf.mxu3  ;;  %v1032_v54 = vpop.f32.mrf.mxu2 }
 0x12e   :  { %v2418_v56 = vadd.f32 %v956_v30, %v824_v52  ;;  %v761_v57 = vpop.f32.mrf.mxu0 }
 0x12f   :  { %v1172_v62 = vpack.c.bf16 %v1123_v53, %v1123_v53  ;;  %v762_v0 = vadd.f32 %v2051_v58, %v761_v57  ;;  %v894_v1 = vpop.f32.mrf.mxu1 }
 0x131   :  { %1222 = vst.msk [vmem:[%s2626_s3 + $0x44] sm:$0xf] %vm1204_vm1, %v1172_v62  ;;  %v895_v2 = vadd.f32 %v894_v1, %v762_v0  ;;  %800 = vmatmul.bf16.gmra.mxu0 %v1465_v55 }
 0x132   :  { %933 = vmatmul.bf16.gmra.mxu1 %v1469_v59 }
 0x133   :  { %v1028_v28 = vadd.f32 %v1027_v18, %v895_v2  ;;  %v1698_v18 = vld [vmem:[%s2624_s0 + $0x1b8] sm:$0xf0] }
 0x134   :  { %v1477_v31 = vor.u32 %v1698_v18, %v1476_v42 }
 0x135   :  { %v1124_v44 = vmax.f32 %v1028_v28, 0.0  ;;  %v959_v6 = vpop.f32.mrf.mxu3  ;;  %v1034_v7 = vpop.f32.mrf.mxu2 }
 0x136   :  { %v2433_v8 = vadd.f32 %v959_v6, %v827_v5  ;;  %v763_v9 = vpop.f32.mrf.mxu0 }
 0x137   :  { %v1173_v14 = vpack.c.bf16 %v1124_v44, %v1124_v44  ;;  %v764_v15 = vadd.f32 %v2051_v58, %v763_v9  ;;  %v896_v16 = vpop.f32.mrf.mxu1 }
 0x139   :  { %1223 = vst.msk [vmem:[%s2626_s3 + $0x48] sm:$0xf] %vm1204_vm1, %v1173_v14  ;;  %v897_v17 = vadd.f32 %v896_v16, %v764_v15 }
 0x13a   :  { %1637 = vmatmul.msk.bf16.gmra.mxu2 %vm631_vm0, %v1497_v10 }
 0x13b   :  { %v1030_v19 = vadd.f32 %v1029_v36, %v897_v17 }
 0x13d   :  { %v1125_v26 = vmax.f32 %v1030_v19, 0.0  ;;  %v961_v27 = vpop.f32.mrf.mxu3  ;;  %v1037_v29 = vpop.f32.mrf.mxu2 }
 0x13e   :  { %v2455_v61 = vadd.f32 %v961_v27, %v829_v22  ;;  %v766_v13 = vpop.f32.mrf.mxu0 }
 0x13f   :  { %v1174_v34 = vpack.c.bf16 %v1125_v26, %v1125_v26  ;;  %v767_v35 = vadd.f32 %v2051_v58, %v766_v13  ;;  %v899_v20 = vpop.f32.mrf.mxu1 }
 0x141   :  { %1224 = vst.msk [vmem:[%s2626_s3 + $0x4c] sm:$0xf] %vm1204_vm1, %v1174_v34  ;;  %v900_v36 = vadd.f32 %v899_v20, %v767_v35  ;;  %805 = vmatmul.bf16.gmra.mxu0 %v1477_v31 }
 0x142   :  { %938 = vmatmul.bf16.gmra.mxu1 %v1481_v33 }
 0x143   :  { %v1033_v60 = vadd.f32 %v1032_v54, %v900_v36 }
 0x145   :  { %v1126_v39 = vmax.f32 %v1033_v60, 0.0  ;;  %v964_v40 = vpop.f32.mrf.mxu3  ;;  %v1039_v41 = vpop.f32.mrf.mxu2 }
 0x146   :  { %v2464_v43 = vadd.f32 %v964_v40, %v832_v38  ;;  %v768_v46 = vpop.f32.mrf.mxu0 }
 0x147   :  { %v1175_v11 = vpack.c.bf16 %v1126_v39, %v1126_v39  ;;  %v769_v48 = vadd.f32 %v2051_v58, %v768_v46  ;;  %v901_v49 = vpop.f32.mrf.mxu1 }
 0x149   :  { %1225 = vst.msk [vmem:[%s2626_s3 + $0x50] sm:$0xf] %vm1204_vm1, %v1175_v11  ;;  %v902_v50 = vadd.f32 %v901_v49, %v769_v48 }
 0x14b   :  { %v1035_v51 = vadd.f32 %v1034_v7, %v902_v50 }
 0x14d   :  { %v1127_v52 = vmax.f32 %v1035_v51, 0.0  ;;  %v966_v53 = vpop.f32.mrf.mxu3  ;;  %v1042_v30 = vpop.f32.mrf.mxu2 }
 0x14e   :  { %v2473_v54 = vadd.f32 %v966_v53, %v834_v12  ;;  %v771_v55 = vpop.f32.mrf.mxu0 }
 0x14f   :  { %v1176_v57 = vpack.c.bf16 %v1127_v52, %v1127_v52  ;;  %v772_v59 = vadd.f32 %v2051_v58, %v771_v55  ;;  %v904_v62 = vpop.f32.mrf.mxu1 }
 0x151   :  { %1226 = vst.msk [vmem:[%s2626_s3 + $0x54] sm:$0xf] %vm1204_vm1, %v1176_v57  ;;  %v905_v0 = vadd.f32 %v904_v62, %v772_v59 }
 0x153   :  { %v1038_v1 = vadd.f32 %v1037_v29, %v905_v0 }
 0x155   :  { %v1128_v2 = vmax.f32 %v1038_v1, 0.0  ;;  %v969_v28 = vpop.f32.mrf.mxu3  ;;  %v1044_v3 = vpop.f32.mrf.mxu2 }
 0x156   :  { %v2482_v4 = vadd.f32 %v969_v28, %v837_v32  ;;  %v773_v5 = vpop.f32.mrf.mxu0 }
 0x157   :  { %v1177_v44 = vpack.c.bf16 %v1128_v2, %v1128_v2  ;;  %v774_v6 = vadd.f32 %v2051_v58, %v773_v5  ;;  %v906_v7 = vpop.f32.mrf.mxu1 }
 0x159   :  { %1227 = vst.msk [vmem:[%s2626_s3 + $0x58] sm:$0xf] %vm1204_vm1, %v1177_v44  ;;  %v907_v9 = vadd.f32 %v906_v7, %v774_v6 }
 0x15b   :  { %v1040_v10 = vadd.f32 %v1039_v41, %v907_v9 }
 0x15d   :  { %v1129_v14 = vmax.f32 %v1040_v10, 0.0  ;;  %v971_v15 = vpop.f32.mrf.mxu3  ;;  %v1047_v47 = vpop.f32.mrf.mxu2 }
 0x15e   :  { %v776_v16 = vpop.f32.mrf.mxu0 }
 0x15f   :  { %v1178_v17 = vpack.c.bf16 %v1129_v14, %v1129_v14  ;;  %v777_v42 = vadd.f32 %v2051_v58, %v776_v16  ;;  %v909_v18 = vpop.f32.mrf.mxu1 }
 0x161   :  { %1228 = vst.msk [vmem:[%s2626_s3 + $0x5c] sm:$0xf] %vm1204_vm1, %v1178_v17  ;;  %v910_v19 = vadd.f32 %v909_v18, %v777_v42 }
 0x163   :  { %v1043_v24 = vadd.f32 %v1042_v30, %v910_v19 }
 0x165   :  { %v1130_v25 = vmax.f32 %v1043_v24, 0.0  ;;  %v1049_v22 = vpop.f32.mrf.mxu2  ;;  %v1082_v26 = vpop.f32.mrf.mxu3 }
 0x166   :  { %v1083_v27 = vadd.f32 %v1082_v26, %v2355_v63  ;;  %v778_v29 = vpop.f32.mrf.mxu0 }
 0x167   :  { %v1179_v31 = vpack.c.bf16 %v1130_v25, %v1130_v25  ;;  %v779_v13 = vadd.f32 %v2051_v58, %v778_v29  ;;  %v911_v33 = vpop.f32.mrf.mxu1 }
 0x168   :  { %v1146_v34 = vmax.f32 %v1083_v27, 0.0 }
 0x169   :  { %1229 = vst.msk [vmem:[%s2626_s3 + $0x60] sm:$0xf] %vm1204_vm1, %v1179_v31  ;;  %v912_v35 = vadd.f32 %v911_v33, %v779_v13 }
 0x16a   :  { %v1195_v20 = vpack.c.bf16 %v1146_v34, %v1146_v34 }
 0x16b   :  { %v1045_v36 = vadd.f32 %v1044_v3, %v912_v35 }
 0x16c   :  { %1245 = vst.msk [vmem:[%s2626_s3 + $0xa0] sm:$0xf] %vm1204_vm1, %v1195_v20 }
 0x16d   :  { %v1131_v63 = vmax.f32 %v1045_v36, 0.0  ;;  %v1052_v60 = vpop.f32.mrf.mxu2  ;;  %v1084_v38 = vpop.f32.mrf.mxu3 }
 0x16e   :  { %v1085_v39 = vadd.f32 %v1084_v38, %v2380_v21  ;;  %v781_v40 = vpop.f32.mrf.mxu0 }
 0x16f   :  { %v1180_v41 = vpack.c.bf16 %v1131_v63, %v1131_v63  ;;  %v782_v46 = vadd.f32 %v2051_v58, %v781_v40  ;;  %v914_v11 = vpop.f32.mrf.mxu1 }
 0x170   :  { %v1147_v48 = vmax.f32 %v1085_v39, 0.0 }
 0x171   :  { %1230 = vst.msk [vmem:[%s2626_s3 + $0x64] sm:$0xf] %vm1204_vm1, %v1180_v41  ;;  %v915_v49 = vadd.f32 %v914_v11, %v782_v46  ;;  %v2558_v11 = vld [vmem:[%s2625_s2] ss:$0 sm:$0xff] }
 0x172   :  { %v1196_v50 = vpack.c.bf16 %v1147_v48, %v1147_v48 }
 0x173   :  { %v1048_v51 = vadd.f32 %v1047_v47, %v915_v49 }
 0x174   :  { %1246 = vst.msk [vmem:[%s2626_s3 + $0xa4] sm:$0xf] %vm1204_vm1, %v1196_v50 }
 0x175   :  { %v1132_v21 = vmax.f32 %v1048_v51, 0.0  ;;  %v1054_v12 = vpop.f32.mrf.mxu2  ;;  %v1087_v52 = vpop.f32.mrf.mxu3 }
 0x176   :  { %v1088_v53 = vadd.f32 %v1087_v52, %v2396_v37  ;;  %v783_v30 = vpop.f32.mrf.mxu0 }
 0x177   :  { %v1181_v55 = vpack.c.bf16 %v1132_v21, %v1132_v21  ;;  %v784_v57 = vadd.f32 %v2051_v58, %v783_v30  ;;  %v916_v59 = vpop.f32.mrf.mxu1 }
 0x178   :  { %v1148_v62 = vmax.f32 %v1088_v53, 0.0 }
 0x179   :  { %1231 = vst.msk [vmem:[%s2626_s3 + $0x68] sm:$0xf] %vm1204_vm1, %v1181_v55  ;;  %v917_v0 = vadd.f32 %v916_v59, %v784_v57 }
 0x17a   :  { %v1197_v1 = vpack.c.bf16 %v1148_v62, %v1148_v62 }
 0x17b   :  { %v1050_v32 = vadd.f32 %v1049_v22, %v917_v0 }
 0x17c   :  { %1247 = vst.msk [vmem:[%s2626_s3 + $0xa8] sm:$0xf] %vm1204_vm1, %v1197_v1 }
 0x17d   :  { %v1133_v37 = vmax.f32 %v1050_v32, 0.0  ;;  %v1057_v2 = vpop.f32.mrf.mxu2  ;;  %v1089_v28 = vpop.f32.mrf.mxu3 }
 0x17e   :  { %v1090_v3 = vadd.f32 %v1089_v28, %v2418_v56  ;;  %v786_v5 = vpop.f32.mrf.mxu0 }
 0x17f   :  { %v1182_v44 = vpack.c.bf16 %v1133_v37, %v1133_v37  ;;  %v787_v6 = vadd.f32 %v2051_v58, %v786_v5  ;;  %v919_v7 = vpop.f32.mrf.mxu1 }
 0x180   :  { %v1149_v9 = vmax.f32 %v1090_v3, 0.0 }
 0x181   :  { %1232 = vst.msk [vmem:[%s2626_s3 + $0x6c] sm:$0xf] %vm1204_vm1, %v1182_v44  ;;  %v920_v10 = vadd.f32 %v919_v7, %v787_v6 }
 0x182   :  { %v1198_v14 = vpack.c.bf16 %v1149_v9, %v1149_v9 }
 0x183   :  { %v1053_v15 = vadd.f32 %v1052_v60, %v920_v10 }
 0x184   :  { %1248 = vst.msk [vmem:[%s2626_s3 + $0xac] sm:$0xf] %vm1204_vm1, %v1198_v14 }
 0x185   :  { %v1134_v56 = vmax.f32 %v1053_v15, 0.0  ;;  %v1059_v47 = vpop.f32.mrf.mxu2  ;;  %v1092_v16 = vpop.f32.mrf.mxu3 }
 0x186   :  { %v1093_v17 = vadd.f32 %v1092_v16, %v2433_v8  ;;  %v788_v42 = vpop.f32.mrf.mxu0 }
 0x187   :  { %v1183_v18 = vpack.c.bf16 %v1134_v56, %v1134_v56  ;;  %v789_v19 = vadd.f32 %v2051_v58, %v788_v42  ;;  %v921_v24 = vpop.f32.mrf.mxu1 }
 0x188   :  { %v1150_v25 = vmax.f32 %v1093_v17, 0.0 }
 0x189   :  { %1233 = vst.msk [vmem:[%s2626_s3 + $0x70] sm:$0xf] %vm1204_vm1, %v1183_v18  ;;  %v922_v22 = vadd.f32 %v921_v24, %v789_v19 }
 0x18a   :  { %v1199_v26 = vpack.c.bf16 %v1150_v25, %v1150_v25 }
 0x18b   :  { %v1055_v27 = vadd.f32 %v1054_v12, %v922_v22 }
 0x18c   :  { %1249 = vst.msk [vmem:[%s2626_s3 + $0xb0] sm:$0xf] %vm1204_vm1, %v1199_v26 }
 0x18d   :  { %v1135_v8 = vmax.f32 %v1055_v27, 0.0  ;;  %v1062_v29 = vpop.f32.mrf.mxu2  ;;  %v1094_v31 = vpop.f32.mrf.mxu3 }
 0x18e   :  { %v1095_v13 = vadd.f32 %v1094_v31, %v2455_v61  ;;  %v791_v33 = vpop.f32.mrf.mxu0 }
 0x18f   :  { %v1184_v34 = vpack.c.bf16 %v1135_v8, %v1135_v8  ;;  %v792_v35 = vadd.f32 %v2051_v58, %v791_v33  ;;  %v924_v20 = vpop.f32.mrf.mxu1 }
 0x190   :  { %v1151_v36 = vmax.f32 %v1095_v13, 0.0 }
 0x191   :  { %1234 = vst.msk [vmem:[%s2626_s3 + $0x74] sm:$0xf] %vm1204_vm1, %v1184_v34  ;;  %v925_v63 = vadd.f32 %v924_v20, %v792_v35 }
 0x192   :  { %v1200_v60 = vpack.c.bf16 %v1151_v36, %v1151_v36 }
 0x193   :  { %v1058_v38 = vadd.f32 %v1057_v2, %v925_v63 }
 0x194   :  { %1250 = vst.msk [vmem:[%s2626_s3 + $0xb4] sm:$0xf] %vm1204_vm1, %v1200_v60 }
 0x195   :  { %v1136_v61 = vmax.f32 %v1058_v38, 0.0  ;;  %v1064_v39 = vpop.f32.mrf.mxu2  ;;  %v1097_v40 = vpop.f32.mrf.mxu3 }
 0x196   :  { %v1098_v58 = vadd.f32 %v1097_v40, %v2464_v43  ;;  %v793_v41 = vpop.f32.mrf.mxu0 }
 0x197   :  { %v1185_v46 = vpack.c.bf16 %v1136_v61, %v1136_v61  ;;  %v794_v48 = vadd.f32 %v2558_v11, %v793_v41  ;;  %v926_v49 = vpop.f32.mrf.mxu1 }
 0x198   :  { %v1152_v50 = vmax.f32 %v1098_v58, 0.0 }
 0x199   :  { %1235 = vst.msk [vmem:[%s2626_s3 + $0x78] sm:$0xf] %vm1204_vm1, %v1185_v46  ;;  %v927_v51 = vadd.f32 %v926_v49, %v794_v48 }
 0x19a   :  { %v1201_v21 = vpack.c.bf16 %v1152_v50, %v1152_v50 }
 0x19b   :  { %v1060_v12 = vadd.f32 %v1059_v47, %v927_v51 }
 0x19c   :  { %1251 = vst.msk [vmem:[%s2626_s3 + $0xb8] sm:$0xf] %vm1204_vm1, %v1201_v21 }
 0x19d   :  { %v1137_v43 = vmax.f32 %v1060_v12, 0.0  ;;  %v1067_v52 = vpop.f32.mrf.mxu2  ;;  %v1099_v53 = vpop.f32.mrf.mxu3 }
 0x19e   :  { %v1100_v30 = vadd.f32 %v1099_v53, %v2473_v54  ;;  %v796_v55 = vpop.f32.mrf.mxu0 }
 0x19f   :  { %v1186_v57 = vpack.c.bf16 %v1137_v43, %v1137_v43  ;;  %v797_v59 = vadd.f32 %v2558_v11, %v796_v55  ;;  %v929_v62 = vpop.f32.mrf.mxu1 }
 0x1a0   :  { %v1153_v0 = vmax.f32 %v1100_v30, 0.0 }
 0x1a1   :  { %1236 = vst.msk [vmem:[%s2626_s3 + $0x7c] sm:$0xf] %vm1204_vm1, %v1186_v57  ;;  %v930_v1 = vadd.f32 %v929_v62, %v797_v59 }
 0x1a2   :  { %v1202_v32 = vpack.c.bf16 %v1153_v0, %v1153_v0 }
 0x1a3   :  { %v1063_v37 = vadd.f32 %v1062_v29, %v930_v1 }
 0x1a4   :  { %1252 = vst.msk [vmem:[%s2626_s3 + $0xbc] sm:$0xf] %vm1204_vm1, %v1202_v32 }
 0x1a5   :  { %v1138_v54 = vmax.f32 %v1063_v37, 0.0  ;;  %v1069_v2 = vpop.f32.mrf.mxu2  ;;  %v1102_v28 = vpop.f32.mrf.mxu3 }
 0x1a6   :  { %v1103_v3 = vadd.f32 %v1102_v28, %v2482_v4  ;;  %v798_v5 = vpop.f32.mrf.mxu0 }
 0x1a7   :  { %v1187_v44 = vpack.c.bf16 %v1138_v54, %v1138_v54  ;;  %v799_v6 = vadd.f32 %v2558_v11, %v798_v5  ;;  %v931_v7 = vpop.f32.mrf.mxu1 }
 0x1a8   :  { %v1154_v9 = vmax.f32 %v1103_v3, 0.0 }
 0x1a9   :  { %1237 = vst.msk [vmem:[%s2626_s3 + $0x80] sm:$0xf] %vm1204_vm1, %v1187_v44  ;;  %v932_v10 = vadd.f32 %v931_v7, %v799_v6 }
 0x1aa   :  { %v1203_v14 = vpack.c.bf16 %v1154_v9, %v1154_v9 }
 0x1ab   :  { %v1065_v15 = vadd.f32 %v1064_v39, %v932_v10 }
 0x1ac   :  { %1253 = vst.msk [vmem:[%s2626_s3 + $0xc0] sm:$0xf] %vm1204_vm1, %v1203_v14 }
 0x1ad   :  { %v1139_v4 = vmax.f32 %v1065_v15, 0.0  ;;  %v1072_v56 = vpop.f32.mrf.mxu2  ;;  %v1104_v47 = vpop.f32.mrf.mxu3 }
 0x1ae   :  { %v801_v16 = vpop.f32.mrf.mxu0 }
 0x1af   :  { %v1188_v17 = vpack.c.bf16 %v1139_v4, %v1139_v4  ;;  %v802_v42 = vadd.f32 %v2558_v11, %v801_v16  ;;  %v934_v18 = vpop.f32.mrf.mxu1 }
 0x1b1   :  { %1238 = vst.msk [vmem:[%s2626_s3 + $0x84] sm:$0xf] %vm1204_vm1, %v1188_v17  ;;  %v935_v19 = vadd.f32 %v934_v18, %v802_v42 }
 0x1b3   :  { %v1068_v24 = vadd.f32 %v1067_v52, %v935_v19 }
 0x1b5   :  { %v1140_v25 = vmax.f32 %v1068_v24, 0.0  ;;  %v1074_v22 = vpop.f32.mrf.mxu2 }
 0x1b6   :  { %v803_v26 = vpop.f32.mrf.mxu0 }
 0x1b7   :  { %v1189_v27 = vpack.c.bf16 %v1140_v25, %v1140_v25  ;;  %v804_v8 = vadd.f32 %v2558_v11, %v803_v26  ;;  %v936_v29 = vpop.f32.mrf.mxu1 }
 0x1b9   :  { %1239 = vst.msk [vmem:[%s2626_s3 + $0x88] sm:$0xf] %vm1204_vm1, %v1189_v27  ;;  %v937_v31 = vadd.f32 %v936_v29, %v804_v8 }
 0x1bb   :  { %v1070_v13 = vadd.f32 %v1069_v2, %v937_v31 }
 0x1bd   :  { %v1141_v33 = vmax.f32 %v1070_v13, 0.0  ;;  %v1077_v34 = vpop.f32.mrf.mxu2 }
 0x1be   :  { %v1078_v35 = vadd.f32 %v1077_v34, %v2311_v23  ;;  %v806_v20 = vpop.f32.mrf.mxu0 }
 0x1bf   :  { %v1190_v36 = vpack.c.bf16 %v1141_v33, %v1141_v33  ;;  %v807_v63 = vadd.f32 %v2558_v11, %v806_v20  ;;  %v939_v60 = vpop.f32.mrf.mxu1 }
 0x1c0   :  { %v1144_v38 = vmax.f32 %v1078_v35, 0.0 }
 0x1c1   :  { %1240 = vst.msk [vmem:[%s2626_s3 + $0x8c] sm:$0xf] %vm1204_vm1, %v1190_v36  ;;  %v940_v61 = vadd.f32 %v939_v60, %v807_v63 }
 0x1c2   :  { %v1193_v39 = vpack.c.bf16 %v1144_v38, %v1144_v38 }
 0x1c3   :  { %v1073_v40 = vadd.f32 %v1072_v56, %v940_v61 }
 0x1c4   :  { %1243 = vst.msk [vmem:[%s2626_s3 + $0x98] sm:$0xf] %vm1204_vm1, %v1193_v39 }
 0x1c5   :  { %v1142_v23 = vmax.f32 %v1073_v40, 0.0  ;;  %v1079_v58 = vpop.f32.mrf.mxu2 }
 0x1c6   :  { %v1080_v41 = vadd.f32 %v1079_v58, %v2339_v45  ;;  %v808_v46 = vpop.f32.mrf.mxu0 }
 0x1c7   :  { %v1191_v48 = vpack.c.bf16 %v1142_v23, %v1142_v23  ;;  %v809_v49 = vadd.f32 %v2558_v11, %v808_v46  ;;  %v941_v51 = vpop.f32.mrf.mxu1 }
 0x1c8   :  { %v1145_v50 = vmax.f32 %v1080_v41, 0.0 }
 0x1c9   :  { %1241 = vst.msk [vmem:[%s2626_s3 + $0x90] sm:$0xf] %vm1204_vm1, %v1191_v48  ;;  %v942_v21 = vadd.f32 %v941_v51, %v809_v49 }
 0x1ca   :  { %v1194_v12 = vpack.c.bf16 %v1145_v50, %v1145_v50 }
 0x1cb   :  { %v1075_v43 = vadd.f32 %v1074_v22, %v942_v21 }
 0x1cc   :  { %1244 = vst.msk [vmem:[%s2626_s3 + $0x9c] sm:$0xf] %vm1204_vm1, %v1194_v12 }
 0x1cd   :  { %v1143_v45 = vmax.f32 %v1075_v43, 0.0 }
 0x1cf   :  { %v1192_v52 = vpack.c.bf16 %v1143_v45, %v1143_v45 }
 0x1d1   :  { %1242 = vst.msk [vmem:[%s2626_s3 + $0x94] sm:$0xf] %vm1204_vm1, %v1192_v52 }

// kernel: cnn_forward.6
= control target key start
LH: loop header
LB: loop body
LE: loop exit
PB: predicated region body
PF: predicated region fallthrough
CT: control target
= control target key end

     0   :  { %vm865_vm0 = vcmask 523264   ;;  %s3250_s1 = inlined_call_operand.vmem [shape: bf16[576,128], index: 1, kind: input, shape index: {}]   ;;  %s3251_s2 = inlined_call_operand.vmem [shape: f32[1,128], index: 2, kind: input, shape index: {}]   ;;  %s3252_s0 = inlined_call_operand.vmem [shape: bf16[288,576], index: 0, kind: input, shape index: {}]   ;;  %s3253_s3 = inlined_call_operand.vmem [shape: bf16[288,128], index: 3, kind: output, shape index: {}]  }
   0x1   :  { %v2146_v0 = vld [vmem:[%s3250_s1 + $0x38] sm:$0xff]  ;;  %v2145_v1 = vld [vmem:[%s3250_s1 + $0x30] sm:$0xff]  ;;  %v2144_v2 = vld [vmem:[%s3250_s1 + $0x28] sm:$0xff] }
   0x2   :  { %2282 = vmatpush.bf16.msra.mxu1 %v2146_v0  ;;  %2283 = vmatpush.bf16.msra.mxu2 %v2146_v0  ;;  %v2143_v3 = vld [vmem:[%s3250_s1 + $0x20] sm:$0xff]  ;;  %v2142_v4 = vld [vmem:[%s3250_s1 + $0x18] sm:$0xff]  ;;  %v2141_v5 = vld [vmem:[%s3250_s1 + $0x10] sm:$0xff] }
   0x3   :  { %920 = vmatpush.bf16.msra.mxu0 %v2146_v0  ;;  %2284 = vmatpush.bf16.msra.mxu3 %v2146_v0  ;;  %v2140_v6 = vld [vmem:[%s3250_s1 + $0x8] sm:$0xff]  ;;  %v2139_v7 = vld [vmem:[%s3250_s1] sm:$0xff]  ;;  %v2076_v9 = vld [vmem:[%s3252_s0 + $0xd8] sm:$0xf0] }
   0x4   :  { %v1629_v8 = vld [vmem:[%s3252_s0 + $0xc8] sm:$0xf]  ;;  %v1729_v10 = vld [vmem:[%s3252_s0 + $0x190] sm:$0xf]  ;;  %v2101_v11 = vld [vmem:[%s3252_s0 + $0x1a0] sm:$0xf0] }
   0x5   :  { %v2162_v12 = vld [vmem:[%s3250_s1 + $0xb8] sm:$0xff]  ;;  %v1529_v13 = vld [vmem:[%s3252_s0] sm:$0xf]  ;;  %v2051_v14 = vld [vmem:[%s3252_s0 + $0x10] sm:$0xf0]  ;;  %v1630_v17 = vor.u32 %v2076_v9, %v1629_v8  ;;  %v1730_v18 = vor.u32 %v2101_v11, %v1729_v10 }
   0x6   :  { %2285 = vmatpush.bf16.msra.mxu1 %v2145_v1  ;;  %2286 = vmatpush.bf16.msra.mxu2 %v2145_v1  ;;  %v2154_v15 = vld [vmem:[%s3250_s1 + $0x78] sm:$0xff]  ;;  %v1530_v19 = vor.u32 %v2051_v14, %v1529_v13  ;;  %v2126_v21 = vld [vmem:[%s3252_s0 + $0x268] sm:$0xf0]  ;;  %v2161_v22 = vld [vmem:[%s3250_s1 + $0xb0] sm:$0xff] }
   0x7   :  { %921 = vmatpush.bf16.msra.mxu0 %v2145_v1  ;;  %2287 = vmatpush.bf16.msra.mxu3 %v2145_v1  ;;  %v2174_v16 = vld [vmem:[%s3250_s1 + $0x118] sm:$0xff]  ;;  %v2153_v23 = vld [vmem:[%s3250_s1 + $0x70] sm:$0xff]  ;;  %v2160_v27 = vld [vmem:[%s3250_s1 + $0xa8] sm:$0xff] }
   0x8   :  { %v1829_v20 = vld [vmem:[%s3252_s0 + $0x258] sm:$0xf]  ;;  %v2173_v24 = vld [vmem:[%s3250_s1 + $0x110] sm:$0xff]  ;;  %v2152_v28 = vld [vmem:[%s3250_s1 + $0x68] sm:$0xff] }
   0x9   :  { %v1830_v25 = vor.u32 %v2126_v21, %v1829_v20  ;;  %v2170_v26 = vld [vmem:[%s3250_s1 + $0xf8] sm:$0xff]  ;;  %v2169_v29 = vld [vmem:[%s3250_s1 + $0xf0] sm:$0xff]  ;;  %v2159_v30 = vld [vmem:[%s3250_s1 + $0xa0] sm:$0xff] }
   0xa   :  { %2288 = vmatpush.bf16.msra.mxu1 %v2144_v2  ;;  %2289 = vmatpush.bf16.msra.mxu2 %v2144_v2  ;;  %v2151_v31 = vld [vmem:[%s3250_s1 + $0x60] sm:$0xff]  ;;  %v1649_v32 = vld [vmem:[%s3252_s0 + $0xf0] sm:$0xf]  ;;  %v1749_v34 = vld [vmem:[%s3252_s0 + $0x1b8] sm:$0xf] }
   0xb   :  { %922 = vmatpush.bf16.msra.mxu0 %v2144_v2  ;;  %2290 = vmatpush.bf16.msra.mxu3 %v2144_v2  ;;  %v2081_v33 = vld [vmem:[%s3252_s0 + $0x100] sm:$0xf0]  ;;  %v2106_v35 = vld [vmem:[%s3252_s0 + $0x1c8] sm:$0xf0]  ;;  %v1549_v37 = vld [vmem:[%s3252_s0 + $0x28] sm:$0xf] }
   0xc   :  { %v2168_v36 = vld [vmem:[%s3250_s1 + $0xe8] sm:$0xff]  ;;  %v2056_v38 = vld [vmem:[%s3252_s0 + $0x38] sm:$0xf0]  ;;  %v1650_v41 = vor.u32 %v2081_v33, %v1649_v32  ;;  %v1750_v42 = vor.u32 %v2106_v35, %v1749_v34  ;;  %v1849_v44 = vld [vmem:[%s3252_s0 + $0x280] sm:$0xf] }
   0xd   :  { %v2158_v39 = vld [vmem:[%s3250_s1 + $0x98] sm:$0xff]  ;;  %v1550_v43 = vor.u32 %v2056_v38, %v1549_v37  ;;  %v2131_v45 = vld [vmem:[%s3252_s0 + $0x290] sm:$0xf0]  ;;  %v2172_v48 = vld [vmem:[%s3250_s1 + $0x108] sm:$0xff] }
   0xe   :  { %2291 = vmatpush.bf16.msra.mxu1 %v2143_v3  ;;  %2292 = vmatpush.bf16.msra.mxu2 %v2143_v3  ;;  %v2150_v40 = vld [vmem:[%s3250_s1 + $0x58] sm:$0xff]  ;;  %v1850_v46 = vor.u32 %v2131_v45, %v1849_v44  ;;  %v2157_v47 = vld [vmem:[%s3250_s1 + $0x90] sm:$0xff]  ;;  %v2167_v49 = vld [vmem:[%s3250_s1 + $0xe0] sm:$0xff] }
   0xf   :  { %923 = vmatpush.bf16.msra.mxu0 %v2143_v3  ;;  %2293 = vmatpush.bf16.msra.mxu3 %v2143_v3  ;;  %v2149_v50 = vld [vmem:[%s3250_s1 + $0x50] sm:$0xff]  ;;  %v2156_v51 = vld [vmem:[%s3250_s1 + $0x88] sm:$0xff]  ;;  %v2166_v52 = vld [vmem:[%s3250_s1 + $0xd8] sm:$0xff] }
  0x10   :  { %v1669_v53 = vld [vmem:[%s3252_s0 + $0x118] sm:$0xf]  ;;  %v2086_v54 = vld [vmem:[%s3252_s0 + $0x128] sm:$0xf0]  ;;  %v1769_v55 = vld [vmem:[%s3252_s0 + $0x1e0] sm:$0xf] }
  0x11   :  { %v2111_v56 = vld [vmem:[%s3252_s0 + $0x1f0] sm:$0xf0]  ;;  %v1569_v58 = vld [vmem:[%s3252_s0 + $0x50] sm:$0xf]  ;;  %v2061_v59 = vld [vmem:[%s3252_s0 + $0x60] sm:$0xf0]  ;;  %v1670_v60 = vor.u32 %v2086_v54, %v1669_v53 }
  0x12   :  { %2294 = vmatpush.bf16.msra.mxu1 %v2142_v4  ;;  %2295 = vmatpush.bf16.msra.mxu2 %v2142_v4  ;;  %v2165_v57 = vld [vmem:[%s3250_s1 + $0xd0] sm:$0xff]  ;;  %v1770_v61 = vor.u32 %v2111_v56, %v1769_v55  ;;  %v1570_v62 = vor.u32 %v2061_v59, %v1569_v58  ;;  %v1869_v63 = vld [vmem:[%s3252_s0 + $0x2a8] sm:$0xf]  ;;  %v2136_v0 = vld [vmem:[%s3252_s0 + $0x2b8] sm:$0xf0] }
  0x13   :  { %924 = vmatpush.bf16.msra.mxu0 %v2142_v4  ;;  %2296 = vmatpush.bf16.msra.mxu3 %v2142_v4  ;;  %v1870_v1 = vor.u32 %v2136_v0, %v1869_v63  ;;  %v2148_v2 = vld [vmem:[%s3250_s1 + $0x48] sm:$0xff]  ;;  %v2155_v4 = vld [vmem:[%s3250_s1 + $0x80] sm:$0xff]  ;;  %v2091_v9 = vld [vmem:[%s3252_s0 + $0x150] sm:$0xf0] }
  0x14   :  { %v2164_v3 = vld [vmem:[%s3250_s1 + $0xc8] sm:$0xff]  ;;  %v1689_v8 = vld [vmem:[%s3252_s0 + $0x140] sm:$0xf]  ;;  %v2116_v11 = vld [vmem:[%s3252_s0 + $0x218] sm:$0xf0] }
  0x15   :  { %v1789_v10 = vld [vmem:[%s3252_s0 + $0x208] sm:$0xf]  ;;  %v2066_v13 = vld [vmem:[%s3252_s0 + $0x88] sm:$0xf0]  ;;  %v1690_v14 = vor.u32 %v2091_v9, %v1689_v8  ;;  %v2096_v21 = vld [vmem:[%s3252_s0 + $0x178] sm:$0xf0] }
  0x16   :  { %2297 = vmatpush.bf16.msra.mxu1 %v2141_v5  ;;  %2298 = vmatpush.bf16.msra.mxu2 %v2141_v5  ;;  %v1709_v20 = vld [vmem:[%s3252_s0 + $0x168] sm:$0xf]  ;;  %v2049_v32 = vld [vmem:[%s3252_s0 + $0x4] sm:$0xf]  ;;  %v1531_v33 = vld [vmem:[%s3252_s0 + $0x14] sm:$0xf0] }
  0x17   :  { %925 = vmatpush.bf16.msra.mxu0 %v2141_v5  ;;  %2299 = vmatpush.bf16.msra.mxu3 %v2141_v5  ;;  %v2171_v5 = vld [vmem:[%s3250_s1 + $0x100] sm:$0xff]  ;;  %v1537_v34 = vld [vmem:[%s3252_s0 + $0x8] sm:$0xf]  ;;  %v2052_v35 = vld [vmem:[%s3252_s0 + $0x18] sm:$0xf0]  ;;  %v1534_v38 = vor.u32 %v2049_v32, %v1531_v33 }
  0x18   :  { %v2053_v37 = vld [vmem:[%s3252_s0 + $0x20] sm:$0xf0]  ;;  %v2054_v44 = vld [vmem:[%s3252_s0 + $0x2c] sm:$0xf]  ;;  %v1551_v45 = vld [vmem:[%s3252_s0 + $0x3c] sm:$0xf0] }
  0x19   :  { %v2065_v53 = vld [vmem:[%s3252_s0 + $0x84] sm:$0xf]  ;;  %v1599_v54 = vld [vmem:[%s3252_s0 + $0x94] sm:$0xf0]  ;;  %v2059_v56 = vld [vmem:[%s3252_s0 + $0x54] sm:$0xf] }
  0x1a   :  { %2300 = vmatpush.bf16.msra.mxu1 %v2140_v6  ;;  %2301 = vmatpush.bf16.msra.mxu2 %v2140_v6  ;;  %v1602_v55 = vor.u32 %v2065_v53, %v1599_v54  ;;  %v1577_v58 = vld [vmem:[%s3252_s0 + $0x58] sm:$0xf]  ;;  %v2062_v59 = vld [vmem:[%s3252_s0 + $0x68] sm:$0xf0]  ;;  %v1605_v8 = vld [vmem:[%s3252_s0 + $0x88] sm:$0xf] }
  0x1b   :  { %926 = vmatpush.bf16.msra.mxu0 %v2140_v6  ;;  %2302 = vmatpush.bf16.msra.mxu3 %v2140_v6  ;;  %v2147_v6 = vld [vmem:[%s3250_s1 + $0x40] sm:$0xff]  ;;  %v1578_v63 = vor.u32 %v2062_v59, %v1577_v58  ;;  %v2068_v9 = vld [vmem:[%s3252_s0 + $0x98] sm:$0xf0]  ;;  %v1679_v54 = vld [vmem:[%s3252_s0 + $0x134] sm:$0xf0] }
  0x1c   :  { %v2080_v33 = vld [vmem:[%s3252_s0 + $0xfc] sm:$0xf]  ;;  %v2085_v53 = vld [vmem:[%s3252_s0 + $0x124] sm:$0xf] }
  0x1e   :  { %2303 = vmatpush.bf16.msra.mxu1 %v2139_v7  ;;  %2304 = vmatpush.bf16.msra.mxu2 %v2139_v7 }
  0x1f   :  { %927 = vmatpush.bf16.msra.mxu0 %v2139_v7  ;;  %2305 = vmatpush.bf16.msra.mxu3 %v2139_v7  ;;  %v2163_v7 = vld [vmem:[%s3250_s1 + $0xc0] sm:$0xff] }
  0x21   :  { %953 = vmatmul.bf16.vlgmr.msra.gmra.mxu1 %v1630_v17  ;;  %978 = vmatmul.bf16.vlgmr.msra.gmra.mxu2 %v1730_v18  ;;  %v2050_v17 = vld [vmem:[%s3252_s0 + $0xc] sm:$0xf]  ;;  %v1539_v18 = vld [vmem:[%s3252_s0 + $0x1c] sm:$0xf0] }
  0x22   :  { %1118 = vmatpush.bf16.msrb.mxu2 %v2162_v12  ;;  %1019 = vmatpush.bf16.msrb.mxu1 %v2154_v15  ;;  %v1589_v12 = vld [vmem:[%s3252_s0 + $0x78] sm:$0xf]  ;;  %v1790_v15 = vor.u32 %v2116_v11, %v1789_v10 }
  0x23   :  { %1320 = vmatpush.bf16.msrb.mxu0 %v2174_v16  ;;  %1003 = vmatmul.bf16.vlgmr.msra.gmra.mxu3 %v1830_v25  ;;  %v1590_v16 = vor.u32 %v2066_v13, %v1589_v12  ;;  %v2071_v25 = vld [vmem:[%s3252_s0 + $0xb0] sm:$0xf0]  ;;  %v1606_v13 = vor.u32 %v2068_v9, %v1605_v8  ;;  %v2090_v9 = vld [vmem:[%s3252_s0 + $0x14c] sm:$0xf] }
  0x24   :  { %928 = vmatmul.bf16.vlgmr.msra.gmra.mxu0 %v1530_v19  ;;  %1217 = vmatpush.bf16.msrb.mxu3 %v2170_v26  ;;  %v1542_v19 = vor.u32 %v2050_v17, %v1539_v18  ;;  %v1710_v26 = vor.u32 %v2096_v21, %v1709_v20 }
  0x26   :  { %1119 = vmatpush.bf16.msrb.mxu2 %v2161_v22  ;;  %1020 = vmatpush.bf16.msrb.mxu1 %v2153_v23  ;;  %v1809_v22 = vld [vmem:[%s3252_s0 + $0x230] sm:$0xf]  ;;  %v2121_v23 = vld [vmem:[%s3252_s0 + $0x240] sm:$0xf0] }
  0x27   :  { %1321 = vmatpush.bf16.msrb.mxu0 %v2173_v24  ;;  %v1609_v24 = vld [vmem:[%s3252_s0 + $0xa0] sm:$0xf] }
  0x28   :  { %1218 = vmatpush.bf16.msrb.mxu3 %v2169_v29  ;;  %v2055_v29 = vld [vmem:[%s3252_s0 + $0x34] sm:$0xf] }
  0x2a   :  { %1120 = vmatpush.bf16.msrb.mxu2 %v2160_v27  ;;  %1021 = vmatpush.bf16.msrb.mxu1 %v2152_v28  ;;  %v1810_v27 = vor.u32 %v2121_v23, %v1809_v22  ;;  %v1610_v28 = vor.u32 %v2071_v25, %v1609_v24  ;;  %v2069_v22 = vld [vmem:[%s3252_s0 + $0xa4] sm:$0xf]  ;;  %v1611_v23 = vld [vmem:[%s3252_s0 + $0xb4] sm:$0xf0]  ;;  %v1617_v24 = vld [vmem:[%s3252_s0 + $0xa8] sm:$0xf] }
  0x2b   :  { %1322 = vmatpush.bf16.msrb.mxu0 %v2172_v48  ;;  %v1565_v48 = vld [vmem:[%s3252_s0 + $0x38] sm:$0xf]  ;;  %v2072_v25 = vld [vmem:[%s3252_s0 + $0xb8] sm:$0xf0] }
  0x2c   :  { %1219 = vmatpush.bf16.msrb.mxu3 %v2168_v36  ;;  %v1545_v36 = vld [vmem:[%s3252_s0 + $0x10] sm:$0xf] }
  0x2e   :  { %1121 = vmatpush.bf16.msrb.mxu2 %v2159_v30  ;;  %1022 = vmatpush.bf16.msrb.mxu1 %v2151_v31  ;;  %v1559_v30 = vld [vmem:[%s3252_s0 + $0x44] sm:$0xf0] }
  0x2f   :  { %1323 = vmatpush.bf16.msrb.mxu0 %v2171_v5  ;;  %v1562_v31 = vor.u32 %v2055_v29, %v1559_v30  ;;  %v1591_v5 = vld [vmem:[%s3252_s0 + $0x8c] sm:$0xf0]  ;;  %v1614_v29 = vor.u32 %v2069_v22, %v1611_v23  ;;  %v1618_v30 = vor.u32 %v2072_v25, %v1617_v24  ;;  %v2084_v24 = vld [vmem:[%s3252_s0 + $0x11c] sm:$0xf] }
  0x30   :  { %1220 = vmatpush.bf16.msrb.mxu3 %v2167_v49  ;;  %v2058_v49 = vld [vmem:[%s3252_s0 + $0x48] sm:$0xf0]  ;;  %v1671_v25 = vld [vmem:[%s3252_s0 + $0x12c] sm:$0xf0] }
  0x31   :  { %958 = vmatmul.bf16.gmra.mxu1 %v1650_v41  ;;  %983 = vmatmul.bf16.gmra.mxu2 %v1750_v42  ;;  %v2060_v41 = vld [vmem:[%s3252_s0 + $0x5c] sm:$0xf]  ;;  %v1579_v42 = vld [vmem:[%s3252_s0 + $0x6c] sm:$0xf0] }
  0x32   :  { %1122 = vmatpush.bf16.msrb.mxu2 %v2158_v39  ;;  %1023 = vmatpush.bf16.msrb.mxu1 %v2150_v40  ;;  %v1538_v39 = vor.u32 %v2052_v35, %v1537_v34  ;;  %v1546_v40 = vor.u32 %v2053_v37, %v1545_v36  ;;  %v1659_v34 = vld [vmem:[%s3252_s0 + $0x10c] sm:$0xf0] }
  0x33   :  { %1008 = vmatmul.bf16.gmra.mxu3 %v1850_v46  ;;  %v1557_v46 = vld [vmem:[%s3252_s0 + $0x30] sm:$0xf]  ;;  %v1662_v37 = vor.u32 %v2080_v33, %v1659_v34  ;;  %v1674_v33 = vor.u32 %v2084_v24, %v1671_v25  ;;  %v2859_v25 = vld [vmem:[%s3251_s2] ss:$0 sm:$0xff] }
  0x34   :  { %933 = vmatmul.bf16.gmra.mxu0 %v1550_v43  ;;  %1221 = vmatpush.bf16.msrb.mxu3 %v2166_v52  ;;  %v1582_v43 = vor.u32 %v2060_v41, %v1579_v42  ;;  %v1566_v52 = vor.u32 %v2058_v49, %v1565_v48  ;;  %v2074_v42 = vld [vmem:[%s3252_s0 + $0xcc] sm:$0xf] }
  0x36   :  { %1123 = vmatpush.bf16.msrb.mxu2 %v2157_v47  ;;  %1024 = vmatpush.bf16.msrb.mxu1 %v2149_v50  ;;  %v2057_v47 = vld [vmem:[%s3252_s0 + $0x40] sm:$0xf0]  ;;  %v1554_v50 = vor.u32 %v2054_v44, %v1551_v45  ;;  %v1637_v44 = vld [vmem:[%s3252_s0 + $0xd0] sm:$0xf] }
  0x37   :  { %v2077_v45 = vld [vmem:[%s3252_s0 + $0xe0] sm:$0xf0] }
  0x38   :  { %1222 = vmatpush.bf16.msrb.mxu3 %v2165_v57  ;;  %v1571_v57 = vld [vmem:[%s3252_s0 + $0x64] sm:$0xf0] }
  0x3a   :  { %1124 = vmatpush.bf16.msrb.mxu2 %v2156_v51  ;;  %1025 = vmatpush.bf16.msrb.mxu1 %v2148_v2  ;;  %v1558_v51 = vor.u32 %v2057_v47, %v1557_v46  ;;  %v1619_v2 = vld [vmem:[%s3252_s0 + $0xbc] sm:$0xf0]  ;;  %v1645_v46 = vld [vmem:[%s3252_s0 + $0xd8] sm:$0xf]  ;;  %v2078_v47 = vld [vmem:[%s3252_s0 + $0xe8] sm:$0xf0] }
  0x3c   :  { %1223 = vmatpush.bf16.msrb.mxu3 %v2164_v3 }
  0x3e   :  { %1125 = vmatpush.bf16.msrb.mxu2 %v2155_v4  ;;  %1026 = vmatpush.bf16.msrb.mxu1 %v2147_v6  ;;  %v2064_v4 = vld [vmem:[%s3252_s0 + $0x7c] sm:$0xf]  ;;  %v1597_v6 = vld [vmem:[%s3252_s0 + $0x80] sm:$0xf] }
  0x3f   :  { %v1594_v10 = vor.u32 %v2064_v4, %v1591_v5 }
  0x40   :  { %1224 = vmatpush.bf16.msrb.mxu3 %v2163_v7  ;;  %v2067_v7 = vld [vmem:[%s3252_s0 + $0x90] sm:$0xf0] }
  0x41   :  { %963 = vmatmul.bf16.gmra.mxu1 %v1670_v60  ;;  %988 = vmatmul.bf16.gmra.mxu2 %v1770_v61  ;;  %v1585_v60 = vld [vmem:[%s3252_s0 + $0x60] sm:$0xf]  ;;  %v2063_v61 = vld [vmem:[%s3252_s0 + $0x70] sm:$0xf0]  ;;  %v1598_v11 = vor.u32 %v2067_v7, %v1597_v6 }
  0x42   :  { %v1586_v0 = vor.u32 %v2063_v61, %v1585_v60 }
  0x43   :  { %1013 = vmatmul.bf16.gmra.mxu3 %v1870_v1  ;;  %v2070_v1 = vld [vmem:[%s3252_s0 + $0xac] sm:$0xf] }
  0x44   :  { %938 = vmatmul.bf16.gmra.mxu0 %v1570_v62  ;;  %v1574_v62 = vor.u32 %v2059_v56, %v1571_v57  ;;  %v1622_v3 = vor.u32 %v2070_v1, %v1619_v2  ;;  %v1682_v57 = vor.u32 %v2085_v53, %v1679_v54  ;;  %v2082_v1 = vld [vmem:[%s3252_s0 + $0x108] sm:$0xf0]  ;;  %v1665_v2 = vld [vmem:[%s3252_s0 + $0x100] sm:$0xf]  ;;  %v2089_v54 = vld [vmem:[%s3252_s0 + $0x144] sm:$0xf] }
  0x51   :  { %968 = vmatmul.bf16.gmra.mxu1 %v1690_v14  ;;  %993 = vmatmul.bf16.gmra.mxu2 %v1790_v15  ;;  %v2075_v14 = vld [vmem:[%s3252_s0 + $0xd4] sm:$0xf]  ;;  %v1639_v15 = vld [vmem:[%s3252_s0 + $0xe4] sm:$0xf0] }
  0x52   :  { %v1642_v17 = vor.u32 %v2075_v14, %v1639_v15 }
  0x53   :  { %1225 = vmatmul.bf16.vlgmr.msrb.gmra.mxu3 %v1542_v19 }
  0x54   :  { %943 = vmatmul.bf16.gmra.mxu0 %v1590_v16 }
  0x61   :  { %973 = vmatmul.bf16.gmra.mxu1 %v1710_v26  ;;  %998 = vmatmul.bf16.gmra.mxu2 %v1810_v27  ;;  %v1625_v26 = vld [vmem:[%s3252_s0 + $0xb0] sm:$0xf]  ;;  %v2073_v27 = vld [vmem:[%s3252_s0 + $0xc0] sm:$0xf0] }
  0x62   :  { %v1626_v32 = vor.u32 %v2073_v27, %v1625_v26  ;;  %v1677_v26 = vld [vmem:[%s3252_s0 + $0x120] sm:$0xf]  ;;  %v2087_v27 = vld [vmem:[%s3252_s0 + $0x130] sm:$0xf0] }
  0x63   :  { %1230 = vmatmul.bf16.gmra.mxu3 %v1562_v31  ;;  %v1678_v34 = vor.u32 %v2087_v27, %v1677_v26 }
  0x64   :  { %948 = vmatmul.bf16.gmra.mxu0 %v1610_v28 }
  0x71   :  { %1027 = vmatmul.bf16.vlgmr.msrb.gmra.mxu1 %v1534_v38  ;;  %1126 = vmatmul.bf16.vlgmr.msrb.gmra.mxu2 %v1538_v39 }
  0x73   :  { %1235 = vmatmul.bf16.gmra.mxu3 %v1582_v43  ;;  %v1631_v43 = vld [vmem:[%s3252_s0 + $0xdc] sm:$0xf0] }
  0x74   :  { %2031 = vmatmul.msk.bf16.vlgmr.msrb.gmra.mxu0 %vm865_vm0, %v1546_v40  ;;  %v1634_v49 = vor.u32 %v2074_v42, %v1631_v43  ;;  %v2095_v43 = vld [vmem:[%s3252_s0 + $0x174] sm:$0xf] }
  0x81   :  { %1032 = vmatmul.bf16.gmra.mxu1 %v1554_v50  ;;  %1131 = vmatmul.bf16.gmra.mxu2 %v1558_v51  ;;  %v1638_v50 = vor.u32 %v2077_v45, %v1637_v44  ;;  %v1719_v44 = vld [vmem:[%s3252_s0 + $0x184] sm:$0xf0] }
  0x83   :  { %1240 = vmatmul.bf16.gmra.mxu3 %v1602_v55 }
  0x84   :  { %2032 = vmatmul.msk.bf16.gmra.mxu0 %vm865_vm0, %v1566_v52  ;;  %v1646_v52 = vor.u32 %v2078_v47, %v1645_v46  ;;  %v1722_v47 = vor.u32 %v2095_v43, %v1719_v44 }
  0x91   :  { %1037 = vmatmul.bf16.gmra.mxu1 %v1574_v62  ;;  %1136 = vmatmul.bf16.gmra.mxu2 %v1578_v63  ;;  %v2079_v62 = vld [vmem:[%s3252_s0 + $0xf4] sm:$0xf]  ;;  %v1651_v63 = vld [vmem:[%s3252_s0 + $0x104] sm:$0xf0] }
  0x92   :  { %v1654_v5 = vor.u32 %v2079_v62, %v1651_v63  ;;  %v1697_v62 = vld [vmem:[%s3252_s0 + $0x148] sm:$0xf]  ;;  %v2092_v63 = vld [vmem:[%s3252_s0 + $0x158] sm:$0xf0] }
  0x93   :  { %1245 = vmatmul.bf16.gmra.mxu3 %v1622_v3  ;;  %v2083_v3 = vld [vmem:[%s3252_s0 + $0x110] sm:$0xf0] }
  0x94   :  { %2033 = vmatmul.msk.bf16.gmra.mxu0 %vm865_vm0, %v1586_v0  ;;  %v1657_v0 = vld [vmem:[%s3252_s0 + $0xf8] sm:$0xf]  ;;  %v1666_v8 = vor.u32 %v2083_v3, %v1665_v2 }
  0x95   :  { %v1658_v6 = vor.u32 %v2082_v1, %v1657_v0  ;;  %v1705_v0 = vld [vmem:[%s3252_s0 + $0x150] sm:$0xf]  ;;  %v2093_v1 = vld [vmem:[%s3252_s0 + $0x160] sm:$0xf0] }
  0x9e   :  { %v2649_v12 = vpop.f32.mrf.mxu1 }
  0xa1   :  { %v2657_v16 = vpop.f32.mrf.mxu0  ;;  %1042 = vmatmul.bf16.gmra.mxu1 %v1594_v10  ;;  %1141 = vmatmul.bf16.gmra.mxu2 %v1598_v11  ;;  %v1699_v10 = vld [vmem:[%s3252_s0 + $0x15c] sm:$0xf0] }
  0xa2   :  { %v1702_v14 = vor.u32 %v2090_v9, %v1699_v10  ;;  %v2100_v9 = vld [vmem:[%s3252_s0 + $0x19c] sm:$0xf]  ;;  %v1739_v10 = vld [vmem:[%s3252_s0 + $0x1ac] sm:$0xf0]  ;;  %v930_v27 = vadd.f32 %v2859_v25, %v2657_v16 }
  0xa3   :  { %1250 = vmatmul.bf16.gmra.mxu3 %v1642_v17  ;;  %v1742_v26 = vor.u32 %v2100_v9, %v1739_v10  ;;  %v1717_v16 = vld [vmem:[%s3252_s0 + $0x170] sm:$0xf]  ;;  %v2105_v10 = vld [vmem:[%s3252_s0 + $0x1c4] sm:$0xf] }
  0xa4   :  { %2034 = vmatmul.msk.bf16.gmra.mxu0 %vm865_vm0, %v1606_v13  ;;  %v2660_v18 = vpop.f32.mrf.mxu2 }
  0xa6   :  { %v2662_v19 = vpop.f32.mrf.mxu1  ;;  %v2666_v21 = vpop.f32.mrf.mxu3 }
  0xa9   :  { %v2664_v20 = vpop.f32.mrf.mxu0 }
  0xaa   :  { %v932_v44 = vadd.f32 %v2859_v25, %v2664_v20  ;;  %v1725_v20 = vld [vmem:[%s3252_s0 + $0x178] sm:$0xf] }
  0xac   :  { %v2686_v28 = vpop.f32.mrf.mxu2 }
  0xae   :  { %v2688_v31 = vpop.f32.mrf.mxu1  ;;  %v2698_v36 = vpop.f32.mrf.mxu3 }
  0xb1   :  { %v2696_v35 = vpop.f32.mrf.mxu0  ;;  %1047 = vmatmul.bf16.gmra.mxu1 %v1614_v29  ;;  %1146 = vmatmul.bf16.gmra.mxu2 %v1618_v30  ;;  %v1685_v29 = vld [vmem:[%s3252_s0 + $0x128] sm:$0xf]  ;;  %v2088_v30 = vld [vmem:[%s3252_s0 + $0x138] sm:$0xf0] }
  0xb2   :  { %v1686_v42 = vor.u32 %v2088_v30, %v1685_v29 }
  0xb3   :  { %1255 = vmatmul.bf16.gmra.mxu3 %v1662_v37 }
  0xb4   :  { %2035 = vmatmul.msk.bf16.gmra.mxu0 %vm865_vm0, %v1626_v32  ;;  %v2701_v38 = vpop.f32.mrf.mxu2 }
  0xb6   :  { %v2703_v39 = vpop.f32.mrf.mxu1  ;;  %v2707_v41 = vpop.f32.mrf.mxu3 }
  0xb9   :  { %v2705_v40 = vpop.f32.mrf.mxu0 }
  0xbc   :  { %v2727_v48 = vpop.f32.mrf.mxu2 }
  0xbe   :  { %v2729_v51 = vpop.f32.mrf.mxu1  ;;  %v2739_v56 = vpop.f32.mrf.mxu3 }
  0xc1   :  { %v2737_v55 = vpop.f32.mrf.mxu0  ;;  %1052 = vmatmul.bf16.gmra.mxu1 %v1634_v49  ;;  %1151 = vmatmul.bf16.gmra.mxu2 %v1638_v50 }
  0xc3   :  { %1260 = vmatmul.bf16.gmra.mxu3 %v1682_v57  ;;  %v1691_v57 = vld [vmem:[%s3252_s0 + $0x154] sm:$0xf0] }
  0xc4   :  { %2036 = vmatmul.msk.bf16.gmra.mxu0 %vm865_vm0, %v1646_v52  ;;  %v2742_v58 = vpop.f32.mrf.mxu2  ;;  %v1694_v3 = vor.u32 %v2089_v54, %v1691_v57  ;;  %v1711_v54 = vld [vmem:[%s3252_s0 + $0x17c] sm:$0xf0]  ;;  %v2097_v57 = vld [vmem:[%s3252_s0 + $0x180] sm:$0xf0] }
  0xc6   :  { %v2744_v59 = vpop.f32.mrf.mxu1  ;;  %v2748_v61 = vpop.f32.mrf.mxu3 }
  0xc9   :  { %v2746_v60 = vpop.f32.mrf.mxu0 }
  0xcc   :  { %v2768_v4 = vpop.f32.mrf.mxu2 }
  0xce   :  { %v2770_v7 = vpop.f32.mrf.mxu1  ;;  %v2780_v13 = vpop.f32.mrf.mxu3 }
  0xd1   :  { %v2778_v11 = vpop.f32.mrf.mxu0  ;;  %1057 = vmatmul.bf16.gmra.mxu1 %v1654_v5  ;;  %1156 = vmatmul.bf16.gmra.mxu2 %v1658_v6  ;;  %v1698_v5 = vor.u32 %v2092_v63, %v1697_v62 }
  0xd3   :  { %1265 = vmatmul.bf16.gmra.mxu3 %v1702_v14 }
  0xd4   :  { %2037 = vmatmul.msk.bf16.gmra.mxu0 %vm865_vm0, %v1666_v8  ;;  %v2783_v15 = vpop.f32.mrf.mxu2  ;;  %v1706_v8 = vor.u32 %v2093_v1, %v1705_v0  ;;  %v2098_v0 = vld [vmem:[%s3252_s0 + $0x188] sm:$0xf0] }
  0xd5   :  { %v1726_v9 = vor.u32 %v2098_v0, %v1725_v20  ;;  %v937_v20 = vadd.f32 %v2859_v25, %v2705_v40  ;;  %v1731_v0 = vld [vmem:[%s3252_s0 + $0x1a4] sm:$0xf0]  ;;  %v1745_v40 = vld [vmem:[%s3252_s0 + $0x1a0] sm:$0xf] }
  0xd6   :  { %v2785_v17 = vpop.f32.mrf.mxu1  ;;  %v1226_v23 = vpop.f32.mrf.mxu3 }
  0xd9   :  { %v2787_v22 = vpop.f32.mrf.mxu0 }
  0xdc   :  { %v2807_v32 = vpop.f32.mrf.mxu2 }
  0xde   :  { %v2809_v37 = vpop.f32.mrf.mxu1  ;;  %v1228_v46 = vpop.f32.mrf.mxu3 }
  0xe1   :  { %v2817_v45 = vpop.f32.mrf.mxu0  ;;  %1062 = vmatmul.bf16.gmra.mxu1 %v1674_v33  ;;  %1161 = vmatmul.bf16.gmra.mxu2 %v1678_v34 }
  0xe3   :  { %1270 = vmatmul.bf16.gmra.mxu3 %v1722_v47  ;;  %v2094_v47 = vld [vmem:[%s3252_s0 + $0x16c] sm:$0xf] }
  0xe4   :  { %2038 = vmatmul.msk.bf16.gmra.mxu0 %vm865_vm0, %v1686_v42  ;;  %v2820_v49 = vpop.f32.mrf.mxu2 }
  0xe6   :  { %v2822_v50 = vpop.f32.mrf.mxu1  ;;  %v2826_v53 = vpop.f32.mrf.mxu3 }
  0xe9   :  { %v2824_v52 = vpop.f32.mrf.mxu0 }
  0xec   :  { %v2846_v2 = vpop.f32.mrf.mxu2 }
  0xee   :  { %v1028_v6 = vpop.f32.mrf.mxu1  ;;  %v2854_v24 = vpop.f32.mrf.mxu3 }
  0xef   :  { %v1029_v30 = vadd.f32 %v1028_v6, %v930_v27  ;;  %v1718_v6 = vor.u32 %v2097_v57, %v1717_v16 }
  0xf1   :  { %v1325_v14 = vpop.f32.mrf.mxu0  ;;  %1067 = vmatmul.bf16.gmra.mxu1 %v1694_v3  ;;  %1166 = vmatmul.bf16.gmra.mxu2 %v1698_v5  ;;  %v1714_v5 = vor.u32 %v2094_v47, %v1711_v54 }
  0xf3   :  { %1275 = vmatmul.bf16.gmra.mxu3 %v1742_v26 }
  0xf4   :  { %2039 = vmatmul.msk.bf16.gmra.mxu0 %vm865_vm0, %v1706_v8  ;;  %v1127_v29 = vpop.f32.mrf.mxu2 }
  0xf5   :  { %v1128_v34 = vadd.f32 %v1127_v29, %v1029_v30 }
  0xf6   :  { %v1030_v33 = vpop.f32.mrf.mxu1  ;;  %v2864_v43 = vpop.f32.mrf.mxu3 }
  0xf7   :  { %v1227_v62 = vadd.f32 %v1226_v23, %v1128_v34  ;;  %v1031_v63 = vadd.f32 %v1030_v33, %v932_v44  ;;  %v1759_v23 = vld [vmem:[%s3252_s0 + $0x1d4] sm:$0xf0]  ;;  %v935_v44 = vadd.f32 %v2859_v25, %v2696_v35  ;;  %v2099_v35 = vld [vmem:[%s3252_s0 + $0x194] sm:$0xf] }
  0xf8   :  { %v1762_v34 = vor.u32 %v2105_v10, %v1759_v23  ;;  %v1734_v23 = vor.u32 %v2099_v35, %v1731_v0 }
  0xf9   :  { %v1327_v42 = vpop.f32.mrf.mxu0  ;;  %v1326_v26 = vadd.f32 %v1325_v14, %v1227_v62 }
  0xfb   :  { %v1415_v47 = vmax.f32 %v1326_v26, 0.0 }
  0xfc   :  { %v1129_v1 = vpop.f32.mrf.mxu2 }
  0xfd   :  { %v1130_v3 = vadd.f32 %v1129_v1, %v1031_v63  ;;  %v1737_v1 = vld [vmem:[%s3252_s0 + $0x198] sm:$0xf] }
  0xfe   :  { %v1033_v8 = vpop.f32.mrf.mxu1  ;;  %v2892_v30 = vpop.f32.mrf.mxu3 }
  0xff   :  { %v1229_v27 = vadd.f32 %v1228_v46, %v1130_v3  ;;  %v1034_v63 = vadd.f32 %v1033_v8, %v935_v44  ;;  %v2102_v3 = vld [vmem:[%s3252_s0 + $0x1a8] sm:$0xf0]  ;;  %v2103_v8 = vld [vmem:[%s3252_s0 + $0x1b0] sm:$0xf0] }
 0x100   :  { %v1738_v26 = vor.u32 %v2102_v3, %v1737_v1 }
 0x101   :  { %v1330_v29 = vpop.f32.mrf.mxu0  ;;  %v1328_v33 = vadd.f32 %v1327_v42, %v1229_v27  ;;  %1072 = vmatmul.bf16.gmra.mxu1 %v1714_v5  ;;  %1171 = vmatmul.bf16.gmra.mxu2 %v1718_v6 }
 0x103   :  { %v1416_v54 = vmax.f32 %v1328_v33, 0.0  ;;  %1280 = vmatmul.bf16.gmra.mxu3 %v1762_v34  ;;  %v1746_v33 = vor.u32 %v2103_v8, %v1745_v40  ;;  %v2110_v34 = vld [vmem:[%s3252_s0 + $0x1ec] sm:$0xf]  ;;  %v1757_v40 = vld [vmem:[%s3252_s0 + $0x1c0] sm:$0xf] }
 0x104   :  { %2040 = vmatmul.msk.bf16.gmra.mxu0 %vm865_vm0, %v1726_v9  ;;  %v1132_v16 = vpop.f32.mrf.mxu2  ;;  %v2107_v8 = vld [vmem:[%s3252_s0 + $0x1d0] sm:$0xf0] }
 0x105   :  { %v2178_v57 = vpack.c.bf16 %v1416_v54, %v1415_v47  ;;  %v1133_v46 = vadd.f32 %v1132_v16, %v1034_v63 }
 0x106   :  { %v1035_v14 = vpop.f32.mrf.mxu1  ;;  %v2900_v62 = vpop.f32.mrf.mxu3 }
 0x107   :  { %2179 = vst [vmem:[%s3253_s3] sm:$0xff] %v2178_v57   ;;  %v1232_v5 = vadd.f32 %v2826_v53, %v1133_v46  ;;  %v1036_v6 = vadd.f32 %v1035_v14, %v937_v20  ;;  %v1779_v53 = vld [vmem:[%s3252_s0 + $0x1fc] sm:$0xf0]  ;;  %v940_v14 = vadd.f32 %v2859_v25, %v2737_v55  ;;  %v2104_v55 = vld [vmem:[%s3252_s0 + $0x1bc] sm:$0xf] }
 0x108   :  { %v1782_v63 = vor.u32 %v2110_v34, %v1779_v53  ;;  %v1758_v34 = vor.u32 %v2107_v8, %v1757_v40  ;;  %v947_v40 = vadd.f32 %v2859_v25, %v2787_v22  ;;  %v1771_v8 = vld [vmem:[%s3252_s0 + $0x1f4] sm:$0xf0]  ;;  %v1785_v22 = vld [vmem:[%s3252_s0 + $0x1f0] sm:$0xf] }
 0x109   :  { %v1332_v42 = vpop.f32.mrf.mxu0  ;;  %v1331_v44 = vadd.f32 %v1330_v29, %v1232_v5  ;;  %v942_v5 = vadd.f32 %v2859_v25, %v2746_v60  ;;  %v1765_v60 = vld [vmem:[%s3252_s0 + $0x1c8] sm:$0xf] }
 0x10b   :  { %v1417_v46 = vmax.f32 %v1331_v44, 0.0 }
 0x10c   :  { %v1134_v9 = vpop.f32.mrf.mxu2 }
 0x10d   :  { %v1135_v10 = vadd.f32 %v1134_v9, %v1036_v6  ;;  %v1751_v6 = vld [vmem:[%s3252_s0 + $0x1cc] sm:$0xf0] }
 0x10e   :  { %v1038_v27 = vpop.f32.mrf.mxu1  ;;  %v2930_v16 = vpop.f32.mrf.mxu3 }
 0x10f   :  { %v1234_v47 = vadd.f32 %v2854_v24, %v1135_v10  ;;  %v1039_v1 = vadd.f32 %v1038_v27, %v940_v14 }
 0x111   :  { %v1335_v54 = vpop.f32.mrf.mxu0  ;;  %v1333_v57 = vadd.f32 %v1332_v42, %v1234_v47  ;;  %1077 = vmatmul.bf16.gmra.mxu1 %v1734_v23  ;;  %1176 = vmatmul.bf16.gmra.mxu2 %v1738_v26  ;;  %v2108_v23 = vld [vmem:[%s3252_s0 + $0x1d8] sm:$0xf0]  ;;  %v2115_v47 = vld [vmem:[%s3252_s0 + $0x214] sm:$0xf] }
 0x112   :  { %v1766_v44 = vor.u32 %v2108_v23, %v1765_v60 }
 0x113   :  { %v1418_v20 = vmax.f32 %v1333_v57, 0.0  ;;  %1285 = vmatmul.bf16.gmra.mxu3 %v1782_v63 }
 0x114   :  { %2041 = vmatmul.msk.bf16.gmra.mxu0 %vm865_vm0, %v1746_v33  ;;  %v1137_v35 = vpop.f32.mrf.mxu2  ;;  %v1754_v33 = vor.u32 %v2104_v55, %v1751_v6 }
 0x115   :  { %v2183_v0 = vpack.c.bf16 %v1418_v20, %v1417_v46  ;;  %v1138_v24 = vadd.f32 %v1137_v35, %v1039_v1 }
 0x116   :  { %v1040_v29 = vpop.f32.mrf.mxu1  ;;  %v2938_v3 = vpop.f32.mrf.mxu3 }
 0x117   :  { %2265 = vst [vmem:[%s3253_s3 + $0x8] sm:$0xff] %v2183_v0   ;;  %v1237_v9 = vadd.f32 %v2864_v43, %v1138_v24  ;;  %v1041_v10 = vadd.f32 %v1040_v29, %v942_v5  ;;  %v1799_v43 = vld [vmem:[%s3252_s0 + $0x224] sm:$0xf0]  ;;  %v945_v0 = vadd.f32 %v2859_v25, %v2778_v11  ;;  %v2109_v11 = vld [vmem:[%s3252_s0 + $0x1e4] sm:$0xf] }
 0x118   :  { %v1802_v35 = vor.u32 %v2115_v47, %v1799_v43  ;;  %v2120_v43 = vld [vmem:[%s3252_s0 + $0x23c] sm:$0xf] }
 0x119   :  { %v1337_v42 = vpop.f32.mrf.mxu0  ;;  %v1336_v57 = vadd.f32 %v1335_v54, %v1237_v9  ;;  %v1777_v9 = vld [vmem:[%s3252_s0 + $0x1e8] sm:$0xf] }
 0x11b   :  { %v1419_v1 = vmax.f32 %v1336_v57, 0.0 }
 0x11c   :  { %v1139_v26 = vpop.f32.mrf.mxu2 }
 0x11d   :  { %v1140_v27 = vadd.f32 %v1139_v26, %v1041_v10  ;;  %v2112_v10 = vld [vmem:[%s3252_s0 + $0x1f8] sm:$0xf0]  ;;  %v2113_v26 = vld [vmem:[%s3252_s0 + $0x200] sm:$0xf0] }
 0x11e   :  { %v1043_v53 = vpop.f32.mrf.mxu1  ;;  %v2968_v46 = vpop.f32.mrf.mxu3  ;;  %v1786_v47 = vor.u32 %v2113_v26, %v1785_v22  ;;  %v2118_v22 = vld [vmem:[%s3252_s0 + $0x228] sm:$0xf0] }
 0x11f   :  { %v1239_v63 = vadd.f32 %v2892_v30, %v1140_v27  ;;  %v1044_v55 = vadd.f32 %v1043_v53, %v945_v0  ;;  %v1778_v53 = vor.u32 %v2112_v10, %v1777_v9  ;;  %v1797_v9 = vld [vmem:[%s3252_s0 + $0x210] sm:$0xf]  ;;  %v2117_v10 = vld [vmem:[%s3252_s0 + $0x220] sm:$0xf0] }
 0x121   :  { %v1340_v14 = vpop.f32.mrf.mxu0  ;;  %v1338_v20 = vadd.f32 %v1337_v42, %v1239_v63  ;;  %1082 = vmatmul.bf16.gmra.mxu1 %v1754_v33  ;;  %1181 = vmatmul.bf16.gmra.mxu2 %v1758_v34  ;;  %v1774_v34 = vor.u32 %v2109_v11, %v1771_v8  ;;  %v952_v11 = vadd.f32 %v2859_v25, %v2824_v52  ;;  %v1791_v8 = vld [vmem:[%s3252_s0 + $0x21c] sm:$0xf0]  ;;  %v1805_v52 = vld [vmem:[%s3252_s0 + $0x218] sm:$0xf] }
 0x123   :  { %v1420_v29 = vmax.f32 %v1338_v20, 0.0  ;;  %1290 = vmatmul.bf16.gmra.mxu3 %v1802_v35 }
 0x124   :  { %2042 = vmatmul.msk.bf16.gmra.mxu0 %vm865_vm0, %v1766_v44  ;;  %v1142_v24 = vpop.f32.mrf.mxu2 }
 0x125   :  { %v2188_v5 = vpack.c.bf16 %v1420_v29, %v1419_v1  ;;  %v1143_v30 = vadd.f32 %v1142_v24, %v1044_v55  ;;  %v950_v29 = vadd.f32 %v2859_v25, %v2817_v45  ;;  %v2114_v45 = vld [vmem:[%s3252_s0 + $0x20c] sm:$0xf] }
 0x126   :  { %v1045_v54 = vpop.f32.mrf.mxu1  ;;  %v2976_v6 = vpop.f32.mrf.mxu3 }
 0x127   :  { %2266 = vst [vmem:[%s3253_s3 + $0x10] sm:$0xff] %v2188_v5   ;;  %v1242_v60 = vadd.f32 %v2900_v62, %v1143_v30  ;;  %v1046_v23 = vadd.f32 %v1045_v54, %v947_v40  ;;  %v1819_v62 = vld [vmem:[%s3252_s0 + $0x24c] sm:$0xf0] }
 0x128   :  { %v1822_v1 = vor.u32 %v2120_v43, %v1819_v62 }
 0x129   :  { %v1342_v42 = vpop.f32.mrf.mxu0  ;;  %v1341_v57 = vadd.f32 %v1340_v14, %v1242_v60 }
 0x12b   :  { %v1421_v24 = vmax.f32 %v1341_v57, 0.0 }
 0x12c   :  { %v1144_v27 = vpop.f32.mrf.mxu2 }
 0x12d   :  { %v1145_v33 = vadd.f32 %v1144_v27, %v1046_v23 }
 0x12e   :  { %v1048_v44 = vpop.f32.mrf.mxu1  ;;  %v3006_v35 = vpop.f32.mrf.mxu3 }
 0x12f   :  { %v1244_v63 = vadd.f32 %v2930_v16, %v1145_v33  ;;  %v1049_v30 = vadd.f32 %v1048_v44, %v950_v29  ;;  %v1794_v33 = vor.u32 %v2114_v45, %v1791_v8  ;;  %v1806_v44 = vor.u32 %v2118_v22, %v1805_v52  ;;  %v1817_v45 = vld [vmem:[%s3252_s0 + $0x238] sm:$0xf]  ;;  %v2122_v8 = vld [vmem:[%s3252_s0 + $0x248] sm:$0xf0] }
 0x130   :  { %v955_v29 = vadd.f32 %v2859_v25, %v2649_v12  ;;  %v2119_v12 = vld [vmem:[%s3252_s0 + $0x234] sm:$0xf] }
 0x131   :  { %v1345_v20 = vpop.f32.mrf.mxu0  ;;  %v1343_v0 = vadd.f32 %v1342_v42, %v1244_v63  ;;  %1087 = vmatmul.bf16.gmra.mxu1 %v1774_v34  ;;  %1186 = vmatmul.bf16.gmra.mxu2 %v1778_v53  ;;  %v1798_v34 = vor.u32 %v2117_v10, %v1797_v9 }
 0x133   :  { %v1422_v5 = vmax.f32 %v1343_v0, 0.0  ;;  %1295 = vmatmul.bf16.gmra.mxu3 %v1822_v1 }
 0x134   :  { %2043 = vmatmul.msk.bf16.gmra.mxu0 %vm865_vm0, %v1786_v47  ;;  %v1147_v55 = vpop.f32.mrf.mxu2  ;;  %v2125_v47 = vld [vmem:[%s3252_s0 + $0x264] sm:$0xf] }
 0x135   :  { %v2193_v54 = vpack.c.bf16 %v1422_v5, %v1421_v24  ;;  %v1148_v16 = vadd.f32 %v1147_v55, %v1049_v30 }
 0x136   :  { %v1050_v14 = vpop.f32.mrf.mxu1  ;;  %v3014_v40 = vpop.f32.mrf.mxu3 }
 0x137   :  { %2267 = vst [vmem:[%s3253_s3 + $0x18] sm:$0xff] %v2193_v54   ;;  %v1247_v60 = vadd.f32 %v2938_v3, %v1148_v16  ;;  %v1051_v23 = vadd.f32 %v1050_v14, %v952_v11  ;;  %v1839_v3 = vld [vmem:[%s3252_s0 + $0x274] sm:$0xf0]  ;;  %v1811_v11 = vld [vmem:[%s3252_s0 + $0x244] sm:$0xf0] }
 0x138   :  { %v1842_v1 = vor.u32 %v2125_v47, %v1839_v3  ;;  %v1814_v22 = vor.u32 %v2119_v12, %v1811_v11 }
 0x139   :  { %v1347_v42 = vpop.f32.mrf.mxu0  ;;  %v1346_v43 = vadd.f32 %v1345_v20, %v1247_v60  ;;  %v2123_v60 = vld [vmem:[%s3252_s0 + $0x250] sm:$0xf0] }
 0x13b   :  { %v1423_v24 = vmax.f32 %v1346_v43, 0.0 }
 0x13c   :  { %v1149_v26 = vpop.f32.mrf.mxu2 }
 0x13d   :  { %v1150_v27 = vadd.f32 %v1149_v26, %v1051_v23  ;;  %v1818_v26 = vor.u32 %v2122_v8, %v1817_v45  ;;  %v2128_v45 = vld [vmem:[%s3252_s0 + $0x278] sm:$0xf0] }
 0x13e   :  { %v1053_v53 = vpop.f32.mrf.mxu1  ;;  %v3044_v63 = vpop.f32.mrf.mxu3 }
 0x13f   :  { %v1249_v62 = vadd.f32 %v2968_v46, %v1150_v27  ;;  %v1054_v30 = vadd.f32 %v1053_v53, %v955_v29 }
 0x141   :  { %v1350_v57 = vpop.f32.mrf.mxu0  ;;  %v1348_v0 = vadd.f32 %v1347_v42, %v1249_v62  ;;  %1092 = vmatmul.bf16.gmra.mxu1 %v1794_v33  ;;  %1191 = vmatmul.bf16.gmra.mxu2 %v1798_v34  ;;  %v957_v42 = vadd.f32 %v2859_v25, %v2662_v19  ;;  %v1825_v19 = vld [vmem:[%s3252_s0 + $0x240] sm:$0xf]  ;;  %v2130_v34 = vld [vmem:[%s3252_s0 + $0x28c] sm:$0xf] }
 0x142   :  { %v1826_v33 = vor.u32 %v2123_v60, %v1825_v19 }
 0x143   :  { %v1424_v5 = vmax.f32 %v1348_v0, 0.0  ;;  %1300 = vmatmul.bf16.gmra.mxu3 %v1842_v1  ;;  %v960_v0 = vadd.f32 %v2859_v25, %v2688_v31  ;;  %v2124_v31 = vld [vmem:[%s3252_s0 + $0x25c] sm:$0xf] }
 0x144   :  { %2044 = vmatmul.msk.bf16.gmra.mxu0 %vm865_vm0, %v1806_v44  ;;  %v1152_v55 = vpop.f32.mrf.mxu2 }
 0x145   :  { %v2198_v54 = vpack.c.bf16 %v1424_v5, %v1423_v24  ;;  %v1153_v46 = vadd.f32 %v1152_v55, %v1054_v30 }
 0x146   :  { %v1055_v20 = vpop.f32.mrf.mxu1  ;;  %v3052_v16 = vpop.f32.mrf.mxu3 }
 0x147   :  { %2268 = vst [vmem:[%s3253_s3 + $0x20] sm:$0xff] %v2198_v54   ;;  %v1252_v9 = vadd.f32 %v2976_v6, %v1153_v46  ;;  %v1056_v10 = vadd.f32 %v1055_v20, %v957_v42  ;;  %v1859_v6 = vld [vmem:[%s3252_s0 + $0x29c] sm:$0xf0]  ;;  %v962_v20 = vadd.f32 %v2859_v25, %v2703_v39  ;;  %v1831_v46 = vld [vmem:[%s3252_s0 + $0x26c] sm:$0xf0] }
 0x148   :  { %v1862_v62 = vor.u32 %v2130_v34, %v1859_v6  ;;  %v2127_v42 = vld [vmem:[%s3252_s0 + $0x270] sm:$0xf0]  ;;  %v1845_v39 = vld [vmem:[%s3252_s0 + $0x268] sm:$0xf] }
 0x149   :  { %v1352_v14 = vpop.f32.mrf.mxu0  ;;  %v1351_v53 = vadd.f32 %v1350_v57, %v1252_v9 }
 0x14b   :  { %v1425_v1 = vmax.f32 %v1351_v53, 0.0  ;;  %v965_v53 = vadd.f32 %v2859_v25, %v2729_v51  ;;  %v2129_v51 = vld [vmem:[%s3252_s0 + $0x284] sm:$0xf] }
 0x14c   :  { %v1154_v23 = vpop.f32.mrf.mxu2 }
 0x14d   :  { %v1155_v52 = vadd.f32 %v1154_v23, %v1056_v10  ;;  %v1834_v10 = vor.u32 %v2124_v31, %v1831_v46  ;;  %v1846_v23 = vor.u32 %v2128_v45, %v1845_v39  ;;  %v2133_v31 = vld [vmem:[%s3252_s0 + $0x2a0] sm:$0xf0] }
 0x14e   :  { %v1058_v27 = vpop.f32.mrf.mxu1  ;;  %v3082_v3 = vpop.f32.mrf.mxu3 }
 0x14f   :  { %v1254_v44 = vadd.f32 %v3006_v35, %v1155_v52  ;;  %v1059_v55 = vadd.f32 %v1058_v27, %v960_v0  ;;  %v2135_v52 = vld [vmem:[%s3252_s0 + $0x2b4] sm:$0xf] }
 0x151   :  { %v1355_v47 = vpop.f32.mrf.mxu0  ;;  %v1353_v43 = vadd.f32 %v1352_v14, %v1254_v44  ;;  %1097 = vmatmul.bf16.gmra.mxu1 %v1814_v22  ;;  %1196 = vmatmul.bf16.gmra.mxu2 %v1818_v26  ;;  %v1837_v14 = vld [vmem:[%s3252_s0 + $0x260] sm:$0xf] }
 0x152   :  { %v1838_v19 = vor.u32 %v2127_v42, %v1837_v14 }
 0x153   :  { %v1426_v29 = vmax.f32 %v1353_v43, 0.0  ;;  %1305 = vmatmul.bf16.gmra.mxu3 %v1862_v62 }
 0x154   :  { %2045 = vmatmul.msk.bf16.gmra.mxu0 %vm865_vm0, %v1826_v33  ;;  %v1157_v24 = vpop.f32.mrf.mxu2 }
 0x155   :  { %v2203_v5 = vpack.c.bf16 %v1426_v29, %v1425_v1  ;;  %v1158_v35 = vadd.f32 %v1157_v24, %v1059_v55  ;;  %v1851_v55 = vld [vmem:[%s3252_s0 + $0x294] sm:$0xf0] }
 0x156   :  { %v1060_v57 = vpop.f32.mrf.mxu1  ;;  %v3090_v30 = vpop.f32.mrf.mxu3  ;;  %v1854_v42 = vor.u32 %v2129_v51, %v1851_v55 }
 0x157   :  { %2269 = vst [vmem:[%s3253_s3 + $0x28] sm:$0xff] %v2203_v5   ;;  %v1257_v12 = vadd.f32 %v3014_v40, %v1158_v35  ;;  %v1061_v11 = vadd.f32 %v1060_v57, %v962_v20  ;;  %v1879_v40 = vld [vmem:[%s3252_s0 + $0x2c4] sm:$0xf0]  ;;  %v967_v5 = vadd.f32 %v2859_v25, %v2744_v59  ;;  %v2132_v35 = vld [vmem:[%s3252_s0 + $0x298] sm:$0xf0] }
 0x158   :  { %v1882_v6 = vor.u32 %v2135_v52, %v1879_v40  ;;  %v1857_v57 = vld [vmem:[%s3252_s0 + $0x288] sm:$0xf]  ;;  %v1865_v59 = vld [vmem:[%s3252_s0 + $0x290] sm:$0xf] }
 0x159   :  { %v1357_v54 = vpop.f32.mrf.mxu0  ;;  %v1356_v22 = vadd.f32 %v1355_v47, %v1257_v12  ;;  %v1858_v12 = vor.u32 %v2132_v35, %v1857_v57  ;;  %v1866_v39 = vor.u32 %v2133_v31, %v1865_v59  ;;  %v975_v59 = vadd.f32 %v2859_v25, %v2809_v37 }
 0x15b   :  { %v1427_v44 = vmax.f32 %v1356_v22, 0.0 }
 0x15c   :  { %v1159_v8 = vpop.f32.mrf.mxu2 }
 0x15d   :  { %v1160_v9 = vadd.f32 %v1159_v8, %v1061_v11 }
 0x15e   :  { %v1063_v60 = vpop.f32.mrf.mxu1  ;;  %v3120_v33 = vpop.f32.mrf.mxu3 }
 0x15f   :  { %v1259_v26 = vadd.f32 %v3044_v63, %v1160_v9  ;;  %v1064_v1 = vadd.f32 %v1063_v60, %v965_v53  ;;  %v1871_v53 = vld [vmem:[%s3252_s0 + $0x2bc] sm:$0xf0] }
 0x161   :  { %v1360_v27 = vpop.f32.mrf.mxu0  ;;  %v1358_v34 = vadd.f32 %v1357_v54, %v1259_v26  ;;  %1102 = vmatmul.bf16.gmra.mxu1 %v1834_v10  ;;  %1201 = vmatmul.bf16.gmra.mxu2 %v1838_v19  ;;  %v970_v19 = vadd.f32 %v2859_v25, %v2770_v7  ;;  %v2134_v7 = vld [vmem:[%s3252_s0 + $0x2ac] sm:$0xf] }
 0x163   :  { %v1428_v43 = vmax.f32 %v1358_v34, 0.0  ;;  %1310 = vmatmul.bf16.gmra.mxu3 %v1882_v6  ;;  %v972_v6 = vadd.f32 %v2859_v25, %v2785_v17  ;;  %v1885_v17 = vld [vmem:[%s3252_s0 + $0x2b8] sm:$0xf] }
 0x164   :  { %2046 = vmatmul.msk.bf16.gmra.mxu0 %vm865_vm0, %v1846_v23  ;;  %v1162_v62 = vpop.f32.mrf.mxu2 }
 0x165   :  { %v2208_v0 = vpack.c.bf16 %v1428_v43, %v1427_v44  ;;  %v1163_v63 = vadd.f32 %v1162_v62, %v1064_v1  ;;  %v1877_v44 = vld [vmem:[%s3252_s0 + $0x2b0] sm:$0xf]  ;;  %v2137_v43 = vld [vmem:[%s3252_s0 + $0x2c0] sm:$0xf0]  ;;  %v2138_v1 = vld [vmem:[%s3252_s0 + $0x2c8] sm:$0xf0] }
 0x166   :  { %v1065_v47 = vpop.f32.mrf.mxu1  ;;  %v3128_v24 = vpop.f32.mrf.mxu3  ;;  %v1886_v55 = vor.u32 %v2138_v1, %v1885_v17 }
 0x167   :  { %2270 = vst [vmem:[%s3253_s3 + $0x30] sm:$0xff] %v2208_v0   ;;  %v1262_v54 = vadd.f32 %v3052_v16, %v1163_v63  ;;  %v1066_v20 = vadd.f32 %v1065_v47, %v967_v5  ;;  %v1878_v5 = vor.u32 %v2137_v43, %v1877_v44 }
 0x169   :  { %v1362_v29 = vpop.f32.mrf.mxu0  ;;  %v1361_v45 = vadd.f32 %v1360_v27, %v1262_v54 }
 0x16b   :  { %v1429_v60 = vmax.f32 %v1361_v45, 0.0  ;;  %v977_v45 = vadd.f32 %v2859_v25, %v2822_v50 }
 0x16c   :  { %v1164_v46 = vpop.f32.mrf.mxu2 }
 0x16d   :  { %v1165_v14 = vadd.f32 %v1164_v46, %v1066_v20 }
 0x16e   :  { %v1068_v11 = vpop.f32.mrf.mxu1  ;;  %v1273_v16 = vpop.f32.mrf.mxu3 }
 0x16f   :  { %v1264_v8 = vadd.f32 %v3082_v3, %v1165_v14  ;;  %v1069_v22 = vadd.f32 %v1068_v11, %v970_v19 }
 0x171   :  { %v1365_v9 = vpop.f32.mrf.mxu0  ;;  %v1363_v10 = vadd.f32 %v1362_v29, %v1264_v8  ;;  %1107 = vmatmul.bf16.gmra.mxu1 %v1854_v42  ;;  %1206 = vmatmul.bf16.gmra.mxu2 %v1858_v12  ;;  %v1874_v29 = vor.u32 %v2134_v7, %v1871_v53 }
 0x173   :  { %v1430_v23 = vmax.f32 %v1363_v10, 0.0 }
 0x174   :  { %2047 = vmatmul.msk.bf16.gmra.mxu0 %vm865_vm0, %v1866_v39  ;;  %v1167_v52 = vpop.f32.mrf.mxu2 }
 0x175   :  { %v2213_v40 = vpack.c.bf16 %v1430_v23, %v1429_v60  ;;  %v1168_v3 = vadd.f32 %v1167_v52, %v1069_v22 }
 0x176   :  { %v1070_v26 = vpop.f32.mrf.mxu1  ;;  %v1276_v34 = vpop.f32.mrf.mxu3 }
 0x177   :  { %2271 = vst [vmem:[%s3253_s3 + $0x38] sm:$0xff] %v2213_v40   ;;  %v1267_v62 = vadd.f32 %v3090_v30, %v1168_v3  ;;  %v1071_v0 = vadd.f32 %v1070_v26, %v972_v6  ;;  %v980_v26 = vadd.f32 %v2859_v25, %v2660_v18 }
 0x179   :  { %v1367_v27 = vpop.f32.mrf.mxu0  ;;  %v1366_v57 = vadd.f32 %v1365_v9, %v1267_v62 }
 0x17b   :  { %v1431_v31 = vmax.f32 %v1366_v57, 0.0 }
 0x17c   :  { %v1169_v47 = vpop.f32.mrf.mxu2 }
 0x17d   :  { %v1170_v63 = vadd.f32 %v1169_v47, %v1071_v0 }
 0x17e   :  { %v1073_v51 = vpop.f32.mrf.mxu1  ;;  %v1278_v20 = vpop.f32.mrf.mxu3 }
 0x17f   :  { %v1269_v35 = vadd.f32 %v3120_v33, %v1170_v63  ;;  %v1074_v12 = vadd.f32 %v1073_v51, %v975_v59 }
 0x181   :  { %v1370_v54 = vpop.f32.mrf.mxu0  ;;  %v1368_v30 = vadd.f32 %v1367_v27, %v1269_v35  ;;  %1112 = vmatmul.bf16.gmra.mxu1 %v1874_v29  ;;  %1211 = vmatmul.bf16.gmra.mxu2 %v1878_v5 }
 0x183   :  { %v1432_v46 = vmax.f32 %v1368_v30, 0.0 }
 0x184   :  { %2048 = vmatmul.msk.bf16.gmra.mxu0 %vm865_vm0, %v1886_v55  ;;  %v1172_v14 = vpop.f32.mrf.mxu2  ;;  %v985_v55 = vadd.f32 %v2859_v25, %v2701_v38 }
 0x185   :  { %v2218_v42 = vpack.c.bf16 %v1432_v46, %v1431_v31  ;;  %v1173_v33 = vadd.f32 %v1172_v14, %v1074_v12 }
 0x186   :  { %v1075_v11 = vpop.f32.mrf.mxu1  ;;  %v1281_v37 = vpop.f32.mrf.mxu3 }
 0x187   :  { %2272 = vst [vmem:[%s3253_s3 + $0x40] sm:$0xff] %v2218_v42   ;;  %v1272_v8 = vadd.f32 %v3128_v24, %v1173_v33  ;;  %v1076_v9 = vadd.f32 %v1075_v11, %v977_v45 }
 0x189   :  { %v1372_v39 = vpop.f32.mrf.mxu0  ;;  %v1371_v23 = vadd.f32 %v1370_v54, %v1272_v8 }
 0x18b   :  { %v1433_v3 = vmax.f32 %v1371_v23, 0.0 }
 0x18c   :  { %v1174_v10 = vpop.f32.mrf.mxu2 }
 0x18d   :  { %v1175_v19 = vadd.f32 %v1174_v10, %v1076_v9  ;;  %v990_v9 = vadd.f32 %v2859_v25, %v2742_v58 }
 0x18e   :  { %v1078_v60 = vpop.f32.mrf.mxu1  ;;  %v1283_v44 = vpop.f32.mrf.mxu3 }
 0x18f   :  { %v1274_v52 = vadd.f32 %v1273_v16, %v1175_v19  ;;  %v1079_v53 = vadd.f32 %v1078_v60, %v980_v26  ;;  %v982_v16 = vadd.f32 %v2859_v25, %v2686_v28  ;;  %v992_v26 = vadd.f32 %v2859_v25, %v2768_v4 }
 0x191   :  { %v1375_v40 = vpop.f32.mrf.mxu0  ;;  %v1373_v22 = vadd.f32 %v1372_v39, %v1274_v52 }
 0x193   :  { %v1434_v27 = vmax.f32 %v1373_v22, 0.0 }
 0x194   :  { %v1177_v6 = vpop.f32.mrf.mxu2 }
 0x195   :  { %v2223_v7 = vpack.c.bf16 %v1434_v27, %v1433_v3  ;;  %v1178_v24 = vadd.f32 %v1177_v6, %v1079_v53 }
 0x196   :  { %v1080_v50 = vpop.f32.mrf.mxu1  ;;  %v1286_v5 = vpop.f32.mrf.mxu3 }
 0x197   :  { %2273 = vst [vmem:[%s3253_s3 + $0x48] sm:$0xff] %v2223_v7   ;;  %v1277_v62 = vadd.f32 %v1276_v34, %v1178_v24  ;;  %v1081_v0 = vadd.f32 %v1080_v50, %v982_v16  ;;  %v995_v16 = vadd.f32 %v2859_v25, %v2783_v15 }
 0x199   :  { %v1377_v43 = vpop.f32.mrf.mxu0  ;;  %v1376_v47 = vadd.f32 %v1375_v40, %v1277_v62 }
 0x19b   :  { %v1435_v57 = vmax.f32 %v1376_v47, 0.0 }
 0x19c   :  { %v1179_v17 = vpop.f32.mrf.mxu2 }
 0x19d   :  { %v1180_v18 = vadd.f32 %v1179_v17, %v1081_v0 }
 0x19e   :  { %v1083_v1 = vpop.f32.mrf.mxu1  ;;  %v1288_v46 = vpop.f32.mrf.mxu3 }
 0x19f   :  { %v1279_v63 = vadd.f32 %v1278_v20, %v1180_v18  ;;  %v1084_v59 = vadd.f32 %v1083_v1, %v985_v55  ;;  %v987_v20 = vadd.f32 %v2859_v25, %v2727_v48 }
 0x1a1   :  { %v1380_v29 = vpop.f32.mrf.mxu0  ;;  %v1378_v51 = vadd.f32 %v1377_v43, %v1279_v63 }
 0x1a3   :  { %v1436_v35 = vmax.f32 %v1378_v51, 0.0 }
 0x1a4   :  { %v1182_v54 = vpop.f32.mrf.mxu2 }
 0x1a5   :  { %v2228_v30 = vpack.c.bf16 %v1436_v35, %v1435_v57  ;;  %v1183_v28 = vadd.f32 %v1182_v54, %v1084_v59 }
 0x1a6   :  { %v1085_v31 = vpop.f32.mrf.mxu1  ;;  %v1291_v23 = vpop.f32.mrf.mxu3 }
 0x1a7   :  { %2274 = vst [vmem:[%s3253_s3 + $0x50] sm:$0xff] %v2228_v30   ;;  %v1282_v14 = vadd.f32 %v1281_v37, %v1183_v28  ;;  %v1086_v42 = vadd.f32 %v1085_v31, %v987_v20 }
 0x1a9   :  { %v1382_v34 = vpop.f32.mrf.mxu0  ;;  %v1381_v33 = vadd.f32 %v1380_v29, %v1282_v14 }
 0x1ab   :  { %v1437_v10 = vmax.f32 %v1381_v33, 0.0  ;;  %v1002_v33 = vadd.f32 %v2859_v25, %v2846_v2 }
 0x1ac   :  { %v1184_v12 = vpop.f32.mrf.mxu2 }
 0x1ad   :  { %v1185_v38 = vadd.f32 %v1184_v12, %v1086_v42 }
 0x1ae   :  { %v1088_v11 = vpop.f32.mrf.mxu1  ;;  %v1293_v53 = vpop.f32.mrf.mxu3 }
 0x1af   :  { %v1284_v39 = vadd.f32 %v1283_v44, %v1185_v38  ;;  %v1089_v40 = vadd.f32 %v1088_v11, %v990_v9 }
 0x1b1   :  { %v1385_v45 = vpop.f32.mrf.mxu0  ;;  %v1383_v8 = vadd.f32 %v1382_v34, %v1284_v39  ;;  %v1000_v34 = vadd.f32 %v2859_v25, %v2820_v49 }
 0x1b3   :  { %v1438_v19 = vmax.f32 %v1383_v8, 0.0 }
 0x1b4   :  { %v1187_v60 = vpop.f32.mrf.mxu2 }
 0x1b5   :  { %v2233_v52 = vpack.c.bf16 %v1438_v19, %v1437_v10  ;;  %v1188_v37 = vadd.f32 %v1187_v60, %v1089_v40  ;;  %v1005_v40 = vadd.f32 %v2859_v25, %v2666_v21 }
 0x1b6   :  { %v1090_v48 = vpop.f32.mrf.mxu1  ;;  %v1296_v29 = vpop.f32.mrf.mxu3 }
 0x1b7   :  { %2275 = vst [vmem:[%s3253_s3 + $0x58] sm:$0xff] %v2233_v52   ;;  %v1287_v3 = vadd.f32 %v1286_v5, %v1188_v37  ;;  %v1091_v27 = vadd.f32 %v1090_v48, %v992_v26  ;;  %v997_v5 = vadd.f32 %v2859_v25, %v2807_v32 }
 0x1b9   :  { %v1387_v22 = vpop.f32.mrf.mxu0  ;;  %v1386_v50 = vadd.f32 %v1385_v45, %v1287_v3 }
 0x1bb   :  { %v1439_v62 = vmax.f32 %v1386_v50, 0.0 }
 0x1bc   :  { %v1189_v6 = vpop.f32.mrf.mxu2 }
 0x1bd   :  { %v1190_v58 = vadd.f32 %v1189_v6, %v1091_v27 }
 0x1be   :  { %v1093_v7 = vpop.f32.mrf.mxu1  ;;  %v1298_v28 = vpop.f32.mrf.mxu3 }
 0x1bf   :  { %v1289_v44 = vadd.f32 %v1288_v46, %v1190_v58  ;;  %v1094_v1 = vadd.f32 %v1093_v7, %v995_v16  ;;  %v1007_v7 = vadd.f32 %v2859_v25, %v2698_v36 }
 0x1c1   :  { %v1390_v24 = vpop.f32.mrf.mxu0  ;;  %v1388_v43 = vadd.f32 %v1387_v22, %v1289_v44 }
 0x1c3   :  { %v1440_v0 = vmax.f32 %v1388_v43, 0.0 }
 0x1c4   :  { %v1192_v17 = vpop.f32.mrf.mxu2 }
 0x1c5   :  { %v2238_v18 = vpack.c.bf16 %v1440_v0, %v1439_v62  ;;  %v1193_v4 = vadd.f32 %v1192_v17, %v1094_v1 }
 0x1c6   :  { %v1095_v47 = vpop.f32.mrf.mxu1  ;;  %v1301_v9 = vpop.f32.mrf.mxu3 }
 0x1c7   :  { %2276 = vst [vmem:[%s3253_s3 + $0x60] sm:$0xff] %v2238_v18   ;;  %v1292_v51 = vadd.f32 %v1291_v23, %v1193_v4  ;;  %v1096_v55 = vadd.f32 %v1095_v47, %v997_v5  ;;  %v1010_v18 = vadd.f32 %v2859_v25, %v2707_v41 }
 0x1c9   :  { %v1392_v63 = vpop.f32.mrf.mxu0  ;;  %v1391_v54 = vadd.f32 %v1390_v24, %v1292_v51  ;;  %v1012_v51 = vadd.f32 %v2859_v25, %v2739_v56 }
 0x1cb   :  { %v1441_v20 = vmax.f32 %v1391_v54, 0.0 }
 0x1cc   :  { %v1194_v57 = vpop.f32.mrf.mxu2 }
 0x1cd   :  { %v1195_v15 = vadd.f32 %v1194_v57, %v1096_v55 }
 0x1ce   :  { %v1098_v35 = vpop.f32.mrf.mxu1  ;;  %v1303_v2 = vpop.f32.mrf.mxu3 }
 0x1cf   :  { %v1294_v30 = vadd.f32 %v1293_v53, %v1195_v15  ;;  %v1099_v12 = vadd.f32 %v1098_v35, %v1000_v34  ;;  %v1015_v34 = vadd.f32 %v2859_v25, %v2748_v61 }
 0x1d1   :  { %v1395_v59 = vpop.f32.mrf.mxu0  ;;  %v1393_v31 = vadd.f32 %v1392_v63, %v1294_v30 }
 0x1d3   :  { %v1442_v46 = vmax.f32 %v1393_v31, 0.0 }
 0x1d4   :  { %v1197_v14 = vpop.f32.mrf.mxu2 }
 0x1d5   :  { %v2243_v42 = vpack.c.bf16 %v1442_v46, %v1441_v20  ;;  %v1198_v32 = vadd.f32 %v1197_v14, %v1099_v12 }
 0x1d6   :  { %v1100_v38 = vpop.f32.mrf.mxu1  ;;  %v1306_v62 = vpop.f32.mrf.mxu3 }
 0x1d7   :  { %2277 = vst [vmem:[%s3253_s3 + $0x68] sm:$0xff] %v2243_v42   ;;  %v1297_v39 = vadd.f32 %v1296_v29, %v1198_v32  ;;  %v1101_v45 = vadd.f32 %v1100_v38, %v1002_v33  ;;  %v2307_v33 = vld [vmem:[%s3251_s2] ss:$0 sm:$0xff] }
 0x1d9   :  { %v1397_v11 = vpop.f32.mrf.mxu0  ;;  %v1396_v19 = vadd.f32 %v1395_v59, %v1297_v39  ;;  %v1017_v39 = vadd.f32 %v2307_v33, %v2780_v13 }
 0x1db   :  { %v1443_v48 = vmax.f32 %v1396_v19, 0.0 }
 0x1dc   :  { %v1199_v8 = vpop.f32.mrf.mxu2 }
 0x1dd   :  { %v1200_v49 = vadd.f32 %v1199_v8, %v1101_v45 }
 0x1de   :  { %v1103_v10 = vpop.f32.mrf.mxu1  ;;  %v1308_v55 = vpop.f32.mrf.mxu3 }
 0x1df   :  { %v1299_v60 = vadd.f32 %v1298_v28, %v1200_v49  ;;  %v1104_v3 = vadd.f32 %v1103_v10, %v1005_v40 }
 0x1e1   :  { %v1400_v23 = vpop.f32.mrf.mxu0  ;;  %v1398_v52 = vadd.f32 %v1397_v11, %v1299_v60 }
 0x1e3   :  { %v1444_v37 = vmax.f32 %v1398_v52, 0.0 }
 0x1e4   :  { %v1202_v22 = vpop.f32.mrf.mxu2 }
 0x1e5   :  { %v2248_v26 = vpack.c.bf16 %v1444_v37, %v1443_v48  ;;  %v1203_v6 = vadd.f32 %v1202_v22, %v1104_v3 }
 0x1e6   :  { %v1105_v27 = vpop.f32.mrf.mxu1  ;;  %v1311_v14 = vpop.f32.mrf.mxu3 }
 0x1e7   :  { %2278 = vst [vmem:[%s3253_s3 + $0x70] sm:$0xff] %v2248_v26   ;;  %v1302_v53 = vadd.f32 %v1301_v9, %v1203_v6  ;;  %v1106_v50 = vadd.f32 %v1105_v27, %v1007_v7 }
 0x1e9   :  { %v1402_v58 = vpop.f32.mrf.mxu0  ;;  %v1401_v43 = vadd.f32 %v1400_v23, %v1302_v53 }
 0x1eb   :  { %v1445_v1 = vmax.f32 %v1401_v43, 0.0 }
 0x1ec   :  { %v1204_v44 = vpop.f32.mrf.mxu2 }
 0x1ed   :  { %v1205_v21 = vadd.f32 %v1204_v44, %v1106_v50 }
 0x1ee   :  { %v1108_v24 = vpop.f32.mrf.mxu1  ;;  %v1313_v9 = vpop.f32.mrf.mxu3 }
 0x1ef   :  { %v1304_v16 = vadd.f32 %v1303_v2, %v1205_v21  ;;  %v1109_v29 = vadd.f32 %v1108_v24, %v1010_v18 }
 0x1f1   :  { %v1403_v0 = vadd.f32 %v1402_v58, %v1304_v16  ;;  %v1405_v17 = vpop.f32.mrf.mxu0 }
 0x1f3   :  { %v1446_v47 = vmax.f32 %v1403_v0, 0.0 }
 0x1f4   :  { %v1207_v4 = vpop.f32.mrf.mxu2 }
 0x1f5   :  { %v2253_v63 = vpack.c.bf16 %v1446_v47, %v1445_v1  ;;  %v1208_v36 = vadd.f32 %v1207_v4, %v1109_v29 }
 0x1f6   :  { %v1110_v5 = vpop.f32.mrf.mxu1 }
 0x1f7   :  { %2279 = vst [vmem:[%s3253_s3 + $0x78] sm:$0xff] %v2253_v63   ;;  %v1307_v57 = vadd.f32 %v1306_v62, %v1208_v36  ;;  %v1111_v15 = vadd.f32 %v1110_v5, %v1012_v51 }
 0x1f9   :  { %v1407_v35 = vpop.f32.mrf.mxu0  ;;  %v1406_v59 = vadd.f32 %v1405_v17, %v1307_v57 }
 0x1fb   :  { %v1447_v20 = vmax.f32 %v1406_v59, 0.0 }
 0x1fc   :  { %v1209_v54 = vpop.f32.mrf.mxu2 }
 0x1fd   :  { %v1210_v41 = vadd.f32 %v1209_v54, %v1111_v15 }
 0x1fe   :  { %v1113_v30 = vpop.f32.mrf.mxu1 }
 0x1ff   :  { %v1309_v31 = vadd.f32 %v1308_v55, %v1210_v41  ;;  %v1114_v38 = vadd.f32 %v1113_v30, %v1015_v34 }
 0x201   :  { %v1408_v28 = vadd.f32 %v1407_v35, %v1309_v31  ;;  %v1410_v56 = vpop.f32.mrf.mxu0 }
 0x203   :  { %v1448_v46 = vmax.f32 %v1408_v28, 0.0 }
 0x204   :  { %v1212_v42 = vpop.f32.mrf.mxu2 }
 0x205   :  { %v2258_v12 = vpack.c.bf16 %v1448_v46, %v1447_v20  ;;  %v1213_v32 = vadd.f32 %v1212_v42, %v1114_v38 }
 0x206   :  { %v1115_v11 = vpop.f32.mrf.mxu1 }
 0x207   :  { %2280 = vst [vmem:[%s3253_s3 + $0x80] sm:$0xff] %v2258_v12   ;;  %v1312_v61 = vadd.f32 %v1311_v14, %v1213_v32  ;;  %v1116_v25 = vadd.f32 %v1115_v11, %v1017_v39 }
 0x209   :  { %v1411_v49 = vadd.f32 %v1410_v56, %v1312_v61  ;;  %v1412_v19 = vpop.f32.mrf.mxu0 }
 0x20b   :  { %v1449_v23 = vmax.f32 %v1411_v49, 0.0 }
 0x20c   :  { %v1214_v45 = vpop.f32.mrf.mxu2 }
 0x20d   :  { %v1215_v8 = vadd.f32 %v1214_v45, %v1116_v25 }
 0x20f   :  { %v1314_v10 = vadd.f32 %v1313_v9, %v1215_v8 }
 0x211   :  { %v1413_v60 = vadd.f32 %v1412_v19, %v1314_v10 }
 0x213   :  { %v1450_v52 = vmax.f32 %v1413_v60, 0.0 }
 0x215   :  { %v2263_v40 = vpack.c.bf16 %v1450_v52, %v1449_v23 }
 0x217   :  { %2281 = vst [vmem:[%s3253_s3 + $0x88] sm:$0xff] %v2263_v40  }

// kernel: cnn_forward.7
= control target key start
LH: loop header
LB: loop body
LE: loop exit
PB: predicated region body
PF: predicated region fallthrough
CT: control target
= control target key end

     0   :  { %10 = vsyncpa [#allocation4], 0  ;;  %s4767_s18 = smov 0   ;;  %s5154_s0 = inlined_call_operand.vmem [shape: bf16[2,18432], index: 0, kind: input, shape index: {}]   ;;  %s5155_s1 = inlined_call_operand.vmem [shape: bf16[18432,128], index: 1, kind: input, shape index: {}]   ;;  %s5156_s2 = inlined_call_operand.vmem [shape: f32[1,128], index: 2, kind: input, shape index: {}]   ;;  %s5157_s3 = inlined_call_operand.vmem [shape: f32[128,10], index: 3, kind: input, shape index: {}]   ;;  %s5158_s4 = inlined_call_operand.vmem [shape: f32[1,10], index: 4, kind: input, shape index: {}]   ;;  %s5159_s5 = inlined_call_operand.hbm [shape: f32[2,10], index: 5, kind: output, shape index: {}]  }
   0x1 LB: > { %s4773_s19 = sadd.s32 4294967295, %s4733_s18   ;;  %p3225_p0 = scmp.ge.s32.totalorder %s4733_s18, 1  ;;  %s4733_s18 = sphi %s4767_s18, %s16_s18  }
   0x2   : > { %p194_p1 = scmp.lt.s32.totalorder %s4733_s18, 5 }
   0x4   : > { %p195_p2 = pnand %p3225_p0, %p194_p1 }
   0x5   : > { %s221_s20 = smul.u32 (!%p195_p2), 36, %s4773_s19  ;;  %p3227_p5 = scmp.ne.s32.totalorder (!%p195_p2), %s4773_s19, 0 }
   0x6   : > { %198 = sbr.rel (%p195_p2) target bundleno = 875 (0x36b), region = 40 }
   0x7   : > { %s226_s21 = smul.u32 (!%p195_p2), 576, %s4773_s19  ;;  %p222_p3 = scmp.lt.s32.totalorder (!%p195_p2), %s221_s20, 143 }
   0x9   : > { %p227_p4 = scmp.lt.s32.totalorder (!%p195_p2), %s226_s21, 2303 }
   0xb   : > { %s5161_s20 = smov (!%p222_p3, %s221_s20), 143  ;;  %s5163_s21 = smov (!%p227_p4, %s226_s21), 2303 }
   0xc   : > { %s4782_s24 = scalar_lea.vmem %s5154_s0, %s5161_s20  ;;  %s3226_s25 = sshll.u32 %s5163_s21, 2 }
   0xd   : > { %s4787_s28 = scalar_lea.vmem %s5155_s1, %s3226_s25  ;;  %235 = sbr.rel (%p3227_p5) target bundleno = 20 (0x14), region = 44 }
  0x12   : > { %v4735_v0 = vmov 0.0  }
  0x13   : > { %236 = vst [vmem:[#allocation2] sm:$0x3] %v4735_v0 }
  0x14 PF: > { %v4392_v1 = vld [vmem:[%s4787_s28 + $0x38] sm:$0xff]  ;;  %v4391_v5 = vld [vmem:[%s4787_s28 + $0x30] sm:$0xff]  ;;  %v4390_v9 = vld [vmem:[%s4787_s28 + $0x28] sm:$0xff]  ;;  %p4380_p6 = scmp.ne.s32.totalorder %s4773_s19, 3 }
  0x15   : > { %v4400_v2 = vld [vmem:[%s4787_s28 + $0x78] sm:$0xff]  ;;  %2629 = vmatpush.bf16.msra.mxu0 %v4392_v1  ;;  %v4399_v6 = vld [vmem:[%s4787_s28 + $0x70] sm:$0xff]  ;;  %v4398_v10 = vld [vmem:[%s4787_s28 + $0x68] sm:$0xff] }
  0x16   : > { %v4408_v3 = vld [vmem:[%s4787_s28 + $0xb8] sm:$0xff]  ;;  %2642 = vmatpush.bf16.msra.mxu1 %v4400_v2  ;;  %v4407_v7 = vld [vmem:[%s4787_s28 + $0xb0] sm:$0xff]  ;;  %v4406_v11 = vld [vmem:[%s4787_s28 + $0xa8] sm:$0xff] }
  0x17   : > { %v4416_v4 = vld [vmem:[%s4787_s28 + $0xf8] sm:$0xff]  ;;  %2655 = vmatpush.bf16.msra.mxu2 %v4408_v3  ;;  %v4415_v8 = vld [vmem:[%s4787_s28 + $0xf0] sm:$0xff]  ;;  %v4414_v12 = vld [vmem:[%s4787_s28 + $0xe8] sm:$0xff] }
  0x18   : > { %2668 = vmatpush.bf16.msra.mxu3 %v4416_v4  ;;  %v4389_v13 = vld [vmem:[%s4787_s28 + $0x20] sm:$0xff]  ;;  %v4388_v17 = vld [vmem:[%s4787_s28 + $0x18] sm:$0xff]  ;;  %v4387_v22 = vld [vmem:[%s4787_s28 + $0x10] sm:$0xff] }
  0x19   : > { %2630 = vmatpush.bf16.msra.mxu0 %v4391_v5  ;;  %v4397_v14 = vld [vmem:[%s4787_s28 + $0x60] sm:$0xff]  ;;  %v4396_v18 = vld [vmem:[%s4787_s28 + $0x58] sm:$0xff]  ;;  %v4395_v23 = vld [vmem:[%s4787_s28 + $0x50] sm:$0xff] }
  0x1a   : > { %2643 = vmatpush.bf16.msra.mxu1 %v4399_v6  ;;  %v4405_v15 = vld [vmem:[%s4787_s28 + $0xa0] sm:$0xff]  ;;  %v4404_v19 = vld [vmem:[%s4787_s28 + $0x98] sm:$0xff]  ;;  %v4403_v24 = vld [vmem:[%s4787_s28 + $0x90] sm:$0xff] }
  0x1b   : > { %2656 = vmatpush.bf16.msra.mxu2 %v4407_v7  ;;  %v4413_v16 = vld [vmem:[%s4787_s28 + $0xe0] sm:$0xff]  ;;  %v4412_v20 = vld [vmem:[%s4787_s28 + $0xd8] sm:$0xff]  ;;  %v4411_v25 = vld [vmem:[%s4787_s28 + $0xd0] sm:$0xff] }
  0x1c   : > { %2669 = vmatpush.bf16.msra.mxu3 %v4415_v8  ;;  %v238_v21 = vld [vmem:[%s4782_s24] sm:$0xff]  ;;  %v4386_v26 = vld [vmem:[%s4787_s28 + $0x8] sm:$0xff]  ;;  %v4424_v34 = vld [vmem:[%s4787_s28 + $0x138] sm:$0xff] }
  0x1d   : > { %2631 = vmatpush.bf16.msra.mxu0 %v4390_v9  ;;  %820 = vst [vmem:[#allocation1] ss:$9 sm:$0xff] %v238_v21  ;;  %v4394_v27 = vld [vmem:[%s4787_s28 + $0x48] sm:$0xff]  ;;  %v4385_v30 = vld [vmem:[%s4787_s28] sm:$0xff]  ;;  %v4432_v35 = vld [vmem:[%s4787_s28 + $0x178] sm:$0xff] }
  0x1e   : > { %2644 = vmatpush.bf16.msra.mxu1 %v4398_v10  ;;  %v4402_v28 = vld [vmem:[%s4787_s28 + $0x88] sm:$0xff]  ;;  %v4393_v31 = vld [vmem:[%s4787_s28 + $0x40] sm:$0xff]  ;;  %v4440_v36 = vld [vmem:[%s4787_s28 + $0x1b8] sm:$0xff] }
  0x1f   : > { %2657 = vmatpush.bf16.msra.mxu2 %v4406_v11  ;;  %v4410_v29 = vld [vmem:[%s4787_s28 + $0xc8] sm:$0xff]  ;;  %v4401_v32 = vld [vmem:[%s4787_s28 + $0x80] sm:$0xff]  ;;  %v4448_v37 = vld [vmem:[%s4787_s28 + $0x1f8] sm:$0xff] }
  0x20   : > { %2670 = vmatpush.bf16.msra.mxu3 %v4414_v12  ;;  %v4409_v33 = vld [vmem:[%s4787_s28 + $0xc0] sm:$0xff]  ;;  %v4423_v38 = vld [vmem:[%s4787_s28 + $0x130] sm:$0xff]  ;;  %v4422_v46 = vld [vmem:[%s4787_s28 + $0x128] sm:$0xff] }
  0x21   : > { %2632 = vmatpush.bf16.msra.mxu0 %v4389_v13  ;;  %v4431_v41 = vld [vmem:[%s4787_s28 + $0x170] sm:$0xff]  ;;  %v4430_v47 = vld [vmem:[%s4787_s28 + $0x168] sm:$0xff]  ;;  %v4421_v55 = vld [vmem:[%s4787_s28 + $0x120] sm:$0xff] }
  0x22   : > { %2645 = vmatpush.bf16.msra.mxu1 %v4397_v14  ;;  %v4439_v44 = vld [vmem:[%s4787_s28 + $0x1b0] sm:$0xff]  ;;  %v4438_v48 = vld [vmem:[%s4787_s28 + $0x1a8] sm:$0xff]  ;;  %v4429_v56 = vld [vmem:[%s4787_s28 + $0x160] sm:$0xff] }
  0x23   : > { %2658 = vmatpush.bf16.msra.mxu2 %v4405_v15  ;;  %v4447_v45 = vld [vmem:[%s4787_s28 + $0x1f0] sm:$0xff]  ;;  %v4446_v49 = vld [vmem:[%s4787_s28 + $0x1e8] sm:$0xff]  ;;  %v4437_v57 = vld [vmem:[%s4787_s28 + $0x1a0] sm:$0xff] }
  0x24   : > { %2671 = vmatpush.bf16.msra.mxu3 %v4413_v16  ;;  %v823_v39 = vld [vmem:[#allocation1 + $0x12] sm:$0xff]  ;;  %v821_v40 = vld [vmem:[#allocation1] sm:$0xff]  ;;  %v822_v43 = vld [vmem:[#allocation1 + $0x9] sm:$0xff] }
  0x25   : > { %2633 = vmatpush.bf16.msra.mxu0 %v4388_v17  ;;  %v824_v42 = vld [vmem:[#allocation1 + $0x1b] sm:$0xff]  ;;  %v825_v51 = vld [vmem:[#allocation1 + $0x24] sm:$0xff]  ;;  %v826_v54 = vld [vmem:[#allocation1 + $0x2d] sm:$0xff] }
  0x26   : > { %2646 = vmatpush.bf16.msra.mxu1 %v4396_v18  ;;  %v827_v50 = vld [vmem:[#allocation1 + $0x36] sm:$0xff]  ;;  %v828_v52 = vld [vmem:[#allocation1 + $0x3f] sm:$0xff]  ;;  %v239_v53 = vld [vmem:[%s4782_s24 + $0x8] sm:$0xff] }
  0x27   : > { %2659 = vmatpush.bf16.msra.mxu2 %v4404_v19  ;;  %830 = vst [vmem:[#allocation1] ss:$9 sm:$0xff] %v239_v53  ;;  %v4445_v58 = vld [vmem:[%s4787_s28 + $0x1e0] sm:$0xff]  ;;  %v4420_v59 = vld [vmem:[%s4787_s28 + $0x118] sm:$0xff]  ;;  %v4419_v63 = vld [vmem:[%s4787_s28 + $0x110] sm:$0xff] }
  0x28   : > { %2672 = vmatpush.bf16.msra.mxu3 %v4412_v20  ;;  %v4428_v60 = vld [vmem:[%s4787_s28 + $0x158] sm:$0xff]  ;;  %v4427_v0 = vld [vmem:[%s4787_s28 + $0x150] sm:$0xff]  ;;  %v4418_v3 = vld [vmem:[%s4787_s28 + $0x108] sm:$0xff] }
  0x29   : > { %2634 = vmatpush.bf16.msra.mxu0 %v4387_v22  ;;  %v4436_v61 = vld [vmem:[%s4787_s28 + $0x198] sm:$0xff]  ;;  %v4435_v1 = vld [vmem:[%s4787_s28 + $0x190] sm:$0xff]  ;;  %v4426_v4 = vld [vmem:[%s4787_s28 + $0x148] sm:$0xff] }
  0x2a   : > { %2647 = vmatpush.bf16.msra.mxu1 %v4395_v23  ;;  %v4444_v62 = vld [vmem:[%s4787_s28 + $0x1d8] sm:$0xff]  ;;  %v4443_v2 = vld [vmem:[%s4787_s28 + $0x1d0] sm:$0xff]  ;;  %v4434_v5 = vld [vmem:[%s4787_s28 + $0x188] sm:$0xff] }
  0x2b   : > { %2660 = vmatpush.bf16.msra.mxu2 %v4403_v24  ;;  %v4442_v6 = vld [vmem:[%s4787_s28 + $0x1c8] sm:$0xff]  ;;  %v4417_v7 = vld [vmem:[%s4787_s28 + $0x100] sm:$0xff]  ;;  %v4456_v11 = vld [vmem:[%s4787_s28 + $0x238] sm:$0xff] }
  0x2c   : > { %2673 = vmatpush.bf16.msra.mxu3 %v4411_v25  ;;  %v4425_v8 = vld [vmem:[%s4787_s28 + $0x140] sm:$0xff]  ;;  %v4464_v12 = vld [vmem:[%s4787_s28 + $0x278] sm:$0xff]  ;;  %v4455_v15 = vld [vmem:[%s4787_s28 + $0x230] sm:$0xff] }
  0x2d   : > { %2635 = vmatpush.bf16.msra.mxu0 %v4386_v26  ;;  %v4433_v9 = vld [vmem:[%s4787_s28 + $0x180] sm:$0xff]  ;;  %v4472_v13 = vld [vmem:[%s4787_s28 + $0x2b8] sm:$0xff]  ;;  %v4463_v16 = vld [vmem:[%s4787_s28 + $0x270] sm:$0xff] }
  0x2e   : > { %2648 = vmatpush.bf16.msra.mxu1 %v4394_v27  ;;  %v4441_v10 = vld [vmem:[%s4787_s28 + $0x1c0] sm:$0xff]  ;;  %v4480_v14 = vld [vmem:[%s4787_s28 + $0x2f8] sm:$0xff]  ;;  %v4471_v17 = vld [vmem:[%s4787_s28 + $0x2b0] sm:$0xff] }
  0x2f   : > { %2661 = vmatpush.bf16.msra.mxu2 %v4402_v28  ;;  %v4479_v18 = vld [vmem:[%s4787_s28 + $0x2f0] sm:$0xff]  ;;  %v4454_v19 = vld [vmem:[%s4787_s28 + $0x228] sm:$0xff]  ;;  %v4453_v23 = vld [vmem:[%s4787_s28 + $0x220] sm:$0xff] }
  0x30   : > { %2674 = vmatpush.bf16.msra.mxu3 %v4410_v29  ;;  %v4462_v20 = vld [vmem:[%s4787_s28 + $0x268] sm:$0xff]  ;;  %v4461_v24 = vld [vmem:[%s4787_s28 + $0x260] sm:$0xff]  ;;  %v4452_v27 = vld [vmem:[%s4787_s28 + $0x218] sm:$0xff] }
  0x31   : > { %2636 = vmatpush.bf16.msra.mxu0 %v4385_v30  ;;  %v4470_v21 = vld [vmem:[%s4787_s28 + $0x2a8] sm:$0xff]  ;;  %v4469_v25 = vld [vmem:[%s4787_s28 + $0x2a0] sm:$0xff]  ;;  %v4460_v28 = vld [vmem:[%s4787_s28 + $0x258] sm:$0xff] }
  0x32   : > { %2649 = vmatpush.bf16.msra.mxu1 %v4393_v31  ;;  %v4478_v22 = vld [vmem:[%s4787_s28 + $0x2e8] sm:$0xff]  ;;  %v4477_v26 = vld [vmem:[%s4787_s28 + $0x2e0] sm:$0xff]  ;;  %v4468_v29 = vld [vmem:[%s4787_s28 + $0x298] sm:$0xff] }
  0x33   : > { %2662 = vmatpush.bf16.msra.mxu2 %v4401_v32  ;;  %v4476_v30 = vld [vmem:[%s4787_s28 + $0x2d8] sm:$0xff]  ;;  %v4451_v31 = vld [vmem:[%s4787_s28 + $0x210] sm:$0xff] }
  0x34   : > { %2675 = vmatpush.bf16.msra.mxu3 %v4409_v33  ;;  %2637 = vmatmul.bf16.vlgmr.msra.gmra.mxu0 %v821_v40  ;;  %v4459_v32 = vld [vmem:[%s4787_s28 + $0x250] sm:$0xff]  ;;  %v4457_v40 = vld [vmem:[%s4787_s28 + $0x240] sm:$0xff] }
  0x35   : > { %2681 = vmatpush.bf16.msrb.mxu0 %v4424_v34  ;;  %2650 = vmatmul.bf16.vlgmr.msra.gmra.mxu1 %v822_v43  ;;  %v4467_v33 = vld [vmem:[%s4787_s28 + $0x290] sm:$0xff]  ;;  %v4488_v43 = vld [vmem:[%s4787_s28 + $0x338] sm:$0xff] }
  0x36   : > { %2694 = vmatpush.bf16.msrb.mxu1 %v4432_v35  ;;  %2663 = vmatmul.bf16.vlgmr.msra.gmra.mxu2 %v823_v39  ;;  %v4475_v34 = vld [vmem:[%s4787_s28 + $0x2d0] sm:$0xff]  ;;  %v4450_v35 = vld [vmem:[%s4787_s28 + $0x208] sm:$0xff]  ;;  %v4449_v39 = vld [vmem:[%s4787_s28 + $0x200] sm:$0xff] }
  0x37   : > { %2707 = vmatpush.bf16.msrb.mxu2 %v4440_v36  ;;  %2676 = vmatmul.bf16.vlgmr.msra.gmra.mxu3 %v824_v42  ;;  %v4458_v36 = vld [vmem:[%s4787_s28 + $0x248] sm:$0xff]  ;;  %v4473_v42 = vld [vmem:[%s4787_s28 + $0x2c0] sm:$0xff]  ;;  %v4503_v53 = vld [vmem:[%s4787_s28 + $0x3b0] sm:$0xff] }
  0x38   : > { %2720 = vmatpush.bf16.msrb.mxu3 %v4448_v37  ;;  %v4466_v37 = vld [vmem:[%s4787_s28 + $0x288] sm:$0xff] }
  0x39   : > { %2682 = vmatpush.bf16.msrb.mxu0 %v4423_v38  ;;  %v4474_v38 = vld [vmem:[%s4787_s28 + $0x2c8] sm:$0xff] }
  0x3a   : > { %2695 = vmatpush.bf16.msrb.mxu1 %v4431_v41  ;;  %v4465_v41 = vld [vmem:[%s4787_s28 + $0x280] sm:$0xff] }
  0x3b   : > { %2708 = vmatpush.bf16.msrb.mxu2 %v4439_v44  ;;  %v4496_v44 = vld [vmem:[%s4787_s28 + $0x378] sm:$0xff] }
  0x3c   : > { %2721 = vmatpush.bf16.msrb.mxu3 %v4447_v45  ;;  %v4504_v45 = vld [vmem:[%s4787_s28 + $0x3b8] sm:$0xff] }
  0x3d   : > { %2683 = vmatpush.bf16.msrb.mxu0 %v4422_v46  ;;  %v4512_v46 = vld [vmem:[%s4787_s28 + $0x3f8] sm:$0xff] }
  0x3e   : > { %2696 = vmatpush.bf16.msrb.mxu1 %v4430_v47  ;;  %v831_v47 = vld [vmem:[#allocation1] sm:$0xff] }
  0x3f   : > { %2709 = vmatpush.bf16.msrb.mxu2 %v4438_v48  ;;  %v833_v48 = vld [vmem:[#allocation1 + $0x12] sm:$0xff] }
  0x40   : > { %2722 = vmatpush.bf16.msrb.mxu3 %v4446_v49  ;;  %v832_v49 = vld [vmem:[#allocation1 + $0x9] sm:$0xff] }
  0x41   : > { %2684 = vmatpush.bf16.msrb.mxu0 %v4421_v55  ;;  %v4486_v55 = vld [vmem:[%s4787_s28 + $0x328] sm:$0xff] }
  0x42   : > { %2697 = vmatpush.bf16.msrb.mxu1 %v4429_v56  ;;  %v4494_v56 = vld [vmem:[%s4787_s28 + $0x368] sm:$0xff] }
  0x43   : > { %2710 = vmatpush.bf16.msrb.mxu2 %v4437_v57  ;;  %v4502_v57 = vld [vmem:[%s4787_s28 + $0x3a8] sm:$0xff] }
  0x44   : > { %2723 = vmatpush.bf16.msrb.mxu3 %v4445_v58  ;;  %v4510_v58 = vld [vmem:[%s4787_s28 + $0x3e8] sm:$0xff] }
  0x45   : > { %2685 = vmatpush.bf16.msrb.mxu0 %v4420_v59  ;;  %v4485_v59 = vld [vmem:[%s4787_s28 + $0x320] sm:$0xff] }
  0x46   : > { %2698 = vmatpush.bf16.msrb.mxu1 %v4428_v60  ;;  %v4493_v60 = vld [vmem:[%s4787_s28 + $0x360] sm:$0xff] }
  0x47   : > { %2711 = vmatpush.bf16.msrb.mxu2 %v4436_v61  ;;  %v4501_v61 = vld [vmem:[%s4787_s28 + $0x3a0] sm:$0xff] }
  0x48   : > { %2724 = vmatpush.bf16.msrb.mxu3 %v4444_v62  ;;  %v4509_v62 = vld [vmem:[%s4787_s28 + $0x3e0] sm:$0xff] }
  0x49   : > { %2686 = vmatpush.bf16.msrb.mxu0 %v4419_v63  ;;  %v4484_v63 = vld [vmem:[%s4787_s28 + $0x318] sm:$0xff] }
  0x4a   : > { %2699 = vmatpush.bf16.msrb.mxu1 %v4427_v0  ;;  %v4492_v0 = vld [vmem:[%s4787_s28 + $0x358] sm:$0xff] }
  0x4b   : > { %2712 = vmatpush.bf16.msrb.mxu2 %v4435_v1  ;;  %v4500_v1 = vld [vmem:[%s4787_s28 + $0x398] sm:$0xff] }
  0x4c   : > { %2725 = vmatpush.bf16.msrb.mxu3 %v4443_v2  ;;  %v4508_v2 = vld [vmem:[%s4787_s28 + $0x3d8] sm:$0xff] }
  0x4d   : > { %2687 = vmatpush.bf16.msrb.mxu0 %v4418_v3  ;;  %v4483_v3 = vld [vmem:[%s4787_s28 + $0x310] sm:$0xff] }
  0x4e   : > { %2700 = vmatpush.bf16.msrb.mxu1 %v4426_v4  ;;  %v4491_v4 = vld [vmem:[%s4787_s28 + $0x350] sm:$0xff] }
  0x4f   : > { %2713 = vmatpush.bf16.msrb.mxu2 %v4434_v5  ;;  %v4499_v5 = vld [vmem:[%s4787_s28 + $0x390] sm:$0xff] }
  0x50   : > { %2726 = vmatpush.bf16.msrb.mxu3 %v4442_v6  ;;  %v4507_v6 = vld [vmem:[%s4787_s28 + $0x3d0] sm:$0xff] }
  0x51   : > { %2688 = vmatpush.bf16.msrb.mxu0 %v4417_v7  ;;  %v4482_v7 = vld [vmem:[%s4787_s28 + $0x308] sm:$0xff] }
  0x52   : > { %2701 = vmatpush.bf16.msrb.mxu1 %v4425_v8  ;;  %v4490_v8 = vld [vmem:[%s4787_s28 + $0x348] sm:$0xff] }
  0x53   : > { %2714 = vmatpush.bf16.msrb.mxu2 %v4433_v9  ;;  %v4498_v9 = vld [vmem:[%s4787_s28 + $0x388] sm:$0xff] }
  0x54   : > { %2727 = vmatpush.bf16.msrb.mxu3 %v4441_v10  ;;  %2689 = vmatmul.bf16.vlgmr.msrb.gmra.mxu0 %v825_v51  ;;  %v4487_v51 = vld [vmem:[%s4787_s28 + $0x330] sm:$0xff]  ;;  %v4506_v10 = vld [vmem:[%s4787_s28 + $0x3c8] sm:$0xff] }
  0x55   : > { %2733 = vmatpush.bf16.msra.mxu0 %v4456_v11  ;;  %2702 = vmatmul.bf16.vlgmr.msrb.gmra.mxu1 %v826_v54  ;;  %v4511_v54 = vld [vmem:[%s4787_s28 + $0x3f0] sm:$0xff]  ;;  %v835_v11 = vld [vmem:[#allocation1 + $0x24] sm:$0xff] }
  0x56   : > { %2746 = vmatpush.bf16.msra.mxu1 %v4464_v12  ;;  %2715 = vmatmul.bf16.vlgmr.msrb.gmra.mxu2 %v827_v50  ;;  %v834_v50 = vld [vmem:[#allocation1 + $0x1b] sm:$0xff] }
  0x57   : > { %2759 = vmatpush.bf16.msra.mxu2 %v4472_v13  ;;  %2728 = vmatmul.bf16.vlgmr.msrb.gmra.mxu3 %v828_v52  ;;  %v4495_v52 = vld [vmem:[%s4787_s28 + $0x370] sm:$0xff] }
  0x58   : > { %2772 = vmatpush.bf16.msra.mxu3 %v4480_v14  ;;  %v837_v12 = vld [vmem:[#allocation1 + $0x36] sm:$0xff]  ;;  %v836_v13 = vld [vmem:[#allocation1 + $0x2d] sm:$0xff]  ;;  %v838_v14 = vld [vmem:[#allocation1 + $0x3f] sm:$0xff] }
  0x59   : > { %2734 = vmatpush.bf16.msra.mxu0 %v4455_v15  ;;  %v240_v15 = vld [vmem:[%s4782_s24 + $0x10] sm:$0xff] }
  0x5a   : > { %2747 = vmatpush.bf16.msra.mxu1 %v4463_v16  ;;  %840 = vst [vmem:[#allocation1] ss:$9 sm:$0xff] %v240_v15  ;;  %v4481_v16 = vld [vmem:[%s4787_s28 + $0x300] sm:$0xff] }
  0x5b   : > { %2760 = vmatpush.bf16.msra.mxu2 %v4471_v17  ;;  %v4489_v17 = vld [vmem:[%s4787_s28 + $0x340] sm:$0xff] }
  0x5c   : > { %2773 = vmatpush.bf16.msra.mxu3 %v4479_v18  ;;  %v4497_v18 = vld [vmem:[%s4787_s28 + $0x380] sm:$0xff] }
  0x5d   : > { %2735 = vmatpush.bf16.msra.mxu0 %v4454_v19  ;;  %v4505_v19 = vld [vmem:[%s4787_s28 + $0x3c0] sm:$0xff] }
  0x5e   : > { %2748 = vmatpush.bf16.msra.mxu1 %v4462_v20  ;;  %v4520_v20 = vld [vmem:[%s4787_s28 + $0x438] sm:$0xff] }
  0x5f   : > { %2761 = vmatpush.bf16.msra.mxu2 %v4470_v21  ;;  %v4528_v21 = vld [vmem:[%s4787_s28 + $0x478] sm:$0xff] }
  0x60   : > { %2774 = vmatpush.bf16.msra.mxu3 %v4478_v22  ;;  %v4536_v22 = vld [vmem:[%s4787_s28 + $0x4b8] sm:$0xff] }
  0x61   : > { %2736 = vmatpush.bf16.msra.mxu0 %v4453_v23  ;;  %v4544_v23 = vld [vmem:[%s4787_s28 + $0x4f8] sm:$0xff] }
  0x62   : > { %2749 = vmatpush.bf16.msra.mxu1 %v4461_v24  ;;  %v4519_v24 = vld [vmem:[%s4787_s28 + $0x430] sm:$0xff] }
  0x63   : > { %2762 = vmatpush.bf16.msra.mxu2 %v4469_v25  ;;  %v4527_v25 = vld [vmem:[%s4787_s28 + $0x470] sm:$0xff] }
  0x64   : > { %2775 = vmatpush.bf16.msra.mxu3 %v4477_v26  ;;  %v4535_v26 = vld [vmem:[%s4787_s28 + $0x4b0] sm:$0xff] }
  0x65   : > { %2737 = vmatpush.bf16.msra.mxu0 %v4452_v27  ;;  %v4543_v27 = vld [vmem:[%s4787_s28 + $0x4f0] sm:$0xff] }
  0x66   : > { %2750 = vmatpush.bf16.msra.mxu1 %v4460_v28  ;;  %v4518_v28 = vld [vmem:[%s4787_s28 + $0x428] sm:$0xff] }
  0x67   : > { %2763 = vmatpush.bf16.msra.mxu2 %v4468_v29  ;;  %v4526_v29 = vld [vmem:[%s4787_s28 + $0x468] sm:$0xff] }
  0x68   : > { %2776 = vmatpush.bf16.msra.mxu3 %v4476_v30  ;;  %v4534_v30 = vld [vmem:[%s4787_s28 + $0x4a8] sm:$0xff] }
  0x69   : > { %2738 = vmatpush.bf16.msra.mxu0 %v4451_v31  ;;  %v4542_v31 = vld [vmem:[%s4787_s28 + $0x4e8] sm:$0xff] }
  0x6a   : > { %2751 = vmatpush.bf16.msra.mxu1 %v4459_v32  ;;  %v4517_v32 = vld [vmem:[%s4787_s28 + $0x420] sm:$0xff] }
  0x6b   : > { %2764 = vmatpush.bf16.msra.mxu2 %v4467_v33  ;;  %v4525_v33 = vld [vmem:[%s4787_s28 + $0x460] sm:$0xff] }
  0x6c   : > { %2777 = vmatpush.bf16.msra.mxu3 %v4475_v34  ;;  %v4533_v34 = vld [vmem:[%s4787_s28 + $0x4a0] sm:$0xff] }
  0x6d   : > { %2739 = vmatpush.bf16.msra.mxu0 %v4450_v35  ;;  %v4541_v35 = vld [vmem:[%s4787_s28 + $0x4e0] sm:$0xff] }
  0x6e   : > { %2752 = vmatpush.bf16.msra.mxu1 %v4458_v36  ;;  %v4516_v36 = vld [vmem:[%s4787_s28 + $0x418] sm:$0xff] }
  0x6f   : > { %2765 = vmatpush.bf16.msra.mxu2 %v4466_v37  ;;  %v4524_v37 = vld [vmem:[%s4787_s28 + $0x458] sm:$0xff] }
  0x70   : > { %2778 = vmatpush.bf16.msra.mxu3 %v4474_v38  ;;  %v4532_v38 = vld [vmem:[%s4787_s28 + $0x498] sm:$0xff] }
  0x71   : > { %2740 = vmatpush.bf16.msra.mxu0 %v4449_v39  ;;  %v4540_v39 = vld [vmem:[%s4787_s28 + $0x4d8] sm:$0xff] }
  0x72   : > { %2753 = vmatpush.bf16.msra.mxu1 %v4457_v40  ;;  %v4515_v40 = vld [vmem:[%s4787_s28 + $0x410] sm:$0xff] }
  0x73   : > { %2766 = vmatpush.bf16.msra.mxu2 %v4465_v41  ;;  %v4523_v41 = vld [vmem:[%s4787_s28 + $0x450] sm:$0xff] }
  0x74   : > { %2779 = vmatpush.bf16.msra.mxu3 %v4473_v42  ;;  %2741 = vmatmul.bf16.vlgmr.msra.gmra.mxu0 %v831_v47  ;;  %v4531_v42 = vld [vmem:[%s4787_s28 + $0x490] sm:$0xff]  ;;  %v4538_v47 = vld [vmem:[%s4787_s28 + $0x4c8] sm:$0xff] }
  0x75   : > { %2785 = vmatpush.bf16.msrb.mxu0 %v4488_v43  ;;  %2754 = vmatmul.bf16.vlgmr.msra.gmra.mxu1 %v832_v49  ;;  %v4539_v43 = vld [vmem:[%s4787_s28 + $0x4d0] sm:$0xff]  ;;  %v4521_v49 = vld [vmem:[%s4787_s28 + $0x440] sm:$0xff] }
  0x76   : > { %2798 = vmatpush.bf16.msrb.mxu1 %v4496_v44  ;;  %2767 = vmatmul.bf16.vlgmr.msra.gmra.mxu2 %v833_v48  ;;  %v4514_v44 = vld [vmem:[%s4787_s28 + $0x408] sm:$0xff]  ;;  %v4513_v48 = vld [vmem:[%s4787_s28 + $0x400] sm:$0xff] }
  0x77   : > { %2811 = vmatpush.bf16.msrb.mxu2 %v4504_v45  ;;  %2780 = vmatmul.bf16.vlgmr.msra.gmra.mxu3 %v834_v50  ;;  %v4522_v45 = vld [vmem:[%s4787_s28 + $0x448] sm:$0xff]  ;;  %v4529_v50 = vld [vmem:[%s4787_s28 + $0x480] sm:$0xff] }
  0x78   : > { %2824 = vmatpush.bf16.msrb.mxu3 %v4512_v46  ;;  %v4530_v46 = vld [vmem:[%s4787_s28 + $0x488] sm:$0xff] }
  0x79   : > { %2786 = vmatpush.bf16.msrb.mxu0 %v4487_v51  ;;  %v4537_v51 = vld [vmem:[%s4787_s28 + $0x4c0] sm:$0xff] }
  0x7a   : > { %2799 = vmatpush.bf16.msrb.mxu1 %v4495_v52  ;;  %v4552_v52 = vld [vmem:[%s4787_s28 + $0x538] sm:$0xff] }
  0x7b   : > { %2812 = vmatpush.bf16.msrb.mxu2 %v4503_v53  ;;  %v4560_v53 = vld [vmem:[%s4787_s28 + $0x578] sm:$0xff] }
  0x7c   : > { %2825 = vmatpush.bf16.msrb.mxu3 %v4511_v54  ;;  %v4568_v54 = vld [vmem:[%s4787_s28 + $0x5b8] sm:$0xff] }
  0x7d   : > { %2787 = vmatpush.bf16.msrb.mxu0 %v4486_v55  ;;  %v4576_v55 = vld [vmem:[%s4787_s28 + $0x5f8] sm:$0xff] }
  0x7e   : > { %2800 = vmatpush.bf16.msrb.mxu1 %v4494_v56  ;;  %v841_v56 = vld [vmem:[#allocation1] sm:$0xff] }
  0x7f   : > { %2813 = vmatpush.bf16.msrb.mxu2 %v4502_v57  ;;  %v843_v57 = vld [vmem:[#allocation1 + $0x12] sm:$0xff] }
  0x80   : > { %2826 = vmatpush.bf16.msrb.mxu3 %v4510_v58  ;;  %v842_v58 = vld [vmem:[#allocation1 + $0x9] sm:$0xff] }
  0x81   : > { %2788 = vmatpush.bf16.msrb.mxu0 %v4485_v59  ;;  %v844_v59 = vld [vmem:[#allocation1 + $0x1b] sm:$0xff] }
  0x82   : > { %2801 = vmatpush.bf16.msrb.mxu1 %v4493_v60  ;;  %v4551_v60 = vld [vmem:[%s4787_s28 + $0x530] sm:$0xff] }
  0x83   : > { %2814 = vmatpush.bf16.msrb.mxu2 %v4501_v61  ;;  %v4559_v61 = vld [vmem:[%s4787_s28 + $0x570] sm:$0xff] }
  0x84   : > { %2827 = vmatpush.bf16.msrb.mxu3 %v4509_v62  ;;  %v4567_v62 = vld [vmem:[%s4787_s28 + $0x5b0] sm:$0xff] }
  0x85   : > { %2789 = vmatpush.bf16.msrb.mxu0 %v4484_v63  ;;  %v4575_v63 = vld [vmem:[%s4787_s28 + $0x5f0] sm:$0xff] }
  0x86   : > { %2802 = vmatpush.bf16.msrb.mxu1 %v4492_v0  ;;  %v4550_v0 = vld [vmem:[%s4787_s28 + $0x528] sm:$0xff] }
  0x87   : > { %2815 = vmatpush.bf16.msrb.mxu2 %v4500_v1  ;;  %v4558_v1 = vld [vmem:[%s4787_s28 + $0x568] sm:$0xff] }
  0x88   : > { %2828 = vmatpush.bf16.msrb.mxu3 %v4508_v2  ;;  %v4566_v2 = vld [vmem:[%s4787_s28 + $0x5a8] sm:$0xff] }
  0x89   : > { %2790 = vmatpush.bf16.msrb.mxu0 %v4483_v3  ;;  %v4574_v3 = vld [vmem:[%s4787_s28 + $0x5e8] sm:$0xff] }
  0x8a   : > { %2803 = vmatpush.bf16.msrb.mxu1 %v4491_v4 }
  0x8b   : > { %2816 = vmatpush.bf16.msrb.mxu2 %v4499_v5  ;;  %v4549_v5 = vld [vmem:[%s4787_s28 + $0x520] sm:$0xff] }
  0x8c   : > { %2829 = vmatpush.bf16.msrb.mxu3 %v4507_v6  ;;  %v4557_v6 = vld [vmem:[%s4787_s28 + $0x560] sm:$0xff] }
  0x8d   : > { %2791 = vmatpush.bf16.msrb.mxu0 %v4482_v7 }
  0x8e   : > { %2804 = vmatpush.bf16.msrb.mxu1 %v4490_v8  ;;  %v4565_v8 = vld [vmem:[%s4787_s28 + $0x5a0] sm:$0xff] }
  0x8f   : > { %2817 = vmatpush.bf16.msrb.mxu2 %v4498_v9  ;;  %v4573_v9 = vld [vmem:[%s4787_s28 + $0x5e0] sm:$0xff] }
  0x90   : > { %2830 = vmatpush.bf16.msrb.mxu3 %v4506_v10 }
  0x91   : > { %2792 = vmatpush.bf16.msrb.mxu0 %v4481_v16 }
  0x92   : > { %2805 = vmatpush.bf16.msrb.mxu1 %v4489_v17 }
  0x93   : > { %2818 = vmatpush.bf16.msrb.mxu2 %v4497_v18 }
  0x94   : > { %2831 = vmatpush.bf16.msrb.mxu3 %v4505_v19  ;;  %2793 = vmatmul.bf16.vlgmr.msrb.gmra.mxu0 %v835_v11  ;;  %v4548_v11 = vld [vmem:[%s4787_s28 + $0x518] sm:$0xff]  ;;  %v4547_v19 = vld [vmem:[%s4787_s28 + $0x510] sm:$0xff] }
  0x95   : > { %2837 = vmatpush.bf16.msra.mxu0 %v4520_v20  ;;  %2806 = vmatmul.bf16.vlgmr.msrb.gmra.mxu1 %v836_v13  ;;  %v4564_v13 = vld [vmem:[%s4787_s28 + $0x598] sm:$0xff]  ;;  %v4555_v20 = vld [vmem:[%s4787_s28 + $0x550] sm:$0xff] }
  0x96   : > { %2850 = vmatpush.bf16.msra.mxu1 %v4528_v21  ;;  %2819 = vmatmul.bf16.vlgmr.msrb.gmra.mxu2 %v837_v12  ;;  %v4556_v12 = vld [vmem:[%s4787_s28 + $0x558] sm:$0xff] }
  0x97   : > { %2863 = vmatpush.bf16.msra.mxu2 %v4536_v22  ;;  %2832 = vmatmul.bf16.vlgmr.msrb.gmra.mxu3 %v838_v14  ;;  %v4572_v14 = vld [vmem:[%s4787_s28 + $0x5d8] sm:$0xff] }
  0x98   : > { %2876 = vmatpush.bf16.msra.mxu3 %v4544_v23  ;;  %v4563_v23 = vld [vmem:[%s4787_s28 + $0x590] sm:$0xff] }
  0x99   : > { %2838 = vmatpush.bf16.msra.mxu0 %v4519_v24  ;;  %v4571_v24 = vld [vmem:[%s4787_s28 + $0x5d0] sm:$0xff] }
  0x9a   : > { %2851 = vmatpush.bf16.msra.mxu1 %v4527_v25  ;;  %v4546_v25 = vld [vmem:[%s4787_s28 + $0x508] sm:$0xff] }
  0x9b   : > { %2864 = vmatpush.bf16.msra.mxu2 %v4535_v26  ;;  %v4554_v26 = vld [vmem:[%s4787_s28 + $0x548] sm:$0xff] }
  0x9c   : > { %2877 = vmatpush.bf16.msra.mxu3 %v4543_v27  ;;  %v4562_v27 = vld [vmem:[%s4787_s28 + $0x588] sm:$0xff] }
  0x9d   : > { %2839 = vmatpush.bf16.msra.mxu0 %v4518_v28  ;;  %v4570_v28 = vld [vmem:[%s4787_s28 + $0x5c8] sm:$0xff] }
  0x9e   : > { %2852 = vmatpush.bf16.msra.mxu1 %v4526_v29  ;;  %v845_v29 = vld [vmem:[#allocation1 + $0x24] sm:$0xff] }
  0x9f   : > { %2865 = vmatpush.bf16.msra.mxu2 %v4534_v30  ;;  %v847_v30 = vld [vmem:[#allocation1 + $0x36] sm:$0xff] }
  0xa0   : > { %2878 = vmatpush.bf16.msra.mxu3 %v4542_v31 }
  0xa1   : > { %2840 = vmatpush.bf16.msra.mxu0 %v4517_v32  ;;  %v846_v32 = vld [vmem:[#allocation1 + $0x2d] sm:$0xff] }
  0xa2   : > { %2853 = vmatpush.bf16.msra.mxu1 %v4525_v33  ;;  %v848_v33 = vld [vmem:[#allocation1 + $0x3f] sm:$0xff] }
  0xa3   : > { %2866 = vmatpush.bf16.msra.mxu2 %v4533_v34 }
  0xa4   : > { %2879 = vmatpush.bf16.msra.mxu3 %v4541_v35  ;;  %v241_v35 = vld [vmem:[%s4782_s24 + $0x18] sm:$0xff] }
  0xa5   : > { %2841 = vmatpush.bf16.msra.mxu0 %v4516_v36  ;;  %850 = vst [vmem:[#allocation1] ss:$9 sm:$0xff] %v241_v35  ;;  %v4545_v36 = vld [vmem:[%s4787_s28 + $0x500] sm:$0xff]  ;;  %v4638_v35 = vld [vmem:[%s4787_s28 + $0x7e8] sm:$0xff] }
  0xa6   : > { %2854 = vmatpush.bf16.msra.mxu1 %v4524_v37  ;;  %v4553_v37 = vld [vmem:[%s4787_s28 + $0x540] sm:$0xff] }
  0xa7   : > { %2867 = vmatpush.bf16.msra.mxu2 %v4532_v38  ;;  %v4561_v38 = vld [vmem:[%s4787_s28 + $0x580] sm:$0xff] }
  0xa8   : > { %2880 = vmatpush.bf16.msra.mxu3 %v4540_v39  ;;  %v4569_v39 = vld [vmem:[%s4787_s28 + $0x5c0] sm:$0xff] }
  0xa9   : > { %2842 = vmatpush.bf16.msra.mxu0 %v4515_v40  ;;  %v4584_v40 = vld [vmem:[%s4787_s28 + $0x638] sm:$0xff] }
  0xaa   : > { %2855 = vmatpush.bf16.msra.mxu1 %v4523_v41  ;;  %v4592_v41 = vld [vmem:[%s4787_s28 + $0x678] sm:$0xff] }
  0xab   : > { %2868 = vmatpush.bf16.msra.mxu2 %v4531_v42  ;;  %v4600_v42 = vld [vmem:[%s4787_s28 + $0x6b8] sm:$0xff] }
  0xac   : > { %2881 = vmatpush.bf16.msra.mxu3 %v4539_v43  ;;  %v4608_v43 = vld [vmem:[%s4787_s28 + $0x6f8] sm:$0xff] }
  0xad   : > { %2843 = vmatpush.bf16.msra.mxu0 %v4514_v44  ;;  %v4583_v44 = vld [vmem:[%s4787_s28 + $0x630] sm:$0xff] }
  0xae   : > { %2856 = vmatpush.bf16.msra.mxu1 %v4522_v45  ;;  %v4591_v45 = vld [vmem:[%s4787_s28 + $0x670] sm:$0xff] }
  0xaf   : > { %2869 = vmatpush.bf16.msra.mxu2 %v4530_v46  ;;  %v4599_v46 = vld [vmem:[%s4787_s28 + $0x6b0] sm:$0xff] }
  0xb0   : > { %2882 = vmatpush.bf16.msra.mxu3 %v4538_v47  ;;  %v4607_v47 = vld [vmem:[%s4787_s28 + $0x6f0] sm:$0xff] }
  0xb1   : > { %2844 = vmatpush.bf16.msra.mxu0 %v4513_v48  ;;  %v2638_v4 = vpop.f32.mrf.mxu0  ;;  %v4582_v48 = vld [vmem:[%s4787_s28 + $0x628] sm:$0xff] }
  0xb2   : > { %2857 = vmatpush.bf16.msra.mxu1 %v4521_v49  ;;  %v2651_v7 = vpop.f32.mrf.mxu1  ;;  %v4590_v49 = vld [vmem:[%s4787_s28 + $0x668] sm:$0xff] }
  0xb3   : > { %2870 = vmatpush.bf16.msra.mxu2 %v4529_v50  ;;  %v2652_v10 = vadd.f32 %v2651_v7, %v2638_v4  ;;  %v4598_v50 = vld [vmem:[%s4787_s28 + $0x6a8] sm:$0xff]  ;;  %v4579_v4 = vld [vmem:[%s4787_s28 + $0x610] sm:$0xff] }
  0xb4   : > { %2883 = vmatpush.bf16.msra.mxu3 %v4537_v51  ;;  %2845 = vmatmul.bf16.vlgmr.msra.gmra.mxu0 %v841_v56  ;;  %v4606_v51 = vld [vmem:[%s4787_s28 + $0x6e8] sm:$0xff] }
  0xb5   : > { %2889 = vmatpush.bf16.msrb.mxu0 %v4552_v52  ;;  %2858 = vmatmul.bf16.vlgmr.msra.gmra.mxu1 %v842_v58  ;;  %v4605_v58 = vld [vmem:[%s4787_s28 + $0x6e0] sm:$0xff] }
  0xb6   : > { %2902 = vmatpush.bf16.msrb.mxu1 %v4560_v53  ;;  %2871 = vmatmul.bf16.vlgmr.msra.gmra.mxu2 %v843_v57  ;;  %v4581_v53 = vld [vmem:[%s4787_s28 + $0x620] sm:$0xff] }
  0xb7   : > { %2915 = vmatpush.bf16.msrb.mxu2 %v4568_v54  ;;  %2884 = vmatmul.bf16.vlgmr.msra.gmra.mxu3 %v844_v59  ;;  %v4589_v54 = vld [vmem:[%s4787_s28 + $0x660] sm:$0xff] }
  0xb8   : > { %2928 = vmatpush.bf16.msrb.mxu3 %v4576_v55  ;;  %v4597_v57 = vld [vmem:[%s4787_s28 + $0x6a0] sm:$0xff] }
  0xb9   : > { %2890 = vmatpush.bf16.msrb.mxu0 %v4551_v60  ;;  %v2664_v15 = vpop.f32.mrf.mxu2  ;;  %v2640_v18 = vpop.f32.mrf.mxu0  ;;  %v4580_v60 = vld [vmem:[%s4787_s28 + $0x618] sm:$0xff] }
  0xba   : > { %2903 = vmatpush.bf16.msrb.mxu1 %v4559_v61  ;;  %v2665_v16 = vadd.f32 %v2664_v15, %v2652_v10  ;;  %v2677_v17 = vpop.f32.mrf.mxu3  ;;  %v2653_v22 = vpop.f32.mrf.mxu1  ;;  %v4588_v61 = vld [vmem:[%s4787_s28 + $0x658] sm:$0xff]  ;;  %v4578_v10 = vld [vmem:[%s4787_s28 + $0x608] sm:$0xff]  ;;  %v4593_v18 = vld [vmem:[%s4787_s28 + $0x680] sm:$0xff] }
  0xbb   : > { %2916 = vmatpush.bf16.msrb.mxu2 %v4567_v62  ;;  %v4596_v62 = vld [vmem:[%s4787_s28 + $0x698] sm:$0xff] }
  0xbc   : > { %2929 = vmatpush.bf16.msrb.mxu3 %v4575_v63  ;;  %v4975_v21 = vadd.f32 %v2677_v17, %v2665_v16  ;;  %v4604_v63 = vld [vmem:[%s4787_s28 + $0x6d8] sm:$0xff]  ;;  %v4577_v16 = vld [vmem:[%s4787_s28 + $0x600] sm:$0xff] }
  0xbd   : > { %2891 = vmatpush.bf16.msrb.mxu0 %v4550_v0  ;;  %v4585_v17 = vld [vmem:[%s4787_s28 + $0x640] sm:$0xff]  ;;  %v4632_v22 = vld [vmem:[%s4787_s28 + $0x7b8] sm:$0xff] }
  0xbe   : > { %2904 = vmatpush.bf16.msrb.mxu1 %v4558_v1 }
  0xbf   : > { %2917 = vmatpush.bf16.msrb.mxu2 %v4566_v2 }
  0xc0   : > { %2930 = vmatpush.bf16.msrb.mxu3 %v4574_v3 }
  0xc1   : > { %2892 = vmatpush.bf16.msrb.mxu0 %v4549_v5  ;;  %v2666_v31 = vpop.f32.mrf.mxu2  ;;  %v4587_v5 = vld [vmem:[%s4787_s28 + $0x650] sm:$0xff] }
  0xc2   : > { %2905 = vmatpush.bf16.msrb.mxu1 %v4557_v6  ;;  %v2679_v34 = vpop.f32.mrf.mxu3  ;;  %v4639_v31 = vld [vmem:[%s4787_s28 + $0x7f0] sm:$0xff] }
  0xc3   : > { %2918 = vmatpush.bf16.msrb.mxu2 %v4565_v8  ;;  %v4595_v8 = vld [vmem:[%s4787_s28 + $0x690] sm:$0xff]  ;;  %v4630_v34 = vld [vmem:[%s4787_s28 + $0x7a8] sm:$0xff] }
  0xc4   : > { %2931 = vmatpush.bf16.msrb.mxu3 %v4573_v9  ;;  %v4603_v9 = vld [vmem:[%s4787_s28 + $0x6d0] sm:$0xff] }
  0xc5   : > { %2893 = vmatpush.bf16.msrb.mxu0 %v4548_v11  ;;  %v4586_v11 = vld [vmem:[%s4787_s28 + $0x648] sm:$0xff] }
  0xc6   : > { %2906 = vmatpush.bf16.msrb.mxu1 %v4556_v12  ;;  %v4594_v12 = vld [vmem:[%s4787_s28 + $0x688] sm:$0xff] }
  0xc7   : > { %2919 = vmatpush.bf16.msrb.mxu2 %v4564_v13  ;;  %v4602_v13 = vld [vmem:[%s4787_s28 + $0x6c8] sm:$0xff] }
  0xc8   : > { %2932 = vmatpush.bf16.msrb.mxu3 %v4572_v14 }
  0xc9   : > { %2894 = vmatpush.bf16.msrb.mxu0 %v4547_v19  ;;  %v4601_v19 = vld [vmem:[%s4787_s28 + $0x6c0] sm:$0xff] }
  0xca   : > { %2907 = vmatpush.bf16.msrb.mxu1 %v4555_v20  ;;  %v4616_v20 = vld [vmem:[%s4787_s28 + $0x738] sm:$0xff] }
  0xcb   : > { %2920 = vmatpush.bf16.msrb.mxu2 %v4563_v23  ;;  %v4640_v23 = vld [vmem:[%s4787_s28 + $0x7f8] sm:$0xff] }
  0xcc   : > { %2933 = vmatpush.bf16.msrb.mxu3 %v4571_v24  ;;  %v851_v24 = vld [vmem:[#allocation1] sm:$0xff] }
  0xcd   : > { %2895 = vmatpush.bf16.msrb.mxu0 %v4546_v25  ;;  %v853_v25 = vld [vmem:[#allocation1 + $0x12] sm:$0xff] }
  0xce   : > { %2908 = vmatpush.bf16.msrb.mxu1 %v4554_v26  ;;  %v852_v26 = vld [vmem:[#allocation1 + $0x9] sm:$0xff] }
  0xcf   : > { %2921 = vmatpush.bf16.msrb.mxu2 %v4562_v27  ;;  %v854_v27 = vld [vmem:[#allocation1 + $0x1b] sm:$0xff] }
  0xd0   : > { %2934 = vmatpush.bf16.msrb.mxu3 %v4570_v28  ;;  %v4615_v28 = vld [vmem:[%s4787_s28 + $0x730] sm:$0xff] }
  0xd1   : > { %2896 = vmatpush.bf16.msrb.mxu0 %v4545_v36  ;;  %v2690_v52 = vpop.f32.mrf.mxu0 }
  0xd2   : > { %2909 = vmatpush.bf16.msrb.mxu1 %v4553_v37  ;;  %v2691_v55 = vadd.f32 %v2690_v52, %v4975_v21  ;;  %v2703_v56 = vpop.f32.mrf.mxu1  ;;  %v4624_v21 = vld [vmem:[%s4787_s28 + $0x778] sm:$0xff] }
  0xd3   : > { %2922 = vmatpush.bf16.msrb.mxu2 %v4561_v38  ;;  %v4613_v38 = vld [vmem:[%s4787_s28 + $0x720] sm:$0xff] }
  0xd4   : > { %2935 = vmatpush.bf16.msrb.mxu3 %v4569_v39  ;;  %2897 = vmatmul.bf16.vlgmr.msrb.gmra.mxu0 %v845_v29  ;;  %v2704_v59 = vadd.f32 %v2703_v56, %v2691_v55  ;;  %v4623_v29 = vld [vmem:[%s4787_s28 + $0x770] sm:$0xff]  ;;  %v4621_v39 = vld [vmem:[%s4787_s28 + $0x760] sm:$0xff] }
  0xd5   : > { %2941 = vmatpush.bf16.msra.mxu0 %v4584_v40  ;;  %2910 = vmatmul.bf16.vlgmr.msrb.gmra.mxu1 %v846_v32  ;;  %v4614_v32 = vld [vmem:[%s4787_s28 + $0x728] sm:$0xff]  ;;  %v4627_v56 = vld [vmem:[%s4787_s28 + $0x790] sm:$0xff] }
  0xd6   : > { %2954 = vmatpush.bf16.msra.mxu1 %v4592_v41  ;;  %2923 = vmatmul.bf16.vlgmr.msrb.gmra.mxu2 %v847_v30  ;;  %v4631_v30 = vld [vmem:[%s4787_s28 + $0x7b0] sm:$0xff]  ;;  %v4629_v41 = vld [vmem:[%s4787_s28 + $0x7a0] sm:$0xff] }
  0xd7   : > { %2967 = vmatpush.bf16.msra.mxu2 %v4600_v42  ;;  %2936 = vmatmul.bf16.vlgmr.msrb.gmra.mxu3 %v848_v33  ;;  %v4622_v33 = vld [vmem:[%s4787_s28 + $0x768] sm:$0xff]  ;;  %v4637_v42 = vld [vmem:[%s4787_s28 + $0x7e0] sm:$0xff] }
  0xd8   : > { %2980 = vmatpush.bf16.msra.mxu3 %v4608_v43 }
  0xd9   : > { %2942 = vmatpush.bf16.msra.mxu0 %v4583_v44  ;;  %v2716_v0 = vpop.f32.mrf.mxu2  ;;  %v2692_v3 = vpop.f32.mrf.mxu0  ;;  %v4612_v44 = vld [vmem:[%s4787_s28 + $0x718] sm:$0xff] }
  0xda   : > { %2955 = vmatpush.bf16.msra.mxu1 %v4591_v45  ;;  %v2717_v1 = vadd.f32 %v2716_v0, %v2704_v59  ;;  %v2729_v2 = vpop.f32.mrf.mxu3  ;;  %v2705_v7 = vpop.f32.mrf.mxu1  ;;  %v4620_v45 = vld [vmem:[%s4787_s28 + $0x758] sm:$0xff]  ;;  %v4618_v59 = vld [vmem:[%s4787_s28 + $0x748] sm:$0xff] }
  0xdb   : > { %2968 = vmatpush.bf16.msra.mxu2 %v4599_v46  ;;  %v4628_v46 = vld [vmem:[%s4787_s28 + $0x798] sm:$0xff]  ;;  %v4625_v7 = vld [vmem:[%s4787_s28 + $0x780] sm:$0xff] }
  0xdc   : > { %2981 = vmatpush.bf16.msra.mxu3 %v4607_v47  ;;  %v2730_v6 = vadd.f32 %v2729_v2, %v2717_v1  ;;  %v4636_v47 = vld [vmem:[%s4787_s28 + $0x7d8] sm:$0xff]  ;;  %v856_v1 = vld [vmem:[#allocation1 + $0x2d] sm:$0xff] }
  0xdd   : > { %2943 = vmatpush.bf16.msra.mxu0 %v4582_v48  ;;  %v858_v2 = vld [vmem:[#allocation1 + $0x3f] sm:$0xff] }
  0xde   : > { %2956 = vmatpush.bf16.msra.mxu1 %v4590_v49 }
  0xdf   : > { %2969 = vmatpush.bf16.msra.mxu2 %v4598_v50 }
  0xe0   : > { %2982 = vmatpush.bf16.msra.mxu3 %v4606_v51 }
  0xe1   : > { %2944 = vmatpush.bf16.msra.mxu0 %v4581_v53  ;;  %v2718_v14 = vpop.f32.mrf.mxu2  ;;  %v4611_v53 = vld [vmem:[%s4787_s28 + $0x710] sm:$0xff] }
  0xe2   : > { %2957 = vmatpush.bf16.msra.mxu1 %v4589_v54  ;;  %v2731_v15 = vpop.f32.mrf.mxu3  ;;  %v4619_v54 = vld [vmem:[%s4787_s28 + $0x750] sm:$0xff] }
  0xe3   : > { %2970 = vmatpush.bf16.msra.mxu2 %v4597_v57  ;;  %v4635_v57 = vld [vmem:[%s4787_s28 + $0x7d0] sm:$0xff] }
  0xe4   : > { %2983 = vmatpush.bf16.msra.mxu3 %v4605_v58  ;;  %v4610_v58 = vld [vmem:[%s4787_s28 + $0x708] sm:$0xff]  ;;  %v4655_v14 = vld [vmem:[%s4787_s28 + $0x870] sm:$0xff] }
  0xe5   : > { %2945 = vmatpush.bf16.msra.mxu0 %v4580_v60  ;;  %v4626_v60 = vld [vmem:[%s4787_s28 + $0x788] sm:$0xff]  ;;  %v4663_v15 = vld [vmem:[%s4787_s28 + $0x8b0] sm:$0xff] }
  0xe6   : > { %2958 = vmatpush.bf16.msra.mxu1 %v4588_v61  ;;  %v4634_v61 = vld [vmem:[%s4787_s28 + $0x7c8] sm:$0xff] }
  0xe7   : > { %2971 = vmatpush.bf16.msra.mxu2 %v4596_v62  ;;  %v855_v62 = vld [vmem:[#allocation1 + $0x24] sm:$0xff] }
  0xe8   : > { %2984 = vmatpush.bf16.msra.mxu3 %v4604_v63  ;;  %v857_v63 = vld [vmem:[#allocation1 + $0x36] sm:$0xff] }
  0xe9   : > { %2946 = vmatpush.bf16.msra.mxu0 %v4579_v4  ;;  %v242_v4 = vld [vmem:[%s4782_s24 + $0x20] sm:$0xf] }
  0xea   : > { %2959 = vmatpush.bf16.msra.mxu1 %v4587_v5  ;;  %860 = vst [vmem:[#allocation1] ss:$9 sm:$0xff] %v242_v4  ;;  %v4609_v5 = vld [vmem:[%s4787_s28 + $0x700] sm:$0xff] }
  0xeb   : > { %2972 = vmatpush.bf16.msra.mxu2 %v4595_v8  ;;  %v4633_v8 = vld [vmem:[%s4787_s28 + $0x7c0] sm:$0xff] }
  0xec   : > { %2985 = vmatpush.bf16.msra.mxu3 %v4603_v9  ;;  %v4648_v9 = vld [vmem:[%s4787_s28 + $0x838] sm:$0xff] }
  0xed   : > { %2947 = vmatpush.bf16.msra.mxu0 %v4578_v10  ;;  %v4656_v10 = vld [vmem:[%s4787_s28 + $0x878] sm:$0xff] }
  0xee   : > { %2960 = vmatpush.bf16.msra.mxu1 %v4586_v11  ;;  %v4664_v11 = vld [vmem:[%s4787_s28 + $0x8b8] sm:$0xff] }
  0xef   : > { %2973 = vmatpush.bf16.msra.mxu2 %v4594_v12  ;;  %v4672_v12 = vld [vmem:[%s4787_s28 + $0x8f8] sm:$0xff] }
  0xf0   : > { %2986 = vmatpush.bf16.msra.mxu3 %v4602_v13  ;;  %v4647_v13 = vld [vmem:[%s4787_s28 + $0x830] sm:$0xff] }
  0xf1   : > { %2948 = vmatpush.bf16.msra.mxu0 %v4577_v16  ;;  %v2742_v36 = vpop.f32.mrf.mxu0  ;;  %v4671_v16 = vld [vmem:[%s4787_s28 + $0x8f0] sm:$0xff] }
  0xf2   : > { %2961 = vmatpush.bf16.msra.mxu1 %v4585_v17  ;;  %v2743_v37 = vadd.f32 %v2742_v36, %v2730_v6  ;;  %v2755_v40 = vpop.f32.mrf.mxu1  ;;  %v4617_v6 = vld [vmem:[%s4787_s28 + $0x740] sm:$0xff]  ;;  %v4646_v17 = vld [vmem:[%s4787_s28 + $0x828] sm:$0xff] }
  0xf3   : > { %2974 = vmatpush.bf16.msra.mxu2 %v4593_v18  ;;  %v4654_v18 = vld [vmem:[%s4787_s28 + $0x868] sm:$0xff] }
  0xf4   : > { %2987 = vmatpush.bf16.msra.mxu3 %v4601_v19  ;;  %2949 = vmatmul.bf16.vlgmr.msra.gmra.mxu0 %v851_v24  ;;  %v2756_v43 = vadd.f32 %v2755_v40, %v2743_v37  ;;  %v4662_v19 = vld [vmem:[%s4787_s28 + $0x8a8] sm:$0xff]  ;;  %v4653_v24 = vld [vmem:[%s4787_s28 + $0x860] sm:$0xff] }
  0xf5   : > { %2993 = vmatpush.bf16.msrb.mxu0 %v4616_v20  ;;  %2962 = vmatmul.bf16.vlgmr.msra.gmra.mxu1 %v852_v26  ;;  %v4670_v20 = vld [vmem:[%s4787_s28 + $0x8e8] sm:$0xff]  ;;  %v4661_v26 = vld [vmem:[%s4787_s28 + $0x8a0] sm:$0xff] }
  0xf6   : > { %3006 = vmatpush.bf16.msrb.mxu1 %v4624_v21  ;;  %2975 = vmatmul.bf16.vlgmr.msra.gmra.mxu2 %v853_v25 }
  0xf7   : > { %3019 = vmatpush.bf16.msrb.mxu2 %v4632_v22  ;;  %2988 = vmatmul.bf16.vlgmr.msra.gmra.mxu3 %v854_v27  ;;  %v4669_v27 = vld [vmem:[%s4787_s28 + $0x8e0] sm:$0xff] }
  0xf8   : > { %3032 = vmatpush.bf16.msrb.mxu3 %v4640_v23  ;;  %v4645_v23 = vld [vmem:[%s4787_s28 + $0x820] sm:$0xff] }
  0xf9   : > { %2994 = vmatpush.bf16.msrb.mxu0 %v4615_v28  ;;  %v2768_v48 = vpop.f32.mrf.mxu2  ;;  %v2744_v51 = vpop.f32.mrf.mxu0 }
  0xfa   : > { %3007 = vmatpush.bf16.msrb.mxu1 %v4623_v29  ;;  %v2769_v49 = vadd.f32 %v2768_v48, %v2756_v43  ;;  %v2781_v50 = vpop.f32.mrf.mxu3  ;;  %v2757_v55 = vpop.f32.mrf.mxu1  ;;  %v4644_v29 = vld [vmem:[%s4787_s28 + $0x818] sm:$0xff]  ;;  %v4642_v43 = vld [vmem:[%s4787_s28 + $0x808] sm:$0xff]  ;;  %v4657_v51 = vld [vmem:[%s4787_s28 + $0x880] sm:$0xff] }
  0xfb   : > { %3020 = vmatpush.bf16.msrb.mxu2 %v4631_v30  ;;  %v4652_v30 = vld [vmem:[%s4787_s28 + $0x858] sm:$0xff] }
  0xfc   : > { %3033 = vmatpush.bf16.msrb.mxu3 %v4639_v31  ;;  %v5041_v52 = vadd.f32 %v2781_v50, %v2769_v49  ;;  %v4660_v31 = vld [vmem:[%s4787_s28 + $0x898] sm:$0xff]  ;;  %v4641_v49 = vld [vmem:[%s4787_s28 + $0x800] sm:$0xff] }
  0xfd   : > { %2995 = vmatpush.bf16.msrb.mxu0 %v4614_v32  ;;  %v4668_v32 = vld [vmem:[%s4787_s28 + $0x8d8] sm:$0xff]  ;;  %v4649_v50 = vld [vmem:[%s4787_s28 + $0x840] sm:$0xff] }
  0xfe   : > { %3008 = vmatpush.bf16.msrb.mxu1 %v4622_v33  ;;  %v863_v55 = vld [vmem:[#allocation1 + $0x12] sm:$0xff] }
  0xff   : > { %3021 = vmatpush.bf16.msrb.mxu2 %v4630_v34 }
 0x100   : > { %3034 = vmatpush.bf16.msrb.mxu3 %v4638_v35 }
 0x101   : > { %2996 = vmatpush.bf16.msrb.mxu0 %v4613_v38  ;;  %v2770_v0 = vpop.f32.mrf.mxu2  ;;  %v4643_v38 = vld [vmem:[%s4787_s28 + $0x810] sm:$0xff] }
 0x102   : > { %3009 = vmatpush.bf16.msrb.mxu1 %v4621_v39  ;;  %v2783_v3 = vpop.f32.mrf.mxu3  ;;  %v4651_v39 = vld [vmem:[%s4787_s28 + $0x850] sm:$0xff] }
 0x103   : > { %3022 = vmatpush.bf16.msrb.mxu2 %v4629_v41  ;;  %v4659_v41 = vld [vmem:[%s4787_s28 + $0x890] sm:$0xff] }
 0x104   : > { %3035 = vmatpush.bf16.msrb.mxu3 %v4637_v42  ;;  %v4667_v42 = vld [vmem:[%s4787_s28 + $0x8d0] sm:$0xff] }
 0x105   : > { %2997 = vmatpush.bf16.msrb.mxu0 %v4612_v44  ;;  %v4650_v44 = vld [vmem:[%s4787_s28 + $0x848] sm:$0xff] }
 0x106   : > { %3010 = vmatpush.bf16.msrb.mxu1 %v4620_v45  ;;  %v4658_v45 = vld [vmem:[%s4787_s28 + $0x888] sm:$0xff] }
 0x107   : > { %3023 = vmatpush.bf16.msrb.mxu2 %v4628_v46  ;;  %v4666_v46 = vld [vmem:[%s4787_s28 + $0x8c8] sm:$0xff] }
 0x108   : > { %3036 = vmatpush.bf16.msrb.mxu3 %v4636_v47 }
 0x109   : > { %2998 = vmatpush.bf16.msrb.mxu0 %v4611_v53  ;;  %v861_v53 = vld [vmem:[#allocation1] sm:$0xff] }
 0x10a   : > { %3011 = vmatpush.bf16.msrb.mxu1 %v4619_v54  ;;  %v862_v54 = vld [vmem:[#allocation1 + $0x9] sm:$0xff] }
 0x10b   : > { %3024 = vmatpush.bf16.msrb.mxu2 %v4627_v56  ;;  %v864_v56 = vld [vmem:[#allocation1 + $0x1b] sm:$0xff] }
 0x10c   : > { %3037 = vmatpush.bf16.msrb.mxu3 %v4635_v57 }
 0x10d   : > { %2999 = vmatpush.bf16.msrb.mxu0 %v4610_v58 }
 0x10e   : > { %3012 = vmatpush.bf16.msrb.mxu1 %v4618_v59 }
 0x10f   : > { %3025 = vmatpush.bf16.msrb.mxu2 %v4626_v60 }
 0x110   : > { %3038 = vmatpush.bf16.msrb.mxu3 %v4634_v61 }
 0x111   : > { %3000 = vmatpush.bf16.msrb.mxu0 %v4609_v5  ;;  %v2794_v21 = vpop.f32.mrf.mxu0 }
 0x112   : > { %3013 = vmatpush.bf16.msrb.mxu1 %v4617_v6  ;;  %v2795_v22 = vadd.f32 %v2794_v21, %v5041_v52  ;;  %v2807_v25 = vpop.f32.mrf.mxu1  ;;  %v4665_v52 = vld [vmem:[%s4787_s28 + $0x8c0] sm:$0xff] }
 0x113   : > { %3026 = vmatpush.bf16.msrb.mxu2 %v4625_v7 }
 0x114   : > { %3039 = vmatpush.bf16.msrb.mxu3 %v4633_v8  ;;  %3001 = vmatmul.bf16.vlgmr.msrb.gmra.mxu0 %v855_v62  ;;  %v2808_v28 = vadd.f32 %v2807_v25, %v2795_v22 }
 0x115   : > { %3045 = vmatpush.bf16.msra.mxu0 %v4648_v9  ;;  %3014 = vmatmul.bf16.vlgmr.msrb.gmra.mxu1 %v856_v1 }
 0x116   : > { %3058 = vmatpush.bf16.msra.mxu1 %v4656_v10  ;;  %3027 = vmatmul.bf16.vlgmr.msrb.gmra.mxu2 %v857_v63 }
 0x117   : > { %3071 = vmatpush.bf16.msra.mxu2 %v4664_v11  ;;  %3040 = vmatmul.bf16.vlgmr.msrb.gmra.mxu3 %v858_v2 }
 0x118   : > { %3084 = vmatpush.bf16.msra.mxu3 %v4672_v12 }
 0x119   : > { %3046 = vmatpush.bf16.msra.mxu0 %v4647_v13  ;;  %v2820_v33 = vpop.f32.mrf.mxu2  ;;  %v2796_v36 = vpop.f32.mrf.mxu0 }
 0x11a   : > { %3059 = vmatpush.bf16.msra.mxu1 %v4655_v14  ;;  %v2821_v34 = vadd.f32 %v2820_v33, %v2808_v28  ;;  %v2833_v35 = vpop.f32.mrf.mxu3  ;;  %v2809_v40 = vpop.f32.mrf.mxu1 }
 0x11b   : > { %3072 = vmatpush.bf16.msra.mxu2 %v4663_v15 }
 0x11c   : > { %3085 = vmatpush.bf16.msra.mxu3 %v4671_v16  ;;  %v2834_v37 = vadd.f32 %v2833_v35, %v2821_v34 }
 0x11d   : > { %3047 = vmatpush.bf16.msra.mxu0 %v4646_v17 }
 0x11e   : > { %3060 = vmatpush.bf16.msra.mxu1 %v4654_v18 }
 0x11f   : > { %3073 = vmatpush.bf16.msra.mxu2 %v4662_v19 }
 0x120   : > { %3086 = vmatpush.bf16.msra.mxu3 %v4670_v20 }
 0x121   : > { %3048 = vmatpush.bf16.msra.mxu0 %v4645_v23  ;;  %v2822_v47 = vpop.f32.mrf.mxu2 }
 0x122   : > { %3061 = vmatpush.bf16.msra.mxu1 %v4653_v24  ;;  %v2835_v48 = vpop.f32.mrf.mxu3 }
 0x123   : > { %3074 = vmatpush.bf16.msra.mxu2 %v4661_v26 }
 0x124   : > { %3087 = vmatpush.bf16.msra.mxu3 %v4669_v27 }
 0x125   : > { %3049 = vmatpush.bf16.msra.mxu0 %v4644_v29 }
 0x126   : > { %3062 = vmatpush.bf16.msra.mxu1 %v4652_v30 }
 0x127   : > { %3075 = vmatpush.bf16.msra.mxu2 %v4660_v31 }
 0x128   : > { %3088 = vmatpush.bf16.msra.mxu3 %v4668_v32 }
 0x129   : > { %3050 = vmatpush.bf16.msra.mxu0 %v4643_v38 }
 0x12a   : > { %3063 = vmatpush.bf16.msra.mxu1 %v4651_v39 }
 0x12b   : > { %3076 = vmatpush.bf16.msra.mxu2 %v4659_v41 }
 0x12c   : > { %3089 = vmatpush.bf16.msra.mxu3 %v4667_v42 }
 0x12d   : > { %3051 = vmatpush.bf16.msra.mxu0 %v4642_v43 }
 0x12e   : > { %3064 = vmatpush.bf16.msra.mxu1 %v4650_v44 }
 0x12f   : > { %3077 = vmatpush.bf16.msra.mxu2 %v4658_v45 }
 0x130   : > { %3090 = vmatpush.bf16.msra.mxu3 %v4666_v46 }
 0x131   : > { %3052 = vmatpush.bf16.msra.mxu0 %v4641_v49  ;;  %v2846_v57 = vpop.f32.mrf.mxu0 }
 0x132   : > { %3065 = vmatpush.bf16.msra.mxu1 %v4649_v50  ;;  %v2847_v58 = vadd.f32 %v2846_v57, %v2834_v37  ;;  %v2859_v59 = vpop.f32.mrf.mxu1  ;;  %v237_v50 = vld [vmem:[#allocation2] sm:$0x3] }
 0x133   : > { %3078 = vmatpush.bf16.msra.mxu2 %v4657_v51 }
 0x134   : > { %3091 = vmatpush.bf16.msra.mxu3 %v4665_v52  ;;  %3053 = vmatmul.bf16.vlgmr.msra.gmra.mxu0 %v861_v53  ;;  %v2860_v60 = vadd.f32 %v2859_v59, %v2847_v58 }
 0x135   : > { %3066 = vmatmul.bf16.vlgmr.msra.gmra.mxu1 %v862_v54 }
 0x136   : > { %3079 = vmatmul.bf16.vlgmr.msra.gmra.mxu2 %v863_v55 }
 0x137   : > { %3092 = vmatmul.bf16.vlgmr.msra.gmra.mxu3 %v864_v56 }
 0x139   : > { %v2872_v61 = vpop.f32.mrf.mxu2  ;;  %v2848_v0 = vpop.f32.mrf.mxu0 }
 0x13a   : > { %v2873_v62 = vadd.f32 %v2872_v61, %v2860_v60  ;;  %v2885_v63 = vpop.f32.mrf.mxu3  ;;  %v2861_v2 = vpop.f32.mrf.mxu1 }
 0x13c   : > { %v2886_v1 = vadd.f32 %v2885_v63, %v2873_v62 }
 0x141   : > { %v2874_v3 = vpop.f32.mrf.mxu2 }
 0x142   : > { %v2887_v4 = vpop.f32.mrf.mxu3 }
 0x151   : > { %v2898_v5 = vpop.f32.mrf.mxu0 }
 0x152   : > { %v2899_v6 = vadd.f32 %v2898_v5, %v2886_v1  ;;  %v2911_v7 = vpop.f32.mrf.mxu1 }
 0x154   : > { %v2912_v8 = vadd.f32 %v2911_v7, %v2899_v6 }
 0x159   : > { %v2924_v9 = vpop.f32.mrf.mxu2  ;;  %v2900_v12 = vpop.f32.mrf.mxu0 }
 0x15a   : > { %v2925_v10 = vadd.f32 %v2924_v9, %v2912_v8  ;;  %v2937_v11 = vpop.f32.mrf.mxu3  ;;  %v2913_v14 = vpop.f32.mrf.mxu1 }
 0x15c   : > { %v2938_v13 = vadd.f32 %v2937_v11, %v2925_v10 }
 0x161   : > { %v2926_v15 = vpop.f32.mrf.mxu2 }
 0x162   : > { %v2939_v16 = vpop.f32.mrf.mxu3 }
 0x171   : > { %v2950_v17 = vpop.f32.mrf.mxu0 }
 0x172   : > { %v2963_v18 = vpop.f32.mrf.mxu1  ;;  %v2951_v28 = vadd.f32 %v2950_v17, %v2938_v13 }
 0x174   : > { %v2964_v32 = vadd.f32 %v2963_v18, %v2951_v28 }
 0x179   : > { %v2976_v19 = vpop.f32.mrf.mxu2  ;;  %v2952_v21 = vpop.f32.mrf.mxu0 }
 0x17a   : > { %v2989_v20 = vpop.f32.mrf.mxu3  ;;  %v2965_v22 = vpop.f32.mrf.mxu1  ;;  %v2977_v33 = vadd.f32 %v2976_v19, %v2964_v32 }
 0x17c   : > { %v2990_v36 = vadd.f32 %v2989_v20, %v2977_v33 }
 0x181   : > { %v2978_v23 = vpop.f32.mrf.mxu2 }
 0x182   : > { %v2991_v24 = vpop.f32.mrf.mxu3 }
 0x191   : > { %v3002_v25 = vpop.f32.mrf.mxu0 }
 0x192   : > { %v3015_v26 = vpop.f32.mrf.mxu1  ;;  %v3003_v37 = vadd.f32 %v3002_v25, %v2990_v36 }
 0x194   : > { %v3016_v38 = vadd.f32 %v3015_v26, %v3003_v37 }
 0x199   : > { %v3028_v27 = vpop.f32.mrf.mxu2  ;;  %v3004_v30 = vpop.f32.mrf.mxu0 }
 0x19a   : > { %v3041_v29 = vpop.f32.mrf.mxu3  ;;  %v3017_v31 = vpop.f32.mrf.mxu1  ;;  %v3029_v39 = vadd.f32 %v3028_v27, %v3016_v38 }
 0x19c   : > { %v3042_v40 = vadd.f32 %v3041_v29, %v3029_v39 }
 0x1a1   : > { %v3030_v34 = vpop.f32.mrf.mxu2 }
 0x1a2   : > { %v3043_v35 = vpop.f32.mrf.mxu3 }
 0x1b1   : > { %v3054_v41 = vpop.f32.mrf.mxu0 }
 0x1b2   : > { %v3067_v42 = vpop.f32.mrf.mxu1  ;;  %v3055_v43 = vadd.f32 %v3054_v41, %v3042_v40 }
 0x1b4   : > { %v3068_v44 = vadd.f32 %v3067_v42, %v3055_v43 }
 0x1b9   : > { %v3080_v45 = vpop.f32.mrf.mxu2  ;;  %v3056_v48 = vpop.f32.mrf.mxu0 }
 0x1ba   : > { %v3093_v46 = vpop.f32.mrf.mxu3  ;;  %v3081_v47 = vadd.f32 %v3080_v45, %v3068_v44  ;;  %v3069_v49 = vpop.f32.mrf.mxu1 }
 0x1bc   : > { %v3094_v51 = vadd.f32 %v3093_v46, %v3081_v47 }
 0x1be   : > { %v3097_v52 = vadd.f32 %v3094_v51, %v237_v50  ;;  %3102 = sbr.rel (%p4380_p6) target bundleno = 870 (0x366), region = 48 }
 0x1c0   : > { %3098 = vst [vmem:[#allocation2] sm:$0x3] %v3097_v52 }
 0x1c1   : > { %v3082_v53 = vpop.f32.mrf.mxu2 }
 0x1c2   : > { %v3095_v54 = vpop.f32.mrf.mxu3 }
 0x1c3   : > { %v3125_v55 = vld [vmem:[%s5157_s3 + $0x78] sm:$0xff]  ;;  %v3124_v56 = vld [vmem:[%s5157_s3 + $0x70] sm:$0xff]  ;;  %v3123_v57 = vld [vmem:[%s5157_s3 + $0x68] sm:$0xff]  ;;  %vm3150_vm0 = vcmask 74752  }
 0x1c4   : > { %3130 = vmatpush.msra.mxu0 %v3125_v55  ;;  %v3122_v58 = vld [vmem:[%s5157_s3 + $0x60] sm:$0xff]  ;;  %v3121_v59 = vld [vmem:[%s5157_s3 + $0x58] sm:$0xff]  ;;  %v3120_v60 = vld [vmem:[%s5157_s3 + $0x50] sm:$0xff] }
 0x1c5   : > { %v3119_v61 = vld [vmem:[%s5157_s3 + $0x48] sm:$0xff]  ;;  %v3118_v62 = vld [vmem:[%s5157_s3 + $0x40] sm:$0xff]  ;;  %v3117_v63 = vld [vmem:[%s5157_s3 + $0x38] sm:$0xff] }
 0x1c6   : > { %3131 = vmatpush.msra.mxu0 %v3124_v56  ;;  %v3116_v0 = vld [vmem:[%s5157_s3 + $0x30] sm:$0xff]  ;;  %v3115_v1 = vld [vmem:[%s5157_s3 + $0x28] sm:$0xff]  ;;  %v3114_v2 = vld [vmem:[%s5157_s3 + $0x20] sm:$0xff] }
 0x1c7   : > { %v4689_v3 = vld [vmem:[%s5156_s2] ss:$0 sm:$0xff]  ;;  %v3103_v4 = vld [vmem:[#allocation2] sm:$0x3]  ;;  %v3113_v5 = vld [vmem:[%s5157_s3 + $0x18] sm:$0xff] }
 0x1c8   : > { %3132 = vmatpush.msra.mxu0 %v3123_v57  ;;  %v3112_v6 = vld [vmem:[%s5157_s3 + $0x10] sm:$0xff]  ;;  %v3108_v7 = vadd.f32 %v4689_v3, %v3103_v4  ;;  %v3111_v8 = vld [vmem:[%s5157_s3 + $0x8] sm:$0xff]  ;;  %v3110_v9 = vld [vmem:[%s5157_s3] sm:$0xff] }
 0x1c9   : > { %v4690_v11 = vld [vmem:[%s5158_s4] ss:$0 sm:$0xff] }
 0x1ca   : > { %3133 = vmatpush.msra.mxu0 %v3122_v58  ;;  %v3109_v10 = vmax.f32 %v3108_v7, 0.0 }
 0x1cc   : > { %3134 = vmatpush.msra.mxu0 %v3121_v59 }
 0x1ce   : > { %3135 = vmatpush.msra.mxu0 %v3120_v60 }
 0x1d0   : > { %3136 = vmatpush.msra.mxu0 %v3119_v61 }
 0x1d2   : > { %3137 = vmatpush.msra.mxu0 %v3118_v62 }
 0x1d4   : > { %3138 = vmatpush.msra.mxu0 %v3117_v63 }
 0x1d6   : > { %3139 = vmatpush.msra.mxu0 %v3116_v0 }
 0x1d8   : > { %3140 = vmatpush.msra.mxu0 %v3115_v1 }
 0x1da   : > { %3141 = vmatpush.msra.mxu0 %v3114_v2 }
 0x1dc   : > { %3142 = vmatpush.msra.mxu0 %v3113_v5 }
 0x1de   : > { %3143 = vmatpush.msra.mxu0 %v3112_v6 }
 0x1e0   : > { %3144 = vmatpush.msra.mxu0 %v3111_v8 }
 0x1e2   : > { %3145 = vmatpush.msra.mxu0 %v3110_v9 }
 0x1e3   : > { %3146 = vmatmul.f32.vlgmr.msra.gmra.mxu0 %v3109_v10 }
 0x260   : > { %v3147_v12 = vpop.f32.mrf.mxu0 }
 0x261   : > { %v3148_v13 = vadd.f32 %v4690_v11, %v3147_v12 }
 0x263   : > { %v3151_v14 = vsel %vm3150_vm0, %v3148_v13, -inf }
 0x264   : > { %3152 = vmax.xlane.f32.xlu0 %v3151_v14 }
 0x2d7   : > { %v3153_v15 = vpop.xlane.xlu0 %3152 }
 0x2d8   : > { %v3154_v16 = vsub.f32 %v3148_v13, %v3153_v15 }
 0x2da   : > { %v3155_v17 = vmul.f32 1.442695, %v3154_v16 }
 0x2dc   : > { %4691 = vpow2.f32 %v3155_v17 }
 0x2e2   : > { %v4692_v18 = vpop.eup %4691 }
 0x2e3   : > { %v3157_v19 = vsel %vm3150_vm0, %v4692_v18, 0.0 }
 0x2e4   : > { %3158 = vadd.xlane.f32.xlu0 %v3157_v19 }
 0x357   : > { %v3159_v20 = vpop.xlane.xlu0 %3158 }
 0x358   : > { %4693 = vlog2.f32 %v3159_v20 }
 0x35e   : > { %v4694_v21 = vpop.eup %4693 }
 0x35f   : > { %v3161_v22 = vmul.f32 0.6931472, %v4694_v21 }
 0x361   : > { %v3162_v23 = vadd.f32 %v3161_v22, %v3153_v15 }
 0x363   : > { %v3163_v24 = vsub.f32 %v3148_v13, %v3162_v23 }
 0x365   : > { %3164 = vst.msk [vmem:[#allocation3] sm:$0x3] %vm3150_vm0, %v3163_v24 }
 0x366 PF: > { %p4677_p7 = scmp.eq.s32.totalorder %s4773_s19, 3  ;;  %s4736_s17 = smov [#allocation3]  }
 0x367   : > { %s3171_s20 = sshll.u32 %s4736_s17, 4  ;;  %s3173_s23 = sshll.u32 %s5159_s5, 4  ;;  %s3172_s20 = int_to_ptr.vmem [resolvable:$true] %s3171_s20  ;;  %s3174_s23 = int_to_ptr.hbm [resolvable:$true] %s3173_s23 }
 0x368   : > { %4674 = dma.vmem_to_hbm [thread:$0]  (%p4677_p7), %s3172_s20, 32, %s3174_s23, [#allocation4]  }
 0x369   : > { %4728 = dma.done.wait (%p4677_p7), [#allocation4], 32  }
 0x36a   : > { %4730 = vsyncadd (%p4677_p7), [#allocation4], 4294967264 }
 0x36b PF: > { %s16_s18 = sadd.s32 1, %s4733_s18  }
 0x36c   : > { %p13_p8 = scmp.ge.s32.totalorder %s16_s18, 6  }
 0x36e   :  { %15 = sbr.rel (!%p13_p8) target bundleno = 1 (0x1), region = 78 }
 0x373   :  { %3187 = vsyncpa [#allocation4], 1 }
 0x374   :  { %3189 = vsyncpa [#allocation4 + $0x1], 1 }

</bundles_post_ra>
